<compile_context>
chip_gen: v6e
topology: v6e:2x2x1
jax: 0.10.0
libtpu: 0.0.40
codegen_flags: <defaults>
</compile_context>

<pallas_src>
import jax
import jax.numpy as jnp
from jax import lax
from jax.experimental import pallas as pl
from jax.experimental.pallas import tpu as pltpu


# --------------------------------------------------------------------------
# Fused DecoderBlock kernel (one batch element per grid step)
# --------------------------------------------------------------------------
def _decoder_block_kernel(xp_ref, w1_ref, b1_ref, a1w1_ref, a1w2_ref, sb1_ref,
                          w2_ref, b2_ref, a2w1_ref, a2w2_ref, sb2_ref, up_ref,
                          o_ref,
                          patch1_scr, patch2_scr, pad_scr, map_scr, s_scr):
    H = xp_ref.shape[1] - 2
    W = xp_ref.shape[2] - 2
    Wp = W + 6

    def sigmoid(v):
        return 1.0 / (1.0 + jnp.exp(-v))

    def conv3x3_relu(xpad, patch_scr, wflat, bias):
        # xpad: (H+2, W+2, C) value; build im2col patch in VMEM, one MXU matmul.
        c = xpad.shape[-1]
        for dy in range(3):
            for dx in range(3):
                k = dy * 3 + dx
                patch_scr[:, k * c:(k + 1) * c] = (
                    xpad[dy:dy + H, dx:dx + W, :].reshape(H * W, c))
        acc = jnp.dot(patch_scr[...], wflat, preferred_element_type=jnp.float32)
        return jnp.maximum(acc + bias, 0.0)                      # (H*W, Cout)

    def channel_attn(xf, wm1, wm2):
        # xf: (H*W, C). Shared MLP on stacked [avg; max] -> (2, C) -> 2 dots.
        stats = jnp.concatenate(
            [jnp.mean(xf, axis=0, keepdims=True),
             jnp.max(xf, axis=0, keepdims=True)], axis=0)        # (2, C)
        hid = jnp.maximum(
            jnp.dot(stats, wm1, preferred_element_type=jnp.float32), 0.0)
        out = jnp.dot(hid, wm2, preferred_element_type=jnp.float32)  # (2, C)
        att = sigmoid(out[0:1, :] + out[1:2, :])                 # (1, C)
        return xf * att

    def spatial_attn(y3, band):
        # y3: (H, W, C). 7x7 conv over [mean, max] maps done as ONE banded matmul:
        #   logits = S @ band, S[i, (m*7+dy)*Wp + jp] = PAD_m[i+dy, jp]
        map_scr[...] = jnp.zeros_like(map_scr)
        map_scr[0, 3:3 + H, 3:3 + W] = jnp.mean(y3, axis=-1)
        map_scr[1, 3:3 + H, 3:3 + W] = jnp.max(y3, axis=-1)
        for m in range(2):
            for dy in range(7):
                k = m * 7 + dy
                s_scr[:, k * Wp:(k + 1) * Wp] = map_scr[m, dy:dy + H, :]
        logits = jnp.dot(s_scr[...], band,
                         preferred_element_type=jnp.float32)     # (H, W)
        return y3 * sigmoid(logits)[:, :, None]

    Cmid = w1_ref.shape[1]
    Cout = w2_ref.shape[1]

    # ---- conv1 + ReLU -----------------------------------------------------
    h = conv3x3_relu(xp_ref[0], patch1_scr, w1_ref[...], b1_ref[...])   # (HW, Cmid)
    # ---- CBAM 1 -------------------------------------------------------------
    h = channel_attn(h, a1w1_ref[...], a1w2_ref[...])
    h = spatial_attn(h.reshape(H, W, Cmid), sb1_ref[...])               # (H, W, Cmid)
    # Dropout2d(rate=0) == identity

    # ---- conv2 + ReLU (zero-pad via VMEM scratch) ---------------------------
    pad_scr[...] = jnp.zeros_like(pad_scr)
    pad_scr[1:1 + H, 1:1 + W, :] = h
    h = conv3x3_relu(pad_scr[...], patch2_scr, w2_ref[...], b2_ref[...])  # (HW, Cout)
    # ---- CBAM 2 -------------------------------------------------------------
    h = channel_attn(h, a2w1_ref[...], a2w2_ref[...])
    h = spatial_attn(h.reshape(H, W, Cout), sb2_ref[...])               # (H, W, Cout)

    # ---- 2x bilinear upsample (align_corners=True) --------------------------
    # out[c, i*2W+j] = sum_{h,w} h[h, w, c] * Wh[i,h]*Ww[j,w]
    # = (z^T @ up_mat) with up_mat = kron(Wh, Ww)^T precomputed in the wrapper.
    z = h.reshape(H * W, Cout)
    up = jnp.dot(z.T, up_ref[...], preferred_element_type=jnp.float32)  # (Cout, 4HW)
    o_ref[0] = up


# --------------------------------------------------------------------------
# Wrapper-side constant matrices
# --------------------------------------------------------------------------
def _bilinear_matrix(n_in, n_out):
    i = jnp.arange(n_out, dtype=jnp.float32)
    src = i * (n_in - 1) / max(n_out - 1, 1)
    i0 = jnp.clip(jnp.floor(src).astype(jnp.int32), 0, n_in - 1)
    i1 = jnp.clip(i0 + 1, 0, n_in - 1)
    frac = src - i0.astype(jnp.float32)
    rows = jnp.arange(n_out)
    m = jnp.zeros((n_out, n_in), jnp.float32)
    m = m.at[rows, i0].add(1.0 - frac)
    m = m.at[rows, i1].add(frac)
    return m


def _upsample_matrix(H, W):
    wh = _bilinear_matrix(H, 2 * H)     # (2H, H)
    ww = _bilinear_matrix(W, 2 * W)     # (2W, W)
    # M[h*W + w, i*2W + j] = wh[i, h] * ww[j, w]
    return jnp.einsum('ih,jw->hwij', wh, ww).reshape(H * W, 4 * H * W)


def _spatial_band_matrix(ws, W):
    # ws: (7, 7, 2) spatial-attention conv weight indexed (dy, dx, [mean, max]).
    # B[(m*7+dy)*(W+6) + jp, j] = ws[dy, jp - j, m]  for 0 <= jp - j < 7 else 0.
    Wp = W + 6
    jp = jnp.arange(Wp)[:, None]
    j = jnp.arange(W)[None, :]
    dx = jp - j
    valid = (dx >= 0) & (dx < 7)
    dxc = jnp.clip(dx, 0, 6)
    ws_mdy = jnp.transpose(ws, (2, 0, 1))            # (2, 7, 7) = (m, dy, dx)
    band = ws_mdy[:, :, dxc]                         # (2, 7, Wp, W)
    band = jnp.where(valid[None, None, :, :], band, 0.0)
    return band.reshape(2 * 7 * Wp, W).astype(jnp.float32)


# --------------------------------------------------------------------------
# Full DecoderBlock forward (single fused Pallas call)
# --------------------------------------------------------------------------
@jax.jit
def decoder_block(x_nchw, p):
    N, Cin, H, W = x_nchw.shape
    Cmid = p['conv1_w'].shape[-1]
    Cout = p['conv2_w'].shape[-1]
    Cr1 = p['ca1_w1'].shape[-1]
    Cr2 = p['ca2_w1'].shape[-1]
    Wp = W + 6

    x = jnp.transpose(x_nchw, (0, 2, 3, 1))                 # NCHW -> NHWC
    xp = jnp.pad(x, ((0, 0), (1, 1), (1, 1), (0, 0)))       # conv1 halo
    w1 = p['conv1_w'].reshape(9 * Cin, Cmid)
    w2 = p['conv2_w'].reshape(9 * Cmid, Cout)
    sb1 = _spatial_band_matrix(p['sa1_w'], W)
    sb2 = _spatial_band_matrix(p['sa2_w'], W)
    up = _upsample_matrix(H, W)

    out_flat = pl.pallas_call(
        _decoder_block_kernel,
        out_shape=jax.ShapeDtypeStruct((N, Cout, 4 * H * W), jnp.float32),
        grid=(N,),
        in_specs=[
            pl.BlockSpec((1, H + 2, W + 2, Cin), lambda n: (n, 0, 0, 0)),
            pl.BlockSpec((9 * Cin, Cmid), lambda n: (0, 0)),
            pl.BlockSpec((1, Cmid), lambda n: (0, 0)),
            pl.BlockSpec((Cmid, Cr1), lambda n: (0, 0)),
            pl.BlockSpec((Cr1, Cmid), lambda n: (0, 0)),
            pl.BlockSpec((14 * Wp, W), lambda n: (0, 0)),
            pl.BlockSpec((9 * Cmid, Cout), lambda n: (0, 0)),
            pl.BlockSpec((1, Cout), lambda n: (0, 0)),
            pl.BlockSpec((Cout, Cr2), lambda n: (0, 0)),
            pl.BlockSpec((Cr2, Cout), lambda n: (0, 0)),
            pl.BlockSpec((14 * Wp, W), lambda n: (0, 0)),
            pl.BlockSpec((H * W, 4 * H * W), lambda n: (0, 0)),
        ],
        out_specs=pl.BlockSpec((1, Cout, 4 * H * W), lambda n: (n, 0, 0)),
        scratch_shapes=[
            pltpu.VMEM((H * W, 9 * Cin), jnp.float32),       # im2col patch, conv1
            pltpu.VMEM((H * W, 9 * Cmid), jnp.float32),      # im2col patch, conv2
            pltpu.VMEM((H + 2, W + 2, Cmid), jnp.float32),   # zero-padded conv2 input
            pltpu.VMEM((2, H + 6, W + 6), jnp.float32),      # padded mean/max maps
            pltpu.VMEM((H, 14 * Wp), jnp.float32),           # spatial im2row matrix
        ],
        compiler_params=pltpu.CompilerParams(
            dimension_semantics=("parallel",)),
    )(xp, w1, p['conv1_b'], p['ca1_w1'], p['ca1_w2'], sb1,
      w2, p['conv2_b'], p['ca2_w1'], p['ca2_w2'], sb2, up)

    return out_flat.reshape(N, Cout, 2 * H, 2 * W)


# --------------------------------------------------------------------------
# Pure-JAX reference (same parameter layout) for correctness check
# --------------------------------------------------------------------------
def _sigmoid(x):
    return 1.0 / (1.0 + jnp.exp(-x))


def _ref_conv3x3_relu(x, w, b):
    out = lax.conv_general_dilated(x, w, window_strides=(1, 1),
                                   padding=((1, 1), (1, 1)),
                                   dimension_numbers=('NHWC', 'HWIO', 'NHWC'))
    return jnp.maximum(out + b.reshape(1, 1, 1, -1), 0.0)


def _ref_cbam(x, w1, w2, ws):
    avg = jnp.mean(x, axis=(1, 2))
    mx = jnp.max(x, axis=(1, 2))
    mlp = lambda v: jnp.maximum(v @ w1, 0.0) @ w2
    att = _sigmoid(mlp(avg) + mlp(mx))
    y = x * att[:, None, None, :]
    s = jnp.stack([jnp.mean(y, axis=-1), jnp.max(y, axis=-1)], axis=-1)
    a = lax.conv_general_dilated(s, ws.reshape(7, 7, 2, 1), (1, 1),
                                 padding=((3, 3), (3, 3)),
                                 dimension_numbers=('NHWC', 'HWIO', 'NHWC'))
    return y * _sigmoid(a)


def _ref_decoder_block(x_nchw, p):
    x = jnp.transpose(x_nchw, (0, 2, 3, 1))
    h = _ref_conv3x3_relu(x, p['conv1_w'], p['conv1_b'])
    h = _ref_cbam(h, p['ca1_w1'], p['ca1_w2'], p['sa1_w'])
    h = _ref_conv3x3_relu(h, p['conv2_w'], p['conv2_b'])
    h = _ref_cbam(h, p['ca2_w1'], p['ca2_w2'], p['sa2_w'])
    h = jnp.transpose(h, (0, 3, 1, 2))
    H, W = h.shape[2], h.shape[3]
    wh = _bilinear_matrix(H, 2 * H)
    ww = _bilinear_matrix(W, 2 * W)
    return jnp.einsum('nchw,ih,jw->ncij', h, wh, ww)


if __name__ == "__main__":
    key = jax.random.PRNGKey(0)
    N, Cin, H, W = 2, 4, 16, 16
    Cmid, Cout = 32, 16          # middle_channels, out_channels
    ratio = 16                   # standard CBAM reduction ratio

    ks = jax.random.split(key, 11)
    p = {
        'conv1_w': 0.1 * jax.random.normal(ks[0], (3, 3, Cin, Cmid), jnp.float32),
        'conv1_b': 0.1 * jax.random.normal(ks[1], (1, Cmid), jnp.float32),
        'ca1_w1':  0.1 * jax.random.normal(ks[2], (Cmid, max(Cmid // ratio, 1)), jnp.float32),
        'ca1_w2':  0.1 * jax.random.normal(ks[3], (max(Cmid // ratio, 1), Cmid), jnp.float32),
        'sa1_w':   0.1 * jax.random.normal(ks[4], (7, 7, 2), jnp.float32),
        'conv2_w': 0.1 * jax.random.normal(ks[5], (3, 3, Cmid, Cout), jnp.float32),
        'conv2_b': 0.1 * jax.random.normal(ks[6], (1, Cout), jnp.float32),
        'ca2_w1':  0.1 * jax.random.normal(ks[7], (Cout, max(Cout // ratio, 1)), jnp.float32),
        'ca2_w2':  0.1 * jax.random.normal(ks[8], (max(Cout // ratio, 1), Cout), jnp.float32),
        'sa2_w':   0.1 * jax.random.normal(ks[9], (7, 7, 2), jnp.float32),
    }
    x = jax.random.normal(ks[10], (N, Cin, H, W), jnp.float32)

    out = jax.block_until_ready(decoder_block(x, p))
    assert out.shape == (N, Cout, 2 * H, 2 * W), out.shape

    ref = jax.block_until_ready(_ref_decoder_block(x, p))
    assert jnp.allclose(out, ref, rtol=3e-2, atol=3e-3), \
        f"max abs err {float(jnp.max(jnp.abs(out - ref)))}"

    print("KERNEL_OK")
</pallas_src>

<mosaic_0001>
module attributes {stable_mosaic.version = 11 : i64} {
  func.func private @main(%arg0: i32) attributes {dimension_semantics = [#tpu.dimension_semantics<core_parallel>], iteration_bounds = array<i64: 2>, tpu.core_type = #tpu.core_type<sc_scalar_subcore>, window_params = []} {
    return
  }
}

module attributes {stable_mosaic.version = 11 : i64} {
  func.func private @main(%arg0: i32) attributes {dimension_semantics = [#tpu.dimension_semantics<core_parallel>], iteration_bounds = array<i64: 2>, tpu.core_type = #tpu.core_type<sc_scalar_subcore>, window_params = []} {
    return
  }
}

module attributes {stable_mosaic.version = 11 : i64} {
  func.func @_decoder_block_kernel(%arg0: i32, %arg1: memref<1x18x18x4xf32, #tpu.memory_space<vmem>>, %arg2: memref<36x32xf32, #tpu.memory_space<vmem>>, %arg3: memref<1x32xf32, #tpu.memory_space<vmem>>, %arg4: memref<32x2xf32, #tpu.memory_space<vmem>>, %arg5: memref<2x32xf32, #tpu.memory_space<vmem>>, %arg6: memref<308x16xf32, #tpu.memory_space<vmem>>, %arg7: memref<288x16xf32, #tpu.memory_space<vmem>>, %arg8: memref<1x16xf32, #tpu.memory_space<vmem>>, %arg9: memref<16x1xf32, #tpu.memory_space<vmem>>, %arg10: memref<1x16xf32, #tpu.memory_space<vmem>>, %arg11: memref<308x16xf32, #tpu.memory_space<vmem>>, %arg12: memref<256x1024xf32, #tpu.memory_space<vmem>>, %arg13: memref<1x16x1024xf32, #tpu.memory_space<vmem>>, %arg14: memref<256x36xf32, #tpu.memory_space<vmem>>, %arg15: memref<256x288xf32, #tpu.memory_space<vmem>>, %arg16: memref<18x18x32xf32, #tpu.memory_space<vmem>>, %arg17: memref<2x22x22xf32, #tpu.memory_space<vmem>>, %arg18: memref<16x308xf32, #tpu.memory_space<vmem>>) attributes {dimension_semantics = [#tpu.dimension_semantics<parallel>], iteration_bounds = array<i64: 2>, scalar_prefetch = 0 : i64, scratch_operands = 5 : i64, tpu.core_type = #tpu.core_type<tc>, window_params = [{transform_indices = @transform_0, window_bounds = array<i64: 1, 18, 18, 4>}, {pipeline_mode = #tpu.pipeline_mode<synchronous>, transform_indices = @transform_1, window_bounds = array<i64: 36, 32>}, {pipeline_mode = #tpu.pipeline_mode<synchronous>, transform_indices = @transform_2, window_bounds = array<i64: 1, 32>}, {pipeline_mode = #tpu.pipeline_mode<synchronous>, transform_indices = @transform_3, window_bounds = array<i64: 32, 2>}, {pipeline_mode = #tpu.pipeline_mode<synchronous>, transform_indices = @transform_4, window_bounds = array<i64: 2, 32>}, {pipeline_mode = #tpu.pipeline_mode<synchronous>, transform_indices = @transform_5, window_bounds = array<i64: 308, 16>}, {pipeline_mode = #tpu.pipeline_mode<synchronous>, transform_indices = @transform_6, window_bounds = array<i64: 288, 16>}, {pipeline_mode = #tpu.pipeline_mode<synchronous>, transform_indices = @transform_7, window_bounds = array<i64: 1, 16>}, {pipeline_mode = #tpu.pipeline_mode<synchronous>, transform_indices = @transform_8, window_bounds = array<i64: 16, 1>}, {pipeline_mode = #tpu.pipeline_mode<synchronous>, transform_indices = @transform_9, window_bounds = array<i64: 1, 16>}, {pipeline_mode = #tpu.pipeline_mode<synchronous>, transform_indices = @transform_10, window_bounds = array<i64: 308, 16>}, {pipeline_mode = #tpu.pipeline_mode<synchronous>, transform_indices = @transform_11, window_bounds = array<i64: 256, 1024>}, {transform_indices = @transform_12, window_bounds = array<i64: 1, 16, 1024>}]} {
    %c0 = arith.constant 0 : index
    %c0_0 = arith.constant 0 : index
    %c0_1 = arith.constant 0 : index
    %c0_2 = arith.constant 0 : index
    %0 = vector.load %arg1[%c0, %c0_0, %c0_1, %c0_2] : memref<1x18x18x4xf32, #tpu.memory_space<vmem>>, vector<1x18x18x4xf32>
    %1 = vector.shape_cast %0 : vector<1x18x18x4xf32> to vector<18x18x4xf32>
    %c0_3 = arith.constant 0 : index
    %c0_4 = arith.constant 0 : index
    %2 = vector.load %arg2[%c0_3, %c0_4] : memref<36x32xf32, #tpu.memory_space<vmem>>, vector<36x32xf32>
    %c0_5 = arith.constant 0 : index
    %c0_6 = arith.constant 0 : index
    %3 = vector.load %arg3[%c0_5, %c0_6] : memref<1x32xf32, #tpu.memory_space<vmem>>, vector<1x32xf32>
    %4 = vector.extract_strided_slice %1 {offsets = [0, 0, 0], sizes = [16, 16, 4], strides = [1, 1, 1]} : vector<18x18x4xf32> to vector<16x16x4xf32>
    %5 = vector.shape_cast %4 : vector<16x16x4xf32> to vector<256x4xf32>
    %c0_7 = arith.constant 0 : index
    %c0_8 = arith.constant 0 : index
    %6 = vector.load %arg14[%c0_7, %c0_8] : memref<256x36xf32, #tpu.memory_space<vmem>>, vector<256x4xf32>
    tpu.vector_store %arg14[%c0_7, %c0_8], %5 {strides = array<i32>} : memref<256x36xf32, #tpu.memory_space<vmem>>, vector<256x4xf32>,
    %7 = vector.extract_strided_slice %1 {offsets = [0, 1, 0], sizes = [16, 16, 4], strides = [1, 1, 1]} : vector<18x18x4xf32> to vector<16x16x4xf32>
    %8 = vector.shape_cast %7 : vector<16x16x4xf32> to vector<256x4xf32>
    %c0_9 = arith.constant 0 : index
    %c4 = arith.constant 4 : index
    %9 = vector.load %arg14[%c0_9, %c4] : memref<256x36xf32, #tpu.memory_space<vmem>>, vector<256x4xf32>
    tpu.vector_store %arg14[%c0_9, %c4], %8 {strides = array<i32>} : memref<256x36xf32, #tpu.memory_space<vmem>>, vector<256x4xf32>,
    %10 = vector.extract_strided_slice %1 {offsets = [0, 2, 0], sizes = [16, 16, 4], strides = [1, 1, 1]} : vector<18x18x4xf32> to vector<16x16x4xf32>
    %11 = vector.shape_cast %10 : vector<16x16x4xf32> to vector<256x4xf32>
    %c0_10 = arith.constant 0 : index
    %c8 = arith.constant 8 : index
    %12 = vector.load %arg14[%c0_10, %c8] : memref<256x36xf32, #tpu.memory_space<vmem>>, vector<256x4xf32>
    tpu.vector_store %arg14[%c0_10, %c8], %11 {strides = array<i32>} : memref<256x36xf32, #tpu.memory_space<vmem>>, vector<256x4xf32>,
    %13 = vector.extract_strided_slice %1 {offsets = [1, 0, 0], sizes = [16, 16, 4], strides = [1, 1, 1]} : vector<18x18x4xf32> to vector<16x16x4xf32>
    %14 = vector.shape_cast %13 : vector<16x16x4xf32> to vector<256x4xf32>
    %c0_11 = arith.constant 0 : index
    %c12 = arith.constant 12 : index
    %15 = vector.load %arg14[%c0_11, %c12] : memref<256x36xf32, #tpu.memory_space<vmem>>, vector<256x4xf32>
    tpu.vector_store %arg14[%c0_11, %c12], %14 {strides = array<i32>} : memref<256x36xf32, #tpu.memory_space<vmem>>, vector<256x4xf32>,
    %16 = vector.extract_strided_slice %1 {offsets = [1, 1, 0], sizes = [16, 16, 4], strides = [1, 1, 1]} : vector<18x18x4xf32> to vector<16x16x4xf32>
    %17 = vector.shape_cast %16 : vector<16x16x4xf32> to vector<256x4xf32>
    %c0_12 = arith.constant 0 : index
    %c16 = arith.constant 16 : index
    %18 = vector.load %arg14[%c0_12, %c16] : memref<256x36xf32, #tpu.memory_space<vmem>>, vector<256x4xf32>
    tpu.vector_store %arg14[%c0_12, %c16], %17 {strides = array<i32>} : memref<256x36xf32, #tpu.memory_space<vmem>>, vector<256x4xf32>,
    %19 = vector.extract_strided_slice %1 {offsets = [1, 2, 0], sizes = [16, 16, 4], strides = [1, 1, 1]} : vector<18x18x4xf32> to vector<16x16x4xf32>
    %20 = vector.shape_cast %19 : vector<16x16x4xf32> to vector<256x4xf32>
    %c0_13 = arith.constant 0 : index
    %c20 = arith.constant 20 : index
    %21 = vector.load %arg14[%c0_13, %c20] : memref<256x36xf32, #tpu.memory_space<vmem>>, vector<256x4xf32>
    tpu.vector_store %arg14[%c0_13, %c20], %20 {strides = array<i32>} : memref<256x36xf32, #tpu.memory_space<vmem>>, vector<256x4xf32>,
    %22 = vector.extract_strided_slice %1 {offsets = [2, 0, 0], sizes = [16, 16, 4], strides = [1, 1, 1]} : vector<18x18x4xf32> to vector<16x16x4xf32>
    %23 = vector.shape_cast %22 : vector<16x16x4xf32> to vector<256x4xf32>
    %c0_14 = arith.constant 0 : index
    %c24 = arith.constant 24 : index
    %24 = vector.load %arg14[%c0_14, %c24] : memref<256x36xf32, #tpu.memory_space<vmem>>, vector<256x4xf32>
    tpu.vector_store %arg14[%c0_14, %c24], %23 {strides = array<i32>} : memref<256x36xf32, #tpu.memory_space<vmem>>, vector<256x4xf32>,
    %25 = vector.extract_strided_slice %1 {offsets = [2, 1, 0], sizes = [16, 16, 4], strides = [1, 1, 1]} : vector<18x18x4xf32> to vector<16x16x4xf32>
    %26 = vector.shape_cast %25 : vector<16x16x4xf32> to vector<256x4xf32>
    %c0_15 = arith.constant 0 : index
    %c28 = arith.constant 28 : index
    %27 = vector.load %arg14[%c0_15, %c28] : memref<256x36xf32, #tpu.memory_space<vmem>>, vector<256x4xf32>
    tpu.vector_store %arg14[%c0_15, %c28], %26 {strides = array<i32>} : memref<256x36xf32, #tpu.memory_space<vmem>>, vector<256x4xf32>,
    %28 = vector.extract_strided_slice %1 {offsets = [2, 2, 0], sizes = [16, 16, 4], strides = [1, 1, 1]} : vector<18x18x4xf32> to vector<16x16x4xf32>
    %29 = vector.shape_cast %28 : vector<16x16x4xf32> to vector<256x4xf32>
    %c0_16 = arith.constant 0 : index
    %c32 = arith.constant 32 : index
    %30 = vector.load %arg14[%c0_16, %c32] : memref<256x36xf32, #tpu.memory_space<vmem>>, vector<256x4xf32>
    tpu.vector_store %arg14[%c0_16, %c32], %29 {strides = array<i32>} : memref<256x36xf32, #tpu.memory_space<vmem>>, vector<256x4xf32>,
    %c0_17 = arith.constant 0 : index
    %c0_18 = arith.constant 0 : index
    %31 = vector.load %arg14[%c0_17, %c0_18] : memref<256x36xf32, #tpu.memory_space<vmem>>, vector<256x36xf32>
    %cst = arith.constant dense<0.000000e+00> : vector<256x32xf32>
    %32 = tpu.matmul %31, %2, %cst {dimension_numbers = #tpu.dot_dimension_numbers<[1], [0], [0], [1], [0, 0, 1, 1], [], []>} : vector<256x36xf32>, vector<36x32xf32>, vector<256x32xf32> -> vector<256x32xf32>
    %33 = vector.broadcast %3 : vector<1x32xf32> to vector<256x32xf32>
    %34 = arith.addf %32, %33 : vector<256x32xf32>
    %cst_19 = arith.constant 0.000000e+00 : f32
    %35 = vector.broadcast %cst_19 : f32 to vector<256x32xf32>
    %36 = arith.maximumf %34, %35 : vector<256x32xf32>
    %c0_20 = arith.constant 0 : index
    %c0_21 = arith.constant 0 : index
    %37 = vector.load %arg4[%c0_20, %c0_21] : memref<32x2xf32, #tpu.memory_space<vmem>>, vector<32x2xf32>
    %c0_22 = arith.constant 0 : index
    %c0_23 = arith.constant 0 : index
    %38 = vector.load %arg5[%c0_22, %c0_23] : memref<2x32xf32, #tpu.memory_space<vmem>>, vector<2x32xf32>
    %cst_24 = arith.constant dense<0.000000e+00> : vector<32xf32>
    %39 = vector.multi_reduction <add>, %36, %cst_24 [0] : vector<256x32xf32> to vector<32xf32>
    %40 = vector.shape_cast %39 : vector<32xf32> to vector<1x32xf32>
    %cst_25 = arith.constant 2.560000e+02 : f32
    %41 = vector.broadcast %cst_25 : f32 to vector<1x32xf32>
    %42 = arith.divf %40, %41 : vector<1x32xf32>
    %cst_26 = arith.constant dense<0xFF800000> : vector<32xf32>
    %43 = vector.multi_reduction <maximumf>, %36, %cst_26 [0] : vector<256x32xf32> to vector<32xf32>
    %44 = vector.shape_cast %43 : vector<32xf32> to vector<1x32xf32>
    %45 = tpu.concatenate %42, %44 in 0 : vector<1x32xf32>, vector<1x32xf32> -> vector<2x32xf32>
    %cst_27 = arith.constant dense<0.000000e+00> : vector<2x2xf32>
    %46 = tpu.matmul %45, %37, %cst_27 {dimension_numbers = #tpu.dot_dimension_numbers<[1], [0], [0], [1], [0, 0, 1, 1], [], []>} : vector<2x32xf32>, vector<32x2xf32>, vector<2x2xf32> -> vector<2x2xf32>
    %cst_28 = arith.constant 0.000000e+00 : f32
    %47 = vector.broadcast %cst_28 : f32 to vector<2x2xf32>
    %48 = arith.maximumf %46, %47 : vector<2x2xf32>
    %cst_29 = arith.constant dense<0.000000e+00> : vector<2x32xf32>
    %49 = tpu.matmul %48, %38, %cst_29 {dimension_numbers = #tpu.dot_dimension_numbers<[1], [0], [0], [1], [0, 0, 1, 1], [], []>} : vector<2x2xf32>, vector<2x32xf32>, vector<2x32xf32> -> vector<2x32xf32>
    %50 = vector.extract_strided_slice %49 {offsets = [0, 0], sizes = [1, 32], strides = [1, 1]} : vector<2x32xf32> to vector<1x32xf32>
    %51 = vector.extract_strided_slice %49 {offsets = [1, 0], sizes = [1, 32], strides = [1, 1]} : vector<2x32xf32> to vector<1x32xf32>
    %52 = arith.addf %50, %51 : vector<1x32xf32>
    %cst_30 = arith.constant 0.000000e+00 : f32
    %53 = vector.broadcast %cst_30 : f32 to vector<1x32xf32>
    %54 = arith.subf %53, %52 : vector<1x32xf32>
    %55 = math.exp %54 : vector<1x32xf32>
    %cst_31 = arith.constant 1.000000e+00 : f32
    %56 = vector.broadcast %cst_31 : f32 to vector<1x32xf32>
    %57 = arith.addf %56, %55 : vector<1x32xf32>
    %cst_32 = arith.constant 1.000000e+00 : f32
    %58 = vector.broadcast %cst_32 : f32 to vector<1x32xf32>
    %59 = arith.divf %58, %57 : vector<1x32xf32>
    %60 = vector.broadcast %59 : vector<1x32xf32> to vector<256x32xf32>
    %61 = arith.mulf %36, %60 : vector<256x32xf32>
    %62 = vector.shape_cast %61 : vector<256x32xf32> to vector<16x16x32xf32>
    %c0_33 = arith.constant 0 : index
    %c0_34 = arith.constant 0 : index
    %63 = vector.load %arg6[%c0_33, %c0_34] : memref<308x16xf32, #tpu.memory_space<vmem>>, vector<308x16xf32>
    %cst_35 = arith.constant 0.000000e+00 : f32
    %64 = vector.broadcast %cst_35 : f32 to vector<2x22x22xf32>
    %c0_36 = arith.constant 0 : index
    %c0_37 = arith.constant 0 : index
    %c0_38 = arith.constant 0 : index
    %65 = vector.load %arg17[%c0_36, %c0_37, %c0_38] : memref<2x22x22xf32, #tpu.memory_space<vmem>>, vector<2x22x22xf32>
    tpu.vector_store %arg17[%c0_36, %c0_37, %c0_38], %64 {strides = array<i32>} : memref<2x22x22xf32, #tpu.memory_space<vmem>>, vector<2x22x22xf32>,
    %cst_39 = arith.constant dense<0.000000e+00> : vector<16x16xf32>
    %66 = vector.multi_reduction <add>, %62, %cst_39 [2] : vector<16x16x32xf32> to vector<16x16xf32>
    %cst_40 = arith.constant 3.200000e+01 : f32
    %67 = vector.broadcast %cst_40 : f32 to vector<16x16xf32>
    %68 = arith.divf %66, %67 : vector<16x16xf32>
    %c0_41 = arith.constant 0 : index
    %c3 = arith.constant 3 : index
    %c3_42 = arith.constant 3 : index
    %69 = vector.load %arg17[%c0_41, %c3, %c3_42] : memref<2x22x22xf32, #tpu.memory_space<vmem>>, vector<1x16x16xf32>
    %70 = vector.shape_cast %69 : vector<1x16x16xf32> to vector<16x16xf32>
    %71 = vector.shape_cast %68 : vector<16x16xf32> to vector<1x16x16xf32>
    tpu.vector_store %arg17[%c0_41, %c3, %c3_42], %71 {strides = array<i32>} : memref<2x22x22xf32, #tpu.memory_space<vmem>>, vector<1x16x16xf32>,
    %cst_43 = arith.constant dense<0xFF800000> : vector<16x16xf32>
    %72 = vector.multi_reduction <maximumf>, %62, %cst_43 [2] : vector<16x16x32xf32> to vector<16x16xf32>
    %c1 = arith.constant 1 : index
    %c3_44 = arith.constant 3 : index
    %c3_45 = arith.constant 3 : index
    %73 = vector.load %arg17[%c1, %c3_44, %c3_45] : memref<2x22x22xf32, #tpu.memory_space<vmem>>, vector<1x16x16xf32>
    %74 = vector.shape_cast %73 : vector<1x16x16xf32> to vector<16x16xf32>
    %75 = vector.shape_cast %72 : vector<16x16xf32> to vector<1x16x16xf32>
    tpu.vector_store %arg17[%c1, %c3_44, %c3_45], %75 {strides = array<i32>} : memref<2x22x22xf32, #tpu.memory_space<vmem>>, vector<1x16x16xf32>,
    %c0_46 = arith.constant 0 : index
    %c0_47 = arith.constant 0 : index
    %c0_48 = arith.constant 0 : index
    %76 = vector.load %arg17[%c0_46, %c0_47, %c0_48] : memref<2x22x22xf32, #tpu.memory_space<vmem>>, vector<1x16x22xf32>
    %77 = vector.shape_cast %76 : vector<1x16x22xf32> to vector<16x22xf32>
    %c0_49 = arith.constant 0 : index
    %c0_50 = arith.constant 0 : index
    %78 = vector.load %arg18[%c0_49, %c0_50] : memref<16x308xf32, #tpu.memory_space<vmem>>, vector<16x22xf32>
    tpu.vector_store %arg18[%c0_49, %c0_50], %77 {strides = array<i32>} : memref<16x308xf32, #tpu.memory_space<vmem>>, vector<16x22xf32>,
    %c0_51 = arith.constant 0 : index
    %c1_52 = arith.constant 1 : index
    %c0_53 = arith.constant 0 : index
    %79 = vector.load %arg17[%c0_51, %c1_52, %c0_53] : memref<2x22x22xf32, #tpu.memory_space<vmem>>, vector<1x16x22xf32>
    %80 = vector.shape_cast %79 : vector<1x16x22xf32> to vector<16x22xf32>
    %c0_54 = arith.constant 0 : index
    %c22 = arith.constant 22 : index
    %81 = vector.load %arg18[%c0_54, %c22] : memref<16x308xf32, #tpu.memory_space<vmem>>, vector<16x22xf32>
    tpu.vector_store %arg18[%c0_54, %c22], %80 {strides = array<i32>} : memref<16x308xf32, #tpu.memory_space<vmem>>, vector<16x22xf32>,
    %c0_55 = arith.constant 0 : index
    %c2 = arith.constant 2 : index
    %c0_56 = arith.constant 0 : index
    %82 = vector.load %arg17[%c0_55, %c2, %c0_56] : memref<2x22x22xf32, #tpu.memory_space<vmem>>, vector<1x16x22xf32>
    %83 = vector.shape_cast %82 : vector<1x16x22xf32> to vector<16x22xf32>
    %c0_57 = arith.constant 0 : index
    %c44 = arith.constant 44 : index
    %84 = vector.load %arg18[%c0_57, %c44] : memref<16x308xf32, #tpu.memory_space<vmem>>, vector<16x22xf32>
    tpu.vector_store %arg18[%c0_57, %c44], %83 {strides = array<i32>} : memref<16x308xf32, #tpu.memory_space<vmem>>, vector<16x22xf32>,
    %c0_58 = arith.constant 0 : index
    %c3_59 = arith.constant 3 : index
    %c0_60 = arith.constant 0 : index
    %85 = vector.load %arg17[%c0_58, %c3_59, %c0_60] : memref<2x22x22xf32, #tpu.memory_space<vmem>>, vector<1x16x22xf32>
    %86 = vector.shape_cast %85 : vector<1x16x22xf32> to vector<16x22xf32>
    %c0_61 = arith.constant 0 : index
    %c66 = arith.constant 66 : index
    %87 = vector.load %arg18[%c0_61, %c66] : memref<16x308xf32, #tpu.memory_space<vmem>>, vector<16x22xf32>
    tpu.vector_store %arg18[%c0_61, %c66], %86 {strides = array<i32>} : memref<16x308xf32, #tpu.memory_space<vmem>>, vector<16x22xf32>,
    %c0_62 = arith.constant 0 : index
    %c4_63 = arith.constant 4 : index
    %c0_64 = arith.constant 0 : index
    %88 = vector.load %arg17[%c0_62, %c4_63, %c0_64] : memref<2x22x22xf32, #tpu.memory_space<vmem>>, vector<1x16x22xf32>
    %89 = vector.shape_cast %88 : vector<1x16x22xf32> to vector<16x22xf32>
    %c0_65 = arith.constant 0 : index
    %c88 = arith.constant 88 : index
    %90 = vector.load %arg18[%c0_65, %c88] : memref<16x308xf32, #tpu.memory_space<vmem>>, vector<16x22xf32>
    tpu.vector_store %arg18[%c0_65, %c88], %89 {strides = array<i32>} : memref<16x308xf32, #tpu.memory_space<vmem>>, vector<16x22xf32>,
    %c0_66 = arith.constant 0 : index
    %c5 = arith.constant 5 : index
    %c0_67 = arith.constant 0 : index
    %91 = vector.load %arg17[%c0_66, %c5, %c0_67] : memref<2x22x22xf32, #tpu.memory_space<vmem>>, vector<1x16x22xf32>
    %92 = vector.shape_cast %91 : vector<1x16x22xf32> to vector<16x22xf32>
    %c0_68 = arith.constant 0 : index
    %c110 = arith.constant 110 : index
    %93 = vector.load %arg18[%c0_68, %c110] : memref<16x308xf32, #tpu.memory_space<vmem>>, vector<16x22xf32>
    tpu.vector_store %arg18[%c0_68, %c110], %92 {strides = array<i32>} : memref<16x308xf32, #tpu.memory_space<vmem>>, vector<16x22xf32>,
    %c0_69 = arith.constant 0 : index
    %c6 = arith.constant 6 : index
    %c0_70 = arith.constant 0 : index
    %94 = vector.load %arg17[%c0_69, %c6, %c0_70] : memref<2x22x22xf32, #tpu.memory_space<vmem>>, vector<1x16x22xf32>
    %95 = vector.shape_cast %94 : vector<1x16x22xf32> to vector<16x22xf32>
    %c0_71 = arith.constant 0 : index
    %c132 = arith.constant 132 : index
    %96 = vector.load %arg18[%c0_71, %c132] : memref<16x308xf32, #tpu.memory_space<vmem>>, vector<16x22xf32>
    tpu.vector_store %arg18[%c0_71, %c132], %95 {strides = array<i32>} : memref<16x308xf32, #tpu.memory_space<vmem>>, vector<16x22xf32>,
    %c1_72 = arith.constant 1 : index
    %c0_73 = arith.constant 0 : index
    %c0_74 = arith.constant 0 : index
    %97 = vector.load %arg17[%c1_72, %c0_73, %c0_74] : memref<2x22x22xf32, #tpu.memory_space<vmem>>, vector<1x16x22xf32>
    %98 = vector.shape_cast %97 : vector<1x16x22xf32> to vector<16x22xf32>
    %c0_75 = arith.constant 0 : index
    %c154 = arith.constant 154 : index
    %99 = vector.load %arg18[%c0_75, %c154] : memref<16x308xf32, #tpu.memory_space<vmem>>, vector<16x22xf32>
    tpu.vector_store %arg18[%c0_75, %c154], %98 {strides = array<i32>} : memref<16x308xf32, #tpu.memory_space<vmem>>, vector<16x22xf32>,
    %c1_76 = arith.constant 1 : index
    %c1_77 = arith.constant 1 : index
    %c0_78 = arith.constant 0 : index
    %100 = vector.load %arg17[%c1_76, %c1_77, %c0_78] : memref<2x22x22xf32, #tpu.memory_space<vmem>>, vector<1x16x22xf32>
    %101 = vector.shape_cast %100 : vector<1x16x22xf32> to vector<16x22xf32>
    %c0_79 = arith.constant 0 : index
    %c176 = arith.constant 176 : index
    %102 = vector.load %arg18[%c0_79, %c176] : memref<16x308xf32, #tpu.memory_space<vmem>>, vector<16x22xf32>
    tpu.vector_store %arg18[%c0_79, %c176], %101 {strides = array<i32>} : memref<16x308xf32, #tpu.memory_space<vmem>>, vector<16x22xf32>,
    %c1_80 = arith.constant 1 : index
    %c2_81 = arith.constant 2 : index
    %c0_82 = arith.constant 0 : index
    %103 = vector.load %arg17[%c1_80, %c2_81, %c0_82] : memref<2x22x22xf32, #tpu.memory_space<vmem>>, vector<1x16x22xf32>
    %104 = vector.shape_cast %103 : vector<1x16x22xf32> to vector<16x22xf32>
    %c0_83 = arith.constant 0 : index
    %c198 = arith.constant 198 : index
    %105 = vector.load %arg18[%c0_83, %c198] : memref<16x308xf32, #tpu.memory_space<vmem>>, vector<16x22xf32>
    tpu.vector_store %arg18[%c0_83, %c198], %104 {strides = array<i32>} : memref<16x308xf32, #tpu.memory_space<vmem>>, vector<16x22xf32>,
    %c1_84 = arith.constant 1 : index
    %c3_85 = arith.constant 3 : index
    %c0_86 = arith.constant 0 : index
    %106 = vector.load %arg17[%c1_84, %c3_85, %c0_86] : memref<2x22x22xf32, #tpu.memory_space<vmem>>, vector<1x16x22xf32>
    %107 = vector.shape_cast %106 : vector<1x16x22xf32> to vector<16x22xf32>
    %c0_87 = arith.constant 0 : index
    %c220 = arith.constant 220 : index
    %108 = vector.load %arg18[%c0_87, %c220] : memref<16x308xf32, #tpu.memory_space<vmem>>, vector<16x22xf32>
    tpu.vector_store %arg18[%c0_87, %c220], %107 {strides = array<i32>} : memref<16x308xf32, #tpu.memory_space<vmem>>, vector<16x22xf32>,
    %c1_88 = arith.constant 1 : index
    %c4_89 = arith.constant 4 : index
    %c0_90 = arith.constant 0 : index
    %109 = vector.load %arg17[%c1_88, %c4_89, %c0_90] : memref<2x22x22xf32, #tpu.memory_space<vmem>>, vector<1x16x22xf32>
    %110 = vector.shape_cast %109 : vector<1x16x22xf32> to vector<16x22xf32>
    %c0_91 = arith.constant 0 : index
    %c242 = arith.constant 242 : index
    %111 = vector.load %arg18[%c0_91, %c242] : memref<16x308xf32, #tpu.memory_space<vmem>>, vector<16x22xf32>
    tpu.vector_store %arg18[%c0_91, %c242], %110 {strides = array<i32>} : memref<16x308xf32, #tpu.memory_space<vmem>>, vector<16x22xf32>,
    %c1_92 = arith.constant 1 : index
    %c5_93 = arith.constant 5 : index
    %c0_94 = arith.constant 0 : index
    %112 = vector.load %arg17[%c1_92, %c5_93, %c0_94] : memref<2x22x22xf32, #tpu.memory_space<vmem>>, vector<1x16x22xf32>
    %113 = vector.shape_cast %112 : vector<1x16x22xf32> to vector<16x22xf32>
    %c0_95 = arith.constant 0 : index
    %c264 = arith.constant 264 : index
    %114 = vector.load %arg18[%c0_95, %c264] : memref<16x308xf32, #tpu.memory_space<vmem>>, vector<16x22xf32>
    tpu.vector_store %arg18[%c0_95, %c264], %113 {strides = array<i32>} : memref<16x308xf32, #tpu.memory_space<vmem>>, vector<16x22xf32>,
    %c1_96 = arith.constant 1 : index
    %c6_97 = arith.constant 6 : index
    %c0_98 = arith.constant 0 : index
    %115 = vector.load %arg17[%c1_96, %c6_97, %c0_98] : memref<2x22x22xf32, #tpu.memory_space<vmem>>, vector<1x16x22xf32>
    %116 = vector.shape_cast %115 : vector<1x16x22xf32> to vector<16x22xf32>
    %c0_99 = arith.constant 0 : index
    %c286 = arith.constant 286 : index
    %117 = vector.load %arg18[%c0_99, %c286] : memref<16x308xf32, #tpu.memory_space<vmem>>, vector<16x22xf32>
    tpu.vector_store %arg18[%c0_99, %c286], %116 {strides = array<i32>} : memref<16x308xf32, #tpu.memory_space<vmem>>, vector<16x22xf32>,
    %c0_100 = arith.constant 0 : index
    %c0_101 = arith.constant 0 : index
    %118 = vector.load %arg18[%c0_100, %c0_101] : memref<16x308xf32, #tpu.memory_space<vmem>>, vector<16x308xf32>
    %cst_102 = arith.constant dense<0.000000e+00> : vector<16x16xf32>
    %119 = tpu.matmul %118, %63, %cst_102 {dimension_numbers = #tpu.dot_dimension_numbers<[1], [0], [0], [1], [0, 0, 1, 1], [], []>} : vector<16x308xf32>, vector<308x16xf32>, vector<16x16xf32> -> vector<16x16xf32>
    %cst_103 = arith.constant 0.000000e+00 : f32
    %120 = vector.broadcast %cst_103 : f32 to vector<16x16xf32>
    %121 = arith.subf %120, %119 : vector<16x16xf32>
    %122 = math.exp %121 : vector<16x16xf32>
    %cst_104 = arith.constant 1.000000e+00 : f32
    %123 = vector.broadcast %cst_104 : f32 to vector<16x16xf32>
    %124 = arith.addf %123, %122 : vector<16x16xf32>
    %cst_105 = arith.constant 1.000000e+00 : f32
    %125 = vector.broadcast %cst_105 : f32 to vector<16x16xf32>
    %126 = arith.divf %125, %124 : vector<16x16xf32>
    %127 = vector.shape_cast %126 : vector<16x16xf32> to vector<16x16x1xf32>
    %128 = vector.broadcast %127 : vector<16x16x1xf32> to vector<16x16x32xf32>
    %129 = arith.mulf %62, %128 : vector<16x16x32xf32>
    %cst_106 = arith.constant 0.000000e+00 : f32
    %130 = vector.broadcast %cst_106 : f32 to vector<18x18x32xf32>
    %c0_107 = arith.constant 0 : index
    %c0_108 = arith.constant 0 : index
    %c0_109 = arith.constant 0 : index
    %131 = vector.load %arg16[%c0_107, %c0_108, %c0_109] : memref<18x18x32xf32, #tpu.memory_space<vmem>>, vector<18x18x32xf32>
    tpu.vector_store %arg16[%c0_107, %c0_108, %c0_109], %130 {strides = array<i32>} : memref<18x18x32xf32, #tpu.memory_space<vmem>>, vector<18x18x32xf32>,
    %c1_110 = arith.constant 1 : index
    %c1_111 = arith.constant 1 : index
    %c0_112 = arith.constant 0 : index
    %132 = vector.load %arg16[%c1_110, %c1_111, %c0_112] : memref<18x18x32xf32, #tpu.memory_space<vmem>>, vector<16x16x32xf32>
    tpu.vector_store %arg16[%c1_110, %c1_111, %c0_112], %129 {strides = array<i32>} : memref<18x18x32xf32, #tpu.memory_space<vmem>>, vector<16x16x32xf32>,
    %c0_113 = arith.constant 0 : index
    %c0_114 = arith.constant 0 : index
    %c0_115 = arith.constant 0 : index
    %133 = vector.load %arg16[%c0_113, %c0_114, %c0_115] : memref<18x18x32xf32, #tpu.memory_space<vmem>>, vector<18x18x32xf32>
    %c0_116 = arith.constant 0 : index
    %c0_117 = arith.constant 0 : index
    %134 = vector.load %arg7[%c0_116, %c0_117] : memref<288x16xf32, #tpu.memory_space<vmem>>, vector<288x16xf32>
    %c0_118 = arith.constant 0 : index
    %c0_119 = arith.constant 0 : index
    %135 = vector.load %arg8[%c0_118, %c0_119] : memref<1x16xf32, #tpu.memory_space<vmem>>, vector<1x16xf32>
    %136 = vector.extract_strided_slice %133 {offsets = [0, 0, 0], sizes = [16, 16, 32], strides = [1, 1, 1]} : vector<18x18x32xf32> to vector<16x16x32xf32>
    %137 = vector.shape_cast %136 : vector<16x16x32xf32> to vector<256x32xf32>
    %c0_120 = arith.constant 0 : index
    %c0_121 = arith.constant 0 : index
    %138 = vector.load %arg15[%c0_120, %c0_121] : memref<256x288xf32, #tpu.memory_space<vmem>>, vector<256x32xf32>
    tpu.vector_store %arg15[%c0_120, %c0_121], %137 {strides = array<i32>} : memref<256x288xf32, #tpu.memory_space<vmem>>, vector<256x32xf32>,
    %139 = vector.extract_strided_slice %133 {offsets = [0, 1, 0], sizes = [16, 16, 32], strides = [1, 1, 1]} : vector<18x18x32xf32> to vector<16x16x32xf32>
    %140 = vector.shape_cast %139 : vector<16x16x32xf32> to vector<256x32xf32>
    %c0_122 = arith.constant 0 : index
    %c32_123 = arith.constant 32 : index
    %141 = vector.load %arg15[%c0_122, %c32_123] : memref<256x288xf32, #tpu.memory_space<vmem>>, vector<256x32xf32>
    tpu.vector_store %arg15[%c0_122, %c32_123], %140 {strides = array<i32>} : memref<256x288xf32, #tpu.memory_space<vmem>>, vector<256x32xf32>,
    %142 = vector.extract_strided_slice %133 {offsets = [0, 2, 0], sizes = [16, 16, 32], strides = [1, 1, 1]} : vector<18x18x32xf32> to vector<16x16x32xf32>
    %143 = vector.shape_cast %142 : vector<16x16x32xf32> to vector<256x32xf32>
    %c0_124 = arith.constant 0 : index
    %c64 = arith.constant 64 : index
    %144 = vector.load %arg15[%c0_124, %c64] : memref<256x288xf32, #tpu.memory_space<vmem>>, vector<256x32xf32>
    tpu.vector_store %arg15[%c0_124, %c64], %143 {strides = array<i32>} : memref<256x288xf32, #tpu.memory_space<vmem>>, vector<256x32xf32>,
    %145 = vector.extract_strided_slice %133 {offsets = [1, 0, 0], sizes = [16, 16, 32], strides = [1, 1, 1]} : vector<18x18x32xf32> to vector<16x16x32xf32>
    %146 = vector.shape_cast %145 : vector<16x16x32xf32> to vector<256x32xf32>
    %c0_125 = arith.constant 0 : index
    %c96 = arith.constant 96 : index
    %147 = vector.load %arg15[%c0_125, %c96] : memref<256x288xf32, #tpu.memory_space<vmem>>, vector<256x32xf32>
    tpu.vector_store %arg15[%c0_125, %c96], %146 {strides = array<i32>} : memref<256x288xf32, #tpu.memory_space<vmem>>, vector<256x32xf32>,
    %148 = vector.extract_strided_slice %133 {offsets = [1, 1, 0], sizes = [16, 16, 32], strides = [1, 1, 1]} : vector<18x18x32xf32> to vector<16x16x32xf32>
    %149 = vector.shape_cast %148 : vector<16x16x32xf32> to vector<256x32xf32>
    %c0_126 = arith.constant 0 : index
    %c128 = arith.constant 128 : index
    %150 = vector.load %arg15[%c0_126, %c128] : memref<256x288xf32, #tpu.memory_space<vmem>>, vector<256x32xf32>
    tpu.vector_store %arg15[%c0_126, %c128], %149 {strides = array<i32>} : memref<256x288xf32, #tpu.memory_space<vmem>>, vector<256x32xf32>,
    %151 = vector.extract_strided_slice %133 {offsets = [1, 2, 0], sizes = [16, 16, 32], strides = [1, 1, 1]} : vector<18x18x32xf32> to vector<16x16x32xf32>
    %152 = vector.shape_cast %151 : vector<16x16x32xf32> to vector<256x32xf32>
    %c0_127 = arith.constant 0 : index
    %c160 = arith.constant 160 : index
    %153 = vector.load %arg15[%c0_127, %c160] : memref<256x288xf32, #tpu.memory_space<vmem>>, vector<256x32xf32>
    tpu.vector_store %arg15[%c0_127, %c160], %152 {strides = array<i32>} : memref<256x288xf32, #tpu.memory_space<vmem>>, vector<256x32xf32>,
    %154 = vector.extract_strided_slice %133 {offsets = [2, 0, 0], sizes = [16, 16, 32], strides = [1, 1, 1]} : vector<18x18x32xf32> to vector<16x16x32xf32>
    %155 = vector.shape_cast %154 : vector<16x16x32xf32> to vector<256x32xf32>
    %c0_128 = arith.constant 0 : index
    %c192 = arith.constant 192 : index
    %156 = vector.load %arg15[%c0_128, %c192] : memref<256x288xf32, #tpu.memory_space<vmem>>, vector<256x32xf32>
    tpu.vector_store %arg15[%c0_128, %c192], %155 {strides = array<i32>} : memref<256x288xf32, #tpu.memory_space<vmem>>, vector<256x32xf32>,
    %157 = vector.extract_strided_slice %133 {offsets = [2, 1, 0], sizes = [16, 16, 32], strides = [1, 1, 1]} : vector<18x18x32xf32> to vector<16x16x32xf32>
    %158 = vector.shape_cast %157 : vector<16x16x32xf32> to vector<256x32xf32>
    %c0_129 = arith.constant 0 : index
    %c224 = arith.constant 224 : index
    %159 = vector.load %arg15[%c0_129, %c224] : memref<256x288xf32, #tpu.memory_space<vmem>>, vector<256x32xf32>
    tpu.vector_store %arg15[%c0_129, %c224], %158 {strides = array<i32>} : memref<256x288xf32, #tpu.memory_space<vmem>>, vector<256x32xf32>,
    %160 = vector.extract_strided_slice %133 {offsets = [2, 2, 0], sizes = [16, 16, 32], strides = [1, 1, 1]} : vector<18x18x32xf32> to vector<16x16x32xf32>
    %161 = vector.shape_cast %160 : vector<16x16x32xf32> to vector<256x32xf32>
    %c0_130 = arith.constant 0 : index
    %c256 = arith.constant 256 : index
    %162 = vector.load %arg15[%c0_130, %c256] : memref<256x288xf32, #tpu.memory_space<vmem>>, vector<256x32xf32>
    tpu.vector_store %arg15[%c0_130, %c256], %161 {strides = array<i32>} : memref<256x288xf32, #tpu.memory_space<vmem>>, vector<256x32xf32>,
    %c0_131 = arith.constant 0 : index
    %c0_132 = arith.constant 0 : index
    %163 = vector.load %arg15[%c0_131, %c0_132] : memref<256x288xf32, #tpu.memory_space<vmem>>, vector<256x288xf32>
    %cst_133 = arith.constant dense<0.000000e+00> : vector<256x16xf32>
    %164 = tpu.matmul %163, %134, %cst_133 {dimension_numbers = #tpu.dot_dimension_numbers<[1], [0], [0], [1], [0, 0, 1, 1], [], []>} : vector<256x288xf32>, vector<288x16xf32>, vector<256x16xf32> -> vector<256x16xf32>
    %165 = vector.broadcast %135 : vector<1x16xf32> to vector<256x16xf32>
    %166 = arith.addf %164, %165 : vector<256x16xf32>
    %cst_134 = arith.constant 0.000000e+00 : f32
    %167 = vector.broadcast %cst_134 : f32 to vector<256x16xf32>
    %168 = arith.maximumf %166, %167 : vector<256x16xf32>
    %c0_135 = arith.constant 0 : index
    %c0_136 = arith.constant 0 : index
    %169 = vector.load %arg9[%c0_135, %c0_136] : memref<16x1xf32, #tpu.memory_space<vmem>>, vector<16x1xf32>
    %c0_137 = arith.constant 0 : index
    %c0_138 = arith.constant 0 : index
    %170 = vector.load %arg10[%c0_137, %c0_138] : memref<1x16xf32, #tpu.memory_space<vmem>>, vector<1x16xf32>
    %cst_139 = arith.constant dense<0.000000e+00> : vector<16xf32>
    %171 = vector.multi_reduction <add>, %168, %cst_139 [0] : vector<256x16xf32> to vector<16xf32>
    %172 = vector.shape_cast %171 : vector<16xf32> to vector<1x16xf32>
    %cst_140 = arith.constant 2.560000e+02 : f32
    %173 = vector.broadcast %cst_140 : f32 to vector<1x16xf32>
    %174 = arith.divf %172, %173 : vector<1x16xf32>
    %cst_141 = arith.constant dense<0xFF800000> : vector<16xf32>
    %175 = vector.multi_reduction <maximumf>, %168, %cst_141 [0] : vector<256x16xf32> to vector<16xf32>
    %176 = vector.shape_cast %175 : vector<16xf32> to vector<1x16xf32>
    %177 = tpu.concatenate %174, %176 in 0 : vector<1x16xf32>, vector<1x16xf32> -> vector<2x16xf32>
    %cst_142 = arith.constant dense<0.000000e+00> : vector<2x1xf32>
    %178 = tpu.matmul %177, %169, %cst_142 {dimension_numbers = #tpu.dot_dimension_numbers<[1], [0], [0], [1], [0, 0, 1, 1], [], []>} : vector<2x16xf32>, vector<16x1xf32>, vector<2x1xf32> -> vector<2x1xf32>
    %cst_143 = arith.constant 0.000000e+00 : f32
    %179 = vector.broadcast %cst_143 : f32 to vector<2x1xf32>
    %180 = arith.maximumf %178, %179 : vector<2x1xf32>
    %cst_144 = arith.constant dense<0.000000e+00> : vector<2x16xf32>
    %181 = tpu.matmul %180, %170, %cst_144 {dimension_numbers = #tpu.dot_dimension_numbers<[1], [0], [0], [1], [0, 0, 1, 1], [], []>} : vector<2x1xf32>, vector<1x16xf32>, vector<2x16xf32> -> vector<2x16xf32>
    %182 = vector.extract_strided_slice %181 {offsets = [0, 0], sizes = [1, 16], strides = [1, 1]} : vector<2x16xf32> to vector<1x16xf32>
    %183 = vector.extract_strided_slice %181 {offsets = [1, 0], sizes = [1, 16], strides = [1, 1]} : vector<2x16xf32> to vector<1x16xf32>
    %184 = arith.addf %182, %183 : vector<1x16xf32>
    %cst_145 = arith.constant 0.000000e+00 : f32
    %185 = vector.broadcast %cst_145 : f32 to vector<1x16xf32>
    %186 = arith.subf %185, %184 : vector<1x16xf32>
    %187 = math.exp %186 : vector<1x16xf32>
    %cst_146 = arith.constant 1.000000e+00 : f32
    %188 = vector.broadcast %cst_146 : f32 to vector<1x16xf32>
    %189 = arith.addf %188, %187 : vector<1x16xf32>
    %cst_147 = arith.constant 1.000000e+00 : f32
    %190 = vector.broadcast %cst_147 : f32 to vector<1x16xf32>
    %191 = arith.divf %190, %189 : vector<1x16xf32>
    %192 = vector.broadcast %191 : vector<1x16xf32> to vector<256x16xf32>
    %193 = arith.mulf %168, %192 : vector<256x16xf32>
    %194 = vector.shape_cast %193 : vector<256x16xf32> to vector<16x16x16xf32>
    %c0_148 = arith.constant 0 : index
    %c0_149 = arith.constant 0 : index
    %195 = vector.load %arg11[%c0_148, %c0_149] : memref<308x16xf32, #tpu.memory_space<vmem>>, vector<308x16xf32>
    %cst_150 = arith.constant 0.000000e+00 : f32
    %196 = vector.broadcast %cst_150 : f32 to vector<2x22x22xf32>
    %c0_151 = arith.constant 0 : index
    %c0_152 = arith.constant 0 : index
    %c0_153 = arith.constant 0 : index
    %197 = vector.load %arg17[%c0_151, %c0_152, %c0_153] : memref<2x22x22xf32, #tpu.memory_space<vmem>>, vector<2x22x22xf32>
    tpu.vector_store %arg17[%c0_151, %c0_152, %c0_153], %196 {strides = array<i32>} : memref<2x22x22xf32, #tpu.memory_space<vmem>>, vector<2x22x22xf32>,
    %cst_154 = arith.constant dense<0.000000e+00> : vector<16x16xf32>
    %198 = vector.multi_reduction <add>, %194, %cst_154 [2] : vector<16x16x16xf32> to vector<16x16xf32>
    %cst_155 = arith.constant 1.600000e+01 : f32
    %199 = vector.broadcast %cst_155 : f32 to vector<16x16xf32>
    %200 = arith.divf %198, %199 : vector<16x16xf32>
    %c0_156 = arith.constant 0 : index
    %c3_157 = arith.constant 3 : index
    %c3_158 = arith.constant 3 : index
    %201 = vector.load %arg17[%c0_156, %c3_157, %c3_158] : memref<2x22x22xf32, #tpu.memory_space<vmem>>, vector<1x16x16xf32>
    %202 = vector.shape_cast %201 : vector<1x16x16xf32> to vector<16x16xf32>
    %203 = vector.shape_cast %200 : vector<16x16xf32> to vector<1x16x16xf32>
    tpu.vector_store %arg17[%c0_156, %c3_157, %c3_158], %203 {strides = array<i32>} : memref<2x22x22xf32, #tpu.memory_space<vmem>>, vector<1x16x16xf32>,
    %cst_159 = arith.constant dense<0xFF800000> : vector<16x16xf32>
    %204 = vector.multi_reduction <maximumf>, %194, %cst_159 [2] : vector<16x16x16xf32> to vector<16x16xf32>
    %c1_160 = arith.constant 1 : index
    %c3_161 = arith.constant 3 : index
    %c3_162 = arith.constant 3 : index
    %205 = vector.load %arg17[%c1_160, %c3_161, %c3_162] : memref<2x22x22xf32, #tpu.memory_space<vmem>>, vector<1x16x16xf32>
    %206 = vector.shape_cast %205 : vector<1x16x16xf32> to vector<16x16xf32>
    %207 = vector.shape_cast %204 : vector<16x16xf32> to vector<1x16x16xf32>
    tpu.vector_store %arg17[%c1_160, %c3_161, %c3_162], %207 {strides = array<i32>} : memref<2x22x22xf32, #tpu.memory_space<vmem>>, vector<1x16x16xf32>,
    %c0_163 = arith.constant 0 : index
    %c0_164 = arith.constant 0 : index
    %c0_165 = arith.constant 0 : index
    %208 = vector.load %arg17[%c0_163, %c0_164, %c0_165] : memref<2x22x22xf32, #tpu.memory_space<vmem>>, vector<1x16x22xf32>
    %209 = vector.shape_cast %208 : vector<1x16x22xf32> to vector<16x22xf32>
    %c0_166 = arith.constant 0 : index
    %c0_167 = arith.constant 0 : index
    %210 = vector.load %arg18[%c0_166, %c0_167] : memref<16x308xf32, #tpu.memory_space<vmem>>, vector<16x22xf32>
    tpu.vector_store %arg18[%c0_166, %c0_167], %209 {strides = array<i32>} : memref<16x308xf32, #tpu.memory_space<vmem>>, vector<16x22xf32>,
    %c0_168 = arith.constant 0 : index
    %c1_169 = arith.constant 1 : index
    %c0_170 = arith.constant 0 : index
    %211 = vector.load %arg17[%c0_168, %c1_169, %c0_170] : memref<2x22x22xf32, #tpu.memory_space<vmem>>, vector<1x16x22xf32>
    %212 = vector.shape_cast %211 : vector<1x16x22xf32> to vector<16x22xf32>
    %c0_171 = arith.constant 0 : index
    %c22_172 = arith.constant 22 : index
    %213 = vector.load %arg18[%c0_171, %c22_172] : memref<16x308xf32, #tpu.memory_space<vmem>>, vector<16x22xf32>
    tpu.vector_store %arg18[%c0_171, %c22_172], %212 {strides = array<i32>} : memref<16x308xf32, #tpu.memory_space<vmem>>, vector<16x22xf32>,
    %c0_173 = arith.constant 0 : index
    %c2_174 = arith.constant 2 : index
    %c0_175 = arith.constant 0 : index
    %214 = vector.load %arg17[%c0_173, %c2_174, %c0_175] : memref<2x22x22xf32, #tpu.memory_space<vmem>>, vector<1x16x22xf32>
    %215 = vector.shape_cast %214 : vector<1x16x22xf32> to vector<16x22xf32>
    %c0_176 = arith.constant 0 : index
    %c44_177 = arith.constant 44 : index
    %216 = vector.load %arg18[%c0_176, %c44_177] : memref<16x308xf32, #tpu.memory_space<vmem>>, vector<16x22xf32>
    tpu.vector_store %arg18[%c0_176, %c44_177], %215 {strides = array<i32>} : memref<16x308xf32, #tpu.memory_space<vmem>>, vector<16x22xf32>,
    %c0_178 = arith.constant 0 : index
    %c3_179 = arith.constant 3 : index
    %c0_180 = arith.constant 0 : index
    %217 = vector.load %arg17[%c0_178, %c3_179, %c0_180] : memref<2x22x22xf32, #tpu.memory_space<vmem>>, vector<1x16x22xf32>
    %218 = vector.shape_cast %217 : vector<1x16x22xf32> to vector<16x22xf32>
    %c0_181 = arith.constant 0 : index
    %c66_182 = arith.constant 66 : index
    %219 = vector.load %arg18[%c0_181, %c66_182] : memref<16x308xf32, #tpu.memory_space<vmem>>, vector<16x22xf32>
    tpu.vector_store %arg18[%c0_181, %c66_182], %218 {strides = array<i32>} : memref<16x308xf32, #tpu.memory_space<vmem>>, vector<16x22xf32>,
    %c0_183 = arith.constant 0 : index
    %c4_184 = arith.constant 4 : index
    %c0_185 = arith.constant 0 : index
    %220 = vector.load %arg17[%c0_183, %c4_184, %c0_185] : memref<2x22x22xf32, #tpu.memory_space<vmem>>, vector<1x16x22xf32>
    %221 = vector.shape_cast %220 : vector<1x16x22xf32> to vector<16x22xf32>
    %c0_186 = arith.constant 0 : index
    %c88_187 = arith.constant 88 : index
    %222 = vector.load %arg18[%c0_186, %c88_187] : memref<16x308xf32, #tpu.memory_space<vmem>>, vector<16x22xf32>
    tpu.vector_store %arg18[%c0_186, %c88_187], %221 {strides = array<i32>} : memref<16x308xf32, #tpu.memory_space<vmem>>, vector<16x22xf32>,
    %c0_188 = arith.constant 0 : index
    %c5_189 = arith.constant 5 : index
    %c0_190 = arith.constant 0 : index
    %223 = vector.load %arg17[%c0_188, %c5_189, %c0_190] : memref<2x22x22xf32, #tpu.memory_space<vmem>>, vector<1x16x22xf32>
    %224 = vector.shape_cast %223 : vector<1x16x22xf32> to vector<16x22xf32>
    %c0_191 = arith.constant 0 : index
    %c110_192 = arith.constant 110 : index
    %225 = vector.load %arg18[%c0_191, %c110_192] : memref<16x308xf32, #tpu.memory_space<vmem>>, vector<16x22xf32>
    tpu.vector_store %arg18[%c0_191, %c110_192], %224 {strides = array<i32>} : memref<16x308xf32, #tpu.memory_space<vmem>>, vector<16x22xf32>,
    %c0_193 = arith.constant 0 : index
    %c6_194 = arith.constant 6 : index
    %c0_195 = arith.constant 0 : index
    %226 = vector.load %arg17[%c0_193, %c6_194, %c0_195] : memref<2x22x22xf32, #tpu.memory_space<vmem>>, vector<1x16x22xf32>
    %227 = vector.shape_cast %226 : vector<1x16x22xf32> to vector<16x22xf32>
    %c0_196 = arith.constant 0 : index
    %c132_197 = arith.constant 132 : index
    %228 = vector.load %arg18[%c0_196, %c132_197] : memref<16x308xf32, #tpu.memory_space<vmem>>, vector<16x22xf32>
    tpu.vector_store %arg18[%c0_196, %c132_197], %227 {strides = array<i32>} : memref<16x308xf32, #tpu.memory_space<vmem>>, vector<16x22xf32>,
    %c1_198 = arith.constant 1 : index
    %c0_199 = arith.constant 0 : index
    %c0_200 = arith.constant 0 : index
    %229 = vector.load %arg17[%c1_198, %c0_199, %c0_200] : memref<2x22x22xf32, #tpu.memory_space<vmem>>, vector<1x16x22xf32>
    %230 = vector.shape_cast %229 : vector<1x16x22xf32> to vector<16x22xf32>
    %c0_201 = arith.constant 0 : index
    %c154_202 = arith.constant 154 : index
    %231 = vector.load %arg18[%c0_201, %c154_202] : memref<16x308xf32, #tpu.memory_space<vmem>>, vector<16x22xf32>
    tpu.vector_store %arg18[%c0_201, %c154_202], %230 {strides = array<i32>} : memref<16x308xf32, #tpu.memory_space<vmem>>, vector<16x22xf32>,
    %c1_203 = arith.constant 1 : index
    %c1_204 = arith.constant 1 : index
    %c0_205 = arith.constant 0 : index
    %232 = vector.load %arg17[%c1_203, %c1_204, %c0_205] : memref<2x22x22xf32, #tpu.memory_space<vmem>>, vector<1x16x22xf32>
    %233 = vector.shape_cast %232 : vector<1x16x22xf32> to vector<16x22xf32>
    %c0_206 = arith.constant 0 : index
    %c176_207 = arith.constant 176 : index
    %234 = vector.load %arg18[%c0_206, %c176_207] : memref<16x308xf32, #tpu.memory_space<vmem>>, vector<16x22xf32>
    tpu.vector_store %arg18[%c0_206, %c176_207], %233 {strides = array<i32>} : memref<16x308xf32, #tpu.memory_space<vmem>>, vector<16x22xf32>,
    %c1_208 = arith.constant 1 : index
    %c2_209 = arith.constant 2 : index
    %c0_210 = arith.constant 0 : index
    %235 = vector.load %arg17[%c1_208, %c2_209, %c0_210] : memref<2x22x22xf32, #tpu.memory_space<vmem>>, vector<1x16x22xf32>
    %236 = vector.shape_cast %235 : vector<1x16x22xf32> to vector<16x22xf32>
    %c0_211 = arith.constant 0 : index
    %c198_212 = arith.constant 198 : index
    %237 = vector.load %arg18[%c0_211, %c198_212] : memref<16x308xf32, #tpu.memory_space<vmem>>, vector<16x22xf32>
    tpu.vector_store %arg18[%c0_211, %c198_212], %236 {strides = array<i32>} : memref<16x308xf32, #tpu.memory_space<vmem>>, vector<16x22xf32>,
    %c1_213 = arith.constant 1 : index
    %c3_214 = arith.constant 3 : index
    %c0_215 = arith.constant 0 : index
    %238 = vector.load %arg17[%c1_213, %c3_214, %c0_215] : memref<2x22x22xf32, #tpu.memory_space<vmem>>, vector<1x16x22xf32>
    %239 = vector.shape_cast %238 : vector<1x16x22xf32> to vector<16x22xf32>
    %c0_216 = arith.constant 0 : index
    %c220_217 = arith.constant 220 : index
    %240 = vector.load %arg18[%c0_216, %c220_217] : memref<16x308xf32, #tpu.memory_space<vmem>>, vector<16x22xf32>
    tpu.vector_store %arg18[%c0_216, %c220_217], %239 {strides = array<i32>} : memref<16x308xf32, #tpu.memory_space<vmem>>, vector<16x22xf32>,
    %c1_218 = arith.constant 1 : index
    %c4_219 = arith.constant 4 : index
    %c0_220 = arith.constant 0 : index
    %241 = vector.load %arg17[%c1_218, %c4_219, %c0_220] : memref<2x22x22xf32, #tpu.memory_space<vmem>>, vector<1x16x22xf32>
    %242 = vector.shape_cast %241 : vector<1x16x22xf32> to vector<16x22xf32>
    %c0_221 = arith.constant 0 : index
    %c242_222 = arith.constant 242 : index
    %243 = vector.load %arg18[%c0_221, %c242_222] : memref<16x308xf32, #tpu.memory_space<vmem>>, vector<16x22xf32>
    tpu.vector_store %arg18[%c0_221, %c242_222], %242 {strides = array<i32>} : memref<16x308xf32, #tpu.memory_space<vmem>>, vector<16x22xf32>,
    %c1_223 = arith.constant 1 : index
    %c5_224 = arith.constant 5 : index
    %c0_225 = arith.constant 0 : index
    %244 = vector.load %arg17[%c1_223, %c5_224, %c0_225] : memref<2x22x22xf32, #tpu.memory_space<vmem>>, vector<1x16x22xf32>
    %245 = vector.shape_cast %244 : vector<1x16x22xf32> to vector<16x22xf32>
    %c0_226 = arith.constant 0 : index
    %c264_227 = arith.constant 264 : index
    %246 = vector.load %arg18[%c0_226, %c264_227] : memref<16x308xf32, #tpu.memory_space<vmem>>, vector<16x22xf32>
    tpu.vector_store %arg18[%c0_226, %c264_227], %245 {strides = array<i32>} : memref<16x308xf32, #tpu.memory_space<vmem>>, vector<16x22xf32>,
    %c1_228 = arith.constant 1 : index
    %c6_229 = arith.constant 6 : index
    %c0_230 = arith.constant 0 : index
    %247 = vector.load %arg17[%c1_228, %c6_229, %c0_230] : memref<2x22x22xf32, #tpu.memory_space<vmem>>, vector<1x16x22xf32>
    %248 = vector.shape_cast %247 : vector<1x16x22xf32> to vector<16x22xf32>
    %c0_231 = arith.constant 0 : index
    %c286_232 = arith.constant 286 : index
    %249 = vector.load %arg18[%c0_231, %c286_232] : memref<16x308xf32, #tpu.memory_space<vmem>>, vector<16x22xf32>
    tpu.vector_store %arg18[%c0_231, %c286_232], %248 {strides = array<i32>} : memref<16x308xf32, #tpu.memory_space<vmem>>, vector<16x22xf32>,
    %c0_233 = arith.constant 0 : index
    %c0_234 = arith.constant 0 : index
    %250 = vector.load %arg18[%c0_233, %c0_234] : memref<16x308xf32, #tpu.memory_space<vmem>>, vector<16x308xf32>
    %cst_235 = arith.constant dense<0.000000e+00> : vector<16x16xf32>
    %251 = tpu.matmul %250, %195, %cst_235 {dimension_numbers = #tpu.dot_dimension_numbers<[1], [0], [0], [1], [0, 0, 1, 1], [], []>} : vector<16x308xf32>, vector<308x16xf32>, vector<16x16xf32> -> vector<16x16xf32>
    %cst_236 = arith.constant 0.000000e+00 : f32
    %252 = vector.broadcast %cst_236 : f32 to vector<16x16xf32>
    %253 = arith.subf %252, %251 : vector<16x16xf32>
    %254 = math.exp %253 : vector<16x16xf32>
    %cst_237 = arith.constant 1.000000e+00 : f32
    %255 = vector.broadcast %cst_237 : f32 to vector<16x16xf32>
    %256 = arith.addf %255, %254 : vector<16x16xf32>
    %cst_238 = arith.constant 1.000000e+00 : f32
    %257 = vector.broadcast %cst_238 : f32 to vector<16x16xf32>
    %258 = arith.divf %257, %256 : vector<16x16xf32>
    %259 = vector.shape_cast %258 : vector<16x16xf32> to vector<16x16x1xf32>
    %260 = vector.broadcast %259 : vector<16x16x1xf32> to vector<16x16x16xf32>
    %261 = arith.mulf %194, %260 : vector<16x16x16xf32>
    %262 = vector.shape_cast %261 : vector<16x16x16xf32> to vector<256x16xf32>
    %263 = tpu.transpose %262, [1, 0] : vector<256x16xf32> -> vector<16x256xf32>
    %c0_239 = arith.constant 0 : index
    %c0_240 = arith.constant 0 : index
    %264 = vector.load %arg12[%c0_239, %c0_240] : memref<256x1024xf32, #tpu.memory_space<vmem>>, vector<256x1024xf32>
    %cst_241 = arith.constant dense<0.000000e+00> : vector<16x1024xf32>
    %265 = tpu.matmul %263, %264, %cst_241 {dimension_numbers = #tpu.dot_dimension_numbers<[1], [0], [0], [1], [0, 0, 1, 1], [], []>} : vector<16x256xf32>, vector<256x1024xf32>, vector<16x1024xf32> -> vector<16x1024xf32>
    %c0_242 = arith.constant 0 : index
    %c0_243 = arith.constant 0 : index
    %c0_244 = arith.constant 0 : index
    %266 = vector.load %arg13[%c0_242, %c0_243, %c0_244] : memref<1x16x1024xf32, #tpu.memory_space<vmem>>, vector<1x16x1024xf32>
    %267 = vector.shape_cast %266 : vector<1x16x1024xf32> to vector<16x1024xf32>
    %268 = vector.shape_cast %265 : vector<16x1024xf32> to vector<1x16x1024xf32>
    tpu.vector_store %arg13[%c0_242, %c0_243, %c0_244], %268 {strides = array<i32>} : memref<1x16x1024xf32, #tpu.memory_space<vmem>>, vector<1x16x1024xf32>,
    return
  }
  func.func @transform_0(%arg0: i32) -> (i32, i32, i32, i32) {
    %c0_i32 = arith.constant 0 : i32
    %c0_i32_0 = arith.constant 0 : i32
    %c0_i32_1 = arith.constant 0 : i32
    %c0_i32_2 = arith.constant 0 : i32
    return %arg0, %c0_i32, %c0_i32_0, %c0_i32_1 : i32, i32, i32, i32
  }
  func.func @transform_1(%arg0: i32) -> (i32, i32) {
    %c0_i32 = arith.constant 0 : i32
    %c0_i32_0 = arith.constant 0 : i32
    %c0_i32_1 = arith.constant 0 : i32
    return %c0_i32, %c0_i32_0 : i32, i32
  }
  func.func @transform_2(%arg0: i32) -> (i32, i32) {
    %c0_i32 = arith.constant 0 : i32
    %c0_i32_0 = arith.constant 0 : i32
    %c0_i32_1 = arith.constant 0 : i32
    return %c0_i32, %c0_i32_0 : i32, i32
  }
  func.func @transform_3(%arg0: i32) -> (i32, i32) {
    %c0_i32 = arith.constant 0 : i32
    %c0_i32_0 = arith.constant 0 : i32
    %c0_i32_1 = arith.constant 0 : i32
    return %c0_i32, %c0_i32_0 : i32, i32
  }
  func.func @transform_4(%arg0: i32) -> (i32, i32) {
    %c0_i32 = arith.constant 0 : i32
    %c0_i32_0 = arith.constant 0 : i32
    %c0_i32_1 = arith.constant 0 : i32
    return %c0_i32, %c0_i32_0 : i32, i32
  }
  func.func @transform_5(%arg0: i32) -> (i32, i32) {
    %c0_i32 = arith.constant 0 : i32
    %c0_i32_0 = arith.constant 0 : i32
    %c0_i32_1 = arith.constant 0 : i32
    return %c0_i32, %c0_i32_0 : i32, i32
  }
  func.func @transform_6(%arg0: i32) -> (i32, i32) {
    %c0_i32 = arith.constant 0 : i32
    %c0_i32_0 = arith.constant 0 : i32
    %c0_i32_1 = arith.constant 0 : i32
    return %c0_i32, %c0_i32_0 : i32, i32
  }
  func.func @transform_7(%arg0: i32) -> (i32, i32) {
    %c0_i32 = arith.constant 0 : i32
    %c0_i32_0 = arith.constant 0 : i32
    %c0_i32_1 = arith.constant 0 : i32
    return %c0_i32, %c0_i32_0 : i32, i32
  }
  func.func @transform_8(%arg0: i32) -> (i32, i32) {
    %c0_i32 = arith.constant 0 : i32
    %c0_i32_0 = arith.constant 0 : i32
    %c0_i32_1 = arith.constant 0 : i32
    return %c0_i32, %c0_i32_0 : i32, i32
  }
  func.func @transform_9(%arg0: i32) -> (i32, i32) {
    %c0_i32 = arith.constant 0 : i32
    %c0_i32_0 = arith.constant 0 : i32
    %c0_i32_1 = arith.constant 0 : i32
    return %c0_i32, %c0_i32_0 : i32, i32
  }
  func.func @transform_10(%arg0: i32) -> (i32, i32) {
    %c0_i32 = arith.constant 0 : i32
    %c0_i32_0 = arith.constant 0 : i32
    %c0_i32_1 = arith.constant 0 : i32
    return %c0_i32, %c0_i32_0 : i32, i32
  }
  func.func @transform_11(%arg0: i32) -> (i32, i32) {
    %c0_i32 = arith.constant 0 : i32
    %c0_i32_0 = arith.constant 0 : i32
    %c0_i32_1 = arith.constant 0 : i32
    return %c0_i32, %c0_i32_0 : i32, i32
  }
  func.func @transform_12(%arg0: i32) -> (i32, i32, i32) {
    %c0_i32 = arith.constant 0 : i32
    %c0_i32_0 = arith.constant 0 : i32
    %c0_i32_1 = arith.constant 0 : i32
    return %arg0, %c0_i32, %c0_i32_0 : i32, i32, i32
  }
}

</mosaic_0001>

<bundles_post_ra>
// kernel: decoder_block.1
= control target key start
LH: loop header
LB: loop body
LE: loop exit
PB: predicated region body
PF: predicated region fallthrough
CT: control target
= control target key end

     0   :  { %s8667_s21 = smov 0   ;;  %s13985_s0 = inlined_call_operand.vmem [shape: f32[2,18,18,4], index: 0, kind: input, shape index: {}]   ;;  %s13986_s1 = inlined_call_operand.vmem [shape: f32[36,32], index: 1, kind: input, shape index: {}]   ;;  %s13987_s2 = inlined_call_operand.vmem [shape: f32[1,32], index: 2, kind: input, shape index: {}]   ;;  %s13988_s3 = inlined_call_operand.vmem [shape: f32[32,2], index: 3, kind: input, shape index: {}]   ;;  %s13989_s4 = inlined_call_operand.vmem [shape: f32[2,32], index: 4, kind: input, shape index: {}]   ;;  %s13990_s5 = inlined_call_operand.vmem [shape: f32[308,16], index: 5, kind: input, shape index: {}]   ;;  %s13991_s6 = inlined_call_operand.vmem [shape: f32[288,16], index: 6, kind: input, shape index: {}]   ;;  %s13992_s7 = inlined_call_operand.vmem [shape: f32[1,16], index: 7, kind: input, shape index: {}]   ;;  %s13993_s8 = inlined_call_operand.vmem [shape: f32[16,1], index: 8, kind: input, shape index: {}]   ;;  %s13994_s9 = inlined_call_operand.vmem [shape: f32[1,16], index: 9, kind: input, shape index: {}]   ;;  %s13995_s10 = inlined_call_operand.vmem [shape: f32[308,16], index: 10, kind: input, shape index: {}]   ;;  %s13996_s11 = inlined_call_operand.vmem [shape: f32[256,1024], index: 11, kind: input, shape index: {}]   ;;  %s13997_s12 = inlined_call_operand.vmem [shape: f32[2,16,1024], index: 12, kind: output, shape index: {}]  }
   0x1 LB: > { %s8026_s22 = sadd.s32 4294967295, %s8577_s21   ;;  %p8030_p0 = scmp.ge.s32.totalorder %s8577_s21, 1  ;;  %s8577_s21 = sphi %s8667_s21, %s22_s21  }
   0x2   : > { %p362_p1 = scmp.lt.s32.totalorder %s8577_s21, 3 }
   0x4   : > { %p363_p2 = pnand %p8030_p0, %p362_p1 }
   0x6   : > { %366 = sbr.rel (%p363_p2) target bundleno = 4460 (0x116c), region = 68 }
   0xb   : > { %p404_p3 = scmp.lt.s32.totalorder %s8026_s22, 1  ;;  %vm474_vm0 = vcmask 31744   ;;  %vm14041_vm1 = vcmask 1045504   ;;  %s8579_s27 = smov 12   ;;  %vm14043_vm2 = vcmask 1046528   ;;  %vm1910_vm3 = vcmask 1043456  }
   0xc   : > { %s8580_s28 = smov 8   ;;  %s14021_s29 = smov 4   ;;  %v472_v43 = vld [vmem:[%s13986_s1 + $0x20] sm:$0xf]  ;;  %v471_v47 = vld [vmem:[%s13986_s1 + $0x18] sm:$0xff]  ;;  %v470_v48 = vld [vmem:[%s13986_s1 + $0x10] sm:$0xff] }
   0xd   : > { %s14428_s22 = smov (!%p404_p3, %s8026_s22), 1  ;;  %s8582_s30 = smov 16   ;;  %8295 = vmatprep.subr.msk.mxu0 %vm1910_vm3, %v472_v43  ;;  %v469_v51 = vld [vmem:[%s13986_s1 + $0x8] sm:$0xff]  ;;  %v468_v52 = vld [vmem:[%s13986_s1] sm:$0xff]  ;;  %vm732_vm4 = vcmask 64544   ;;  %vm942_vm5 = vcmask 97344  }
   0xe   : > { %s8471_s23 = smul.u32 432, %s14428_s22  ;;  %s8583_s13 = smov 20   ;;  %8296 = vmatpush3.msk.msra.mxu0 %vm1910_vm3, %v472_v43  ;;  %vm1073_vm6 = vcmask 130144   ;;  %vm1208_vm7 = vcmask 162944   ;;  %vm1342_vm8 = vcmask 195744   ;;  %vm1473_vm9 = vcmask 228544  }
   0xf   : > { %s8584_s14 = smov 24   ;;  %s8585_s15 = smov 28   ;;  %8297 = vmatprep.subr.mxu0 %v471_v47  ;;  %vm1608_vm10 = vcmask 261344   ;;  %vm1742_vm11 = vcmask 294144   ;;  %vm1813_vm12 = vcmask 293888   ;;  %vm2176_vm13 = vcmask 261120  }
  0x10   : > { %s8681_s26 = scalar_lea.vmem %s13985_s0, %s8471_s23  ;;  %8298 = vmatpush3.msra.mxu0 %v471_v47  ;;  %s14019_s16 = smov 32   ;;  %vm14017_vm14 = vmmov 0   ;;  %vm14016_vm15 = vcmask 1040384  }
  0x11   : > { %v8684_v0 = vld [vmem:[%s8681_s26 + $0x20] sm:$0xff]  ;;  %v417_v1 = vld [vmem:[%s8681_s26 + $0x18] sm:$0xff]  ;;  %v415_v3 = vld [vmem:[%s8681_s26 + $0x8] sm:$0xff]  ;;  %8299 = vmatprep.subr.mxu0 %v470_v48  ;;  %s8589_s18 = smov 48   ;;  %s14025_s17 = smov 44  }
  0x12   : > { %v414_v2 = vld [vmem:[%s8681_s26] sm:$0xff]  ;;  %979 = vrot.lane.b32.xlu1 %v8684_v0, %s8579_s27  ;;  %977 = vrot.lane.b32.xlu0 %v417_v1, %s8579_s27  ;;  %v416_v6 = vld [vmem:[%s8681_s26 + $0x10] sm:$0x3]  ;;  %477 = vst.msk [vmem:[#allocation2 + $0x10] sm:$0xff] %vm474_vm0, %v417_v1  ;;  %478 = vst.msk [vmem:[#allocation2 + $0x18] sm:$0xff] %vm474_vm0, %v8684_v0  ;;  %v767_v7 = vrot.slane %v415_v3, 2 }
  0x13   : > { %v766_v4 = vrot.slane %v414_v2, 2  ;;  %v556_v5 = vrot.slane %v414_v2, 1  ;;  %475 = vst.msk [vmem:[#allocation2] sm:$0xff] %vm474_vm0, %v414_v2  ;;  %v557_v8 = vrot.slane %v415_v3, 1  ;;  %v769_v9 = vrot.slane %v416_v6, 2  ;;  %476 = vst.msk [vmem:[#allocation2 + $0x8] sm:$0xff] %vm474_vm0, %v415_v3  ;;  %8300 = vmatpush3.msra.mxu0 %v470_v48 }
  0x14   : > { %v559_v10 = vrot.slane %v416_v6, 1  ;;  %v8699_v11 = vld [vmem:[%s8681_s26 + $0x30] sm:$0xff]  ;;  %v8702_v12 = vld [vmem:[%s8681_s26 + $0x38] sm:$0xff]  ;;  %v8707_v15 = vld [vmem:[%s8681_s26 + $0x48] sm:$0xff]  ;;  %v561_v20 = vrot.slane %v417_v1, 1  ;;  %v562_v21 = vrot.slane %v8684_v0, 1  ;;  %8301 = vmatprep.subr.mxu0 %v469_v51 }
  0x15   : > { %v768_v13 = vsel %vm14041_vm1, %v766_v4, %v767_v7  ;;  %v558_v14 = vsel %vm14043_vm2, %v556_v5, %v557_v8  ;;  %v8710_v16 = vld [vmem:[%s8681_s26 + $0x50] sm:$0xff]  ;;  %479 = vst.msk [vmem:[#allocation2 + $0x20] sm:$0xff] %vm474_vm0, %v8699_v11  ;;  %480 = vst.msk [vmem:[#allocation2 + $0x28] sm:$0xff] %vm474_vm0, %v8702_v12  ;;  %v8719_v17 = vld [vmem:[%s8681_s26 + $0x60] sm:$0xff]  ;;  %v770_v18 = vsel %vm14041_vm1, %v767_v7, %v769_v9  ;;  %v781_v26 = vrot.slane %v8707_v15, 2  ;;  %s8600_s20 = smov 64  }
  0x16   : > { %846 = vrot.lane.b32.xlu1 %v768_v13, %s8580_s28  ;;  %636 = vrot.lane.b32.xlu0 %v558_v14, %s14021_s29  ;;  %481 = vst.msk [vmem:[#allocation2 + $0x30] sm:$0xff] %vm474_vm0, %v8707_v15  ;;  %482 = vst.msk [vmem:[#allocation2 + $0x38] sm:$0xff] %vm474_vm0, %v8710_v16  ;;  %v560_v19 = vsel %vm14043_vm2, %v557_v8, %v559_v10  ;;  %v8729_v22 = vld [vmem:[%s8681_s26 + $0x68] sm:$0xff]  ;;  %v8734_v23 = vld [vmem:[%s8681_s26 + $0x78] sm:$0xff]  ;;  %v782_v27 = vrot.slane %v8710_v16, 2  ;;  %v563_v28 = vsel %vm14043_vm2, %v561_v20, %v562_v21  ;;  %s14384_s24 = smov 88  }
  0x17   : > { %483 = vst.msk [vmem:[#allocation2 + $0x40] sm:$0xff] %vm474_vm0, %v8719_v17  ;;  %v419_v24 = vld [vmem:[%s8681_s26 + $0x28] sm:$0x3]  ;;  %484 = vst.msk [vmem:[#allocation2 + $0x48] sm:$0xff] %vm474_vm0, %v8729_v22  ;;  %v8742_v25 = vld [vmem:[%s8681_s26 + $0x80] sm:$0xff]  ;;  %v771_v29 = vrot.slane %v417_v1, 2  ;;  %8302 = vmatpush3.msra.mxu0 %v469_v51 }
  0x18   : > { %485 = vst.msk [vmem:[#allocation2 + $0x50] sm:$0xff] %vm474_vm0, %v8734_v23  ;;  %486 = vst.msk [vmem:[#allocation2 + $0x58] sm:$0xff] %vm474_vm0, %v8742_v25  ;;  %v772_v30 = vrot.slane %v8684_v0, 2  ;;  %v564_v31 = vrot.slane %v419_v24, 1  ;;  %v8755_v32 = vsel %vm14041_vm1, %v781_v26, %v782_v27  ;;  %v774_v35 = vrot.slane %v419_v24, 2  ;;  %v8767_v37 = vld [vmem:[%s8681_s26 + $0x90] sm:$0xff]  ;;  %8303 = vmatprep.subr.mxu0 %v468_v52 }
  0x19   : > { %487 = vst.msk [vmem:[#allocation2 + $0x60] sm:$0xff] %vm474_vm0, %v8767_v37  ;;  %v566_v38 = vrot.slane %v8699_v11, 1  ;;  %v567_v39 = vrot.slane %v8702_v12, 1  ;;  %v8780_v40 = vld [vmem:[%s8681_s26 + $0x98] sm:$0xff]  ;;  %v422_v42 = vld [vmem:[%s8681_s26 + $0x40] sm:$0x3]  ;;  %8304 = vmatpush3.msra.mxu0 %v468_v52 }
  0x1a   : > { %848 = vrot.lane.b32.xlu1 %v770_v18, %s8580_s28  ;;  %638 = vrot.lane.b32.xlu0 %v560_v19, %s14021_s29  ;;  %v773_v33 = vsel %vm14041_vm1, %v771_v29, %v772_v30  ;;  %v565_v34 = vsel %vm14043_vm2, %v562_v21, %v564_v31  ;;  %v775_v36 = vsel %vm14041_vm1, %v772_v30, %v774_v35  ;;  %v776_v44 = vrot.slane %v8699_v11, 2  ;;  %v8823_v55 = vld [vmem:[%s8681_s26 + $0xa8] sm:$0xff]  ;;  %v8836_v58 = vld [vmem:[%s8681_s26 + $0xb0] sm:$0xff]  ;;  %s14385_s19 = smov 30   ;;  %s8115_s25 = sshll.u32 %s14428_s22, 7 }
  0x1b   : > { %v568_v41 = vsel %vm14043_vm2, %v566_v38, %v567_v39  ;;  %488 = vst.msk [vmem:[#allocation2 + $0x68] sm:$0xff] %vm474_vm0, %v8780_v40  ;;  %v777_v45 = vrot.slane %v8702_v12, 2  ;;  %v569_v46 = vrot.slane %v422_v42, 1  ;;  %v779_v53 = vrot.slane %v422_v42, 2  ;;  %489 = vst.msk [vmem:[#allocation2 + $0x70] sm:$0xff] %vm474_vm0, %v8823_v55  ;;  %v8864_v1 = vld [vmem:[%s8681_s26 + $0xc0] sm:$0xff]  ;;  %s13964_s23 = scalar_lea.vmem %s13997_s12, %s8115_s25 }
  0x1c   : > { %v571_v56 = vrot.slane %v8707_v15, 1  ;;  %v572_v57 = vrot.slane %v8710_v16, 1  ;;  %490 = vst.msk [vmem:[#allocation2 + $0x78] sm:$0xff] %vm474_vm0, %v8836_v58  ;;  %v425_v60 = vld [vmem:[%s8681_s26 + $0x58] sm:$0x3]  ;;  %491 = vst.msk [vmem:[#allocation2 + $0x80] sm:$0xff] %vm474_vm0, %v8864_v1 }
  0x1d   : > { %v778_v49 = vsel %vm14041_vm1, %v776_v44, %v777_v45  ;;  %v570_v50 = vsel %vm14043_vm2, %v567_v39, %v569_v46  ;;  %v780_v54 = vsel %vm14041_vm1, %v777_v45, %v779_v53  ;;  %v574_v61 = vrot.slane %v425_v60, 1  ;;  %v8877_v4 = vld [vmem:[%s8681_s26 + $0xc8] sm:$0xff]  ;;  %v428_v6 = vld [vmem:[%s8681_s26 + $0x70] sm:$0x3]  ;;  %v8904_v18 = vld [vmem:[%s8681_s26 + $0xd8] sm:$0xff] }
  0x1e   : > { %640 = vrot.lane.b32.xlu1 %v563_v28, %s14021_s29  ;;  %1112 = vrot.lane.b32.xlu0 %v563_v28, %s8582_s30  ;;  %v573_v59 = vsel %vm14043_vm2, %v571_v56, %v572_v57  ;;  %v784_v63 = vrot.slane %v425_v60, 2  ;;  %v576_v2 = vrot.slane %v8719_v17, 1  ;;  %v577_v3 = vrot.slane %v8729_v22, 1  ;;  %492 = vst.msk [vmem:[#allocation2 + $0x88] sm:$0xff] %vm474_vm0, %v8877_v4  ;;  %493 = vst.msk [vmem:[#allocation2 + $0x90] sm:$0xff] %vm474_vm0, %v8904_v18  ;;  %v8921_v24 = vld [vmem:[%s8681_s26 + $0xe0] sm:$0xff] }
  0x1f   : > { %v575_v62 = vsel %vm14043_vm2, %v572_v57, %v574_v61  ;;  %v786_v7 = vrot.slane %v8719_v17, 2  ;;  %v787_v8 = vrot.slane %v8729_v22, 2  ;;  %v579_v9 = vrot.slane %v428_v6, 1  ;;  %494 = vst.msk [vmem:[#allocation2 + $0x98] sm:$0xff] %vm474_vm0, %v8921_v24  ;;  %v431_v29 = vld [vmem:[%s8681_s26 + $0x88] sm:$0x3] }
  0x20   : > { %v785_v0 = vsel %vm14041_vm1, %v782_v27, %v784_v63  ;;  %v578_v5 = vsel %vm14043_vm2, %v576_v2, %v577_v3  ;;  %v581_v19 = vrot.slane %v8734_v23, 1  ;;  %v582_v20 = vrot.slane %v8742_v25, 1  ;;  %v434_v60 = vld [vmem:[%s8681_s26 + $0xa0] sm:$0x3] }
  0x21   : > { %v788_v10 = vsel %vm14041_vm1, %v786_v7, %v787_v8  ;;  %v791_v30 = vrot.slane %v8734_v23, 2  ;;  %v792_v31 = vrot.slane %v8742_v25, 2  ;;  %v794_v39 = vrot.slane %v431_v29, 2 }
  0x22   : > { %1246 = vrot.lane.b32.xlu1 %v773_v33, %s8583_s13  ;;  %1114 = vrot.lane.b32.xlu0 %v565_v34, %s8582_s30  ;;  %v583_v26 = vsel %vm14043_vm2, %v581_v19, %v582_v20  ;;  %v587_v51 = vrot.slane %v8780_v40, 1  ;;  %v796_v61 = vrot.slane %v8767_v37, 2  ;;  %v589_v63 = vrot.slane %v434_v60, 1  ;;  %v9019_v19 = vld [vmem:[%s8681_s26 + $0x108] sm:$0xff] }
  0x23   : > { %v793_v35 = vsel %vm14041_vm1, %v791_v30, %v792_v31  ;;  %497 = vst.msk [vmem:[#allocation2 + $0xb0] sm:$0xff] %vm474_vm0, %v9019_v19 }
  0x26   : > { %850 = vrot.lane.b32.xlu1 %v773_v33, %s8580_s28  ;;  %642 = vrot.lane.b32.xlu0 %v565_v34, %s14021_s29 }
  0x2a   : > { %1377 = vrot.lane.b32.xlu1 %v8699_v11, %s8584_s14  ;;  %1248 = vrot.lane.b32.xlu0 %v775_v36, %s8583_s13 }
  0x2e   : > { %981 = vrot.lane.b32.xlu1 %v8699_v11, %s8579_s27  ;;  %852 = vrot.lane.b32.xlu0 %v775_v36, %s8580_s28  ;;  %v580_v11 = vsel %vm14043_vm2, %v577_v3, %v579_v9 }
  0x32   : > { %1512 = vrot.lane.b32.xlu1 %v568_v41, %s8585_s15  ;;  %1379 = vrot.lane.b32.xlu0 %v8702_v12, %s8584_s14 }
  0x36   : > { %1116 = vrot.lane.b32.xlu1 %v568_v41, %s8582_s30  ;;  %983 = vrot.lane.b32.xlu0 %v8702_v12, %s8579_s27  ;;  %v789_v12 = vrot.slane %v428_v6, 2 }
  0x38   : > { %v790_v13 = vsel %vm14041_vm1, %v787_v8, %v789_v12  ;;  %v799_v8 = vrot.slane %v434_v60, 2  ;;  %v9091_v60 = vld [vmem:[%s8681_s26 + $0x128] sm:$0xff] }
  0x39   : > { %500 = vst.msk [vmem:[#allocation2 + $0xc8] sm:$0xff] %vm474_vm0, %v9091_v60 }
  0x3a   : > { %1646 = vrot.lane.b32.xlu1 %v778_v49, %s14019_s16  ;;  %1514 = vrot.lane.b32.xlu0 %v570_v50, %s8585_s15 }
  0x3e   : > { %1118 = vrot.lane.b32.xlu1 %v570_v50, %s8582_s30  ;;  %644 = vrot.lane.b32.xlu0 %v568_v41, %s14021_s29 }
  0x42   : > { %1648 = vrot.lane.b32.xlu1 %v780_v54, %s14019_s16  ;;  %1250 = vrot.lane.b32.xlu0 %v778_v49, %s8583_s13 }
  0x46   : > { %854 = vrot.lane.b32.xlu1 %v778_v49, %s8580_s28  ;;  %646 = vrot.lane.b32.xlu0 %v570_v50, %s14021_s29  ;;  %v8962_v49 = vld [vmem:[%s8681_s26 + $0xf0] sm:$0xff]  ;;  %v586_v50 = vrot.slane %v8767_v37, 1 }
  0x47   : > { %495 = vst.msk [vmem:[#allocation2 + $0xa0] sm:$0xff] %vm474_vm0, %v8962_v49 }
  0x48   : > { %v588_v56 = vsel %vm14043_vm2, %v586_v50, %v587_v51 }
  0x4a   : > { %1381 = vrot.lane.b32.xlu1 %v8707_v15, %s8584_s14  ;;  %1252 = vrot.lane.b32.xlu0 %v780_v54, %s8583_s13 }
  0x4e   : > { %985 = vrot.lane.b32.xlu1 %v8707_v15, %s8579_s27  ;;  %856 = vrot.lane.b32.xlu0 %v780_v54, %s8580_s28  ;;  %v8977_v54 = vld [vmem:[%s8681_s26 + $0xf8] sm:$0xff] }
  0x4f   : > { %496 = vst.msk [vmem:[#allocation2 + $0xa8] sm:$0xff] %vm474_vm0, %v8977_v54 }
  0x52   : > { %1516 = vrot.lane.b32.xlu1 %v573_v59, %s8585_s15  ;;  %1383 = vrot.lane.b32.xlu0 %v8710_v16, %s8584_s14 }
  0x56   : > { %1120 = vrot.lane.b32.xlu1 %v573_v59, %s8582_s30  ;;  %987 = vrot.lane.b32.xlu0 %v8710_v16, %s8579_s27 }
  0x5a   : > { %1650 = vrot.lane.b32.xlu1 %v8755_v32, %s14019_s16  ;;  %1518 = vrot.lane.b32.xlu0 %v575_v62, %s8585_s15 }
  0x5e   : > { %1122 = vrot.lane.b32.xlu1 %v575_v62, %s8582_s30  ;;  %648 = vrot.lane.b32.xlu0 %v573_v59, %s14021_s29 }
  0x62   : > { %1652 = vrot.lane.b32.xlu1 %v785_v0, %s14019_s16  ;;  %1254 = vrot.lane.b32.xlu0 %v8755_v32, %s8583_s13 }
  0x66   : > { %858 = vrot.lane.b32.xlu1 %v8755_v32, %s8580_s28  ;;  %650 = vrot.lane.b32.xlu0 %v575_v62, %s14021_s29  ;;  %v584_v32 = vrot.slane %v431_v29, 1  ;;  %v797_v62 = vrot.slane %v8780_v40, 2 }
  0x68   : > { %v585_v36 = vsel %vm14043_vm2, %v582_v20, %v584_v32  ;;  %v591_v20 = vrot.slane %v8823_v55, 1  ;;  %v801_v32 = vrot.slane %v8823_v55, 2 }
  0x6a   : > { %1385 = vrot.lane.b32.xlu1 %v8719_v17, %s8584_s14  ;;  %1256 = vrot.lane.b32.xlu0 %v785_v0, %s8583_s13 }
  0x6e   : > { %989 = vrot.lane.b32.xlu1 %v8719_v17, %s8579_s27  ;;  %860 = vrot.lane.b32.xlu0 %v785_v0, %s8580_s28 }
  0x72   : > { %1520 = vrot.lane.b32.xlu1 %v578_v5, %s8585_s15  ;;  %1387 = vrot.lane.b32.xlu0 %v8729_v22, %s8584_s14 }
  0x76   : > { %1124 = vrot.lane.b32.xlu1 %v578_v5, %s8582_s30  ;;  %991 = vrot.lane.b32.xlu0 %v8729_v22, %s8579_s27 }
  0x7a   : > { %1654 = vrot.lane.b32.xlu1 %v788_v10, %s14019_s16  ;;  %1522 = vrot.lane.b32.xlu0 %v580_v11, %s8585_s15 }
  0x7e   : > { %1126 = vrot.lane.b32.xlu1 %v580_v11, %s8582_s30  ;;  %652 = vrot.lane.b32.xlu0 %v578_v5, %s14021_s29  ;;  %v798_v5 = vsel %vm14041_vm1, %v796_v61, %v797_v62 }
  0x82   : > { %1656 = vrot.lane.b32.xlu1 %v790_v13, %s14019_s16  ;;  %1258 = vrot.lane.b32.xlu0 %v788_v10, %s8583_s13 }
  0x84   : > { %v980_v14 = vpop.permute.xlu1 %979  ;;  %v978_v15 = vpop.permute.xlu0 %977 }
  0x86   : > { %862 = vrot.lane.b32.xlu1 %v788_v10, %s8580_s28  ;;  %654 = vrot.lane.b32.xlu0 %v580_v11, %s14021_s29 }
  0x88   : > { %v847_v16 = vpop.permute.xlu1 %846  ;;  %v637_v17 = vpop.permute.xlu0 %636 }
  0x89   : > { %733 = vst.msk [vmem:[#allocation2] sm:$0xff] %vm732_vm4, %v637_v17 }
  0x8a   : > { %943 = vst.msk [vmem:[#allocation2] sm:$0xff] %vm942_vm5, %v847_v16  ;;  %1389 = vrot.lane.b32.xlu1 %v8734_v23, %s8584_s14  ;;  %1260 = vrot.lane.b32.xlu0 %v790_v13, %s8583_s13 }
  0x8b   : > { %1074 = vst.msk [vmem:[#allocation2] sm:$0xff] %vm1073_vm6, %v978_v15 }
  0x8c   : > { %v849_v21 = vpop.permute.xlu1 %848  ;;  %v639_v22 = vpop.permute.xlu0 %638 }
  0x8d   : > { %734 = vst.msk [vmem:[#allocation2 + $0x8] sm:$0xff] %vm732_vm4, %v639_v22 }
  0x8e   : > { %944 = vst.msk [vmem:[#allocation2 + $0x8] sm:$0xff] %vm942_vm5, %v849_v21  ;;  %993 = vrot.lane.b32.xlu1 %v8734_v23, %s8579_s27  ;;  %864 = vrot.lane.b32.xlu0 %v790_v13, %s8580_s28  ;;  %v592_v21 = vrot.slane %v8836_v58, 1 }
  0x8f   : > { %1075 = vst.msk [vmem:[#allocation2 + $0x8] sm:$0xff] %vm1073_vm6, %v980_v14 }
  0x90   : > { %v641_v27 = vpop.permute.xlu1 %640  ;;  %v1113_v28 = vpop.permute.xlu0 %1112 }
  0x91   : > { %735 = vst.msk [vmem:[#allocation2 + $0x10] sm:$0xff] %vm732_vm4, %v641_v27  ;;  %v9034_v27 = vld [vmem:[%s8681_s26 + $0x110] sm:$0xff] }
  0x92   : > { %1209 = vst.msk [vmem:[#allocation2] sm:$0xff] %vm1208_vm7, %v1113_v28  ;;  %1524 = vrot.lane.b32.xlu1 %v583_v26, %s8585_s15  ;;  %1391 = vrot.lane.b32.xlu0 %v8742_v25, %s8584_s14  ;;  %v593_v28 = vsel %vm14043_vm2, %v591_v20, %v592_v21 }
  0x93   : > { %498 = vst.msk [vmem:[#allocation2 + $0xb8] sm:$0xff] %vm474_vm0, %v9034_v27 }
  0x94   : > { %v1247_v33 = vpop.permute.xlu1 %1246  ;;  %v1115_v34 = vpop.permute.xlu0 %1114 }
  0x95   : > { %1343 = vst.msk [vmem:[#allocation2] sm:$0xff] %vm1342_vm8, %v1247_v33  ;;  %v802_v33 = vrot.slane %v8836_v58, 2 }
  0x96   : > { %1210 = vst.msk [vmem:[#allocation2 + $0x8] sm:$0xff] %vm1208_vm7, %v1115_v34  ;;  %1128 = vrot.lane.b32.xlu1 %v583_v26, %s8582_s30  ;;  %995 = vrot.lane.b32.xlu0 %v8742_v25, %s8579_s27  ;;  %v795_v25 = vsel %vm14041_vm1, %v792_v31, %v794_v39  ;;  %v437_v31 = vld [vmem:[%s8681_s26 + $0xb8] sm:$0x3] }
  0x97   : > { %v594_v34 = vrot.slane %v437_v31, 1 }
  0x98   : > { %v851_v38 = vpop.permute.xlu1 %850  ;;  %v643_v23 = vpop.permute.xlu0 %642 }
  0x99   : > { %945 = vst.msk [vmem:[#allocation2 + $0x10] sm:$0xff] %vm942_vm5, %v851_v38 }
  0x9a   : > { %736 = vst.msk [vmem:[#allocation2 + $0x18] sm:$0xff] %vm732_vm4, %v643_v23  ;;  %1658 = vrot.lane.b32.xlu1 %v793_v35, %s14019_s16  ;;  %1526 = vrot.lane.b32.xlu0 %v585_v36, %s8585_s15  ;;  %v803_v23 = vsel %vm14041_vm1, %v801_v32, %v802_v33 }
  0x9c   : > { %v1378_v41 = vpop.permute.xlu1 %1377  ;;  %v1249_v42 = vpop.permute.xlu0 %1248 }
  0x9d   : > { %1474 = vst.msk [vmem:[#allocation2] sm:$0xff] %vm1473_vm9, %v1378_v41 }
  0x9e   : > { %1344 = vst.msk [vmem:[#allocation2 + $0x8] sm:$0xff] %vm1342_vm8, %v1249_v42  ;;  %1130 = vrot.lane.b32.xlu1 %v585_v36, %s8582_s30  ;;  %656 = vrot.lane.b32.xlu0 %v583_v26, %s14021_s29  ;;  %v804_v42 = vrot.slane %v437_v31, 2  ;;  %v9148_v31 = vld [vmem:[%s8681_s26 + $0x140] sm:$0xff] }
  0x9f   : > { %502 = vst.msk [vmem:[#allocation2 + $0xd8] sm:$0xff] %vm474_vm0, %v9148_v31 }
  0xa0   : > { %v982_v43 = vpop.permute.xlu1 %981  ;;  %v853_v44 = vpop.permute.xlu0 %852 }
  0xa1   : > { %1076 = vst.msk [vmem:[#allocation2 + $0x10] sm:$0xff] %vm1073_vm6, %v982_v43 }
  0xa2   : > { %946 = vst.msk [vmem:[#allocation2 + $0x18] sm:$0xff] %vm942_vm5, %v853_v44  ;;  %1660 = vrot.lane.b32.xlu1 %v795_v25, %s14019_s16  ;;  %1262 = vrot.lane.b32.xlu0 %v793_v35, %s8583_s13 }
  0xa4   : > { %v1513_v45 = vpop.permute.xlu1 %1512  ;;  %v1380_v46 = vpop.permute.xlu0 %1379 }
  0xa5   : > { %1609 = vst.msk [vmem:[#allocation2] sm:$0xff] %vm1608_vm10, %v1513_v45 }
  0xa6   : > { %1475 = vst.msk [vmem:[#allocation2 + $0x8] sm:$0xff] %vm1473_vm9, %v1380_v46  ;;  %866 = vrot.lane.b32.xlu1 %v793_v35, %s8580_s28  ;;  %658 = vrot.lane.b32.xlu0 %v585_v36, %s14021_s29 }
  0xa8   : > { %v1117_v47 = vpop.permute.xlu1 %1116  ;;  %v984_v48 = vpop.permute.xlu0 %983 }
  0xa9   : > { %1211 = vst.msk [vmem:[#allocation2 + $0x10] sm:$0xff] %vm1208_vm7, %v1117_v47 }
  0xaa   : > { %1077 = vst.msk [vmem:[#allocation2 + $0x18] sm:$0xff] %vm1073_vm6, %v984_v48  ;;  %1393 = vrot.lane.b32.xlu1 %v8767_v37, %s8584_s14  ;;  %1264 = vrot.lane.b32.xlu0 %v795_v25, %s8583_s13 }
  0xac   : > { %v1647_v52 = vpop.permute.xlu1 %1646  ;;  %v1515_v53 = vpop.permute.xlu0 %1514 }
  0xad   : > { %1743 = vst.msk [vmem:[#allocation2] sm:$0xff] %vm1742_vm11, %v1647_v52  ;;  %v9076_v52 = vld [vmem:[%s8681_s26 + $0x120] sm:$0xff] }
  0xae   : > { %1610 = vst.msk [vmem:[#allocation2 + $0x8] sm:$0xff] %vm1608_vm10, %v1515_v53  ;;  %997 = vrot.lane.b32.xlu1 %v8767_v37, %s8579_s27  ;;  %868 = vrot.lane.b32.xlu0 %v795_v25, %s8580_s28  ;;  %v590_v37 = vsel %vm14043_vm2, %v587_v51, %v589_v63  ;;  %v596_v53 = vrot.slane %v8864_v1, 1 }
  0xaf   : > { %499 = vst.msk [vmem:[#allocation2 + $0xc0] sm:$0xff] %vm474_vm0, %v9076_v52 }
  0xb0   : > { %v1119_v57 = vpop.permute.xlu1 %1118  ;;  %v645_v59 = vpop.permute.xlu0 %644 }
  0xb1   : > { %1212 = vst.msk [vmem:[#allocation2 + $0x18] sm:$0xff] %vm1208_vm7, %v1119_v57 }
  0xb2   : > { %737 = vst.msk [vmem:[#allocation2 + $0x20] sm:$0xff] %vm732_vm4, %v645_v59  ;;  %1528 = vrot.lane.b32.xlu1 %v588_v56, %s8585_s15  ;;  %1395 = vrot.lane.b32.xlu0 %v8780_v40, %s8584_s14 }
  0xb4   : > { %v1649_v0 = vpop.permute.xlu1 %1648  ;;  %v1251_v2 = vpop.permute.xlu0 %1250  ;;  %v1775_v3 = vld [vmem:[#allocation2] sm:$0xff] }
  0xb5   : > { %1744 = vst.msk [vmem:[#allocation2 + $0x8] sm:$0xff] %vm1742_vm11, %v1649_v0  ;;  %8305 = vmatprep.mubr.msk.f32.mxu0 %vm1813_vm12, %v1775_v3  ;;  %v440_v0 = vld [vmem:[%s8681_s26 + $0xd0] sm:$0x3]  ;;  %v807_v3 = vrot.slane %v8877_v4, 2 }
  0xb6   : > { %1345 = vst.msk [vmem:[#allocation2 + $0x10] sm:$0xff] %vm1342_vm8, %v1251_v2  ;;  %1132 = vrot.lane.b32.xlu1 %v588_v56, %s8582_s30  ;;  %999 = vrot.lane.b32.xlu0 %v8780_v40, %s8579_s27  ;;  %v800_v40 = vsel %vm14041_vm1, %v797_v62, %v799_v8  ;;  %v806_v2 = vrot.slane %v8864_v1, 2 }
  0xb8   : > { %v855_v6 = vpop.permute.xlu1 %854  ;;  %v647_v7 = vpop.permute.xlu0 %646  ;;  %v808_v8 = vsel %vm14041_vm1, %v806_v2, %v807_v3 }
  0xb9   : > { %947 = vst.msk [vmem:[#allocation2 + $0x20] sm:$0xff] %vm942_vm5, %v855_v6 }
  0xba   : > { %738 = vst.msk [vmem:[#allocation2 + $0x28] sm:$0xff] %vm732_vm4, %v647_v7  ;;  %1662 = vrot.lane.b32.xlu1 %v798_v5, %s14019_s16  ;;  %1530 = vrot.lane.b32.xlu0 %v590_v37, %s8585_s15 }
  0xbc   : > { %v1382_v9 = vpop.permute.xlu1 %1381  ;;  %v1253_v10 = vpop.permute.xlu0 %1252  ;;  %v1776_v11 = vld [vmem:[#allocation2 + $0x8] sm:$0xff] }
  0xbd   : > { %1476 = vst.msk [vmem:[#allocation2 + $0x10] sm:$0xff] %vm1473_vm9, %v1382_v9  ;;  %8306 = vmatmul.mubr.msk.f32.vlgmr.msra.gmra.mxu0 %vm1813_vm12, %v1776_v11  ;;  %v809_v11 = vrot.slane %v440_v0, 2 }
  0xbe   : > { %1346 = vst.msk [vmem:[#allocation2 + $0x18] sm:$0xff] %vm1342_vm8, %v1253_v10  ;;  %1134 = vrot.lane.b32.xlu1 %v590_v37, %s8582_s30  ;;  %660 = vrot.lane.b32.xlu0 %v588_v56, %s14021_s29  ;;  %v597_v56 = vrot.slane %v8877_v4, 1 }
  0xc0   : > { %v986_v12 = vpop.permute.xlu1 %985  ;;  %v857_v13 = vpop.permute.xlu0 %856  ;;  %v598_v61 = vsel %vm14043_vm2, %v596_v53, %v597_v56 }
  0xc1   : > { %1078 = vst.msk [vmem:[#allocation2 + $0x20] sm:$0xff] %vm1073_vm6, %v986_v12 }
  0xc2   : > { %948 = vst.msk [vmem:[#allocation2 + $0x28] sm:$0xff] %vm942_vm5, %v857_v13  ;;  %1664 = vrot.lane.b32.xlu1 %v800_v40, %s14019_s16  ;;  %1266 = vrot.lane.b32.xlu0 %v798_v5, %s8583_s13 }
  0xc4   : > { %v1517_v14 = vpop.permute.xlu1 %1516  ;;  %v1384_v15 = vpop.permute.xlu0 %1383 }
  0xc5   : > { %1611 = vst.msk [vmem:[#allocation2 + $0x10] sm:$0xff] %vm1608_vm10, %v1517_v14 }
  0xc6   : > { %1477 = vst.msk [vmem:[#allocation2 + $0x18] sm:$0xff] %vm1473_vm9, %v1384_v15  ;;  %870 = vrot.lane.b32.xlu1 %v798_v5, %s8580_s28  ;;  %662 = vrot.lane.b32.xlu0 %v590_v37, %s14021_s29  ;;  %v599_v5 = vrot.slane %v440_v0, 1  ;;  %v9205_v0 = vld [vmem:[%s8681_s26 + $0x158] sm:$0xff] }
  0xc7   : > { %504 = vst.msk [vmem:[#allocation2 + $0xe8] sm:$0xff] %vm474_vm0, %v9205_v0 }
  0xc8   : > { %v1121_v16 = vpop.permute.xlu1 %1120  ;;  %v988_v17 = vpop.permute.xlu0 %987 }
  0xc9   : > { %1213 = vst.msk [vmem:[#allocation2 + $0x20] sm:$0xff] %vm1208_vm7, %v1121_v16 }
  0xca   : > { %1079 = vst.msk [vmem:[#allocation2 + $0x28] sm:$0xff] %vm1073_vm6, %v988_v17  ;;  %1397 = vrot.lane.b32.xlu1 %v8823_v55, %s8584_s14  ;;  %1268 = vrot.lane.b32.xlu0 %v800_v40, %s8583_s13 }
  0xcc   : > { %v1651_v22 = vpop.permute.xlu1 %1650  ;;  %v1519_v26 = vpop.permute.xlu0 %1518 }
  0xcd   : > { %1745 = vst.msk [vmem:[#allocation2 + $0x10] sm:$0xff] %vm1742_vm11, %v1651_v22  ;;  %v9133_v22 = vld [vmem:[%s8681_s26 + $0x138] sm:$0xff] }
  0xce   : > { %1612 = vst.msk [vmem:[#allocation2 + $0x18] sm:$0xff] %vm1608_vm10, %v1519_v26  ;;  %1001 = vrot.lane.b32.xlu1 %v8823_v55, %s8579_s27  ;;  %872 = vrot.lane.b32.xlu0 %v800_v40, %s8580_s28  ;;  %v595_v55 = vsel %vm14043_vm2, %v592_v21, %v594_v34  ;;  %v601_v26 = vrot.slane %v8904_v18, 1 }
  0xcf   : > { %501 = vst.msk [vmem:[#allocation2 + $0xd0] sm:$0xff] %vm474_vm0, %v9133_v22 }
  0xd0   : > { %v1123_v29 = vpop.permute.xlu1 %1122  ;;  %v649_v30 = vpop.permute.xlu0 %648 }
  0xd1   : > { %1214 = vst.msk [vmem:[#allocation2 + $0x28] sm:$0xff] %vm1208_vm7, %v1123_v29 }
  0xd2   : > { %739 = vst.msk [vmem:[#allocation2 + $0x30] sm:$0xff] %vm732_vm4, %v649_v30  ;;  %1532 = vrot.lane.b32.xlu1 %v593_v28, %s8585_s15  ;;  %1399 = vrot.lane.b32.xlu0 %v8836_v58, %s8584_s14 }
  0xd4   : > { %v1653_v35 = vpop.permute.xlu1 %1652  ;;  %v1255_v36 = vpop.permute.xlu0 %1254  ;;  %v1777_v38 = vld [vmem:[#allocation2 + $0x10] sm:$0xff] }
  0xd5   : > { %1746 = vst.msk [vmem:[#allocation2 + $0x18] sm:$0xff] %vm1742_vm11, %v1653_v35  ;;  %8308 = vmatprep.mubr.msk.f32.mxu0 %vm1813_vm12, %v1777_v38  ;;  %v443_v35 = vld [vmem:[%s8681_s26 + $0xe8] sm:$0x3]  ;;  %v812_v38 = vrot.slane %v8921_v24, 2 }
  0xd6   : > { %1347 = vst.msk [vmem:[#allocation2 + $0x20] sm:$0xff] %vm1342_vm8, %v1255_v36  ;;  %1136 = vrot.lane.b32.xlu1 %v593_v28, %s8582_s30  ;;  %1003 = vrot.lane.b32.xlu0 %v8836_v58, %s8579_s27  ;;  %v805_v58 = vsel %vm14041_vm1, %v802_v33, %v804_v42  ;;  %v811_v36 = vrot.slane %v8904_v18, 2 }
  0xd8   : > { %v859_v39 = vpop.permute.xlu1 %858  ;;  %v651_v41 = vpop.permute.xlu0 %650  ;;  %v813_v42 = vsel %vm14041_vm1, %v811_v36, %v812_v38 }
  0xd9   : > { %949 = vst.msk [vmem:[#allocation2 + $0x30] sm:$0xff] %vm942_vm5, %v859_v39 }
  0xda   : > { %740 = vst.msk [vmem:[#allocation2 + $0x38] sm:$0xff] %vm732_vm4, %v651_v41  ;;  %1666 = vrot.lane.b32.xlu1 %v803_v23, %s14019_s16  ;;  %1534 = vrot.lane.b32.xlu0 %v595_v55, %s8585_s15 }
  0xdc   : > { %v1386_v25 = vpop.permute.xlu1 %1385  ;;  %v1257_v43 = vpop.permute.xlu0 %1256  ;;  %v1778_v44 = vld [vmem:[#allocation2 + $0x18] sm:$0xff] }
  0xdd   : > { %1478 = vst.msk [vmem:[#allocation2 + $0x20] sm:$0xff] %vm1473_vm9, %v1386_v25  ;;  %8309 = vmatmul.mubr.msk.f32.gmra.mxu0 %vm1813_vm12, %v1778_v44  ;;  %v814_v44 = vrot.slane %v443_v35, 2 }
  0xde   : > { %1348 = vst.msk [vmem:[#allocation2 + $0x28] sm:$0xff] %vm1342_vm8, %v1257_v43  ;;  %1138 = vrot.lane.b32.xlu1 %v595_v55, %s8582_s30  ;;  %664 = vrot.lane.b32.xlu0 %v593_v28, %s14021_s29  ;;  %v602_v28 = vrot.slane %v8921_v24, 1 }
  0xe0   : > { %v990_v45 = vpop.permute.xlu1 %989  ;;  %v861_v46 = vpop.permute.xlu0 %860  ;;  %v603_v32 = vsel %vm14043_vm2, %v601_v26, %v602_v28 }
  0xe1   : > { %1080 = vst.msk [vmem:[#allocation2 + $0x30] sm:$0xff] %vm1073_vm6, %v990_v45 }
  0xe2   : > { %950 = vst.msk [vmem:[#allocation2 + $0x38] sm:$0xff] %vm942_vm5, %v861_v46  ;;  %1668 = vrot.lane.b32.xlu1 %v805_v58, %s14019_s16  ;;  %1270 = vrot.lane.b32.xlu0 %v803_v23, %s8583_s13 }
  0xe4   : > { %v1521_v47 = vpop.permute.xlu1 %1520  ;;  %v1388_v48 = vpop.permute.xlu0 %1387 }
  0xe5   : > { %1613 = vst.msk [vmem:[#allocation2 + $0x20] sm:$0xff] %vm1608_vm10, %v1521_v47 }
  0xe6   : > { %1479 = vst.msk [vmem:[#allocation2 + $0x28] sm:$0xff] %vm1473_vm9, %v1388_v48  ;;  %874 = vrot.lane.b32.xlu1 %v803_v23, %s8580_s28  ;;  %666 = vrot.lane.b32.xlu0 %v595_v55, %s14021_s29  ;;  %v604_v23 = vrot.slane %v443_v35, 1  ;;  %v9262_v35 = vld [vmem:[%s8681_s26 + $0x170] sm:$0xff] }
  0xe7   : > { %506 = vst.msk [vmem:[#allocation2 + $0xf8] sm:$0xff] %vm474_vm0, %v9262_v35 }
  0xe8   : > { %v1125_v50 = vpop.permute.xlu1 %1124  ;;  %v992_v51 = vpop.permute.xlu0 %991 }
  0xe9   : > { %1215 = vst.msk [vmem:[#allocation2 + $0x30] sm:$0xff] %vm1208_vm7, %v1125_v50 }
  0xea   : > { %1081 = vst.msk [vmem:[#allocation2 + $0x38] sm:$0xff] %vm1073_vm6, %v992_v51  ;;  %1401 = vrot.lane.b32.xlu1 %v8864_v1, %s8584_s14  ;;  %1272 = vrot.lane.b32.xlu0 %v805_v58, %s8583_s13 }
  0xec   : > { %v1655_v57 = vpop.permute.xlu1 %1654  ;;  %v1523_v59 = vpop.permute.xlu0 %1522 }
  0xed   : > { %1747 = vst.msk [vmem:[#allocation2 + $0x20] sm:$0xff] %vm1742_vm11, %v1655_v57  ;;  %v9190_v57 = vld [vmem:[%s8681_s26 + $0x150] sm:$0xff] }
  0xee   : > { %1614 = vst.msk [vmem:[#allocation2 + $0x28] sm:$0xff] %vm1608_vm10, %v1523_v59  ;;  %1005 = vrot.lane.b32.xlu1 %v8864_v1, %s8579_s27  ;;  %876 = vrot.lane.b32.xlu0 %v805_v58, %s8580_s28  ;;  %v600_v1 = vsel %vm14043_vm2, %v597_v56, %v599_v5  ;;  %v606_v59 = vrot.slane %v8962_v49, 1 }
  0xef   : > { %503 = vst.msk [vmem:[#allocation2 + $0xe0] sm:$0xff] %vm474_vm0, %v9190_v57 }
  0xf0   : > { %v1127_v62 = vpop.permute.xlu1 %1126  ;;  %v653_v63 = vpop.permute.xlu0 %652 }
  0xf1   : > { %1216 = vst.msk [vmem:[#allocation2 + $0x38] sm:$0xff] %vm1208_vm7, %v1127_v62 }
  0xf2   : > { %741 = vst.msk [vmem:[#allocation2 + $0x40] sm:$0xff] %vm732_vm4, %v653_v63  ;;  %1536 = vrot.lane.b32.xlu1 %v598_v61, %s8585_s15  ;;  %1403 = vrot.lane.b32.xlu0 %v8877_v4, %s8584_s14 }
  0xf4   : > { %v1657_v37 = vpop.permute.xlu1 %1656  ;;  %v1259_v6 = vpop.permute.xlu0 %1258  ;;  %v1779_v7 = vld [vmem:[#allocation2 + $0x20] sm:$0xff] }
  0xf5   : > { %1748 = vst.msk [vmem:[#allocation2 + $0x28] sm:$0xff] %vm1742_vm11, %v1657_v37  ;;  %8311 = vmatprep.mubr.msk.f32.mxu0 %vm1813_vm12, %v1779_v7  ;;  %v446_v37 = vld [vmem:[%s8681_s26 + $0x100] sm:$0x3]  ;;  %v817_v7 = vrot.slane %v8977_v54, 2 }
  0xf6   : > { %1349 = vst.msk [vmem:[#allocation2 + $0x30] sm:$0xff] %vm1342_vm8, %v1259_v6  ;;  %1140 = vrot.lane.b32.xlu1 %v598_v61, %s8582_s30  ;;  %1007 = vrot.lane.b32.xlu0 %v8877_v4, %s8579_s27  ;;  %v810_v4 = vsel %vm14041_vm1, %v807_v3, %v809_v11  ;;  %v816_v6 = vrot.slane %v8962_v49, 2 }
  0xf8   : > { %v863_v9 = vpop.permute.xlu1 %862  ;;  %v655_v10 = vpop.permute.xlu0 %654  ;;  %v818_v11 = vsel %vm14041_vm1, %v816_v6, %v817_v7 }
  0xf9   : > { %951 = vst.msk [vmem:[#allocation2 + $0x40] sm:$0xff] %vm942_vm5, %v863_v9 }
  0xfa   : > { %742 = vst.msk [vmem:[#allocation2 + $0x48] sm:$0xff] %vm732_vm4, %v655_v10  ;;  %1670 = vrot.lane.b32.xlu1 %v808_v8, %s14019_s16  ;;  %1538 = vrot.lane.b32.xlu0 %v600_v1, %s8585_s15 }
  0xfc   : > { %v1390_v40 = vpop.permute.xlu1 %1389  ;;  %v1261_v12 = vpop.permute.xlu0 %1260  ;;  %v1780_v13 = vld [vmem:[#allocation2 + $0x28] sm:$0xff] }
  0xfd   : > { %1480 = vst.msk [vmem:[#allocation2 + $0x30] sm:$0xff] %vm1473_vm9, %v1390_v40  ;;  %8312 = vmatmul.mubr.msk.f32.gmra.mxu0 %vm1813_vm12, %v1780_v13  ;;  %v819_v13 = vrot.slane %v446_v37, 2 }
  0xfe   : > { %1350 = vst.msk [vmem:[#allocation2 + $0x38] sm:$0xff] %vm1342_vm8, %v1261_v12  ;;  %1142 = vrot.lane.b32.xlu1 %v600_v1, %s8582_s30  ;;  %668 = vrot.lane.b32.xlu0 %v598_v61, %s14021_s29  ;;  %v607_v61 = vrot.slane %v8977_v54, 1 }
 0x100   : > { %v994_v14 = vpop.permute.xlu1 %993  ;;  %v865_v15 = vpop.permute.xlu0 %864  ;;  %v608_v2 = vsel %vm14043_vm2, %v606_v59, %v607_v61 }
 0x101   : > { %1082 = vst.msk [vmem:[#allocation2 + $0x40] sm:$0xff] %vm1073_vm6, %v994_v14 }
 0x102   : > { %952 = vst.msk [vmem:[#allocation2 + $0x48] sm:$0xff] %vm942_vm5, %v865_v15  ;;  %1672 = vrot.lane.b32.xlu1 %v810_v4, %s14019_s16  ;;  %1274 = vrot.lane.b32.xlu0 %v808_v8, %s8583_s13 }
 0x104   : > { %v1525_v16 = vpop.permute.xlu1 %1524  ;;  %v1392_v17 = vpop.permute.xlu0 %1391 }
 0x105   : > { %1615 = vst.msk [vmem:[#allocation2 + $0x30] sm:$0xff] %vm1608_vm10, %v1525_v16 }
 0x106   : > { %1481 = vst.msk [vmem:[#allocation2 + $0x38] sm:$0xff] %vm1473_vm9, %v1392_v17  ;;  %878 = vrot.lane.b32.xlu1 %v808_v8, %s8580_s28  ;;  %670 = vrot.lane.b32.xlu0 %v600_v1, %s14021_s29  ;;  %v609_v8 = vrot.slane %v446_v37, 1 }
 0x108   : > { %v1129_v20 = vpop.permute.xlu1 %1128  ;;  %v996_v21 = vpop.permute.xlu0 %995 }
 0x109   : > { %1217 = vst.msk [vmem:[#allocation2 + $0x40] sm:$0xff] %vm1208_vm7, %v1129_v20 }
 0x10a   : > { %1083 = vst.msk [vmem:[#allocation2 + $0x48] sm:$0xff] %vm1073_vm6, %v996_v21  ;;  %1405 = vrot.lane.b32.xlu1 %v8904_v18, %s8584_s14  ;;  %1276 = vrot.lane.b32.xlu0 %v810_v4, %s8583_s13 }
 0x10c   : > { %v1659_v29 = vpop.permute.xlu1 %1658  ;;  %v1527_v30 = vpop.permute.xlu0 %1526 }
 0x10d   : > { %1749 = vst.msk [vmem:[#allocation2 + $0x30] sm:$0xff] %vm1742_vm11, %v1659_v29  ;;  %v9247_v29 = vld [vmem:[%s8681_s26 + $0x168] sm:$0xff] }
 0x10e   : > { %1616 = vst.msk [vmem:[#allocation2 + $0x38] sm:$0xff] %vm1608_vm10, %v1527_v30  ;;  %1009 = vrot.lane.b32.xlu1 %v8904_v18, %s8579_s27  ;;  %880 = vrot.lane.b32.xlu0 %v810_v4, %s8580_s28  ;;  %v605_v18 = vsel %vm14043_vm2, %v602_v28, %v604_v23  ;;  %v611_v30 = vrot.slane %v9019_v19, 1 }
 0x10f   : > { %505 = vst.msk [vmem:[#allocation2 + $0xf0] sm:$0xff] %vm474_vm0, %v9247_v29 }
 0x110   : > { %v1131_v33 = vpop.permute.xlu1 %1130  ;;  %v657_v34 = vpop.permute.xlu0 %656 }
 0x111   : > { %1218 = vst.msk [vmem:[#allocation2 + $0x48] sm:$0xff] %vm1208_vm7, %v1131_v33 }
 0x112   : > { %743 = vst.msk [vmem:[#allocation2 + $0x50] sm:$0xff] %vm732_vm4, %v657_v34  ;;  %1540 = vrot.lane.b32.xlu1 %v603_v32, %s8585_s15  ;;  %1407 = vrot.lane.b32.xlu0 %v8921_v24, %s8584_s14 }
 0x114   : > { %v1661_v55 = vpop.permute.xlu1 %1660  ;;  %v1263_v39 = vpop.permute.xlu0 %1262  ;;  %v1781_v41 = vld [vmem:[#allocation2 + $0x30] sm:$0xff] }
 0x115   : > { %1750 = vst.msk [vmem:[#allocation2 + $0x38] sm:$0xff] %vm1742_vm11, %v1661_v55  ;;  %8314 = vmatprep.mubr.msk.f32.mxu0 %vm1813_vm12, %v1781_v41  ;;  %v449_v55 = vld [vmem:[%s8681_s26 + $0x118] sm:$0x3]  ;;  %v822_v41 = vrot.slane %v9034_v27, 2 }
 0x116   : > { %1351 = vst.msk [vmem:[#allocation2 + $0x40] sm:$0xff] %vm1342_vm8, %v1263_v39  ;;  %1144 = vrot.lane.b32.xlu1 %v603_v32, %s8582_s30  ;;  %1011 = vrot.lane.b32.xlu0 %v8921_v24, %s8579_s27  ;;  %v815_v24 = vsel %vm14041_vm1, %v812_v38, %v814_v44  ;;  %v821_v39 = vrot.slane %v9019_v19, 2 }
 0x118   : > { %v867_v25 = vpop.permute.xlu1 %866  ;;  %v659_v43 = vpop.permute.xlu0 %658  ;;  %v823_v44 = vsel %vm14041_vm1, %v821_v39, %v822_v41  ;;  %v831_v39 = vrot.slane %v9133_v22, 2 }
 0x119   : > { %953 = vst.msk [vmem:[#allocation2 + $0x50] sm:$0xff] %vm942_vm5, %v867_v25 }
 0x11a   : > { %744 = vst.msk [vmem:[#allocation2 + $0x58] sm:$0xff] %vm732_vm4, %v659_v43  ;;  %1674 = vrot.lane.b32.xlu1 %v813_v42, %s14019_s16  ;;  %1542 = vrot.lane.b32.xlu0 %v605_v18, %s8585_s15 }
 0x11c   : > { %v1394_v58 = vpop.permute.xlu1 %1393  ;;  %v1265_v45 = vpop.permute.xlu0 %1264  ;;  %v1782_v46 = vld [vmem:[#allocation2 + $0x38] sm:$0xff] }
 0x11d   : > { %1482 = vst.msk [vmem:[#allocation2 + $0x40] sm:$0xff] %vm1473_vm9, %v1394_v58  ;;  %8315 = vmatmul.mubr.msk.f32.gmra.mxu0 %vm1813_vm12, %v1782_v46  ;;  %v824_v46 = vrot.slane %v449_v55, 2 }
 0x11e   : > { %1352 = vst.msk [vmem:[#allocation2 + $0x48] sm:$0xff] %vm1342_vm8, %v1265_v45  ;;  %1146 = vrot.lane.b32.xlu1 %v605_v18, %s8582_s30  ;;  %672 = vrot.lane.b32.xlu0 %v603_v32, %s14021_s29  ;;  %v612_v32 = vrot.slane %v9034_v27, 1 }
 0x120   : > { %v998_v47 = vpop.permute.xlu1 %997  ;;  %v869_v48 = vpop.permute.xlu0 %868  ;;  %v613_v36 = vsel %vm14043_vm2, %v611_v30, %v612_v32  ;;  %v621_v30 = vrot.slane %v9133_v22, 1 }
 0x121   : > { %1084 = vst.msk [vmem:[#allocation2 + $0x50] sm:$0xff] %vm1073_vm6, %v998_v47 }
 0x122   : > { %954 = vst.msk [vmem:[#allocation2 + $0x58] sm:$0xff] %vm942_vm5, %v869_v48  ;;  %1676 = vrot.lane.b32.xlu1 %v815_v24, %s14019_s16  ;;  %1278 = vrot.lane.b32.xlu0 %v813_v42, %s8583_s13 }
 0x124   : > { %v1529_v50 = vpop.permute.xlu1 %1528  ;;  %v1396_v51 = vpop.permute.xlu0 %1395 }
 0x125   : > { %1617 = vst.msk [vmem:[#allocation2 + $0x40] sm:$0xff] %vm1608_vm10, %v1529_v50 }
 0x126   : > { %1483 = vst.msk [vmem:[#allocation2 + $0x48] sm:$0xff] %vm1473_vm9, %v1396_v51  ;;  %882 = vrot.lane.b32.xlu1 %v813_v42, %s8580_s28  ;;  %674 = vrot.lane.b32.xlu0 %v605_v18, %s14021_s29  ;;  %v614_v42 = vrot.slane %v449_v55, 1  ;;  %v455_v55 = vld [vmem:[%s8681_s26 + $0x148] sm:$0x3] }
 0x128   : > { %v1133_v53 = vpop.permute.xlu1 %1132  ;;  %v1000_v56 = vpop.permute.xlu0 %999 }
 0x129   : > { %1219 = vst.msk [vmem:[#allocation2 + $0x50] sm:$0xff] %vm1208_vm7, %v1133_v53 }
 0x12a   : > { %1085 = vst.msk [vmem:[#allocation2 + $0x58] sm:$0xff] %vm1073_vm6, %v1000_v56  ;;  %1409 = vrot.lane.b32.xlu1 %v8962_v49, %s8584_s14  ;;  %1280 = vrot.lane.b32.xlu0 %v815_v24, %s8583_s13 }
 0x12c   : > { %v1663_v62 = vpop.permute.xlu1 %1662  ;;  %v1531_v63 = vpop.permute.xlu0 %1530 }
 0x12d   : > { %1751 = vst.msk [vmem:[#allocation2 + $0x40] sm:$0xff] %vm1742_vm11, %v1663_v62  ;;  %v616_v62 = vrot.slane %v9076_v52, 1 }
 0x12e   : > { %1618 = vst.msk [vmem:[#allocation2 + $0x48] sm:$0xff] %vm1608_vm10, %v1531_v63  ;;  %1013 = vrot.lane.b32.xlu1 %v8962_v49, %s8579_s27  ;;  %884 = vrot.lane.b32.xlu0 %v815_v24, %s8580_s28  ;;  %v610_v49 = vsel %vm14043_vm2, %v607_v61, %v609_v8  ;;  %v617_v63 = vrot.slane %v9091_v60, 1  ;;  %v826_v8 = vrot.slane %v9076_v52, 2 }
 0x130   : > { %v1135_v3 = vpop.permute.xlu1 %1134  ;;  %v661_v5 = vpop.permute.xlu0 %660 }
 0x131   : > { %1220 = vst.msk [vmem:[#allocation2 + $0x58] sm:$0xff] %vm1208_vm7, %v1135_v3 }
 0x132   : > { %745 = vst.msk [vmem:[#allocation2 + $0x60] sm:$0xff] %vm732_vm4, %v661_v5  ;;  %1544 = vrot.lane.b32.xlu1 %v608_v2, %s8585_s15  ;;  %1411 = vrot.lane.b32.xlu0 %v8977_v54, %s8584_s14  ;;  %v618_v5 = vsel %vm14043_vm2, %v616_v62, %v617_v63 }
 0x134   : > { %v1665_v1 = vpop.permute.xlu1 %1664  ;;  %v1267_v9 = vpop.permute.xlu0 %1266  ;;  %v1783_v10 = vld [vmem:[#allocation2 + $0x40] sm:$0xff] }
 0x135   : > { %1752 = vst.msk [vmem:[#allocation2 + $0x48] sm:$0xff] %vm1742_vm11, %v1665_v1  ;;  %8317 = vmatprep.mubr.msk.f32.mxu0 %vm1813_vm12, %v1783_v10  ;;  %v827_v1 = vrot.slane %v9091_v60, 2 }
 0x136   : > { %1353 = vst.msk [vmem:[#allocation2 + $0x50] sm:$0xff] %vm1342_vm8, %v1267_v9  ;;  %1148 = vrot.lane.b32.xlu1 %v608_v2, %s8582_s30  ;;  %1015 = vrot.lane.b32.xlu0 %v8977_v54, %s8579_s27  ;;  %v820_v54 = vsel %vm14041_vm1, %v817_v7, %v819_v13  ;;  %v452_v7 = vld [vmem:[%s8681_s26 + $0x130] sm:$0x3] }
 0x137   : > { %v619_v9 = vrot.slane %v452_v7, 1 }
 0x138   : > { %v871_v40 = vpop.permute.xlu1 %870  ;;  %v663_v12 = vpop.permute.xlu0 %662 }
 0x139   : > { %955 = vst.msk [vmem:[#allocation2 + $0x60] sm:$0xff] %vm942_vm5, %v871_v40  ;;  %v828_v40 = vsel %vm14041_vm1, %v826_v8, %v827_v1 }
 0x13a   : > { %746 = vst.msk [vmem:[#allocation2 + $0x68] sm:$0xff] %vm732_vm4, %v663_v12  ;;  %1678 = vrot.lane.b32.xlu1 %v818_v11, %s14019_s16  ;;  %1546 = vrot.lane.b32.xlu0 %v610_v49, %s8585_s15 }
 0x13c   : > { %v1398_v4 = vpop.permute.xlu1 %1397  ;;  %v1269_v14 = vpop.permute.xlu0 %1268  ;;  %v1784_v15 = vld [vmem:[#allocation2 + $0x48] sm:$0xff] }
 0x13d   : > { %1484 = vst.msk [vmem:[#allocation2 + $0x50] sm:$0xff] %vm1473_vm9, %v1398_v4  ;;  %8318 = vmatmul.mubr.msk.f32.gmra.mxu0 %vm1813_vm12, %v1784_v15  ;;  %v829_v4 = vrot.slane %v452_v7, 2  ;;  %v837_v7 = vrot.slane %v9205_v0, 2 }
 0x13e   : > { %1354 = vst.msk [vmem:[#allocation2 + $0x58] sm:$0xff] %vm1342_vm8, %v1269_v14  ;;  %1150 = vrot.lane.b32.xlu1 %v610_v49, %s8582_s30  ;;  %676 = vrot.lane.b32.xlu0 %v608_v2, %s14021_s29 }
 0x140   : > { %v1002_v16 = vpop.permute.xlu1 %1001  ;;  %v873_v17 = vpop.permute.xlu0 %872 }
 0x141   : > { %1086 = vst.msk [vmem:[#allocation2 + $0x60] sm:$0xff] %vm1073_vm6, %v1002_v16 }
 0x142   : > { %956 = vst.msk [vmem:[#allocation2 + $0x68] sm:$0xff] %vm942_vm5, %v873_v17  ;;  %1680 = vrot.lane.b32.xlu1 %v820_v54, %s14019_s16  ;;  %1282 = vrot.lane.b32.xlu0 %v818_v11, %s8583_s13 }
 0x144   : > { %v1533_v20 = vpop.permute.xlu1 %1532  ;;  %v1400_v21 = vpop.permute.xlu0 %1399 }
 0x145   : > { %1619 = vst.msk [vmem:[#allocation2 + $0x50] sm:$0xff] %vm1608_vm10, %v1533_v20 }
 0x146   : > { %1485 = vst.msk [vmem:[#allocation2 + $0x58] sm:$0xff] %vm1473_vm9, %v1400_v21  ;;  %886 = vrot.lane.b32.xlu1 %v818_v11, %s8580_s28  ;;  %678 = vrot.lane.b32.xlu0 %v610_v49, %s14021_s29 }
 0x148   : > { %v1137_v26 = vpop.permute.xlu1 %1136  ;;  %v1004_v28 = vpop.permute.xlu0 %1003 }
 0x149   : > { %1221 = vst.msk [vmem:[#allocation2 + $0x60] sm:$0xff] %vm1208_vm7, %v1137_v26 }
 0x14a   : > { %1087 = vst.msk [vmem:[#allocation2 + $0x68] sm:$0xff] %vm1073_vm6, %v1004_v28  ;;  %1413 = vrot.lane.b32.xlu1 %v9019_v19, %s8584_s14  ;;  %1284 = vrot.lane.b32.xlu0 %v820_v54, %s8583_s13 }
 0x14c   : > { %v1667_v33 = vpop.permute.xlu1 %1666  ;;  %v1535_v34 = vpop.permute.xlu0 %1534 }
 0x14d   : > { %1753 = vst.msk [vmem:[#allocation2 + $0x50] sm:$0xff] %vm1742_vm11, %v1667_v33 }
 0x14e   : > { %1620 = vst.msk [vmem:[#allocation2 + $0x58] sm:$0xff] %vm1608_vm10, %v1535_v34  ;;  %1017 = vrot.lane.b32.xlu1 %v9019_v19, %s8579_s27  ;;  %888 = vrot.lane.b32.xlu0 %v820_v54, %s8580_s28  ;;  %v615_v19 = vsel %vm14043_vm2, %v612_v32, %v614_v42  ;;  %v622_v32 = vrot.slane %v9148_v31, 1  ;;  %v624_v42 = vrot.slane %v455_v55, 1 }
 0x150   : > { %v1139_v38 = vpop.permute.xlu1 %1138  ;;  %v665_v23 = vpop.permute.xlu0 %664 }
 0x151   : > { %1222 = vst.msk [vmem:[#allocation2 + $0x68] sm:$0xff] %vm1208_vm7, %v1139_v38 }
 0x152   : > { %747 = vst.msk [vmem:[#allocation2 + $0x70] sm:$0xff] %vm732_vm4, %v665_v23  ;;  %1548 = vrot.lane.b32.xlu1 %v613_v36, %s8585_s15  ;;  %1415 = vrot.lane.b32.xlu0 %v9034_v27, %s8584_s14 }
 0x154   : > { %v1669_v18 = vpop.permute.xlu1 %1668  ;;  %v1271_v25 = vpop.permute.xlu0 %1270  ;;  %v1785_v43 = vld [vmem:[#allocation2 + $0x50] sm:$0xff] }
 0x155   : > { %1754 = vst.msk [vmem:[#allocation2 + $0x58] sm:$0xff] %vm1742_vm11, %v1669_v18  ;;  %8320 = vmatprep.mubr.msk.f32.mxu0 %vm1813_vm12, %v1785_v43 }
 0x156   : > { %1355 = vst.msk [vmem:[#allocation2 + $0x60] sm:$0xff] %vm1342_vm8, %v1271_v25  ;;  %1152 = vrot.lane.b32.xlu1 %v613_v36, %s8582_s30  ;;  %1019 = vrot.lane.b32.xlu0 %v9034_v27, %s8579_s27  ;;  %v825_v27 = vsel %vm14041_vm1, %v822_v41, %v824_v46  ;;  %v832_v41 = vrot.slane %v9148_v31, 2 }
 0x158   : > { %v875_v58 = vpop.permute.xlu1 %874  ;;  %v667_v45 = vpop.permute.xlu0 %666 }
 0x159   : > { %957 = vst.msk [vmem:[#allocation2 + $0x70] sm:$0xff] %vm942_vm5, %v875_v58 }
 0x15a   : > { %748 = vst.msk [vmem:[#allocation2 + $0x78] sm:$0xff] %vm732_vm4, %v667_v45  ;;  %1682 = vrot.lane.b32.xlu1 %v823_v44, %s14019_s16  ;;  %1550 = vrot.lane.b32.xlu0 %v615_v19, %s8585_s15  ;;  %v834_v45 = vrot.slane %v455_v55, 2 }
 0x15c   : > { %v1402_v24 = vpop.permute.xlu1 %1401  ;;  %v1273_v47 = vpop.permute.xlu0 %1272  ;;  %v1786_v48 = vld [vmem:[#allocation2 + $0x58] sm:$0xff] }
 0x15d   : > { %1486 = vst.msk [vmem:[#allocation2 + $0x60] sm:$0xff] %vm1473_vm9, %v1402_v24  ;;  %8321 = vmatmul.mubr.msk.f32.gmra.mxu0 %vm1813_vm12, %v1786_v48 }
 0x15e   : > { %1356 = vst.msk [vmem:[#allocation2 + $0x68] sm:$0xff] %vm1342_vm8, %v1273_v47  ;;  %1154 = vrot.lane.b32.xlu1 %v615_v19, %s8582_s30  ;;  %680 = vrot.lane.b32.xlu0 %v613_v36, %s14021_s29  ;;  %v623_v36 = vsel %vm14043_vm2, %v621_v30, %v622_v32 }
 0x160   : > { %v1006_v50 = vpop.permute.xlu1 %1005  ;;  %v877_v51 = vpop.permute.xlu0 %876 }
 0x161   : > { %1088 = vst.msk [vmem:[#allocation2 + $0x70] sm:$0xff] %vm1073_vm6, %v1006_v50 }
 0x162   : > { %958 = vst.msk [vmem:[#allocation2 + $0x78] sm:$0xff] %vm942_vm5, %v877_v51  ;;  %1684 = vrot.lane.b32.xlu1 %v825_v27, %s14019_s16  ;;  %1286 = vrot.lane.b32.xlu0 %v823_v44, %s8583_s13 }
 0x164   : > { %v1537_v53 = vpop.permute.xlu1 %1536  ;;  %v1404_v56 = vpop.permute.xlu0 %1403 }
 0x165   : > { %1621 = vst.msk [vmem:[#allocation2 + $0x60] sm:$0xff] %vm1608_vm10, %v1537_v53 }
 0x166   : > { %1487 = vst.msk [vmem:[#allocation2 + $0x68] sm:$0xff] %vm1473_vm9, %v1404_v56  ;;  %890 = vrot.lane.b32.xlu1 %v823_v44, %s8580_s28  ;;  %682 = vrot.lane.b32.xlu0 %v615_v19, %s14021_s29  ;;  %v833_v44 = vsel %vm14041_vm1, %v831_v39, %v832_v41 }
 0x168   : > { %v1141_v59 = vpop.permute.xlu1 %1140  ;;  %v1008_v61 = vpop.permute.xlu0 %1007 }
 0x169   : > { %1223 = vst.msk [vmem:[#allocation2 + $0x70] sm:$0xff] %vm1208_vm7, %v1141_v59  ;;  %v626_v59 = vrot.slane %v9190_v57, 1 }
 0x16a   : > { %1089 = vst.msk [vmem:[#allocation2 + $0x78] sm:$0xff] %vm1073_vm6, %v1008_v61  ;;  %1417 = vrot.lane.b32.xlu1 %v9076_v52, %s8584_s14  ;;  %1288 = vrot.lane.b32.xlu0 %v825_v27, %s8583_s13  ;;  %v627_v61 = vrot.slane %v9205_v0, 1 }
 0x16c   : > { %v1671_v2 = vpop.permute.xlu1 %1670  ;;  %v1539_v3 = vpop.permute.xlu0 %1538 }
 0x16d   : > { %1755 = vst.msk [vmem:[#allocation2 + $0x60] sm:$0xff] %vm1742_vm11, %v1671_v2  ;;  %v628_v2 = vsel %vm14043_vm2, %v626_v59, %v627_v61 }
 0x16e   : > { %1622 = vst.msk [vmem:[#allocation2 + $0x68] sm:$0xff] %vm1608_vm10, %v1539_v3  ;;  %1021 = vrot.lane.b32.xlu1 %v9076_v52, %s8579_s27  ;;  %892 = vrot.lane.b32.xlu0 %v825_v27, %s8580_s28  ;;  %v620_v52 = vsel %vm14043_vm2, %v617_v63, %v619_v9 }
 0x170   : > { %v1143_v37 = vpop.permute.xlu1 %1142  ;;  %v669_v6 = vpop.permute.xlu0 %668 }
 0x171   : > { %1224 = vst.msk [vmem:[#allocation2 + $0x78] sm:$0xff] %vm1208_vm7, %v1143_v37  ;;  %v458_v37 = vld [vmem:[%s8681_s26 + $0x160] sm:$0x3] }
 0x172   : > { %749 = vst.msk [vmem:[#allocation2 + $0x80] sm:$0xff] %vm732_vm4, %v669_v6  ;;  %1552 = vrot.lane.b32.xlu1 %v618_v5, %s8585_s15  ;;  %1419 = vrot.lane.b32.xlu0 %v9091_v60, %s8584_s14  ;;  %v836_v6 = vrot.slane %v9190_v57, 2  ;;  %v629_v8 = vrot.slane %v458_v37, 1 }
 0x174   : > { %v1673_v10 = vpop.permute.xlu1 %1672  ;;  %v1275_v11 = vpop.permute.xlu0 %1274  ;;  %v1787_v49 = vld [vmem:[#allocation2 + $0x60] sm:$0xff] }
 0x175   : > { %1756 = vst.msk [vmem:[#allocation2 + $0x68] sm:$0xff] %vm1742_vm11, %v1673_v10  ;;  %8323 = vmatprep.mubr.msk.f32.mxu0 %vm1813_vm12, %v1787_v49 }
 0x176   : > { %1357 = vst.msk [vmem:[#allocation2 + $0x70] sm:$0xff] %vm1342_vm8, %v1275_v11  ;;  %1156 = vrot.lane.b32.xlu1 %v618_v5, %s8582_s30  ;;  %1023 = vrot.lane.b32.xlu0 %v9091_v60, %s8579_s27  ;;  %v830_v60 = vsel %vm14041_vm1, %v827_v1, %v829_v4  ;;  %v838_v11 = vsel %vm14041_vm1, %v836_v6, %v837_v7 }
 0x178   : > { %v879_v12 = vpop.permute.xlu1 %878  ;;  %v671_v13 = vpop.permute.xlu0 %670 }
 0x179   : > { %959 = vst.msk [vmem:[#allocation2 + $0x80] sm:$0xff] %vm942_vm5, %v879_v12 }
 0x17a   : > { %750 = vst.msk [vmem:[#allocation2 + $0x88] sm:$0xff] %vm732_vm4, %v671_v13  ;;  %1686 = vrot.lane.b32.xlu1 %v828_v40, %s14019_s16  ;;  %1554 = vrot.lane.b32.xlu0 %v620_v52, %s8585_s15 }
 0x17c   : > { %v1406_v14 = vpop.permute.xlu1 %1405  ;;  %v1277_v15 = vpop.permute.xlu0 %1276  ;;  %v1788_v54 = vld [vmem:[#allocation2 + $0x68] sm:$0xff] }
 0x17d   : > { %1488 = vst.msk [vmem:[#allocation2 + $0x70] sm:$0xff] %vm1473_vm9, %v1406_v14  ;;  %8324 = vmatmul.mubr.msk.f32.gmra.mxu0 %vm1813_vm12, %v1788_v54 }
 0x17e   : > { %1358 = vst.msk [vmem:[#allocation2 + $0x78] sm:$0xff] %vm1342_vm8, %v1277_v15  ;;  %1158 = vrot.lane.b32.xlu1 %v620_v52, %s8582_s30  ;;  %684 = vrot.lane.b32.xlu0 %v618_v5, %s14021_s29 }
 0x180   : > { %v1010_v16 = vpop.permute.xlu1 %1009  ;;  %v881_v17 = vpop.permute.xlu0 %880 }
 0x181   : > { %1090 = vst.msk [vmem:[#allocation2 + $0x80] sm:$0xff] %vm1073_vm6, %v1010_v16 }
 0x182   : > { %960 = vst.msk [vmem:[#allocation2 + $0x88] sm:$0xff] %vm942_vm5, %v881_v17  ;;  %1688 = vrot.lane.b32.xlu1 %v830_v60, %s14019_s16  ;;  %1290 = vrot.lane.b32.xlu0 %v828_v40, %s8583_s13 }
 0x184   : > { %v1541_v20 = vpop.permute.xlu1 %1540  ;;  %v1408_v21 = vpop.permute.xlu0 %1407 }
 0x185   : > { %1623 = vst.msk [vmem:[#allocation2 + $0x70] sm:$0xff] %vm1608_vm10, %v1541_v20  ;;  %v631_v20 = vrot.slane %v9247_v29, 1 }
 0x186   : > { %1489 = vst.msk [vmem:[#allocation2 + $0x78] sm:$0xff] %vm1473_vm9, %v1408_v21  ;;  %894 = vrot.lane.b32.xlu1 %v828_v40, %s8580_s28  ;;  %686 = vrot.lane.b32.xlu0 %v620_v52, %s14021_s29  ;;  %v839_v52 = vrot.slane %v458_v37, 2  ;;  %v632_v21 = vrot.slane %v9262_v35, 1 }
 0x188   : > { %v1145_v26 = vpop.permute.xlu1 %1144  ;;  %v1012_v28 = vpop.permute.xlu0 %1011  ;;  %v633_v30 = vsel %vm14043_vm2, %v631_v20, %v632_v21 }
 0x189   : > { %1225 = vst.msk [vmem:[#allocation2 + $0x80] sm:$0xff] %vm1208_vm7, %v1145_v26 }
 0x18a   : > { %1091 = vst.msk [vmem:[#allocation2 + $0x88] sm:$0xff] %vm1073_vm6, %v1012_v28  ;;  %1421 = vrot.lane.b32.xlu1 %v9133_v22, %s8584_s14  ;;  %1292 = vrot.lane.b32.xlu0 %v830_v60, %s8583_s13 }
 0x18c   : > { %v1675_v33 = vpop.permute.xlu1 %1674  ;;  %v1543_v34 = vpop.permute.xlu0 %1542 }
 0x18d   : > { %1757 = vst.msk [vmem:[#allocation2 + $0x70] sm:$0xff] %vm1742_vm11, %v1675_v33 }
 0x18e   : > { %1624 = vst.msk [vmem:[#allocation2 + $0x78] sm:$0xff] %vm1608_vm10, %v1543_v34  ;;  %1025 = vrot.lane.b32.xlu1 %v9133_v22, %s8579_s27  ;;  %896 = vrot.lane.b32.xlu0 %v830_v60, %s8580_s28  ;;  %v625_v22 = vsel %vm14043_vm2, %v622_v32, %v624_v42  ;;  %v461_v34 = vld [vmem:[%s8681_s26 + $0x178] sm:$0x3] }
 0x190   : > { %v1147_v38 = vpop.permute.xlu1 %1146  ;;  %v673_v23 = vpop.permute.xlu0 %672 }
 0x191   : > { %1226 = vst.msk [vmem:[#allocation2 + $0x88] sm:$0xff] %vm1208_vm7, %v1147_v38  ;;  %v842_v38 = vrot.slane %v9262_v35, 2 }
 0x192   : > { %751 = vst.msk [vmem:[#allocation2 + $0x90] sm:$0xff] %vm732_vm4, %v673_v23  ;;  %1556 = vrot.lane.b32.xlu1 %v623_v36, %s8585_s15  ;;  %1423 = vrot.lane.b32.xlu0 %v9148_v31, %s8584_s14  ;;  %v634_v23 = vrot.slane %v461_v34, 1 }
 0x194   : > { %v1677_v18 = vpop.permute.xlu1 %1676  ;;  %v1279_v25 = vpop.permute.xlu0 %1278  ;;  %v1789_v43 = vld [vmem:[#allocation2 + $0x70] sm:$0xff] }
 0x195   : > { %1758 = vst.msk [vmem:[#allocation2 + $0x78] sm:$0xff] %vm1742_vm11, %v1677_v18  ;;  %8326 = vmatprep.mubr.msk.f32.mxu0 %vm1813_vm12, %v1789_v43  ;;  %v844_v43 = vrot.slane %v461_v34, 2 }
 0x196   : > { %1359 = vst.msk [vmem:[#allocation2 + $0x80] sm:$0xff] %vm1342_vm8, %v1279_v25  ;;  %1160 = vrot.lane.b32.xlu1 %v623_v36, %s8582_s30  ;;  %1027 = vrot.lane.b32.xlu0 %v9148_v31, %s8579_s27  ;;  %v835_v31 = vsel %vm14041_vm1, %v832_v41, %v834_v45 }
 0x198   : > { %v883_v19 = vpop.permute.xlu1 %882  ;;  %v675_v58 = vpop.permute.xlu0 %674 }
 0x199   : > { %961 = vst.msk [vmem:[#allocation2 + $0x90] sm:$0xff] %vm942_vm5, %v883_v19 }
 0x19a   : > { %752 = vst.msk [vmem:[#allocation2 + $0x98] sm:$0xff] %vm732_vm4, %v675_v58  ;;  %1690 = vrot.lane.b32.xlu1 %v833_v44, %s14019_s16  ;;  %1558 = vrot.lane.b32.xlu0 %v625_v22, %s8585_s15 }
 0x19c   : > { %v1410_v46 = vpop.permute.xlu1 %1409  ;;  %v1281_v24 = vpop.permute.xlu0 %1280  ;;  %v1790_v47 = vld [vmem:[#allocation2 + $0x78] sm:$0xff] }
 0x19d   : > { %1490 = vst.msk [vmem:[#allocation2 + $0x80] sm:$0xff] %vm1473_vm9, %v1410_v46  ;;  %8327 = vmatmul.mubr.msk.f32.gmra.mxu0 %vm1813_vm12, %v1790_v47  ;;  %v462_v47 = vld [vmem:[%s8681_s26 + $0x180] sm:$0xff] }
 0x19e   : > { %1360 = vst.msk [vmem:[#allocation2 + $0x88] sm:$0xff] %vm1342_vm8, %v1281_v24  ;;  %1162 = vrot.lane.b32.xlu1 %v625_v22, %s8582_s30  ;;  %688 = vrot.lane.b32.xlu0 %v623_v36, %s14021_s29  ;;  %v841_v36 = vrot.slane %v9247_v29, 2 }
 0x1a0   : > { %v1014_v48 = vpop.permute.xlu1 %1013  ;;  %v885_v27 = vpop.permute.xlu0 %884  ;;  %v843_v42 = vsel %vm14041_vm1, %v841_v36, %v842_v38 }
 0x1a1   : > { %1092 = vst.msk [vmem:[#allocation2 + $0x90] sm:$0xff] %vm1073_vm6, %v1014_v48 }
 0x1a2   : > { %962 = vst.msk [vmem:[#allocation2 + $0x98] sm:$0xff] %vm942_vm5, %v885_v27  ;;  %1692 = vrot.lane.b32.xlu1 %v835_v31, %s14019_s16  ;;  %1294 = vrot.lane.b32.xlu0 %v833_v44, %s8583_s13  ;;  %v463_v27 = vld [vmem:[%s8681_s26 + $0x188] sm:$0xff] }
 0x1a4   : > { %v1545_v50 = vpop.permute.xlu1 %1544  ;;  %v1412_v51 = vpop.permute.xlu0 %1411 }
 0x1a5   : > { %1625 = vst.msk [vmem:[#allocation2 + $0x80] sm:$0xff] %vm1608_vm10, %v1545_v50  ;;  %v1107_v50 = vrot.slane %v462_v47, 1 }
 0x1a6   : > { %1491 = vst.msk [vmem:[#allocation2 + $0x88] sm:$0xff] %vm1473_vm9, %v1412_v51  ;;  %898 = vrot.lane.b32.xlu1 %v833_v44, %s8580_s28  ;;  %690 = vrot.lane.b32.xlu0 %v625_v22, %s14021_s29  ;;  %v1108_v51 = vrot.slane %v463_v27, 1 }
 0x1a8   : > { %v1149_v53 = vpop.permute.xlu1 %1148  ;;  %v1016_v56 = vpop.permute.xlu0 %1015  ;;  %v1109_v59 = vsel %vm14043_vm2, %v1107_v50, %v1108_v51 }
 0x1a9   : > { %1227 = vst.msk [vmem:[#allocation2 + $0x90] sm:$0xff] %vm1208_vm7, %v1149_v53 }
 0x1aa   : > { %1093 = vst.msk [vmem:[#allocation2 + $0x98] sm:$0xff] %vm1073_vm6, %v1016_v56  ;;  %1425 = vrot.lane.b32.xlu1 %v9190_v57, %s8584_s14  ;;  %1296 = vrot.lane.b32.xlu0 %v835_v31, %s8583_s13 }
 0x1ac   : > { %v1679_v62 = vpop.permute.xlu1 %1678  ;;  %v1547_v63 = vpop.permute.xlu0 %1546 }
 0x1ad   : > { %1759 = vst.msk [vmem:[#allocation2 + $0x80] sm:$0xff] %vm1742_vm11, %v1679_v62 }
 0x1ae   : > { %1626 = vst.msk [vmem:[#allocation2 + $0x88] sm:$0xff] %vm1608_vm10, %v1547_v63  ;;  %1029 = vrot.lane.b32.xlu1 %v9190_v57, %s8579_s27  ;;  %900 = vrot.lane.b32.xlu0 %v835_v31, %s8580_s28  ;;  %v630_v57 = vsel %vm14043_vm2, %v627_v61, %v629_v8  ;;  %v464_v63 = vld [vmem:[%s8681_s26 + $0x190] sm:$0x3] }
 0x1b0   : > { %v1151_v3 = vpop.permute.xlu1 %1150  ;;  %v677_v5 = vpop.permute.xlu0 %676 }
 0x1b1   : > { %1228 = vst.msk [vmem:[#allocation2 + $0x98] sm:$0xff] %vm1208_vm7, %v1151_v3  ;;  %v1242_v3 = vrot.slane %v463_v27, 2 }
 0x1b2   : > { %753 = vst.msk [vmem:[#allocation2 + $0xa0] sm:$0xff] %vm732_vm4, %v677_v5  ;;  %1560 = vrot.lane.b32.xlu1 %v628_v2, %s8585_s15  ;;  %1427 = vrot.lane.b32.xlu0 %v9205_v0, %s8584_s14  ;;  %v1110_v5 = vrot.slane %v464_v63, 1 }
 0x1b4   : > { %v1681_v1 = vpop.permute.xlu1 %1680  ;;  %v1283_v9 = vpop.permute.xlu0 %1282  ;;  %v1791_v10 = vld [vmem:[#allocation2 + $0x80] sm:$0xff]  ;;  %v1111_v8 = vsel %vm14043_vm2, %v1108_v51, %v1110_v5 }
 0x1b5   : > { %1760 = vst.msk [vmem:[#allocation2 + $0x88] sm:$0xff] %vm1742_vm11, %v1681_v1  ;;  %8329 = vmatprep.mubr.msk.f32.mxu0 %vm1813_vm12, %v1791_v10 }
 0x1b6   : > { %1361 = vst.msk [vmem:[#allocation2 + $0x90] sm:$0xff] %vm1342_vm8, %v1283_v9  ;;  %1164 = vrot.lane.b32.xlu1 %v628_v2, %s8582_s30  ;;  %1031 = vrot.lane.b32.xlu0 %v9205_v0, %s8579_s27  ;;  %v840_v0 = vsel %vm14041_vm1, %v837_v7, %v839_v52 }
 0x1b8   : > { %v887_v49 = vpop.permute.xlu1 %886  ;;  %v679_v40 = vpop.permute.xlu0 %678 }
 0x1b9   : > { %963 = vst.msk [vmem:[#allocation2 + $0xa0] sm:$0xff] %vm942_vm5, %v887_v49 }
 0x1ba   : > { %754 = vst.msk [vmem:[#allocation2 + $0xa8] sm:$0xff] %vm732_vm4, %v679_v40  ;;  %1694 = vrot.lane.b32.xlu1 %v838_v11, %s14019_s16  ;;  %1562 = vrot.lane.b32.xlu0 %v630_v57, %s8585_s15 }
 0x1bc   : > { %v1414_v12 = vpop.permute.xlu1 %1413  ;;  %v1285_v13 = vpop.permute.xlu0 %1284  ;;  %v1792_v4 = vld [vmem:[#allocation2 + $0x88] sm:$0xff] }
 0x1bd   : > { %1492 = vst.msk [vmem:[#allocation2 + $0x90] sm:$0xff] %vm1473_vm9, %v1414_v12  ;;  %8330 = vmatmul.mubr.msk.f32.gmra.mxu0 %vm1813_vm12, %v1792_v4  ;;  %v465_v4 = vld [vmem:[%s8681_s26 + $0x198] sm:$0xff] }
 0x1be   : > { %1362 = vst.msk [vmem:[#allocation2 + $0x98] sm:$0xff] %vm1342_vm8, %v1285_v13  ;;  %1166 = vrot.lane.b32.xlu1 %v630_v57, %s8582_s30  ;;  %692 = vrot.lane.b32.xlu0 %v628_v2, %s14021_s29  ;;  %v1241_v2 = vrot.slane %v462_v47, 2  ;;  %v1641_v20 = vrot.slane %v465_v4, 2 }
 0x1c0   : > { %v1018_v14 = vpop.permute.xlu1 %1017  ;;  %v889_v15 = vpop.permute.xlu0 %888  ;;  %v1243_v1 = vsel %vm14041_vm1, %v1241_v2, %v1242_v3 }
 0x1c1   : > { %1094 = vst.msk [vmem:[#allocation2 + $0xa0] sm:$0xff] %vm1073_vm6, %v1018_v14  ;;  %v467_v14 = vld [vmem:[%s8681_s26 + $0x1a8] sm:$0x3] }
 0x1c2   : > { %964 = vst.msk [vmem:[#allocation2 + $0xa8] sm:$0xff] %vm942_vm5, %v889_v15  ;;  %1696 = vrot.lane.b32.xlu1 %v840_v0, %s14019_s16  ;;  %1298 = vrot.lane.b32.xlu0 %v838_v11, %s8583_s13  ;;  %v1507_v15 = vrot.slane %v465_v4, 1 }
 0x1c4   : > { %v1549_v54 = vpop.permute.xlu1 %1548  ;;  %v1416_v60 = vpop.permute.xlu0 %1415 }
 0x1c5   : > { %1627 = vst.msk [vmem:[#allocation2 + $0x90] sm:$0xff] %vm1608_vm10, %v1549_v54 }
 0x1c6   : > { %1493 = vst.msk [vmem:[#allocation2 + $0x98] sm:$0xff] %vm1473_vm9, %v1416_v60  ;;  %902 = vrot.lane.b32.xlu1 %v838_v11, %s8580_s28  ;;  %694 = vrot.lane.b32.xlu0 %v630_v57, %s14021_s29  ;;  %v1244_v11 = vrot.slane %v464_v63, 2  ;;  %v1510_v60 = vrot.slane %v467_v14, 1 }
 0x1c8   : > { %v1153_v16 = vpop.permute.xlu1 %1152  ;;  %v1020_v17 = vpop.permute.xlu0 %1019  ;;  %v1245_v52 = vsel %vm14041_vm1, %v1242_v3, %v1244_v11 }
 0x1c9   : > { %1229 = vst.msk [vmem:[#allocation2 + $0xa0] sm:$0xff] %vm1208_vm7, %v1153_v16 }
 0x1ca   : > { %1095 = vst.msk [vmem:[#allocation2 + $0xa8] sm:$0xff] %vm1073_vm6, %v1020_v17  ;;  %1429 = vrot.lane.b32.xlu1 %v9247_v29, %s8584_s14  ;;  %1300 = vrot.lane.b32.xlu0 %v840_v0, %s8583_s13 }
 0x1cc   : > { %v1683_v26 = vpop.permute.xlu1 %1682  ;;  %v1551_v28 = vpop.permute.xlu0 %1550 }
 0x1cd   : > { %1761 = vst.msk [vmem:[#allocation2 + $0x90] sm:$0xff] %vm1742_vm11, %v1683_v26 }
 0x1ce   : > { %1628 = vst.msk [vmem:[#allocation2 + $0x98] sm:$0xff] %vm1608_vm10, %v1551_v28  ;;  %1033 = vrot.lane.b32.xlu1 %v9247_v29, %s8579_s27  ;;  %904 = vrot.lane.b32.xlu0 %v840_v0, %s8580_s28  ;;  %v635_v29 = vsel %vm14043_vm2, %v632_v21, %v634_v23  ;;  %v466_v0 = vld [vmem:[%s8681_s26 + $0x1a0] sm:$0xff]  ;;  %s8590_s26 = smov 26  }
 0x1cf   : > { %v1508_v54 = vrot.slane %v466_v0, 1  ;;  %v1642_v21 = vrot.slane %v466_v0, 2 }
 0x1d0   : > { %v1155_v32 = vpop.permute.xlu1 %1154  ;;  %v681_v33 = vpop.permute.xlu0 %680 }
 0x1d1   : > { %1230 = vst.msk [vmem:[#allocation2 + $0xa8] sm:$0xff] %vm1208_vm7, %v1155_v32  ;;  %v1509_v26 = vsel %vm14043_vm2, %v1507_v15, %v1508_v54  ;;  %v1511_v28 = vsel %vm14043_vm2, %v1508_v54, %v1510_v60  ;;  %v1643_v34 = vsel %vm14041_vm1, %v1641_v20, %v1642_v21  ;;  %vm14044_vm2 = vcmask 1048432  }
 0x1d2   : > { %755 = vst.msk [vmem:[#allocation2 + $0xb0] sm:$0xff] %vm732_vm4, %v681_v33  ;;  %1564 = vrot.lane.b32.xlu1 %v633_v30, %s8585_s15  ;;  %1431 = vrot.lane.b32.xlu0 %v9262_v35, %s8584_s14 }
 0x1d4   : > { %v1685_v55 = vpop.permute.xlu1 %1684  ;;  %v1287_v39 = vpop.permute.xlu0 %1286  ;;  %v1793_v41 = vld [vmem:[#allocation2 + $0x90] sm:$0xff] }
 0x1d5   : > { %1762 = vst.msk [vmem:[#allocation2 + $0x98] sm:$0xff] %vm1742_vm11, %v1685_v55  ;;  %8332 = vmatprep.mubr.msk.f32.mxu0 %vm1813_vm12, %v1793_v41 }
 0x1d6   : > { %1363 = vst.msk [vmem:[#allocation2 + $0xa0] sm:$0xff] %vm1342_vm8, %v1287_v39  ;;  %1168 = vrot.lane.b32.xlu1 %v633_v30, %s8582_s30  ;;  %1035 = vrot.lane.b32.xlu0 %v9262_v35, %s8579_s27  ;;  %v845_v35 = vsel %vm14041_vm1, %v842_v38, %v844_v43 }
 0x1d8   : > { %v891_v18 = vpop.permute.xlu1 %890  ;;  %v683_v25 = vpop.permute.xlu0 %682 }
 0x1d9   : > { %965 = vst.msk [vmem:[#allocation2 + $0xb0] sm:$0xff] %vm942_vm5, %v891_v18 }
 0x1da   : > { %756 = vst.msk [vmem:[#allocation2 + $0xb8] sm:$0xff] %vm732_vm4, %v683_v25  ;;  %1698 = vrot.lane.b32.xlu1 %v843_v42, %s14019_s16  ;;  %1566 = vrot.lane.b32.xlu0 %v635_v29, %s8585_s15 }
 0x1dc   : > { %v1418_v44 = vpop.permute.xlu1 %1417  ;;  %v1289_v22 = vpop.permute.xlu0 %1288  ;;  %v1794_v19 = vld [vmem:[#allocation2 + $0x98] sm:$0xff] }
 0x1dd   : > { %1494 = vst.msk [vmem:[#allocation2 + $0xa0] sm:$0xff] %vm1473_vm9, %v1418_v44  ;;  %8333 = vmatmul.mubr.msk.f32.gmra.mxu0 %vm1813_vm12, %v1794_v19 }
 0x1de   : > { %1364 = vst.msk [vmem:[#allocation2 + $0xa8] sm:$0xff] %vm1342_vm8, %v1289_v22  ;;  %1170 = vrot.lane.b32.xlu1 %v635_v29, %s8582_s30  ;;  %696 = vrot.lane.b32.xlu0 %v633_v30, %s14021_s29  ;;  %v1644_v30 = vrot.slane %v467_v14, 2 }
 0x1e0   : > { %v1022_v58 = vpop.permute.xlu1 %1021  ;;  %v893_v45 = vpop.permute.xlu0 %892  ;;  %v1645_v36 = vsel %vm14041_vm1, %v1642_v21, %v1644_v30  ;;  %vm14047_vm1 = vcmask 900800  }
 0x1e1   : > { %1096 = vst.msk [vmem:[#allocation2 + $0xb0] sm:$0xff] %vm1073_vm6, %v1022_v58 }
 0x1e2   : > { %966 = vst.msk [vmem:[#allocation2 + $0xb8] sm:$0xff] %vm942_vm5, %v893_v45  ;;  %1700 = vrot.lane.b32.xlu1 %v845_v35, %s14019_s16  ;;  %1302 = vrot.lane.b32.xlu0 %v843_v42, %s8583_s13 }
 0x1e4   : > { %v1553_v46 = vpop.permute.xlu1 %1552  ;;  %v1420_v24 = vpop.permute.xlu0 %1419 }
 0x1e5   : > { %1629 = vst.msk [vmem:[#allocation2 + $0xa0] sm:$0xff] %vm1608_vm10, %v1553_v46 }
 0x1e6   : > { %1495 = vst.msk [vmem:[#allocation2 + $0xa8] sm:$0xff] %vm1473_vm9, %v1420_v24  ;;  %698 = vrot.lane.b32.xlu0 %v635_v29, %s14021_s29  ;;  %906 = vrot.lane.b32.xlu1 %v843_v42, %s8580_s28 }
 0x1e8   : > { %v1157_v31 = vpop.permute.xlu1 %1156  ;;  %v1024_v48 = vpop.permute.xlu0 %1023 }
 0x1e9   : > { %1231 = vst.msk [vmem:[#allocation2 + $0xb0] sm:$0xff] %vm1208_vm7, %v1157_v31 }
 0x1ea   : > { %1097 = vst.msk [vmem:[#allocation2 + $0xb8] sm:$0xff] %vm1073_vm6, %v1024_v48  ;;  %1304 = vrot.lane.b32.xlu0 %v845_v35, %s8583_s13  ;;  %1433 = vrot.lane.b32.xlu1 %v462_v47, %s8584_s14 }
 0x1ec   : > { %v1687_v53 = vpop.permute.xlu1 %1686  ;;  %v1555_v56 = vpop.permute.xlu0 %1554 }
 0x1ed   : > { %1763 = vst.msk [vmem:[#allocation2 + $0xa0] sm:$0xff] %vm1742_vm11, %v1687_v53 }
 0x1ee   : > { %1630 = vst.msk [vmem:[#allocation2 + $0xa8] sm:$0xff] %vm1608_vm10, %v1555_v56  ;;  %908 = vrot.lane.b32.xlu0 %v845_v35, %s8580_s28  ;;  %1037 = vrot.lane.b32.xlu1 %v462_v47, %s8579_s27 }
 0x1f0   : > { %v1159_v61 = vpop.permute.xlu1 %1158  ;;  %v685_v62 = vpop.permute.xlu0 %684 }
 0x1f1   : > { %1232 = vst.msk [vmem:[#allocation2 + $0xb8] sm:$0xff] %vm1208_vm7, %v1159_v61 }
 0x1f2   : > { %757 = vst.msk [vmem:[#allocation2 + $0xc0] sm:$0xff] %vm732_vm4, %v685_v62  ;;  %1435 = vrot.lane.b32.xlu0 %v463_v27, %s8584_s14  ;;  %1568 = vrot.lane.b32.xlu1 %v1109_v59, %s8585_s15 }
 0x1f4   : > { %v1689_v37 = vpop.permute.xlu1 %1688  ;;  %v1291_v6 = vpop.permute.xlu0 %1290  ;;  %v1795_v7 = vld [vmem:[#allocation2 + $0xa0] sm:$0xff] }
 0x1f5   : > { %1764 = vst.msk [vmem:[#allocation2 + $0xa8] sm:$0xff] %vm1742_vm11, %v1689_v37  ;;  %8335 = vmatprep.mubr.msk.f32.mxu0 %vm1813_vm12, %v1795_v7 }
 0x1f6   : > { %1365 = vst.msk [vmem:[#allocation2 + $0xb0] sm:$0xff] %vm1342_vm8, %v1291_v6  ;;  %1039 = vrot.lane.b32.xlu0 %v463_v27, %s8579_s27  ;;  %1172 = vrot.lane.b32.xlu1 %v1109_v59, %s8582_s30  ;;  %s8591_s27 = smov 70  }
 0x1f8   : > { %v895_v9 = vpop.permute.xlu1 %894  ;;  %v687_v10 = vpop.permute.xlu0 %686 }
 0x1f9   : > { %967 = vst.msk [vmem:[#allocation2 + $0xc0] sm:$0xff] %vm942_vm5, %v895_v9 }
 0x1fa   : > { %758 = vst.msk [vmem:[#allocation2 + $0xc8] sm:$0xff] %vm732_vm4, %v687_v10  ;;  %1570 = vrot.lane.b32.xlu0 %v1111_v8, %s8585_s15  ;;  %1702 = vrot.lane.b32.xlu1 %v1243_v1, %s14019_s16 }
 0x1fc   : > { %v1422_v57 = vpop.permute.xlu1 %1421  ;;  %v1293_v49 = vpop.permute.xlu0 %1292  ;;  %v1796_v40 = vld [vmem:[#allocation2 + $0xa8] sm:$0xff] }
 0x1fd   : > { %1496 = vst.msk [vmem:[#allocation2 + $0xb0] sm:$0xff] %vm1473_vm9, %v1422_v57  ;;  %8336 = vmatmul.mubr.msk.f32.gmra.mxu0 %vm1813_vm12, %v1796_v40 }
 0x1fe   : > { %1366 = vst.msk [vmem:[#allocation2 + $0xb8] sm:$0xff] %vm1342_vm8, %v1293_v49  ;;  %1174 = vrot.lane.b32.xlu0 %v1111_v8, %s8582_s30  ;;  %1306 = vrot.lane.b32.xlu1 %v1243_v1, %s8583_s13  ;;  %s14029_s30 = smov 92  }
 0x200   : > { %v1026_v12 = vpop.permute.xlu1 %1025  ;;  %v897_v13 = vpop.permute.xlu0 %896 }
 0x201   : > { %1098 = vst.msk [vmem:[#allocation2 + $0xc0] sm:$0xff] %vm1073_vm6, %v1026_v12 }
 0x202   : > { %968 = vst.msk [vmem:[#allocation2 + $0xc8] sm:$0xff] %vm942_vm5, %v897_v13  ;;  %1704 = vrot.lane.b32.xlu0 %v1245_v52, %s14019_s16  ;;  %1308 = vrot.lane.b32.xlu1 %v1245_v52, %s8583_s13  ;;  %s14023_s13 = smov 22  }
 0x204   : > { %v1557_v16 = vpop.permute.xlu1 %1556  ;;  %v1424_v17 = vpop.permute.xlu0 %1423 }
 0x205   : > { %1631 = vst.msk [vmem:[#allocation2 + $0xb0] sm:$0xff] %vm1608_vm10, %v1557_v16 }
 0x206   : > { %1497 = vst.msk [vmem:[#allocation2 + $0xb8] sm:$0xff] %vm1473_vm9, %v1424_v17  ;;  %1437 = vrot.lane.b32.xlu0 %v465_v4, %s8584_s14  ;;  %1439 = vrot.lane.b32.xlu1 %v466_v0, %s8584_s14  ;;  %s14132_s14 = smov 110  }
 0x208   : > { %v1161_v32 = vpop.permute.xlu1 %1160  ;;  %v1028_v33 = vpop.permute.xlu0 %1027 }
 0x209   : > { %1233 = vst.msk [vmem:[#allocation2 + $0xc0] sm:$0xff] %vm1208_vm7, %v1161_v32 }
 0x20a   : > { %1099 = vst.msk [vmem:[#allocation2 + $0xc8] sm:$0xff] %vm1073_vm6, %v1028_v33  ;;  %1572 = vrot.lane.b32.xlu0 %v1509_v26, %s8585_s15  ;;  %1574 = vrot.lane.b32.xlu1 %v1511_v28, %s8585_s15  ;;  %s8593_s15 = smov 114  }
 0x20c   : > { %v1691_v38 = vpop.permute.xlu1 %1690  ;;  %v1559_v23 = vpop.permute.xlu0 %1558 }
 0x20d   : > { %1765 = vst.msk [vmem:[#allocation2 + $0xb0] sm:$0xff] %vm1742_vm11, %v1691_v38 }
 0x20e   : > { %1632 = vst.msk [vmem:[#allocation2 + $0xb8] sm:$0xff] %vm1608_vm10, %v1559_v23  ;;  %1706 = vrot.lane.b32.xlu0 %v1643_v34, %s14019_s16  ;;  %1708 = vrot.lane.b32.xlu1 %v1645_v36, %s14019_s16  ;;  %s14383_s16 = smov 66  }
 0x210   : > { %v1163_v55 = vpop.permute.xlu1 %1162  ;;  %v689_v39 = vpop.permute.xlu0 %688 }
 0x211   : > { %1234 = vst.msk [vmem:[#allocation2 + $0xc8] sm:$0xff] %vm1208_vm7, %v1163_v55 }
 0x212   : > { %759 = vst.msk [vmem:[#allocation2 + $0xd0] sm:$0xff] %vm732_vm4, %v689_v39 }
 0x214   : > { %v1693_v41 = vpop.permute.xlu1 %1692  ;;  %v1295_v42 = vpop.permute.xlu0 %1294  ;;  %v1797_v29 = vld [vmem:[#allocation2 + $0xb0] sm:$0xff] }
 0x215   : > { %1766 = vst.msk [vmem:[#allocation2 + $0xb8] sm:$0xff] %vm1742_vm11, %v1693_v41  ;;  %8338 = vmatprep.mubr.msk.f32.mxu0 %vm1813_vm12, %v1797_v29  ;;  %v2174_v29 = vld [vmem:[%s13988_s3 + $0x18] sm:$0xff] }
 0x216   : > { %1367 = vst.msk [vmem:[#allocation2 + $0xc0] sm:$0xff] %vm1342_vm8, %v1295_v42 }
 0x218   : > { %v899_v18 = vpop.permute.xlu1 %898  ;;  %v691_v25 = vpop.permute.xlu0 %690 }
 0x219   : > { %969 = vst.msk [vmem:[#allocation2 + $0xd0] sm:$0xff] %vm942_vm5, %v899_v18  ;;  %v13998_v18 = vmov 0.0  }
 0x21a   : > { %760 = vst.msk [vmem:[#allocation2 + $0xd8] sm:$0xff] %vm732_vm4, %v691_v25  ;;  %8353 = vmatprep.subr.mxu1 %v13998_v18  ;;  %v2173_v25 = vld [vmem:[%s13988_s3 + $0x10] sm:$0xff]  ;;  %8361 = vmatprep.mubr.msk.f32.mxu1 %vm14017_vm14, %v13998_v18 }
 0x21b   : > { %3755 = vst.msk [vmem:[#allocation4] sm:$0xff] %vm2176_vm13, %v13998_v18  ;;  %3756 = vst.msk [vmem:[#allocation4 + $0x8] sm:$0xff] %vm2176_vm13, %v13998_v18  ;;  %8354 = vmatpush3.msra.mxu1 %v2174_v29  ;;  %5297 = vmatprep.subr.mxu0 %v13998_v18 }
 0x21c   : > { %v1426_v43 = vpop.permute.xlu1 %1425  ;;  %v1297_v44 = vpop.permute.xlu0 %1296  ;;  %v1798_v22 = vld [vmem:[#allocation2 + $0xb8] sm:$0xff]  ;;  %3759 = vst.msk [vmem:[#allocation4 + $0x18] sm:$0xff] %vm2176_vm13, %v13998_v18  ;;  %3760 = vst.msk [vmem:[#allocation4 + $0x20] sm:$0xff] %vm2176_vm13, %v13998_v18  ;;  %8355 = vmatprep.subr.mxu1 %v13998_v18 }
 0x21d   : > { %1498 = vst.msk [vmem:[#allocation2 + $0xc0] sm:$0xff] %vm1473_vm9, %v1426_v43  ;;  %8339 = vmatmul.mubr.msk.f32.gmra.mxu0 %vm1813_vm12, %v1798_v22  ;;  %v2172_v43 = vld [vmem:[%s13988_s3 + $0x8] sm:$0xff]  ;;  %8356 = vmatpush3.msra.mxu1 %v2173_v25  ;;  %v8307_v22 = vpop.f32.mrf.mxu0 }
 0x21e   : > { %1368 = vst.msk [vmem:[#allocation2 + $0xc8] sm:$0xff] %vm1342_vm8, %v1297_v44  ;;  %8357 = vmatprep.subr.mxu1 %v13998_v18  ;;  %v2171_v44 = vld [vmem:[%s13988_s3] sm:$0xff] }
 0x21f   : > { %3762 = vst.msk [vmem:[#allocation4 + $0x30] sm:$0xff] %vm2176_vm13, %v13998_v18  ;;  %3763 = vst.msk [vmem:[#allocation4 + $0x38] sm:$0xff] %vm2176_vm13, %v13998_v18  ;;  %8358 = vmatpush3.msra.mxu1 %v2172_v43 }
 0x220   : > { %v1030_v19 = vpop.permute.xlu1 %1029  ;;  %v901_v35 = vpop.permute.xlu0 %900  ;;  %3765 = vst.msk [vmem:[#allocation4 + $0x48] sm:$0xff] %vm2176_vm13, %v13998_v18  ;;  %3766 = vst.msk [vmem:[#allocation4 + $0x50] sm:$0xff] %vm2176_vm13, %v13998_v18  ;;  %8359 = vmatprep.subr.mxu1 %v13998_v18 }
 0x221   : > { %1100 = vst.msk [vmem:[#allocation2 + $0xd0] sm:$0xff] %vm1073_vm6, %v1030_v19  ;;  %8360 = vmatpush3.msra.mxu1 %v2171_v44  ;;  %v1980_v19 = vpop.f32.mrf.mxu0 }
 0x222   : > { %970 = vst.msk [vmem:[#allocation2 + $0xd8] sm:$0xff] %vm942_vm5, %v901_v35  ;;  %8364 = vmatprep.subr.mxu1 %v13998_v18  ;;  %v9708_v35 = vld [vmem:[%s13987_s2] ss:$0 sm:$0xff] }
 0x223   : > { %3768 = vst.msk [vmem:[#allocation4 + $0x60] sm:$0xff] %vm2176_vm13, %v13998_v18  ;;  %3769 = vst.msk [vmem:[#allocation4 + $0x68] sm:$0xff] %vm2176_vm13, %v13998_v18 }
 0x224   : > { %v1561_v58 = vpop.permute.xlu1 %1560  ;;  %v1428_v45 = vpop.permute.xlu0 %1427  ;;  %3771 = vst.msk [vmem:[#allocation4 + $0x78] sm:$0xff] %vm2176_vm13, %v13998_v18  ;;  %3772 = vst.msk [vmem:[#allocation4 + $0x80] sm:$0xff] %vm2176_vm13, %v13998_v18 }
 0x225   : > { %1633 = vst.msk [vmem:[#allocation2 + $0xc0] sm:$0xff] %vm1608_vm10, %v1561_v58  ;;  %v8310_v58 = vpop.f32.mrf.mxu0 }
 0x226   : > { %1499 = vst.msk [vmem:[#allocation2 + $0xc8] sm:$0xff] %vm1473_vm9, %v1428_v45  ;;  %v1986_v45 = vadd.f32 %v8307_v22, %v9708_v35 }
 0x227   : > { %3774 = vst.msk [vmem:[#allocation4 + $0x90] sm:$0xff] %vm2176_vm13, %v13998_v18  ;;  %3775 = vst.msk [vmem:[#allocation4 + $0x98] sm:$0xff] %vm2176_vm13, %v13998_v18 }
 0x228   : > { %v1165_v46 = vpop.permute.xlu1 %1164  ;;  %v1032_v24 = vpop.permute.xlu0 %1031  ;;  %3777 = vst.msk [vmem:[#allocation4 + $0xa8] sm:$0xff] %vm2176_vm13, %v13998_v18  ;;  %3778 = vst.msk [vmem:[#allocation4 + $0xb0] sm:$0xff] %vm2176_vm13, %v13998_v18 }
 0x229   : > { %1235 = vst.msk [vmem:[#allocation2 + $0xd0] sm:$0xff] %vm1208_vm7, %v1165_v46  ;;  %v1981_v46 = vadd.f32 %v9708_v35, %v1980_v19 }
 0x22a   : > { %1101 = vst.msk [vmem:[#allocation2 + $0xd8] sm:$0xff] %vm1073_vm6, %v1032_v24  ;;  %v1990_v24 = vpop.f32.mrf.mxu0 }
 0x22b   : > { %3780 = vst.msk [vmem:[#allocation4 + $0xc0] sm:$0xff] %vm2176_vm13, %v13998_v18  ;;  %3781 = vst.msk [vmem:[#allocation4 + $0xc8] sm:$0xff] %vm2176_vm13, %v13998_v18 }
 0x22c   : > { %v1695_v47 = vpop.permute.xlu1 %1694  ;;  %v1563_v31 = vpop.permute.xlu0 %1562  ;;  %3783 = vst.msk [vmem:[#allocation4 + $0xd8] sm:$0xff] %vm2176_vm13, %v13998_v18  ;;  %3784 = vst.msk [vmem:[#allocation4 + $0xe0] sm:$0xff] %vm2176_vm13, %v13998_v18 }
 0x22d   : > { %1767 = vst.msk [vmem:[#allocation2 + $0xc0] sm:$0xff] %vm1742_vm11, %v1695_v47  ;;  %v1996_v47 = vadd.f32 %v8310_v58, %v9708_v35 }
 0x22e   : > { %1634 = vst.msk [vmem:[#allocation2 + $0xc8] sm:$0xff] %vm1608_vm10, %v1563_v31  ;;  %v8313_v31 = vpop.f32.mrf.mxu0 }
 0x22f   : > { %3786 = vst.msk [vmem:[#allocation4 + $0xf0] sm:$0xff] %vm2176_vm13, %v13998_v18  ;;  %3787 = vst.msk [vmem:[#allocation4 + $0xf8] sm:$0xff] %vm2176_vm13, %v13998_v18 }
 0x230   : > { %v1167_v48 = vpop.permute.xlu1 %1166  ;;  %v693_v27 = vpop.permute.xlu0 %692  ;;  %3789 = vst.msk [vmem:[#allocation4 + $0x108] sm:$0xff] %vm2176_vm13, %v13998_v18  ;;  %3790 = vst.msk [vmem:[#allocation4 + $0x110] sm:$0xff] %vm2176_vm13, %v13998_v18 }
 0x231   : > { %1236 = vst.msk [vmem:[#allocation2 + $0xd8] sm:$0xff] %vm1208_vm7, %v1167_v48  ;;  %v9713_v48 = vmax.f32 %v1986_v45, 0.0 }
 0x232   : > { %761 = vst.msk [vmem:[#allocation2 + $0xe0] sm:$0xff] %vm732_vm4, %v693_v27  ;;  %v9715_v27 = vmax.f32 %v1981_v46, 0.0 }
 0x233   : > { %3792 = vst.msk [vmem:[#allocation4 + $0x120] sm:$0xff] %vm2176_vm13, %v13998_v18  ;;  %3793 = vst.msk [vmem:[#allocation4 + $0x128] sm:$0xff] %vm2176_vm13, %v13998_v18 }
 0x234   : > { %v1697_v50 = vpop.permute.xlu1 %1696  ;;  %v1299_v51 = vpop.permute.xlu0 %1298  ;;  %v1799_v53 = vld [vmem:[#allocation2 + $0xc0] sm:$0xff]  ;;  %3795 = vst.msk [vmem:[#allocation4 + $0x138] sm:$0xff] %vm2176_vm13, %v13998_v18  ;;  %3796 = vst.msk [vmem:[#allocation4 + $0x140] sm:$0xff] %vm2176_vm13, %v13998_v18 }
 0x235   : > { %1768 = vst.msk [vmem:[#allocation2 + $0xc8] sm:$0xff] %vm1742_vm11, %v1697_v50  ;;  %8341 = vmatprep.mubr.msk.f32.mxu0 %vm1813_vm12, %v1799_v53  ;;  %v1991_v50 = vadd.f32 %v9708_v35, %v1990_v24  ;;  %v2000_v53 = vpop.f32.mrf.mxu0 }
 0x236   : > { %1369 = vst.msk [vmem:[#allocation2 + $0xd0] sm:$0xff] %vm1342_vm8, %v1299_v51  ;;  %v9718_v51 = vmax.f32 %v1996_v47, 0.0 }
 0x237   : > { %3798 = vst.msk [vmem:[#allocation4 + $0x150] sm:$0xff] %vm2176_vm13, %v13998_v18  ;;  %3799 = vst.msk [vmem:[#allocation4 + $0x158] sm:$0xff] %vm2176_vm13, %v13998_v18 }
 0x238   : > { %v903_v56 = vpop.permute.xlu1 %902  ;;  %v695_v59 = vpop.permute.xlu0 %694  ;;  %3801 = vst.msk [vmem:[#allocation4 + $0x168] sm:$0xff] %vm2176_vm13, %v13998_v18  ;;  %3802 = vst.msk [vmem:[#allocation4 + $0x170] sm:$0xff] %vm2176_vm13, %v13998_v18 }
 0x239   : > { %971 = vst.msk [vmem:[#allocation2 + $0xe0] sm:$0xff] %vm942_vm5, %v903_v56  ;;  %v2249_v56 = vsel %vm2176_vm13, %v9713_v48, -inf }
 0x23a   : > { %762 = vst.msk [vmem:[#allocation2 + $0xe8] sm:$0xff] %vm732_vm4, %v695_v59  ;;  %v2248_v59 = vsel %vm2176_vm13, %v9715_v27, -inf }
 0x23b   : > { %3804 = vst.msk [vmem:[#allocation4 + $0x180] sm:$0xff] %vm2176_vm13, %v13998_v18  ;;  %3805 = vst.msk [vmem:[#allocation4 + $0x188] sm:$0xff] %vm2176_vm13, %v13998_v18 }
 0x23c   : > { %v1430_v61 = vpop.permute.xlu1 %1429  ;;  %v1301_v62 = vpop.permute.xlu0 %1300  ;;  %v1800_v63 = vld [vmem:[#allocation2 + $0xc8] sm:$0xff]  ;;  %3807 = vst.msk [vmem:[#allocation4 + $0x198] sm:$0xff] %vm2176_vm13, %v13998_v18  ;;  %3808 = vst.msk [vmem:[#allocation4 + $0x1a0] sm:$0xff] %vm2176_vm13, %v13998_v18 }
 0x23d   : > { %1500 = vst.msk [vmem:[#allocation2 + $0xd0] sm:$0xff] %vm1473_vm9, %v1430_v61  ;;  %8342 = vmatmul.mubr.msk.f32.gmra.mxu0 %vm1813_vm12, %v1800_v63  ;;  %v9724_v61 = vmax.f32 %v1991_v50, 0.0  ;;  %v8316_v63 = vpop.f32.mrf.mxu0 }
 0x23e   : > { %1370 = vst.msk [vmem:[#allocation2 + $0xd8] sm:$0xff] %vm1342_vm8, %v1301_v62  ;;  %v2006_v62 = vadd.f32 %v8313_v31, %v9708_v35 }
 0x240   : > { %v1034_v2 = vpop.permute.xlu1 %1033  ;;  %v905_v3 = vpop.permute.xlu0 %904 }
 0x241   : > { %1102 = vst.msk [vmem:[#allocation2 + $0xe0] sm:$0xff] %vm1073_vm6, %v1034_v2  ;;  %v2178_v2 = vsel %vm2176_vm13, %v9713_v48, 0.0 }
 0x242   : > { %972 = vst.msk [vmem:[#allocation2 + $0xe8] sm:$0xff] %vm942_vm5, %v905_v3  ;;  %v2177_v3 = vsel %vm2176_vm13, %v9715_v27, 0.0 }
 0x244   : > { %v1565_v5 = vpop.permute.xlu1 %1564  ;;  %v1432_v37 = vpop.permute.xlu0 %1431 }
 0x245   : > { %1635 = vst.msk [vmem:[#allocation2 + $0xd0] sm:$0xff] %vm1608_vm10, %v1565_v5  ;;  %v2251_v5 = vsel %vm2176_vm13, %v9718_v51, -inf }
 0x246   : > { %1501 = vst.msk [vmem:[#allocation2 + $0xd8] sm:$0xff] %vm1473_vm9, %v1432_v37  ;;  %v2001_v37 = vadd.f32 %v9708_v35, %v2000_v53 }
 0x248   : > { %v1169_v6 = vpop.permute.xlu1 %1168  ;;  %v1036_v7 = vpop.permute.xlu0 %1035 }
 0x249   : > { %1237 = vst.msk [vmem:[#allocation2 + $0xe0] sm:$0xff] %vm1208_vm7, %v1169_v6  ;;  %v2255_v6 = vmax.f32 %v2249_v56, %v2248_v59 }
 0x24a   : > { %1103 = vst.msk [vmem:[#allocation2 + $0xe8] sm:$0xff] %vm1073_vm6, %v1036_v7  ;;  %v2180_v7 = vsel %vm2176_vm13, %v9724_v61, 0.0 }
 0x24c   : > { %v1699_v8 = vpop.permute.xlu1 %1698  ;;  %v1567_v1 = vpop.permute.xlu0 %1566 }
 0x24d   : > { %1769 = vst.msk [vmem:[#allocation2 + $0xd0] sm:$0xff] %vm1742_vm11, %v1699_v8  ;;  %v9736_v8 = vmax.f32 %v2006_v62, 0.0 }
 0x24e   : > { %1636 = vst.msk [vmem:[#allocation2 + $0xd8] sm:$0xff] %vm1608_vm10, %v1567_v1  ;;  %v2179_v1 = vadd.f32 %v2178_v2, %v2177_v3 }
 0x250   : > { %v1171_v9 = vpop.permute.xlu1 %1170  ;;  %v697_v10 = vpop.permute.xlu0 %696 }
 0x251   : > { %1238 = vst.msk [vmem:[#allocation2 + $0xe8] sm:$0xff] %vm1208_vm7, %v1171_v9  ;;  %v2253_v9 = vmax.f32 %v2251_v5, %v2255_v6 }
 0x252   : > { %763 = vst.msk [vmem:[#allocation2 + $0xf0] sm:$0xff] %vm732_vm4, %v697_v10  ;;  %v2010_v10 = vpop.f32.mrf.mxu0 }
 0x254   : > { %v1701_v11 = vpop.permute.xlu1 %1700  ;;  %v1303_v57 = vpop.permute.xlu0 %1302  ;;  %v1801_v49 = vld [vmem:[#allocation2 + $0xd0] sm:$0xff] }
 0x255   : > { %1770 = vst.msk [vmem:[#allocation2 + $0xd8] sm:$0xff] %vm1742_vm11, %v1701_v11  ;;  %8344 = vmatprep.mubr.msk.f32.mxu0 %vm1813_vm12, %v1801_v49  ;;  %v2250_v11 = vsel %vm2176_vm13, %v9724_v61, -inf  ;;  %v2016_v49 = vadd.f32 %v8316_v63, %v9708_v35 }
 0x256   : > { %1371 = vst.msk [vmem:[#allocation2 + $0xe0] sm:$0xff] %vm1342_vm8, %v1303_v57  ;;  %v9740_v57 = vmax.f32 %v2001_v37, 0.0 }
 0x258   : > { %v699_v40 = vpop.permute.xlu0 %698  ;;  %v907_v52 = vpop.permute.xlu1 %906 }
 0x259   : > { %764 = vst.msk [vmem:[#allocation2 + $0xf8] sm:$0xff] %vm732_vm4, %v699_v40  ;;  %v2181_v40 = vadd.f32 %v2180_v7, %v2179_v1  ;;  %vm2397_vm4 = vcmask 1041408  }
 0x25a   : > { %973 = vst.msk [vmem:[#allocation2 + $0xf0] sm:$0xff] %vm942_vm5, %v907_v52  ;;  %v8319_v52 = vpop.f32.mrf.mxu0 }
 0x25c   : > { %v1305_v12 = vpop.permute.xlu0 %1304  ;;  %v1434_v13 = vpop.permute.xlu1 %1433  ;;  %v1802_v4 = vld [vmem:[#allocation2 + $0xd8] sm:$0xff] }
 0x25d   : > { %1372 = vst.msk [vmem:[#allocation2 + $0xe8] sm:$0xff] %vm1342_vm8, %v1305_v12  ;;  %8345 = vmatmul.mubr.msk.f32.gmra.mxu0 %vm1813_vm12, %v1802_v4  ;;  %v2254_v12 = vsel %vm2176_vm13, %v9736_v8, -inf  ;;  %v2259_v4 = vmax.f32 %v2250_v11, %v2253_v9 }
 0x25e   : > { %1502 = vst.msk [vmem:[#allocation2 + $0xe0] sm:$0xff] %vm1473_vm9, %v1434_v13  ;;  %v2011_v13 = vadd.f32 %v9708_v35, %v2010_v10 }
 0x260   : > { %v909_v0 = vpop.permute.xlu0 %908  ;;  %v1038_v14 = vpop.permute.xlu1 %1037 }
 0x261   : > { %974 = vst.msk [vmem:[#allocation2 + $0xf8] sm:$0xff] %vm942_vm5, %v909_v0  ;;  %v2182_v0 = vsel %vm2176_vm13, %v9718_v51, 0.0  ;;  %vm2393_vm5 = vcmask 15360  }
 0x262   : > { %1104 = vst.msk [vmem:[#allocation2 + $0xf0] sm:$0xff] %vm1073_vm6, %v1038_v14  ;;  %v2184_v14 = vsel %vm2176_vm13, %v9740_v57, 0.0 }
 0x264   : > { %v1436_v15 = vpop.permute.xlu0 %1435  ;;  %v1569_v54 = vpop.permute.xlu1 %1568 }
 0x265   : > { %1503 = vst.msk [vmem:[#allocation2 + $0xe8] sm:$0xff] %vm1473_vm9, %v1436_v15  ;;  %v9750_v15 = vmax.f32 %v2016_v49, 0.0 }
 0x266   : > { %1637 = vst.msk [vmem:[#allocation2 + $0xe0] sm:$0xff] %vm1608_vm10, %v1569_v54  ;;  %v2257_v54 = vmax.f32 %v2254_v12, %v2259_v4 }
 0x267   : > { %v2190_v58 = vsel %vm2176_vm13, %v9750_v15, 0.0 }
 0x268   : > { %v1040_v60 = vpop.permute.xlu0 %1039  ;;  %v1173_v16 = vpop.permute.xlu1 %1172 }
 0x269   : > { %1105 = vst.msk [vmem:[#allocation2 + $0xf8] sm:$0xff] %vm1073_vm6, %v1040_v60  ;;  %v2183_v60 = vadd.f32 %v2182_v0, %v2181_v40  ;;  %vm14031_vm6 = vcmask 179200  }
 0x26a   : > { %1239 = vst.msk [vmem:[#allocation2 + $0xf0] sm:$0xff] %vm1208_vm7, %v1173_v16  ;;  %v2020_v16 = vpop.f32.mrf.mxu0 }
 0x26b   : > { %2557 = vst.msk [vmem:[#allocation5] sm:$0xff] %vm14031_vm6, %v13998_v18  ;;  %2558 = vst.msk [vmem:[#allocation5 + $0x8] sm:$0xff] %vm14031_vm6, %v13998_v18 }
 0x26c   : > { %v1571_v17 = vpop.permute.xlu0 %1570  ;;  %v1703_v20 = vpop.permute.xlu1 %1702  ;;  %2561 = vst.msk [vmem:[#allocation5 + $0x18] sm:$0xff] %vm14031_vm6, %v13998_v18  ;;  %2562 = vst.msk [vmem:[#allocation5 + $0x20] sm:$0xff] %vm14031_vm6, %v13998_v18 }
 0x26d   : > { %1638 = vst.msk [vmem:[#allocation2 + $0xe8] sm:$0xff] %vm1608_vm10, %v1571_v17  ;;  %v2252_v17 = vsel %vm2176_vm13, %v9740_v57, -inf }
 0x26e   : > { %1771 = vst.msk [vmem:[#allocation2 + $0xe0] sm:$0xff] %vm1742_vm11, %v1703_v20  ;;  %v9754_v20 = vmax.f32 %v2011_v13, 0.0 }
 0x270   : > { %v1175_v21 = vpop.permute.xlu0 %1174  ;;  %v1307_v26 = vpop.permute.xlu1 %1306 }
 0x271   : > { %1240 = vst.msk [vmem:[#allocation2 + $0xf8] sm:$0xff] %vm1208_vm7, %v1175_v21  ;;  %v2026_v21 = vadd.f32 %v8319_v52, %v9708_v35  ;;  %vm2559_vm7 = vcmask 177152  }
 0x272   : > { %1373 = vst.msk [vmem:[#allocation2 + $0xf0] sm:$0xff] %vm1342_vm8, %v1307_v26  ;;  %v2185_v26 = vadd.f32 %v2184_v14, %v2183_v60 }
 0x273   : > { %2560 = vst.msk [vmem:[#allocation5 + $0x10] sm:$0x3f] %vm2559_vm7, %v13998_v18  ;;  %2563 = vst.msk [vmem:[#allocation5 + $0x28] sm:$0x3f] %vm2559_vm7, %v13998_v18 }
 0x274   : > { %v1705_v28 = vpop.permute.xlu0 %1704  ;;  %v1309_v30 = vpop.permute.xlu1 %1308 }
 0x275   : > { %v1803_v32 = vld [vmem:[#allocation2 + $0xe0] sm:$0xff]  ;;  %1772 = vst.msk [vmem:[#allocation2 + $0xe8] sm:$0xff] %vm1742_vm11, %v1705_v28  ;;  %v8322_v28 = vpop.f32.mrf.mxu0 }
 0x276   : > { %1374 = vst.msk [vmem:[#allocation2 + $0xf8] sm:$0xff] %vm1342_vm8, %v1309_v30  ;;  %8347 = vmatprep.mubr.msk.f32.mxu0 %vm1813_vm12, %v1803_v32  ;;  %v2258_v30 = vsel %vm2176_vm13, %v9750_v15, -inf  ;;  %v2021_v32 = vadd.f32 %v9708_v35, %v2020_v16  ;;  %v2036_v29 = vadd.f32 %v8322_v28, %v9708_v35  ;;  %vm14040_vm8 = vcmask 154712  }
 0x278   : > { %v1438_v33 = vpop.permute.xlu0 %1437  ;;  %v1440_v34 = vpop.permute.xlu1 %1439  ;;  %v9778_v46 = vmax.f32 %v2036_v29, 0.0 }
 0x279   : > { %1504 = vst.msk [vmem:[#allocation2 + $0xf0] sm:$0xff] %vm1473_vm9, %v1438_v33  ;;  %1505 = vst.msk [vmem:[#allocation2 + $0xf8] sm:$0xff] %vm1473_vm9, %v1440_v34  ;;  %v2263_v33 = vmax.f32 %v2252_v17, %v2257_v54  ;;  %v2186_v34 = vsel %vm2176_vm13, %v9736_v8, 0.0  ;;  %vm14039_vm9 = vcmask 1041409  }
 0x27a   : > { %v2266_v63 = vsel %vm2176_vm13, %v9778_v46, -inf  ;;  %v2198_v0 = vsel %vm2176_vm13, %v9778_v46, 0.0 }
 0x27c   : > { %v1573_v36 = vpop.permute.xlu0 %1572  ;;  %v1575_v38 = vpop.permute.xlu1 %1574  ;;  %v1804_v23 = vld [vmem:[#allocation2 + $0xe8] sm:$0xff] }
 0x27d   : > { %1639 = vst.msk [vmem:[#allocation2 + $0xf0] sm:$0xff] %vm1608_vm10, %v1573_v36  ;;  %1640 = vst.msk [vmem:[#allocation2 + $0xf8] sm:$0xff] %vm1608_vm10, %v1575_v38  ;;  %8348 = vmatmul.mubr.msk.f32.gmra.mxu0 %vm1813_vm12, %v1804_v23  ;;  %v2188_v36 = vsel %vm2176_vm13, %v9754_v20, 0.0  ;;  %v9764_v38 = vmax.f32 %v2026_v21, 0.0  ;;  %v2261_v23 = vmax.f32 %v2258_v30, %v2263_v33  ;;  %vm14038_vm10 = vcmask 1042434  }
 0x27f   : > { %v2262_v44 = vsel %vm2176_vm13, %v9764_v38, -inf  ;;  %v2194_v5 = vsel %vm2176_vm13, %v9764_v38, 0.0 }
 0x280   : > { %v1707_v55 = vpop.permute.xlu0 %1706  ;;  %v1709_v39 = vpop.permute.xlu1 %1708 }
 0x281   : > { %1773 = vst.msk [vmem:[#allocation2 + $0xf0] sm:$0xff] %vm1742_vm11, %v1707_v55  ;;  %1774 = vst.msk [vmem:[#allocation2 + $0xf8] sm:$0xff] %vm1742_vm11, %v1709_v39  ;;  %v2187_v55 = vadd.f32 %v2186_v34, %v2185_v26  ;;  %v2030_v39 = vpop.f32.mrf.mxu0  ;;  %vm14037_vm11 = vcmask 1043459  }
 0x282   : > { %v2031_v22 = vadd.f32 %v9708_v35, %v2030_v39 }
 0x283   : > { %v2189_v25 = vadd.f32 %v2188_v36, %v2187_v55  ;;  %v8325_v43 = vpop.f32.mrf.mxu0 }
 0x284   : > { %v9782_v53 = vmax.f32 %v2031_v22, 0.0  ;;  %v2046_v56 = vadd.f32 %v8325_v43, %v9708_v35 }
 0x285   : > { %v2191_v47 = vadd.f32 %v2190_v58, %v2189_v25  ;;  %v2040_v31 = vpop.f32.mrf.mxu0 }
 0x286   : > { %v2041_v2 = vadd.f32 %v9708_v35, %v2040_v31  ;;  %v2196_v37 = vsel %vm2176_vm13, %v9782_v53, 0.0  ;;  %v9792_v6 = vmax.f32 %v2046_v56, 0.0  ;;  %v2264_v10 = vsel %vm2176_vm13, %v9782_v53, -inf }
 0x287   : > { %v8328_v62 = vpop.f32.mrf.mxu0 }
 0x288   : > { %v1805_v41 = vld [vmem:[#allocation2 + $0xf0] sm:$0xff]  ;;  %v1806_v42 = vld [vmem:[#allocation2 + $0xf8] sm:$0xff]  ;;  %v9796_v11 = vmax.f32 %v2041_v2, 0.0  ;;  %v2056_v49 = vadd.f32 %v8328_v62, %v9708_v35  ;;  %v2270_v12 = vsel %vm2176_vm13, %v9792_v6, -inf }
 0x289   : > { %8350 = vmatprep.mubr.msk.f32.mxu0 %vm1813_vm12, %v1805_v41  ;;  %v2256_v41 = vsel %vm2176_vm13, %v9754_v20, -inf  ;;  %v2050_v9 = vpop.f32.mrf.mxu0 }
 0x28a   : > { %8351 = vmatmul.mubr.msk.f32.gmra.mxu0 %vm1813_vm12, %v1806_v42  ;;  %v9768_v42 = vmax.f32 %v2021_v32, 0.0  ;;  %v2267_v19 = vmax.f32 %v2256_v41, %v2261_v23  ;;  %v2051_v13 = vadd.f32 %v9708_v35, %v2050_v9  ;;  %v2200_v14 = vsel %vm2176_vm13, %v9796_v11, 0.0 }
 0x28b   : > { %v8331_v52 = vpop.f32.mrf.mxu0  ;;  %v9806_v54 = vmax.f32 %v2056_v49, 0.0  ;;  %v2268_v21 = vsel %vm2176_vm13, %v9796_v11, -inf  ;;  %v2202_v23 = vsel %vm2176_vm13, %v9792_v6, 0.0  ;;  %vm14036_vm12 = vcmask 1044484  }
 0x28c   : > { %v2192_v45 = vsel %vm2176_vm13, %v9768_v42, 0.0  ;;  %v2265_v24 = vmax.f32 %v2262_v44, %v2267_v19  ;;  %v2260_v50 = vsel %vm2176_vm13, %v9768_v42, -inf  ;;  %v9810_v26 = vmax.f32 %v2051_v13, 0.0 }
 0x28d   : > { %v2193_v59 = vadd.f32 %v2192_v45, %v2191_v47  ;;  %v2060_v17 = vpop.f32.mrf.mxu0  ;;  %v2066_v28 = vadd.f32 %v8331_v52, %v9708_v35  ;;  %v2274_v33 = vsel %vm2176_vm13, %v9806_v54, -inf  ;;  %v2206_v31 = vsel %vm2176_vm13, %v9806_v54, 0.0 }
 0x28e   : > { %v2271_v3 = vmax.f32 %v2260_v50, %v2265_v24  ;;  %v2061_v34 = vadd.f32 %v9708_v35, %v2060_v17  ;;  %v2204_v55 = vsel %vm2176_vm13, %v9810_v26, 0.0  ;;  %v2272_v43 = vsel %vm2176_vm13, %v9810_v26, -inf }
 0x28f   : > { %v2195_v1 = vadd.f32 %v2194_v5, %v2193_v59  ;;  %v9820_v39 = vmax.f32 %v2066_v28, 0.0 }
 0x290   : > { %v2269_v7 = vmax.f32 %v2266_v63, %v2271_v3  ;;  %v9824_v44 = vmax.f32 %v2061_v34, 0.0 }
 0x291   : > { %v2197_v40 = vadd.f32 %v2196_v37, %v2195_v1  ;;  %v2278_v45 = vsel %vm2176_vm13, %v9820_v39, -inf  ;;  %v2210_v49 = vsel %vm2176_vm13, %v9820_v39, 0.0 }
 0x292   : > { %v2275_v4 = vmax.f32 %v2264_v10, %v2269_v7  ;;  %v2208_v50 = vsel %vm2176_vm13, %v9824_v44, 0.0  ;;  %v2276_v2 = vsel %vm2176_vm13, %v9824_v44, -inf }
 0x293   : > { %v2199_v16 = vadd.f32 %v2198_v0, %v2197_v40 }
 0x294   : > { %v2273_v60 = vmax.f32 %v2270_v12, %v2275_v4 }
 0x295   : > { %v2201_v30 = vadd.f32 %v2200_v14, %v2199_v16 }
 0x296   : > { %v2279_v36 = vmax.f32 %v2268_v21, %v2273_v60 }
 0x297   : > { %v2203_v29 = vadd.f32 %v2202_v23, %v2201_v30 }
 0x298   : > { %v2277_v41 = vmax.f32 %v2274_v33, %v2279_v36 }
 0x299   : > { %v2205_v19 = vadd.f32 %v2204_v55, %v2203_v29 }
 0x29a   : > { %v2283_v47 = vmax.f32 %v2272_v43, %v2277_v41 }
 0x29b   : > { %v2207_v62 = vadd.f32 %v2206_v31, %v2205_v19 }
 0x29c   : > { %v2281_v59 = vmax.f32 %v2278_v45, %v2283_v47 }
 0x29d   : > { %v8334_v32 = vpop.f32.mrf.mxu0  ;;  %v2209_v37 = vadd.f32 %v2208_v50, %v2207_v62 }
 0x29e   : > { %v2076_v22 = vadd.f32 %v8334_v32, %v9708_v35  ;;  %v2287_v10 = vmax.f32 %v2276_v2, %v2281_v59 }
 0x29f   : > { %v2070_v25 = vpop.f32.mrf.mxu0  ;;  %v2211_v13 = vadd.f32 %v2210_v49, %v2209_v37 }
 0x2a0   : > { %v2071_v24 = vadd.f32 %v9708_v35, %v2070_v25  ;;  %v9834_v56 = vmax.f32 %v2076_v22, 0.0 }
 0x2a2   : > { %v9838_v3 = vmax.f32 %v2071_v24, 0.0  ;;  %v2282_v1 = vsel %vm2176_vm13, %v9834_v56, -inf  ;;  %v2214_v32 = vsel %vm2176_vm13, %v9834_v56, 0.0 }
 0x2a3   : > { %v2285_v12 = vmax.f32 %v2282_v1, %v2287_v10 }
 0x2a4   : > { %v2212_v40 = vsel %vm2176_vm13, %v9838_v3, 0.0  ;;  %v2280_v0 = vsel %vm2176_vm13, %v9838_v3, -inf }
 0x2a5   : > { %v2213_v16 = vadd.f32 %v2212_v40, %v2211_v13  ;;  %v2291_v30 = vmax.f32 %v2280_v0, %v2285_v12 }
 0x2a7   : > { %v2215_v23 = vadd.f32 %v2214_v32, %v2213_v16 }
 0x2bd   : > { %v8337_v58 = vpop.f32.mrf.mxu0 }
 0x2be   : > { %v2086_v5 = vadd.f32 %v8337_v58, %v9708_v35 }
 0x2bf   : > { %v2080_v63 = vpop.f32.mrf.mxu0 }
 0x2c0   : > { %v2081_v9 = vadd.f32 %v9708_v35, %v2080_v63  ;;  %v9848_v52 = vmax.f32 %v2086_v5, 0.0 }
 0x2c2   : > { %v9852_v14 = vmax.f32 %v2081_v9, 0.0  ;;  %v2286_v21 = vsel %vm2176_vm13, %v9848_v52, -inf  ;;  %v2218_v24 = vsel %vm2176_vm13, %v9848_v52, 0.0 }
 0x2c3   : > { %v2289_v36 = vmax.f32 %v2286_v21, %v2291_v30 }
 0x2c4   : > { %v2216_v33 = vsel %vm2176_vm13, %v9852_v14, 0.0  ;;  %v2284_v41 = vsel %vm2176_vm13, %v9852_v14, -inf }
 0x2c5   : > { %v2217_v43 = vadd.f32 %v2216_v33, %v2215_v23  ;;  %v2295_v45 = vmax.f32 %v2284_v41, %v2289_v36 }
 0x2c7   : > { %v2219_v59 = vadd.f32 %v2218_v24, %v2217_v43 }
 0x2dd   : > { %v8340_v7 = vpop.f32.mrf.mxu0 }
 0x2de   : > { %v2096_v60 = vadd.f32 %v8340_v7, %v9708_v35 }
 0x2df   : > { %v2090_v4 = vpop.f32.mrf.mxu0 }
 0x2e0   : > { %v2091_v28 = vadd.f32 %v9708_v35, %v2090_v4  ;;  %v9862_v34 = vmax.f32 %v2096_v60, 0.0 }
 0x2e2   : > { %v9866_v29 = vmax.f32 %v2091_v28, 0.0  ;;  %v2290_v19 = vsel %vm2176_vm13, %v9862_v34, -inf  ;;  %v2222_v10 = vsel %vm2176_vm13, %v9862_v34, 0.0 }
 0x2e3   : > { %v2293_v50 = vmax.f32 %v2290_v19, %v2295_v45 }
 0x2e4   : > { %v2220_v47 = vsel %vm2176_vm13, %v9866_v29, 0.0  ;;  %v2288_v63 = vsel %vm2176_vm13, %v9866_v29, -inf }
 0x2e5   : > { %v2221_v37 = vadd.f32 %v2220_v47, %v2219_v59  ;;  %v2299_v9 = vmax.f32 %v2288_v63, %v2293_v50 }
 0x2e7   : > { %v2223_v4 = vadd.f32 %v2222_v10, %v2221_v37 }
 0x2fd   : > { %v8343_v17 = vpop.f32.mrf.mxu0 }
 0x2fe   : > { %v2106_v25 = vadd.f32 %v8343_v17, %v9708_v35 }
 0x2ff   : > { %v2100_v55 = vpop.f32.mrf.mxu0 }
 0x300   : > { %v2101_v58 = vadd.f32 %v9708_v35, %v2100_v55  ;;  %v9876_v31 = vmax.f32 %v2106_v25, 0.0 }
 0x302   : > { %v9880_v2 = vmax.f32 %v2101_v58, 0.0  ;;  %v2294_v7 = vsel %vm2176_vm13, %v9876_v31, -inf  ;;  %v2226_v33 = vsel %vm2176_vm13, %v9876_v31, 0.0 }
 0x303   : > { %v2297_v13 = vmax.f32 %v2294_v7, %v2299_v9 }
 0x304   : > { %v2224_v49 = vsel %vm2176_vm13, %v9880_v2, 0.0  ;;  %v2292_v0 = vsel %vm2176_vm13, %v9880_v2, -inf }
 0x305   : > { %v2225_v21 = vadd.f32 %v2224_v49, %v2223_v4  ;;  %v2303_v32 = vmax.f32 %v2292_v0, %v2297_v13 }
 0x307   : > { %v2227_v41 = vadd.f32 %v2226_v33, %v2225_v21 }
 0x31d   : > { %v8346_v22 = vpop.f32.mrf.mxu0 }
 0x31e   : > { %v2116_v5 = vadd.f32 %v8346_v22, %v9708_v35 }
 0x31f   : > { %v2110_v62 = vpop.f32.mrf.mxu0 }
 0x320   : > { %v2111_v1 = vadd.f32 %v9708_v35, %v2110_v62  ;;  %v9890_v40 = vmax.f32 %v2116_v5, 0.0 }
 0x322   : > { %v9894_v60 = vmax.f32 %v2111_v1, 0.0  ;;  %v2298_v28 = vsel %vm2176_vm13, %v9890_v40, -inf  ;;  %v2230_v45 = vsel %vm2176_vm13, %v9890_v40, 0.0 }
 0x323   : > { %v2301_v55 = vmax.f32 %v2298_v28, %v2303_v32 }
 0x324   : > { %v2228_v36 = vsel %vm2176_vm13, %v9894_v60, 0.0  ;;  %v2296_v25 = vsel %vm2176_vm13, %v9894_v60, -inf }
 0x325   : > { %v2229_v22 = vadd.f32 %v2228_v36, %v2227_v41  ;;  %v2308_v58 = vmax.f32 %v2301_v55, %v2296_v25 }
 0x327   : > { %v2231_v50 = vadd.f32 %v2230_v45, %v2229_v22 }
 0x33d   : > { %v8349_v12 = vpop.f32.mrf.mxu0 }
 0x33e   : > { %v2126_v16 = vadd.f32 %v8349_v12, %v9708_v35 }
 0x33f   : > { %v2120_v17 = vpop.f32.mrf.mxu0 }
 0x340   : > { %v2121_v30 = vadd.f32 %v9708_v35, %v2120_v17  ;;  %v9904_v23 = vmax.f32 %v2126_v16, 0.0 }
 0x342   : > { %v9908_v43 = vmax.f32 %v2121_v30, 0.0  ;;  %v2302_v19 = vsel %vm2176_vm13, %v9904_v23, -inf  ;;  %v2234_v10 = vsel %vm2176_vm13, %v9904_v23, 0.0 }
 0x343   : > { %v2307_v47 = vmax.f32 %v2302_v19, %v2308_v58 }
 0x344   : > { %v2232_v24 = vsel %vm2176_vm13, %v9908_v43, 0.0  ;;  %v2300_v62 = vsel %vm2176_vm13, %v9908_v43, -inf }
 0x345   : > { %v2233_v5 = vadd.f32 %v2232_v24, %v2231_v50  ;;  %v2305_v9 = vmax.f32 %v2300_v62, %v2307_v47  ;;  %v2175_v50 = vld [vmem:[%s13989_s4] sm:$0x3] }
 0x347   : > { %v2235_v4 = vadd.f32 %v2234_v10, %v2233_v5 }
 0x34a   : > { %v8352_v59 = vpop.f32.mrf.mxu0 }
 0x34b   : > { %v2136_v63 = vadd.f32 %v8352_v59, %v9708_v35 }
 0x34c   : > { %v2130_v37 = vpop.f32.mrf.mxu0 }
 0x34d   : > { %v9919_v7 = vmax.f32 %v2136_v63, 0.0  ;;  %v2131_v1 = vadd.f32 %v9708_v35, %v2130_v37 }
 0x34f   : > { %v2306_v49 = vsel %vm2176_vm13, %v9919_v7, -inf  ;;  %v9926_v12 = vmax.f32 %v2131_v1, 0.0  ;;  %v2238_v35 = vsel %vm2176_vm13, %v9919_v7, 0.0 }
 0x350   : > { %v2309_v13 = vmax.f32 %v2305_v9, %v2306_v49 }
 0x351   : > { %v2236_v0 = vsel %vm2176_vm13, %v9926_v12, 0.0  ;;  %v2304_v16 = vsel %vm2176_vm13, %v9926_v12, -inf }
 0x352   : > { %v2237_v17 = vadd.f32 %v2236_v0, %v2235_v4  ;;  %v2310_v21 = vmax.f32 %v2304_v16, %v2309_v13  ;;  %v2481_v16 = vlaneseq }
 0x354   : > { %v2239_v28 = vadd.f32 %v2238_v35, %v2237_v17  ;;  %v2311_v30 = vrot.slane %v2310_v21, 4  ;;  %v9942_v17 = vshrl.u32 %v2481_v16, 7 }
 0x356   : > { %v2240_v32 = vrot.slane %v2239_v28, 4  ;;  %v2312_v33 = vmax.f32 %v2310_v21, %v2311_v30  ;;  %v9945_v21 = vsub.s32 0, %v9942_v17 }
 0x358   : > { %v2241_v36 = vadd.f32 %v2240_v32, %v2239_v28  ;;  %v2313_v55 = vrot.slane %v2312_v33, 2  ;;  %14134 = vst [vmem:[#allocation7_spill] sm:$0xff] %v9945_v21 }
 0x35a   : > { %v2242_v41 = vrot.slane %v2241_v36, 2  ;;  %v2314_v25 = vmax.f32 %v2312_v33, %v2313_v55 }
 0x35c   : > { %v2243_v22 = vadd.f32 %v2242_v41, %v2241_v36  ;;  %v2315_v58 = vrot.slane %v2314_v25, 1 }
 0x35e   : > { %v2244_v19 = vrot.slane %v2243_v22, 1  ;;  %v2316_v47 = vmax.f32 %v2314_v25, %v2315_v58 }
 0x360   : > { %v2245_v45 = vadd.f32 %v2244_v19, %v2243_v22 }
 0x362   : > { %v2247_v24 = vmul.f32 0.00390625, %v2245_v45 }
 0x364   : > { %v2318_v59 = vsel %vm14016_vm15, %v2247_v24, %v2316_v47  ;;  %vm14033_vm15 = vcmask 1047559  }
 0x365   : > { %8362 = vmatmul.mubr.msk.f32.vlgmr.msra.gmra.mxu1 %vm2176_vm13, %v2318_v59 }
 0x366   : > { %8365 = vmatpush3.msk.msra.mxu1 %vm2397_vm4, %v2175_v50  ;;  %8366 = vmatprep.mubr.msk.f32.mxu1 %vm14017_vm14, %v13998_v18  ;;  %vm14035_vm4 = vcmask 1045509   ;;  %vm14032_vm14 = vcmask 154648  }
 0x425   : > { %v2388_v62 = vpop.f32.mrf.mxu1 }
 0x426   : > { %v2392_v63 = vmax.f32 %v2388_v62, 0.0 }
 0x427   : > { %v8363_v5 = vpop.f32.mrf.mxu1 }
 0x428   : > { %8367 = vmatmul.mubr.msk.f32.vlgmr.msra.gmra.mxu1 %vm2393_vm5, %v2392_v63  ;;  %vm14034_vm5 = vcmask 1046534  }
 0x4e8   : > { %v2467_v37 = vpop.f32.mrf.mxu1 }
 0x4e9   : > { %v2472_v1 = vrot.slane %v2467_v37, 1 }
 0x4ea   : > { %v8368_v9 = vpop.f32.mrf.mxu1 }
 0x4eb   : > { %v2474_v10 = vadd.f32 %v2472_v1, %v2467_v37 }
 0x4ed   : > { %v2475_v49 = vsub.f32 0.0, %v2474_v10 }
 0x4ef   : > { %v2476_v13 = vmul.f32 1.442695, %v2475_v49 }
 0x4f1   : > { %8545 = vpow2.f32 %v2476_v13 }
 0x4fe   : > { %v8546_v4 = vpop.eup %8545 }
 0x4ff   : > { %v2478_v0 = vadd.f32 1.0, %v8546_v4 }
 0x501   : > { %8547 = vrcp.f32 %v2478_v0 }
 0x50e   : > { %v8548_v35 = vpop.eup %8547 }
 0x50f   : > { %v9948_v28 = vrot.slane %v8548_v35, %v9945_v21 }
 0x511   : > { %v9952_v30 = vmul.f32 %v9948_v28, %v9715_v27  ;;  %v9956_v32 = vmul.f32 %v9948_v28, %v9713_v48  ;;  %v9960_v33 = vmul.f32 %v9948_v28, %v9724_v61  ;;  %v9964_v36 = vmul.f32 %v9948_v28, %v9824_v44 }
 0x512   : > { %v9972_v48 = vmul.f32 %v9948_v28, %v9718_v51  ;;  %v9976_v27 = vmul.f32 %v9948_v28, %v9838_v3  ;;  %v9984_v25 = vmul.f32 %v9948_v28, %v9740_v57  ;;  %v9988_v51 = vmul.f32 %v9948_v28, %v9820_v39 }
 0x513   : > { %14135 = vst [vmem:[#allocation8_spill] sm:$0xff] %v9952_v30  ;;  %14136 = vst [vmem:[#allocation9_spill] sm:$0xff] %v9956_v32  ;;  %v2567_v55 = vsel %vm2176_vm13, %v9956_v32, 0.0  ;;  %v2564_v41 = vsel %vm2176_vm13, %v9952_v30, 0.0  ;;  %v2612_v61 = vsel %vm2176_vm13, %v9964_v36, 0.0  ;;  %v2570_v44 = vsel %vm2176_vm13, %v9960_v33, 0.0 }
 0x514   : > { %14137 = vst [vmem:[#allocation10_spill] sm:$0xff] %v9960_v33  ;;  %2568 = vadd.xlane.f32.xlu1 %v2567_v55  ;;  %2565 = vadd.xlane.f32.xlu0 %v2564_v41  ;;  %14138 = vst [vmem:[#allocation11_spill] sm:$0xff] %v9972_v48  ;;  %v2618_v3 = vsel %vm2176_vm13, %v9976_v27, 0.0  ;;  %v2573_v22 = vsel %vm2176_vm13, %v9972_v48, 0.0  ;;  %v9996_v19 = vmul.f32 %v9948_v28, %v9834_v56  ;;  %v2576_v39 = vsel %vm2176_vm13, %v9984_v25, 0.0 }
 0x515   : > { %14139 = vst [vmem:[#allocation12_spill] sm:$0xff] %v9984_v25  ;;  %v10000_v57 = vmul.f32 %v9948_v28, %v9852_v14  ;;  %v2615_v58 = vsel %vm2176_vm13, %v9988_v51, 0.0  ;;  %v10008_v45 = vmul.f32 %v9948_v28, %v9736_v8  ;;  %v10012_v56 = vmul.f32 %v9948_v28, %v9754_v20 }
 0x516   : > { %v2621_v24 = vsel %vm2176_vm13, %v9996_v19, 0.0  ;;  %v10020_v47 = vmul.f32 %v9948_v28, %v9848_v52  ;;  %v10024_v8 = vmul.f32 %v9948_v28, %v9866_v29  ;;  %v10032_v59 = vmul.f32 %v9948_v28, %v9750_v15 }
 0x517   : > { %14140 = vst [vmem:[#allocation13_spill] sm:$0xff] %v10008_v45  ;;  %14141 = vst [vmem:[#allocation14_spill] sm:$0xff] %v10012_v56  ;;  %v2624_v14 = vsel %vm2176_vm13, %v10000_v57, 0.0  ;;  %v2582_v20 = vsel %vm2176_vm13, %v10012_v56, 0.0  ;;  %v2579_v50 = vsel %vm2176_vm13, %v10008_v45, 0.0  ;;  %v10036_v52 = vmul.f32 %v9948_v28, %v9768_v42 }
 0x518   : > { %2613 = vadd.xlane.f32.xlu1 %v2612_v61  ;;  %2571 = vadd.xlane.f32.xlu0 %v2570_v44  ;;  %14142 = vst [vmem:[#allocation15_spill] sm:$0xff] %v10032_v59  ;;  %v2630_v29 = vsel %vm2176_vm13, %v10024_v8, 0.0  ;;  %v2627_v62 = vsel %vm2176_vm13, %v10020_v47, 0.0  ;;  %v10044_v63 = vmul.f32 %v9948_v28, %v9862_v34  ;;  %v10048_v15 = vmul.f32 %v9948_v28, %v9880_v2 }
 0x519   : > { %14143 = vst [vmem:[#allocation16_spill] sm:$0xff] %v10036_v52  ;;  %v2588_v42 = vsel %vm2176_vm13, %v10036_v52, 0.0  ;;  %v2585_v5 = vsel %vm2176_vm13, %v10032_v59, 0.0  ;;  %v10056_v37 = vmul.f32 %v9948_v28, %v9764_v38  ;;  %v10060_v34 = vmul.f32 %v9948_v28, %v9782_v53 }
 0x51a   : > { %v2636_v2 = vsel %vm2176_vm13, %v10048_v15, 0.0  ;;  %v2633_v1 = vsel %vm2176_vm13, %v10044_v63, 0.0  ;;  %v10068_v9 = vmul.f32 %v9948_v28, %v9876_v31  ;;  %v10072_v38 = vmul.f32 %v9948_v28, %v9894_v60 }
 0x51b   : > { %14144 = vst [vmem:[#allocation17_spill] sm:$0xff] %v10056_v37  ;;  %14145 = vst [vmem:[#allocation18_spill] sm:$0xff] %v10060_v34  ;;  %v2594_v53 = vsel %vm2176_vm13, %v10060_v34, 0.0  ;;  %v2591_v10 = vsel %vm2176_vm13, %v10056_v37, 0.0  ;;  %v10080_v49 = vmul.f32 %v9948_v28, %v9778_v46  ;;  %v10088_v60 = vmul.f32 %v9948_v28, %v9890_v40 }
 0x51c   : > { %2619 = vadd.xlane.f32.xlu1 %v2618_v3  ;;  %2574 = vadd.xlane.f32.xlu0 %v2573_v22  ;;  %v2642_v31 = vsel %vm2176_vm13, %v10072_v38, 0.0  ;;  %v2639_v13 = vsel %vm2176_vm13, %v10068_v9, 0.0  ;;  %v2900_v4 = vsel %vm2176_vm13, %v9952_v30, -inf  ;;  %v10096_v46 = vmul.f32 %v9948_v28, %v9796_v11 }
 0x51d   : > { %14146 = vst [vmem:[#allocation19_spill] sm:$0xff] %v10080_v49  ;;  %v2597_v0 = vsel %vm2176_vm13, %v10080_v49, 0.0  ;;  %v2906_v35 = vsel %vm2176_vm13, %v9960_v33, -inf  ;;  %v2645_v55 = vsel %vm2176_vm13, %v10088_v60, 0.0  ;;  %v10104_v40 = vmul.f32 %v9948_v28, %v9908_v43 }
 0x51e   : > { %14147 = vst [vmem:[#allocation20_spill] sm:$0xff] %v10096_v46  ;;  %v2600_v41 = vsel %vm2176_vm13, %v10096_v46, 0.0  ;;  %v2903_v61 = vsel %vm2176_vm13, %v9956_v32, -inf  ;;  %v10112_v11 = vmul.f32 %v9948_v28, %v9792_v6  ;;  %v2909_v3 = vsel %vm2176_vm13, %v9972_v48, -inf }
 0x51f   : > { %v2648_v44 = vsel %vm2176_vm13, %v10104_v40, 0.0  ;;  %v10120_v43 = vmul.f32 %v9948_v28, %v9810_v26  ;;  %v10124_v22 = vmul.f32 %v9948_v28, %v9904_v23  ;;  %v2912_v6 = vsel %vm2176_vm13, %v9984_v25, -inf }
 0x520   : > { %2577 = vadd.xlane.f32.xlu1 %v2576_v39  ;;  %2616 = vadd.xlane.f32.xlu0 %v2615_v58  ;;  %14148 = vst [vmem:[#allocation21_spill] sm:$0xff] %v10112_v11  ;;  %v2603_v39 = vsel %vm2176_vm13, %v10112_v11, 0.0  ;;  %v10132_v58 = vmul.f32 %v9948_v28, %v9926_v12  ;;  %v10140_v23 = vmul.f32 %v9948_v28, %v9806_v54  ;;  %v2924_v54 = vsel %vm2176_vm13, %v10036_v52, -inf }
 0x521   : > { %14149 = vst [vmem:[#allocation22_spill] sm:$0xff] %v10120_v43  ;;  %v2606_v26 = vsel %vm2176_vm13, %v10120_v43, 0.0  ;;  %v10148_v12 = vmul.f32 %v9948_v28, %v9919_v7  ;;  %v2930_v7 = vsel %vm2176_vm13, %v10060_v34, -inf  ;;  %v2921_v28 = vsel %vm2176_vm13, %v10032_v59, -inf }
 0x522   : > { %14150 = vst [vmem:[#allocation23_spill] sm:$0xff] %v10140_v23 }
 0x524   : > { %2625 = vadd.xlane.f32.xlu1 %v2624_v14  ;;  %2622 = vadd.xlane.f32.xlu0 %v2621_v24  ;;  %v2651_v14 = vsel %vm2176_vm13, %v10124_v22, 0.0  ;;  %v2654_v24 = vsel %vm2176_vm13, %v10132_v58, 0.0 }
 0x528   : > { %2583 = vadd.xlane.f32.xlu1 %v2582_v20  ;;  %2580 = vadd.xlane.f32.xlu0 %v2579_v50  ;;  %v2915_v20 = vsel %vm2176_vm13, %v10008_v45, -inf  ;;  %v2918_v50 = vsel %vm2176_vm13, %v10012_v56, -inf }
 0x52c   : > { %2631 = vadd.xlane.f32.xlu1 %v2630_v29  ;;  %2628 = vadd.xlane.f32.xlu0 %v2627_v62  ;;  %v2609_v29 = vsel %vm2176_vm13, %v10140_v23, 0.0  ;;  %v2657_v62 = vsel %vm2176_vm13, %v10148_v12, 0.0 }
 0x530   : > { %2589 = vadd.xlane.f32.xlu1 %v2588_v42  ;;  %2586 = vadd.xlane.f32.xlu0 %v2585_v5  ;;  %v2948_v42 = vsel %vm2176_vm13, %v9964_v36, -inf  ;;  %v2927_v5 = vsel %vm2176_vm13, %v10056_v37, -inf }
 0x534   : > { %2637 = vadd.xlane.f32.xlu1 %v2636_v2  ;;  %2634 = vadd.xlane.f32.xlu0 %v2633_v1  ;;  %v2954_v2 = vsel %vm2176_vm13, %v9976_v27, -inf  ;;  %v2933_v1 = vsel %vm2176_vm13, %v10080_v49, -inf }
 0x538   : > { %2595 = vadd.xlane.f32.xlu1 %v2594_v53  ;;  %2592 = vadd.xlane.f32.xlu0 %v2591_v10  ;;  %v2936_v53 = vsel %vm2176_vm13, %v10096_v46, -inf  ;;  %v2951_v10 = vsel %vm2176_vm13, %v9988_v51, -inf }
 0x53c   : > { %2643 = vadd.xlane.f32.xlu1 %v2642_v31  ;;  %2640 = vadd.xlane.f32.xlu0 %v2639_v13  ;;  %v2960_v31 = vsel %vm2176_vm13, %v10000_v57, -inf  ;;  %v2957_v13 = vsel %vm2176_vm13, %v9996_v19, -inf }
 0x540   : > { %2901 = vmax.xlane.f32.xlu1 %v2900_v4  ;;  %2598 = vadd.xlane.f32.xlu0 %v2597_v0  ;;  %v2942_v4 = vsel %vm2176_vm13, %v10120_v43, -inf  ;;  %v2939_v0 = vsel %vm2176_vm13, %v10112_v11, -inf }
 0x544   : > { %2907 = vmax.xlane.f32.xlu1 %v2906_v35  ;;  %2646 = vadd.xlane.f32.xlu0 %v2645_v55  ;;  %v2966_v35 = vsel %vm2176_vm13, %v10024_v8, -inf  ;;  %v2963_v55 = vsel %vm2176_vm13, %v10020_v47, -inf }
 0x548   : > { %2601 = vadd.xlane.f32.xlu1 %v2600_v41  ;;  %2904 = vmax.xlane.f32.xlu0 %v2903_v61  ;;  %v2972_v41 = vsel %vm2176_vm13, %v10048_v15, -inf  ;;  %v2945_v61 = vsel %vm2176_vm13, %v10140_v23, -inf }
 0x54c   : > { %2649 = vadd.xlane.f32.xlu1 %v2648_v44  ;;  %2910 = vmax.xlane.f32.xlu0 %v2909_v3  ;;  %v2978_v44 = vsel %vm2176_vm13, %v10072_v38, -inf  ;;  %v2969_v3 = vsel %vm2176_vm13, %v10044_v63, -inf }
 0x550   : > { %2913 = vmax.xlane.f32.xlu1 %v2912_v6  ;;  %2604 = vadd.xlane.f32.xlu0 %v2603_v39  ;;  %v2984_v6 = vsel %vm2176_vm13, %v10104_v40, -inf  ;;  %v2975_v39 = vsel %vm2176_vm13, %v10068_v9, -inf }
 0x554   : > { %2607 = vadd.xlane.f32.xlu1 %v2606_v26  ;;  %2652 = vadd.xlane.f32.xlu0 %v2651_v14  ;;  %v2990_v26 = vsel %vm2176_vm13, %v10132_v58, -inf  ;;  %v2981_v14 = vsel %vm2176_vm13, %v10088_v60, -inf }
 0x558   : > { %2655 = vadd.xlane.f32.xlu1 %v2654_v24  ;;  %2916 = vmax.xlane.f32.xlu0 %v2915_v20  ;;  %v2987_v24 = vsel %vm2176_vm13, %v10124_v22, -inf  ;;  %v2993_v20 = vsel %vm2176_vm13, %v10148_v12, -inf }
 0x55c   : > { %2919 = vmax.xlane.f32.xlu1 %v2918_v50  ;;  %2610 = vadd.xlane.f32.xlu0 %v2609_v29 }
 0x560   : > { %2925 = vmax.xlane.f32.xlu1 %v2924_v54  ;;  %2658 = vadd.xlane.f32.xlu0 %v2657_v62 }
 0x564   : > { %2931 = vmax.xlane.f32.xlu1 %v2930_v7  ;;  %2922 = vmax.xlane.f32.xlu0 %v2921_v28 }
 0x568   : > { %2949 = vmax.xlane.f32.xlu1 %v2948_v42  ;;  %2928 = vmax.xlane.f32.xlu0 %v2927_v5 }
 0x56c   : > { %2955 = vmax.xlane.f32.xlu1 %v2954_v2  ;;  %2934 = vmax.xlane.f32.xlu0 %v2933_v1 }
 0x570   : > { %2937 = vmax.xlane.f32.xlu1 %v2936_v53  ;;  %2952 = vmax.xlane.f32.xlu0 %v2951_v10 }
 0x574   : > { %2961 = vmax.xlane.f32.xlu1 %v2960_v31  ;;  %2958 = vmax.xlane.f32.xlu0 %v2957_v13 }
 0x578   : > { %2943 = vmax.xlane.f32.xlu1 %v2942_v4  ;;  %2940 = vmax.xlane.f32.xlu0 %v2939_v0 }
 0x57c   : > { %2967 = vmax.xlane.f32.xlu1 %v2966_v35  ;;  %2964 = vmax.xlane.f32.xlu0 %v2963_v55 }
 0x580   : > { %2973 = vmax.xlane.f32.xlu1 %v2972_v41  ;;  %2946 = vmax.xlane.f32.xlu0 %v2945_v61 }
 0x584   : > { %2979 = vmax.xlane.f32.xlu1 %v2978_v44  ;;  %2970 = vmax.xlane.f32.xlu0 %v2969_v3 }
 0x588   : > { %2985 = vmax.xlane.f32.xlu1 %v2984_v6  ;;  %2976 = vmax.xlane.f32.xlu0 %v2975_v39 }
 0x58c   : > { %2991 = vmax.xlane.f32.xlu1 %v2990_v26  ;;  %2982 = vmax.xlane.f32.xlu0 %v2981_v14  ;;  %v2726_v26 = vand.u32 127, %v2481_v16 }
 0x58e   : > { %v2732_v18 = vadd.s32 4294967285, %v2726_v26 }
 0x590   : > { %2988 = vmax.xlane.f32.xlu0 %v2987_v24  ;;  %v10243_v34 = vsub.s32 %v2732_v18, %v9942_v17 }
 0x592   : > { %14152 = vst [vmem:[#allocation25_spill] sm:$0xff] %v10243_v34 }
 0x594   : > { %2994 = vmax.xlane.f32.xlu0 %v2993_v20  ;;  %v2727_v20 = vadd.s32 4294967293, %v2726_v26 }
 0x596   : > { %v10240_v11 = vsub.s32 %v2727_v20, %v9942_v17 }
 0x598   : > { %14151 = vst [vmem:[#allocation24_spill] sm:$0xff] %v10240_v11 }
 0x59d   : > { %v2569_v50 = vpop.xlane.xlu1 %2568  ;;  %v2566_v29 = vpop.xlane.xlu0 %2565 }
 0x59e   : > { %v2662_v49 = vmul.f32 0.03125, %v2569_v50  ;;  %v2661_v52 = vmul.f32 0.03125, %v2566_v29 }
 0x5a0   : > { %v2731_v20 = vrot.slane %v2661_v52, %v10240_v11 }
 0x5a1   : > { %v2614_v54 = vpop.xlane.xlu1 %2613  ;;  %v2572_v62 = vpop.xlane.xlu0 %2571 }
 0x5a2   : > { %v2663_v16 = vmul.f32 0.03125, %v2572_v62  ;;  %v2677_v18 = vmul.f32 0.03125, %v2614_v54 }
 0x5a4   : > { %v2742_v50 = vrot.slane %v2663_v16, %v10240_v11 }
 0x5a5   : > { %v2620_v7 = vpop.xlane.xlu1 %2619  ;;  %v2575_v28 = vpop.xlane.xlu0 %2574 }
 0x5a6   : > { %v2664_v46 = vmul.f32 0.03125, %v2575_v28  ;;  %v2679_v56 = vmul.f32 0.03125, %v2620_v7  ;;  %v2736_v28 = vrot.slane %v2662_v49, %v10243_v34 }
 0x5a8   : > { %v2746_v45 = vrot.slane %v2664_v46, %v10243_v34  ;;  %v2814_v62 = vrot.slane %v2679_v56, %v10240_v11  ;;  %v2738_v54 = vsel %vm14040_vm8, %v2736_v28, %v2731_v20  ;;  %v2805_v56 = vrot.slane %v2677_v18, %v10240_v11 }
 0x5a9   : > { %v2578_v42 = vpop.xlane.xlu1 %2577  ;;  %v2617_v5 = vpop.xlane.xlu0 %2616 }
 0x5aa   : > { %v2678_v33 = vmul.f32 0.03125, %v2617_v5  ;;  %v2665_v48 = vmul.f32 0.03125, %v2578_v42  ;;  %v2747_v49 = vsel %vm14040_vm8, %v2746_v45, %v2742_v50 }
 0x5ab   : > { %v2875_v32 = vsel %vm14039_vm9, %v2747_v49, %v2738_v54 }
 0x5ac   : > { %v2809_v52 = vrot.slane %v2678_v33, %v10243_v34 }
 0x5ad   : > { %v2626_v2 = vpop.xlane.xlu1 %2625  ;;  %v2623_v1 = vpop.xlane.xlu0 %2622 }
 0x5ae   : > { %v2680_v37 = vmul.f32 0.03125, %v2623_v1  ;;  %v2681_v42 = vmul.f32 0.03125, %v2626_v2  ;;  %v2810_v28 = vsel %vm14040_vm8, %v2809_v52, %v2805_v56 }
 0x5b0   : > { %v2818_v29 = vrot.slane %v2680_v37, %v10243_v34 }
 0x5b1   : > { %v2584_v53 = vpop.xlane.xlu1 %2583  ;;  %v2581_v10 = vpop.xlane.xlu0 %2580 }
 0x5b2   : > { %v2666_v59 = vmul.f32 0.03125, %v2581_v10  ;;  %v2751_v10 = vrot.slane %v2665_v48, %v10240_v11  ;;  %v2819_v16 = vsel %vm14040_vm8, %v2818_v29, %v2814_v62  ;;  %v2823_v48 = vrot.slane %v2681_v42, %v10240_v11 }
 0x5b4   : > { %v2755_v7 = vrot.slane %v2666_v59, %v10243_v34  ;;  %v2667_v59 = vmul.f32 0.03125, %v2584_v53  ;;  %v2888_v53 = vsel %vm14039_vm9, %v2819_v16, %v2810_v28 }
 0x5b5   : > { %v2632_v31 = vpop.xlane.xlu1 %2631  ;;  %v2629_v13 = vpop.xlane.xlu0 %2628 }
 0x5b6   : > { %v2682_v37 = vmul.f32 0.03125, %v2629_v13  ;;  %v2756_v45 = vsel %vm14040_vm8, %v2755_v7, %v2751_v10  ;;  %v2683_v33 = vmul.f32 0.03125, %v2632_v31  ;;  %v2760_v31 = vrot.slane %v2667_v59, %v10240_v11 }
 0x5b8   : > { %v2832_v49 = vrot.slane %v2683_v33, %v10240_v11 }
 0x5b9   : > { %v2590_v4 = vpop.xlane.xlu1 %2589  ;;  %v2587_v0 = vpop.xlane.xlu0 %2586 }
 0x5ba   : > { %v2668_v5 = vmul.f32 0.03125, %v2587_v0  ;;  %v2669_v2 = vmul.f32 0.03125, %v2590_v4  ;;  %v2877_v4 = vsel %vm14038_vm10, %v2756_v45, %v2875_v32 }
 0x5bc   : > { %v2764_v13 = vrot.slane %v2668_v5, %v10243_v34 }
 0x5bd   : > { %v10218_v35 = vpop.xlane.xlu1 %2637  ;;  %v10220_v55 = vpop.xlane.xlu0 %2634 }
 0x5be   : > { %v2684_v18 = vmul.f32 0.03125, %v10220_v55  ;;  %v2685_v32 = vmul.f32 0.03125, %v10218_v35 }
 0x5c0   : > { %v2836_v10 = vrot.slane %v2684_v18, %v10243_v34 }
 0x5c1   : > { %v10222_v41 = vpop.xlane.xlu1 %2595  ;;  %v2593_v61 = vpop.xlane.xlu0 %2592 }
 0x5c2   : > { %v2670_v30 = vmul.f32 0.03125, %v2593_v61  ;;  %v2827_v61 = vrot.slane %v2682_v37, %v10243_v34  ;;  %v2671_v62 = vmul.f32 0.03125, %v10222_v41 }
 0x5c4   : > { %v2773_v7 = vrot.slane %v2670_v30, %v10243_v34  ;;  %v2828_v54 = vsel %vm14040_vm8, %v2827_v61, %v2823_v48 }
 0x5c5   : > { %v10224_v44 = vpop.xlane.xlu1 %2643  ;;  %v10226_v3 = vpop.xlane.xlu0 %2640 }
 0x5c6   : > { %v2686_v52 = vmul.f32 0.03125, %v10226_v3  ;;  %v2687_v16 = vmul.f32 0.03125, %v10224_v44  ;;  %v2837_v44 = vsel %vm14040_vm8, %v2836_v10, %v2832_v49 }
 0x5c8   : > { %v2845_v45 = vrot.slane %v2686_v52, %v10243_v34 }
 0x5c9   : > { %v10228_v6 = vpop.xlane.xlu1 %2901  ;;  %v2599_v39 = vpop.xlane.xlu0 %2598 }
 0x5ca   : > { %v2672_v20 = vmul.f32 0.03125, %v2599_v39  ;;  %v2769_v39 = vrot.slane %v2669_v2, %v10240_v11 }
 0x5cc   : > { %v2782_v41 = vrot.slane %v2672_v20, %v10243_v34  ;;  %v2774_v56 = vsel %vm14040_vm8, %v2773_v7, %v2769_v39 }
 0x5cd   : > { %v10231_v14 = vpop.xlane.xlu1 %2907  ;;  %v10233_v24 = vpop.xlane.xlu0 %2646 }
 0x5ce   : > { %v2688_v30 = vmul.f32 0.03125, %v10233_v24 }
 0x5d1   : > { %v10235_v43 = vpop.xlane.xlu1 %2601  ;;  %v10237_v23 = vpop.xlane.xlu0 %2904 }
 0x5d2   : > { %v2673_v42 = vmul.f32 0.03125, %v10235_v43  ;;  %v2778_v43 = vrot.slane %v2671_v62, %v10240_v11  ;;  %v2889_v62 = vsel %vm14038_vm10, %v2828_v54, %v2888_v53 }
 0x5d4   : > { %v2787_v24 = vrot.slane %v2673_v42, %v10240_v11  ;;  %v2783_v48 = vsel %vm14040_vm8, %v2782_v41, %v2778_v43 }
 0x5d5   : > { %v10245_v25 = vpop.xlane.xlu1 %2649  ;;  %v10247_v26 = vpop.xlane.xlu0 %2910 }
 0x5d6   : > { %v2689_v33 = vmul.f32 0.03125, %v10245_v25  ;;  %v2850_v25 = vrot.slane %v2687_v16, %v10240_v11 }
 0x5d8   : > { %v2859_v49 = vrot.slane %v2689_v33, %v10240_v11 }
 0x5d9   : > { %v10256_v1 = vpop.xlane.xlu1 %2913  ;;  %v2605_v46 = vpop.xlane.xlu0 %2604 }
 0x5da   : > { %v2674_v29 = vmul.f32 0.03125, %v2605_v46  ;;  %v2765_v46 = vsel %vm14040_vm8, %v2764_v13, %v2760_v31  ;;  %v2854_v13 = vrot.slane %v2688_v30, %v10243_v34  ;;  %v2890_v30 = vsel %vm14037_vm11, %v2837_v44, %v2889_v62 }
 0x5db   : > { %v2879_v35 = vsel %vm14037_vm11, %v2765_v46, %v2877_v4 }
 0x5dc   : > { %v2791_v3 = vrot.slane %v2674_v29, %v10243_v34  ;;  %v2855_v46 = vsel %vm14040_vm8, %v2854_v13, %v2850_v25 }
 0x5dd   : > { %v2608_v0 = vpop.xlane.xlu1 %2607  ;;  %v2653_v50 = vpop.xlane.xlu0 %2652 }
 0x5de   : > { %v2690_v37 = vmul.f32 0.03125, %v2653_v50  ;;  %v2675_v59 = vmul.f32 0.03125, %v2608_v0  ;;  %v2841_v50 = vrot.slane %v2685_v32, %v10240_v11  ;;  %v2881_v0 = vsel %vm14036_vm12, %v2774_v56, %v2879_v35 }
 0x5df   : > { %v2792_v61 = vsel %vm14040_vm8, %v2791_v3, %v2787_v24  ;;  %v2883_v39 = vsel %vm14035_vm4, %v2783_v48, %v2881_v0 }
 0x5e0   : > { %v2863_v18 = vrot.slane %v2690_v37, %v10243_v34  ;;  %v2796_v29 = vrot.slane %v2675_v59, %v10240_v11  ;;  %v2846_v7 = vsel %vm14040_vm8, %v2845_v45, %v2841_v50  ;;  %v2885_v32 = vsel %vm14034_vm5, %v2792_v61, %v2883_v39 }
 0x5e1   : > { %v2656_v55 = vpop.xlane.xlu1 %2655  ;;  %v10280_v5 = vpop.xlane.xlu0 %2916  ;;  %v2891_v10 = vsel %vm14036_vm12, %v2846_v7, %v2890_v30 }
 0x5e2   : > { %v2691_v31 = vmul.f32 0.03125, %v2656_v55  ;;  %v2864_v53 = vsel %vm14040_vm8, %v2863_v18, %v2859_v49  ;;  %v2892_v43 = vsel %vm14035_vm4, %v2855_v46, %v2891_v10  ;;  %v3053_v30 = vrot.slane %v10280_v5, %v10243_v34 }
 0x5e3   : > { %v2893_v59 = vsel %vm14034_vm5, %v2864_v53, %v2892_v43  ;;  %v3040_v10 = vrot.slane %v10231_v14, %v10240_v11  ;;  %v3049_v43 = vrot.slane %v10256_v1, %v10240_v11 }
 0x5e4   : > { %v2868_v3 = vrot.slane %v2691_v31, %v10240_v11 }
 0x5e5   : > { %v10296_v2 = vpop.xlane.xlu1 %2919  ;;  %v2611_v28 = vpop.xlane.xlu0 %2610 }
 0x5e6   : > { %v2676_v20 = vmul.f32 0.03125, %v2611_v28 }
 0x5e8   : > { %v2800_v4 = vrot.slane %v2676_v20, %v10243_v34 }
 0x5e9   : > { %v10312_v52 = vpop.xlane.xlu1 %2925  ;;  %v2659_v42 = vpop.xlane.xlu0 %2658 }
 0x5ea   : > { %v2801_v41 = vsel %vm14040_vm8, %v2800_v4, %v2796_v29  ;;  %v2692_v55 = vmul.f32 0.03125, %v2659_v42  ;;  %v14153_v42 = vmov 0.0  }
 0x5eb   : > { %v2887_v54 = vsel %vm14033_vm15, %v2801_v41, %v2885_v32 }
 0x5ec   : > { %2898 = vst.msk [vmem:[#allocation5 + $0x3] sm:$0xff] %vm14032_vm14, %v2887_v54  ;;  %v2872_v37 = vrot.slane %v2692_v55, %v10243_v34  ;;  %v3044_v55 = vrot.slane %v10247_v26, %v10243_v34  ;;  %v3031_v26 = vrot.slane %v10228_v6, %v10240_v11 }
 0x5ed   : > { %v2932_v56 = vpop.xlane.xlu1 %2931  ;;  %v2923_v16 = vpop.xlane.xlu0 %2922 }
 0x5ee   : > { %v2873_v35 = vsel %vm14040_vm8, %v2872_v37, %v2868_v3  ;;  %v3035_v3 = vrot.slane %v10237_v23, %v10243_v34  ;;  %v3062_v37 = vrot.slane %v2923_v16, %v10243_v34  ;;  %v3045_v5 = vsel %vm14040_vm8, %v3044_v55, %v3040_v10 }
 0x5ef   : > { %v2894_v45 = vsel %vm14033_vm15, %v2873_v35, %v2893_v59  ;;  %v3058_v35 = vrot.slane %v10296_v2, %v10240_v11  ;;  %v3067_v23 = vrot.slane %v10312_v52, %v10240_v11  ;;  %v3076_v6 = vrot.slane %v2932_v56, %v10240_v11 }
 0x5f0   : > { %2899 = vst.msk [vmem:[#allocation5 + $0xb] sm:$0xff] %vm14032_vm14, %v2894_v45  ;;  %v3054_v45 = vsel %vm14040_vm8, %v3053_v30, %v3049_v43 }
 0x5f1   : > { %v10329_v24 = vpop.xlane.xlu1 %2949  ;;  %v2929_v33 = vpop.xlane.xlu0 %2928 }
 0x5f2   : > { %v3071_v59 = vrot.slane %v2929_v33, %v10243_v34  ;;  %v3036_v33 = vsel %vm14040_vm8, %v3035_v3, %v3031_v26 }
 0x5f3   : > { %v3191_v28 = vld [vmem:[#allocation5] sm:$0xff]  ;;  %v3172_v55 = vsel %vm14039_vm9, %v3045_v5, %v3036_v33 }
 0x5f4   : > { %3193 = vst.msk [vmem:[#allocation6] sm:$0xff] %vm14031_vm6, %v3191_v28  ;;  %v10340_v0 = vld [vmem:[#allocation5 + $0x1] sm:$0xff]  ;;  %v3072_v2 = vsel %vm14040_vm8, %v3071_v59, %v3067_v23  ;;  %v3173_v30 = vsel %vm14038_vm10, %v3054_v45, %v3172_v55 }
 0x5f5   : > { %v10331_v50 = vpop.xlane.xlu1 %2955  ;;  %v2935_v48 = vpop.xlane.xlu0 %2934  ;;  %v10342_v61 = vld [vmem:[#allocation5 + $0x2] sm:$0xff] }
 0x5f6   : > { %v10344_v18 = vld [vmem:[#allocation5 + $0x3] sm:$0xff]  ;;  %v3080_v14 = vrot.slane %v2935_v48, %v10243_v34 }
 0x5f7   : > { %v10334_v13 = vld [vmem:[#allocation5 + $0x6] sm:$0xff]  ;;  %v10336_v20 = vld [vmem:[#allocation5 + $0xe] sm:$0xff] }
 0x5f8   : > { %v10338_v44 = vld [vmem:[#allocation5 + $0x9] sm:$0xff]  ;;  %v3081_v52 = vsel %vm14040_vm8, %v3080_v14, %v3076_v6 }
 0x5f9   : > { %v10346_v25 = vld [vmem:[#allocation5 + $0x5] sm:$0xff]  ;;  %v2938_v4 = vpop.xlane.xlu1 %2937  ;;  %v10352_v62 = vpop.xlane.xlu0 %2952  ;;  %v10358_v49 = vld [vmem:[#allocation5 + $0xd] sm:$0xff] }
 0x5fa   : > { %v10348_v29 = vld [vmem:[#allocation5 + $0xa] sm:$0xff]  ;;  %v3085_v48 = vrot.slane %v2938_v4, %v10240_v11 }
 0x5fb   : > { %v10350_v31 = vld [vmem:[#allocation5 + $0xb] sm:$0xff] }
 0x5fc   : > { %v10354_v7 = vld [vmem:[#allocation5 + $0xc] sm:$0xff]  ;;  %v10356_v39 = vld [vmem:[#allocation5 + $0x4] sm:$0xff] }
 0x5fd   : > { %6161 = vst.msk [vmem:[#allocation5 + $0x10] sm:$0x3f] %vm2559_vm7, %v14153_v42  ;;  %v3192_v46 = vld [vmem:[#allocation5 + $0x8] sm:$0xff]  ;;  %v10367_v32 = vpop.xlane.xlu1 %2961  ;;  %v2959_v41 = vpop.xlane.xlu0 %2958 }
 0x5fe   : > { %6159 = vst.msk [vmem:[#allocation5] sm:$0xff] %vm14031_vm6, %v14153_v42  ;;  %3194 = vst.msk [vmem:[#allocation6 + $0x18] sm:$0xff] %vm14031_vm6, %v3192_v46  ;;  %v3063_v46 = vsel %vm14040_vm8, %v3062_v37, %v3058_v35 }
 0x5ff   : > { %6160 = vst.msk [vmem:[#allocation5 + $0x8] sm:$0xff] %vm14031_vm6, %v14153_v42 }
 0x601   : > { %v2944_v53 = vpop.xlane.xlu1 %2943  ;;  %v2941_v54 = vpop.xlane.xlu0 %2940 }
 0x602   : > { %v3089_v16 = vrot.slane %v2941_v54, %v10243_v34  ;;  %v3174_v54 = vsel %vm14037_vm11, %v3063_v46, %v3173_v30  ;;  %v3094_v37 = vrot.slane %v2944_v53, %v10240_v11 }
 0x603   : > { %v3175_v56 = vsel %vm14036_vm12, %v3072_v2, %v3174_v54  ;;  %v3112_v2 = vrot.slane %v10331_v50, %v10240_v11 }
 0x604   : > { %v3090_v10 = vsel %vm14040_vm8, %v3089_v16, %v3085_v48  ;;  %v3176_v59 = vsel %vm14035_vm4, %v3081_v52, %v3175_v56  ;;  %v3116_v16 = vrot.slane %v2959_v41, %v10243_v34  ;;  %v3107_v48 = vrot.slane %v10352_v62, %v10243_v34 }
 0x605   : > { %v2968_v1 = vpop.xlane.xlu1 %2967  ;;  %v2965_v28 = vpop.xlane.xlu0 %2964  ;;  %v3177_v4 = vsel %vm14034_vm5, %v3090_v10, %v3176_v59  ;;  %v3121_v41 = vrot.slane %v10367_v32, %v10240_v11  ;;  %v3103_v52 = vrot.slane %v10329_v24, %v10240_v11 }
 0x606   : > { %v3125_v33 = vrot.slane %v2965_v28, %v10243_v34  ;;  %v3117_v50 = vsel %vm14040_vm8, %v3116_v16, %v3112_v2  ;;  %v3130_v62 = vrot.slane %v2968_v1, %v10240_v11 }
 0x608   : > { %v3126_v10 = vsel %vm14040_vm8, %v3125_v33, %v3121_v41  ;;  %v2548_v41 = vld [vmem:[%s13990_s5 + $0xf8] sm:$0xff] }
 0x609   : > { %v2974_v43 = vpop.xlane.xlu1 %2973  ;;  %v2947_v3 = vpop.xlane.xlu0 %2946  ;;  %8160 = vmatprep.subr.mxu1 %v2548_v41  ;;  %v10594_v41 = vld [vmem:[%s13990_s5 + $0x130] sm:$0xf] }
 0x60a   : > { %v3098_v26 = vrot.slane %v2947_v3, %v10243_v34  ;;  %v3139_v3 = vrot.slane %v2974_v43, %v10240_v11 }
 0x60c   : > { %v3099_v5 = vsel %vm14040_vm8, %v3098_v26, %v3094_v37  ;;  %v3108_v26 = vsel %vm14040_vm8, %v3107_v48, %v3103_v52  ;;  %v2547_v52 = vld [vmem:[%s13990_s5 + $0xf0] sm:$0xff] }
 0x60d   : > { %v3178_v35 = vsel %vm14033_vm15, %v3099_v5, %v3177_v4  ;;  %v2971_v14 = vpop.xlane.xlu0 %2970  ;;  %v2980_v45 = vpop.xlane.xlu1 %2979  ;;  %v3179_v1 = vsel %vm14039_vm9, %v3117_v50, %v3108_v26  ;;  %v2531_v50 = vld [vmem:[%s13990_s5 + $0x70] sm:$0xff]  ;;  %vm14049_vm9 = vcmask 1048464  }
 0x60e   : > { %3189 = vst.msk [vmem:[#allocation5 + $0x1b] sm:$0xff] %vm14032_vm14, %v3178_v35  ;;  %v3134_v30 = vrot.slane %v2971_v14, %v10243_v34  ;;  %v3148_v32 = vrot.slane %v2980_v45, %v10240_v11  ;;  %v3180_v35 = vsel %vm14038_vm10, %v3126_v10, %v3179_v1  ;;  %vm14050_vm10 = vcmask 933600  }
 0x610   : > { %v3135_v59 = vsel %vm14040_vm8, %v3134_v30, %v3130_v62  ;;  %v2546_v62 = vld [vmem:[%s13990_s5 + $0xe8] sm:$0xff] }
 0x611   : > { %v2977_v23 = vpop.xlane.xlu0 %2976  ;;  %v2986_v53 = vpop.xlane.xlu1 %2985  ;;  %v3181_v45 = vsel %vm14037_vm11, %v3135_v59, %v3180_v35  ;;  %v2544_v35 = vld [vmem:[%s13990_s5 + $0xd8] sm:$0xff]  ;;  %vm14127_vm11 = vcmask 540000  }
 0x612   : > { %v3143_v28 = vrot.slane %v2977_v23, %v10243_v34  ;;  %v3157_v4 = vrot.slane %v2986_v53, %v10240_v11 }
 0x614   : > { %v3144_v5 = vsel %vm14040_vm8, %v3143_v28, %v3139_v3  ;;  %v2532_v28 = vld [vmem:[%s13990_s5 + $0x78] sm:$0xff]  ;;  %v2530_v3 = vld [vmem:[%s13990_s5 + $0x68] sm:$0xff] }
 0x615   : > { %v2983_v6 = vpop.xlane.xlu0 %2982  ;;  %v3288_v46 = vld [vmem:[#allocation5 + $0x19] sm:$0xff]  ;;  %v2992_v43 = vpop.xlane.xlu1 %2991  ;;  %8161 = vmatpush3.msra.mxu1 %v2532_v28 }
 0x616   : > { %v3275_v55 = vld [vmem:[#allocation5 + $0x18] sm:$0xff]  ;;  %3292 = vrot.lane.b32.xlu0 %v3288_v46, %s8589_s18  ;;  %v3152_v54 = vrot.slane %v2983_v6, %v10243_v34  ;;  %v3182_v6 = vsel %vm14036_vm12, %v3144_v5, %v3181_v45  ;;  %v3166_v46 = vrot.slane %v2992_v43, %v10240_v11  ;;  %8162 = vmatprep.subr.mxu1 %v2547_v52  ;;  %v2545_v5 = vld [vmem:[%s13990_s5 + $0xe0] sm:$0xff]  ;;  %v2527_v45 = vld [vmem:[%s13990_s5 + $0x50] sm:$0xff]  ;;  %vm3311_vm12 = vcmask 753200  }
 0x617   : > { %3279 = vrot.lane.b32.xlu1 %v3275_v55, %s8590_s26  ;;  %v3301_v37 = vld [vmem:[#allocation5 + $0x1a] sm:$0xff]  ;;  %8163 = vmatpush3.msra.mxu1 %v2531_v50  ;;  %v2529_v43 = vld [vmem:[%s13990_s5 + $0x60] sm:$0xff] }
 0x618   : > { %v3153_v14 = vsel %vm14040_vm8, %v3152_v54, %v3148_v32  ;;  %v3314_v33 = vld [vmem:[#allocation5 + $0x1b] sm:$0xff]  ;;  %8164 = vmatprep.subr.mxu1 %v2546_v62 }
 0x619   : > { %v2989_v56 = vpop.xlane.xlu0 %2988  ;;  %v3183_v53 = vsel %vm14035_vm4, %v3153_v14, %v3182_v6  ;;  %8165 = vmatpush3.msra.mxu1 %v2530_v3  ;;  %v2528_v14 = vld [vmem:[%s13990_s5 + $0x58] sm:$0xff]  ;;  %vm3298_vm4 = vcmask 572800  }
 0x61a   : > { %v3161_v24 = vrot.slane %v2989_v56, %v10243_v34  ;;  %3305 = vrot.lane.b32.xlu0 %v3301_v37, %s8591_s27  ;;  %8166 = vmatprep.subr.mxu1 %v2545_v5  ;;  %v2540_v6 = vld [vmem:[%s13990_s5 + $0xb8] sm:$0xff] }
 0x61b   : > { %8167 = vmatpush3.msra.mxu1 %v2529_v43 }
 0x61c   : > { %v3162_v23 = vsel %vm14040_vm8, %v3161_v24, %v3157_v4  ;;  %8168 = vmatprep.subr.mxu1 %v2544_v35 }
 0x61d   : > { %v2995_v16 = vpop.xlane.xlu0 %2994  ;;  %v3184_v2 = vsel %vm14034_vm5, %v3162_v23, %v3183_v53  ;;  %8169 = vmatpush3.msra.mxu1 %v2528_v14  ;;  %v2542_v23 = vld [vmem:[%s13990_s5 + $0xc8] sm:$0xff]  ;;  %v2520_v53 = vld [vmem:[%s13990_s5 + $0x18] sm:$0xff]  ;;  %vm3285_vm5 = vcmask 392400  }
 0x61e   : > { %v3170_v55 = vrot.slane %v2995_v16, %v10243_v34  ;;  %3318 = vrot.lane.b32.xlu0 %v3314_v33, %s14029_s30  ;;  %v2526_v16 = vld [vmem:[%s13990_s5 + $0x48] sm:$0xff]  ;;  %v2525_v33 = vld [vmem:[%s13990_s5 + $0x40] sm:$0xff] }
 0x620   : > { %v3171_v48 = vsel %vm14040_vm8, %v3170_v55, %v3166_v46  ;;  %v2523_v46 = vld [vmem:[%s13990_s5 + $0x30] sm:$0xff]  ;;  %v2537_v55 = vld [vmem:[%s13990_s5 + $0xa0] sm:$0xff]  ;;  %vm14048_vm8 = vcmask 720400  }
 0x621   : > { %v3185_v30 = vsel %vm14033_vm15, %v3171_v48, %v3184_v2  ;;  %v2534_v2 = vld [vmem:[%s13990_s5 + $0x88] sm:$0xff]  ;;  %vm3272_vm15 = vcmask 212000  }
 0x622   : > { %3190 = vst.msk [vmem:[#allocation5 + $0x23] sm:$0xff] %vm14032_vm14, %v3185_v30  ;;  %v2518_v48 = vld [vmem:[%s13990_s5 + $0x8] sm:$0xff]  ;;  %v2517_v30 = vld [vmem:[%s13990_s5] sm:$0xff]  ;;  %vm14042_vm14 = vcmask 359600  }
 0x629   : > { %v3327_v54 = vld [vmem:[#allocation5 + $0x1c] sm:$0xff]  ;;  %v10471_v24 = vld [vmem:[#allocation5 + $0x24] sm:$0xff] }
 0x62a   : > { %v3276_v10 = vld [vmem:[#allocation5 + $0x20] sm:$0xff]  ;;  %3331 = vrot.lane.b32.xlu0 %v3327_v54, %s8593_s15 }
 0x62b   : > { %3281 = vrot.lane.b32.xlu1 %v3276_v10, %s8590_s26  ;;  %v3289_v56 = vld [vmem:[#allocation5 + $0x21] sm:$0xff] }
 0x62c   : > { %v3343_v37 = vld [vmem:[#allocation5 + $0x1d] sm:$0xff]  ;;  %v10475_v1 = vld [vmem:[#allocation5 + $0x25] sm:$0xff] }
 0x62d   : > { %v3302_v26 = vld [vmem:[#allocation5 + $0x22] sm:$0xff] }
 0x62e   : > { %v3315_v32 = vld [vmem:[#allocation5 + $0x23] sm:$0xff]  ;;  %3266 = vrot.lane.b32.xlu0 %v10334_v13, %s14021_s29 }
 0x62f   : > { %v10469_v59 = vld [vmem:[#allocation5 + $0x1e] sm:$0xff]  ;;  %v10477_v4 = vld [vmem:[#allocation5 + $0x26] sm:$0xff]  ;;  %3294 = vrot.lane.b32.xlu1 %v3289_v56, %s8589_s18 }
 0x630   : > { %6162 = vst.msk [vmem:[#allocation5 + $0x18] sm:$0xff] %vm14031_vm6, %v14153_v42  ;;  %6163 = vst.msk [vmem:[#allocation5 + $0x20] sm:$0xff] %vm14031_vm6, %v14153_v42  ;;  %v2543_v13 = vld [vmem:[%s13990_s5 + $0xd0] sm:$0xff]  ;;  %vm3353_vm6 = vcmask 244800  }
 0x631   : > { %6164 = vst.msk [vmem:[#allocation5 + $0x28] sm:$0x3f] %vm2559_vm7, %v14153_v42  ;;  %8170 = vmatprep.subr.mxu1 %v2543_v13  ;;  %vm3339_vm7 = vcmask 64512  }
 0x632   : > { %3347 = vrot.lane.b32.xlu0 %v3343_v37, %s8580_s28  ;;  %8171 = vmatpush3.msra.mxu1 %v2527_v45 }
 0x633   : > { %3307 = vrot.lane.b32.xlu1 %v3302_v26, %s8591_s27  ;;  %8172 = vmatprep.subr.mxu1 %v2542_v23 }
 0x634   : > { %8173 = vmatpush3.msra.mxu1 %v2526_v16 }
 0x636   : > { %3268 = vrot.lane.b32.xlu0 %v10336_v20, %s14021_s29  ;;  %v2541_v20 = vld [vmem:[%s13990_s5 + $0xc0] sm:$0xff]  ;;  %s14027_s29 = smov 66  }
 0x637   : > { %3320 = vrot.lane.b32.xlu1 %v3315_v32, %s14029_s30  ;;  %8174 = vmatprep.subr.mxu1 %v2541_v20  ;;  %s8601_s30 = smov 96  }
 0x638   : > { %8175 = vmatpush3.msra.mxu1 %v2525_v33 }
 0x639   : > { %8176 = vmatprep.subr.mxu1 %v2540_v6  ;;  %v2554_v6 = vld [vmem:[%s13990_s5 + $0x128] sm:$0xff] }
 0x63a   : > { %3201 = vrot.lane.b32.xlu0 %v10338_v44, %s14023_s13  ;;  %v2524_v44 = vld [vmem:[%s13990_s5 + $0x38] sm:$0xff] }
 0x63b   : > { %3251 = vrot.lane.b32.xlu1 %v10346_v25, %s14132_s14  ;;  %v2539_v25 = vld [vmem:[%s13990_s5 + $0xb0] sm:$0xff]  ;;  %8177 = vmatpush3.msra.mxu1 %v2524_v44  ;;  %v2553_v44 = vld [vmem:[%s13990_s5 + $0x120] sm:$0xff] }
 0x63c   : > { %8178 = vmatprep.subr.mxu1 %v2539_v25 }
 0x63d   : > { %8179 = vmatpush3.msra.mxu1 %v2523_v46  ;;  %v2552_v46 = vld [vmem:[%s13990_s5 + $0x118] sm:$0xff] }
 0x63e   : > { %3214 = vrot.lane.b32.xlu0 %v10348_v29, %s14025_s17  ;;  %v2522_v29 = vld [vmem:[%s13990_s5 + $0x28] sm:$0xff] }
 0x63f   : > { %3199 = vrot.lane.b32.xlu1 %v10340_v0, %s14023_s13  ;;  %v2538_v0 = vld [vmem:[%s13990_s5 + $0xa8] sm:$0xff]  ;;  %s14130_s13 = smov 88  }
 0x640   : > { %8180 = vmatprep.subr.mxu1 %v2538_v0  ;;  %v2551_v0 = vld [vmem:[%s13990_s5 + $0x110] sm:$0xff] }
 0x641   : > { %8181 = vmatpush3.msra.mxu1 %v2522_v29 }
 0x642   : > { %3227 = vrot.lane.b32.xlu0 %v10350_v31, %s14027_s29  ;;  %8182 = vmatprep.subr.mxu1 %v2537_v55  ;;  %v2536_v31 = vld [vmem:[%s13990_s5 + $0x98] sm:$0xff]  ;;  %v2550_v55 = vld [vmem:[%s13990_s5 + $0x108] sm:$0xff] }
 0x643   : > { %3212 = vrot.lane.b32.xlu1 %v10342_v61, %s14025_s17  ;;  %v2521_v61 = vld [vmem:[%s13990_s5 + $0x20] sm:$0xff]  ;;  %s14128_s17 = smov 30  }
 0x644   : > { %8183 = vmatpush3.msra.mxu1 %v2521_v61 }
 0x645   : > { %8184 = vmatprep.subr.mxu1 %v2536_v31 }
 0x646   : > { %3240 = vrot.lane.b32.xlu0 %v10354_v7, %s14130_s13  ;;  %v2519_v7 = vld [vmem:[%s13990_s5 + $0x10] sm:$0xff]  ;;  %8185 = vmatpush3.msra.mxu1 %v2520_v53  ;;  %v2549_v53 = vld [vmem:[%s13990_s5 + $0x100] sm:$0xff] }
 0x647   : > { %3225 = vrot.lane.b32.xlu1 %v10344_v18, %s14027_s29  ;;  %v2535_v18 = vld [vmem:[%s13990_s5 + $0x90] sm:$0xff]  ;;  %s14155_s29 = smov 32  }
 0x648   : > { %8186 = vmatprep.subr.mxu1 %v2535_v18 }
 0x649   : > { %8187 = vmatpush3.msra.mxu1 %v2519_v7 }
 0x64a   : > { %3360 = vrot.lane.b32.xlu0 %v10469_v59, %s14128_s17  ;;  %8188 = vmatprep.subr.mxu1 %v2534_v2  ;;  %v3843_v2 = vld [vmem:[#allocation4] sm:$0xff] }
 0x64b   : > { %3238 = vrot.lane.b32.xlu1 %v10356_v39, %s14130_s13  ;;  %v2533_v39 = vld [vmem:[%s13990_s5 + $0x80] sm:$0xff]  ;;  %8189 = vmatpush3.msra.mxu1 %v2518_v48  ;;  %v3844_v48 = vld [vmem:[#allocation4 + $0x8] sm:$0xff]  ;;  %3934 = vst.msk [vmem:[#allocation3] sm:$0xff] %vm2176_vm13, %v3843_v2  ;;  %s14379_s13 = smov 4  }
 0x64c   : > { %8190 = vmatprep.subr.mxu1 %v2533_v39  ;;  %v4014_v39 = vrot.slane %v3843_v2, 1  ;;  %3935 = vst.msk [vmem:[#allocation3 + $0x18] sm:$0xff] %vm2176_vm13, %v3844_v48 }
 0x64d   : > { %8191 = vmatpush3.msra.mxu1 %v2517_v30  ;;  %v4015_v30 = vrot.slane %v3844_v48, 1 }
 0x64e   : > { %8369 = vmatprep.subr.msk.mxu1 %vm1910_vm3, %v10594_v41 }
 0x64f   : > { %3253 = vrot.lane.b32.xlu1 %v10358_v49, %s14132_s14 }
 0x653   : > { %3333 = vrot.lane.b32.xlu1 %v10471_v24, %s8593_s15 }
 0x657   : > { %3349 = vrot.lane.b32.xlu1 %v10475_v1, %s8580_s28 }
 0x65b   : > { %3362 = vrot.lane.b32.xlu1 %v10477_v4, %s14128_s17 }
 0x688   : > { %v3293_v49 = vpop.permute.xlu0 %3292 }
 0x689   : > { %v3280_v52 = vpop.permute.xlu1 %3279 }
 0x68c   : > { %v3306_v28 = vpop.permute.xlu0 %3305 }
 0x690   : > { %v3319_v50 = vpop.permute.xlu0 %3318 }
 0x69c   : > { %v3332_v54 = vpop.permute.xlu0 %3331 }
 0x69d   : > { %v3282_v62 = vpop.permute.xlu1 %3281  ;;  %3340 = vst.msk [vmem:[#allocation6 + $0x10] sm:$0xff] %vm3339_vm7, %v3332_v54 }
 0x6a0   : > { %v3267_v3 = vpop.permute.xlu0 %3266 }
 0x6a1   : > { %v3295_v10 = vpop.permute.xlu1 %3294 }
 0x6a4   : > { %v3348_v37 = vpop.permute.xlu0 %3347 }
 0x6a5   : > { %v3308_v56 = vpop.permute.xlu1 %3307  ;;  %3354 = vst.msk [vmem:[#allocation6 + $0x10] sm:$0xff] %vm3353_vm6, %v3348_v37 }
 0x6a8   : > { %v3269_v32 = vpop.permute.xlu0 %3268 }
 0x6a9   : > { %v3321_v26 = vpop.permute.xlu1 %3320 }
 0x6ac   : > { %v3202_v24 = vpop.permute.xlu0 %3201 }
 0x6ad   : > { %v3252_v59 = vpop.permute.xlu1 %3251  ;;  %3207 = vst.msk [vmem:[#allocation6 + $0x18] sm:$0xff] %vm14042_vm14, %v3202_v24 }
 0x6ae   : > { %3259 = vst.msk [vmem:[#allocation6 + $0x8] sm:$0xff] %vm474_vm0, %v3252_v59 }
 0x6af   : > { %3273 = vst.msk [vmem:[#allocation6 + $0x8] sm:$0xff] %vm3272_vm15, %v3267_v3 }
 0x6b0   : > { %3286 = vst.msk [vmem:[#allocation6 + $0x8] sm:$0xff] %vm3285_vm5, %v3280_v52  ;;  %v3215_v4 = vpop.permute.xlu0 %3214 }
 0x6b1   : > { %3299 = vst.msk [vmem:[#allocation6 + $0x8] sm:$0xff] %vm3298_vm4, %v3293_v49  ;;  %v3200_v1 = vpop.permute.xlu1 %3199  ;;  %v4224_v49 = vrot.slane %v3844_v48, 2 }
 0x6b2   : > { %3312 = vst.msk [vmem:[#allocation6 + $0x8] sm:$0xff] %vm3311_vm12, %v3306_v28 }
 0x6b3   : > { %3206 = vst.msk [vmem:[#allocation6] sm:$0xff] %vm14042_vm14, %v3200_v1  ;;  %vm14045_vm14 = vcmask 425200  }
 0x6b4   : > { %3220 = vst.msk [vmem:[#allocation6 + $0x18] sm:$0xff] %vm14127_vm11, %v3215_v4  ;;  %v3228_v43 = vpop.permute.xlu0 %3227 }
 0x6b5   : > { %3325 = vst.msk [vmem:[#allocation6 + $0x8] sm:$0xff] %vm14050_vm10, %v3319_v50  ;;  %v3213_v5 = vpop.permute.xlu1 %3212 }
 0x6b6   : > { %3338 = vst.msk [vmem:[#allocation6 + $0x8] sm:$0xff] %vm14049_vm9, %v3332_v54 }
 0x6b7   : > { %3219 = vst.msk [vmem:[#allocation6] sm:$0xff] %vm14127_vm11, %v3213_v5 }
 0x6b8   : > { %3233 = vst.msk [vmem:[#allocation6 + $0x18] sm:$0xff] %vm14048_vm8, %v3228_v43  ;;  %v3241_v14 = vpop.permute.xlu0 %3240 }
 0x6b9   : > { %v3226_v35 = vpop.permute.xlu1 %3225  ;;  %3246 = vst.msk [vmem:[#allocation6 + $0x18] sm:$0xff] %vm14047_vm1, %v3241_v14 }
 0x6ba   : > { %3232 = vst.msk [vmem:[#allocation6] sm:$0xff] %vm14048_vm8, %v3226_v35 }
 0x6bc   : > { %v3361_v23 = vpop.permute.xlu0 %3360 }
 0x6bd   : > { %v3370_v13 = vld [vmem:[#allocation6 + $0x8] sm:$0xff]  ;;  %v3239_v45 = vpop.permute.xlu1 %3238  ;;  %3367 = vst.msk [vmem:[#allocation6 + $0x10] sm:$0xff] %vm14045_vm14, %v3361_v23 }
 0x6be   : > { %3449 = vmatprep.mubr.f32.mxu1 %v3370_v13  ;;  %3245 = vst.msk [vmem:[#allocation6] sm:$0xff] %vm14047_vm1, %v3239_v45  ;;  %vm14156_vm1 = vcmask 1045504  }
 0x6bf   : > { %3258 = vst.msk [vmem:[#allocation6] sm:$0xff] %vm14044_vm2, %v3252_v59 }
 0x6c1   : > { %v3254_v16 = vpop.permute.xlu1 %3253 }
 0x6c2   : > { %3260 = vst.msk [vmem:[#allocation6 + $0x18] sm:$0xff] %vm14044_vm2, %v3254_v16  ;;  %vm14046_vm2 = vcmask 424960  }
 0x6c3   : > { %3261 = vst.msk [vmem:[#allocation6 + $0x20] sm:$0xff] %vm474_vm0, %v3254_v16 }
 0x6c4   : > { %3274 = vst.msk [vmem:[#allocation6 + $0x20] sm:$0xff] %vm3272_vm15, %v3269_v32  ;;  %v3371_v18 = vld [vmem:[#allocation6 + $0x10] sm:$0xff] }
 0x6c5   : > { %3287 = vst.msk [vmem:[#allocation6 + $0x20] sm:$0xff] %vm3285_vm5, %v3282_v62  ;;  %v3334_v20 = vpop.permute.xlu1 %3333 }
 0x6c6   : > { %3300 = vst.msk [vmem:[#allocation6 + $0x20] sm:$0xff] %vm3298_vm4, %v3295_v10  ;;  %v3369_v33 = vld [vmem:[#allocation6] sm:$0xff] }
 0x6c7   : > { %3313 = vst.msk [vmem:[#allocation6 + $0x20] sm:$0xff] %vm3311_vm12, %v3308_v56  ;;  %3450 = vmatmul.mubr.f32.vlgmr.msra.gmra.mxu1 %v3369_v33 }
 0x6c8   : > { %3342 = vst.msk [vmem:[#allocation6 + $0x28] sm:$0xff] %vm3339_vm7, %v3334_v20  ;;  %8370 = vmatpush3.msk.msra.mxu1 %vm1910_vm3, %v10594_v41  ;;  %v4223_v41 = vrot.slane %v3843_v2, 2  ;;  %v10720_v2 = vsub.s32 4, %v9942_v17 }
 0x6c9   : > { %3326 = vst.msk [vmem:[#allocation6 + $0x20] sm:$0xff] %vm14050_vm10, %v3321_v26  ;;  %v3350_v25 = vpop.permute.xlu1 %3349  ;;  %8371 = vmatprep.subr.mxu1 %v2554_v6  ;;  %v3372_v31 = vld [vmem:[#allocation6 + $0x18] sm:$0xff] }
 0x6ca   : > { %3341 = vst.msk [vmem:[#allocation6 + $0x20] sm:$0xff] %vm14049_vm9, %v3334_v20  ;;  %8372 = vmatpush3.msra.mxu1 %v2554_v6  ;;  %v4225_v52 = vsel %vm14156_vm1, %v4223_v41, %v4224_v49  ;;  %vm14158_vm9 = vmmov %vm14156_vm1  ;;  %vm4190_vm1 = vcmask 523520   ;;  %v10728_v41 = vsub.s32 6, %v9942_v17 }
 0x6cb   : > { %3355 = vst.msk [vmem:[#allocation6 + $0x28] sm:$0xff] %vm3353_vm6, %v3350_v25  ;;  %8373 = vmatprep.subr.mxu1 %v2553_v44  ;;  %14162 = vst [vmem:[#allocation29_spill] sm:$0xff] %v10720_v2 }
 0x6cc   : > { %8374 = vmatpush3.msra.mxu1 %v2553_v44  ;;  %14164 = vst [vmem:[#allocation31_spill] sm:$0xff] %v10728_v41 }
 0x6cd   : > { %v3363_v29 = vpop.permute.xlu1 %3362  ;;  %8375 = vmatprep.subr.mxu1 %v2552_v46 }
 0x6ce   : > { %3368 = vst.msk [vmem:[#allocation6 + $0x28] sm:$0xff] %vm14045_vm14, %v3363_v29  ;;  %8376 = vmatpush3.msra.mxu1 %v2552_v46  ;;  %vm3757_vm14 = vcmask 254976  }
 0x6cf   : > { %8377 = vmatprep.subr.mxu1 %v2551_v0  ;;  %3758 = vst.msk [vmem:[#allocation4 + $0x10] sm:$0x3] %vm3757_vm14, %v14153_v42  ;;  %3761 = vst.msk [vmem:[#allocation4 + $0x28] sm:$0x3] %vm3757_vm14, %v14153_v42 }
 0x6d0   : > { %8378 = vmatpush3.msra.mxu1 %v2551_v0  ;;  %3764 = vst.msk [vmem:[#allocation4 + $0x40] sm:$0x3] %vm3757_vm14, %v14153_v42  ;;  %3767 = vst.msk [vmem:[#allocation4 + $0x58] sm:$0x3] %vm3757_vm14, %v14153_v42  ;;  %v10708_v0 = vsub.s32 1, %v9942_v17 }
 0x6d1   : > { %v3373_v61 = vld [vmem:[#allocation6 + $0x20] sm:$0xff]  ;;  %8379 = vmatprep.subr.mxu1 %v2550_v55  ;;  %3770 = vst.msk [vmem:[#allocation4 + $0x70] sm:$0x3] %vm3757_vm14, %v14153_v42  ;;  %3773 = vst.msk [vmem:[#allocation4 + $0x88] sm:$0x3] %vm3757_vm14, %v14153_v42 }
 0x6d2   : > { %3454 = vmatprep.mubr.f32.mxu1 %v3373_v61  ;;  %8380 = vmatpush3.msra.mxu1 %v2550_v55  ;;  %3776 = vst.msk [vmem:[#allocation4 + $0xa0] sm:$0x3] %vm3757_vm14, %v14153_v42  ;;  %3779 = vst.msk [vmem:[#allocation4 + $0xb8] sm:$0x3] %vm3757_vm14, %v14153_v42  ;;  %v10712_v55 = vsub.s32 2, %v9942_v17 }
 0x6d3   : > { %3455 = vmatmul.mubr.f32.gmra.mxu1 %v3372_v31  ;;  %8381 = vmatprep.subr.mxu1 %v2549_v53  ;;  %3782 = vst.msk [vmem:[#allocation4 + $0xd0] sm:$0x3] %vm3757_vm14, %v14153_v42  ;;  %3785 = vst.msk [vmem:[#allocation4 + $0xe8] sm:$0x3] %vm3757_vm14, %v14153_v42  ;;  %v10716_v31 = vsub.s32 3, %v9942_v17 }
 0x6d4   : > { %8383 = vmatprep.mubr.msk.f32.mxu1 %vm14046_vm2, %v3371_v18  ;;  %8382 = vmatpush3.msra.mxu1 %v2549_v53  ;;  %3788 = vst.msk [vmem:[#allocation4 + $0x100] sm:$0x3] %vm3757_vm14, %v14153_v42  ;;  %3791 = vst.msk [vmem:[#allocation4 + $0x118] sm:$0x3] %vm3757_vm14, %v14153_v42 }
 0x6d5   : > { %v3374_v7 = vld [vmem:[#allocation6 + $0x28] sm:$0xff]  ;;  %3794 = vst.msk [vmem:[#allocation4 + $0x130] sm:$0x3] %vm3757_vm14, %v14153_v42  ;;  %3797 = vst.msk [vmem:[#allocation4 + $0x148] sm:$0x3] %vm3757_vm14, %v14153_v42 }
 0x6d6   : > { %3800 = vst.msk [vmem:[#allocation4 + $0x160] sm:$0x3] %vm3757_vm14, %v14153_v42  ;;  %3803 = vst.msk [vmem:[#allocation4 + $0x178] sm:$0x3] %vm3757_vm14, %v14153_v42  ;;  %v3845_v50 = vld [vmem:[#allocation4 + $0x10] sm:$0x3] }
 0x6d7   : > { %8384 = vmatmul.mubr.msk.f32.vlgmr.msra.gmra.mxu1 %vm14046_vm2, %v3374_v7  ;;  %3806 = vst.msk [vmem:[#allocation4 + $0x190] sm:$0x3] %vm3757_vm14, %v14153_v42  ;;  %3809 = vst.msk [vmem:[#allocation4 + $0x1a8] sm:$0x3] %vm3757_vm14, %v14153_v42  ;;  %vm14154_vm2 = vcmask 1046528   ;;  %v4017_v62 = vrot.slane %v3845_v50, 1 }
 0x6d8   : > { %v4016_v28 = vsel %vm14154_vm2, %v4014_v39, %v4015_v30  ;;  %v4226_v54 = vrot.slane %v3845_v50, 2  ;;  %vm14157_vm8 = vmmov %vm14154_vm2  ;;  %vm4399_vm2 = vcmask 785920   ;;  %14159 = vst [vmem:[#allocation26_spill] sm:$0xff] %v10708_v0  ;;  %v10724_v39 = vsub.s32 5, %v9942_v17 }
 0x6d9   : > { %4094 = vrot.lane.b32.xlu1 %v4016_v28, %s14155_s29  ;;  %v4018_v10 = vsel %vm14157_vm8, %v4015_v30, %v4017_v62  ;;  %14160 = vst [vmem:[#allocation27_spill] sm:$0xff] %v10712_v55  ;;  %14161 = vst [vmem:[#allocation28_spill] sm:$0xff] %v10716_v31  ;;  %v10732_v28 = vsub.s32 7, %v9942_v17 }
 0x6da   : > { %v4227_v3 = vsel %vm14158_vm9, %v4224_v49, %v4226_v54  ;;  %14163 = vst [vmem:[#allocation30_spill] sm:$0xff] %v10724_v39  ;;  %vm14166_vm14 = vmmov %vm14158_vm9 }
 0x6db   : > { %14165 = vst [vmem:[#allocation32_spill] sm:$0xff] %v10732_v28  ;;  %vm14167_vm8 = vmmov %vm14158_vm9  ;;  %vm14168_vm9 = vcmask 1046528  }
 0x6dc   : > { %vm14169_vm10 = vmmov %vm14168_vm9 }
 0x6dd   : > { %4303 = vrot.lane.b32.xlu1 %v4225_v52, %s8600_s20 }
 0x6e1   : > { %4096 = vrot.lane.b32.xlu1 %v4018_v10, %s14155_s29 }
 0x6e5   : > { %4305 = vrot.lane.b32.xlu1 %v4227_v3, %s8600_s20  ;;  %v3932_v3 = vld [vmem:[%s13991_s6 + $0x118] sm:$0xff] }
 0x6e6   : > { %8386 = vmatprep.subr.mxu1 %v3932_v3 }
 0x6e7   : > { %8387 = vmatpush3.msra.mxu1 %v3932_v3 }
 0x74b   : > { %v4095_v43 = vpop.permute.xlu1 %4094 }
 0x74c   : > { %4191 = vst.msk [vmem:[#allocation3] sm:$0xff] %vm4190_vm1, %v4095_v43 }
 0x74f   : > { %v4304_v13 = vpop.permute.xlu1 %4303 }
 0x750   : > { %4400 = vst.msk [vmem:[#allocation3] sm:$0xff] %vm4399_vm2, %v4304_v13 }
 0x753   : > { %v4097_v20 = vpop.permute.xlu1 %4096 }
 0x754   : > { %4192 = vst.msk [vmem:[#allocation3 + $0x18] sm:$0xff] %vm4190_vm1, %v4097_v20 }
 0x757   : > { %v4306_v6 = vpop.permute.xlu1 %4305 }
 0x758   : > { %4401 = vst.msk [vmem:[#allocation3 + $0x18] sm:$0xff] %vm4399_vm2, %v4306_v6 }
 0x787   : > { %v8192_v56 = vpop.f32.mrf.mxu1 }
 0x789   : > { %v8193_v37 = vpop.f32.mrf.mxu1 }
 0x78a   : > { %v8194_v14 = vadd.f32 %v8193_v37, %v8192_v56  ;;  %v3931_v37 = vld [vmem:[%s13991_s6 + $0x110] sm:$0xff] }
 0x78b   : > { %8388 = vmatprep.subr.mxu1 %v3931_v37 }
 0x78c   : > { %8389 = vmatpush3.msra.mxu1 %v3931_v37 }
 0x793   : > { %v8195_v26 = vpop.f32.mrf.mxu1 }
 0x795   : > { %v8196_v32 = vpop.f32.mrf.mxu1 }
 0x796   : > { %v8197_v59 = vadd.f32 %v8196_v32, %v8195_v26  ;;  %v3930_v32 = vld [vmem:[%s13991_s6 + $0x108] sm:$0xff] }
 0x797   : > { %v8385_v24 = vpop.f32.mrf.mxu1  ;;  %8390 = vmatprep.subr.mxu1 %v3930_v32 }
 0x798   : > { %v3532_v1 = vadd.f32 %v8385_v24, %v8197_v59  ;;  %v3929_v59 = vld [vmem:[%s13991_s6 + $0x100] sm:$0xff]  ;;  %8391 = vmatpush3.msra.mxu1 %v3930_v32 }
 0x799   : > { %v3526_v35 = vpop.f32.mrf.mxu1  ;;  %8392 = vmatprep.subr.mxu1 %v3929_v59 }
 0x79a   : > { %v3536_v4 = vsub.f32 0.0, %v3532_v1  ;;  %v3527_v16 = vadd.f32 %v8194_v14, %v3526_v35  ;;  %8393 = vmatpush3.msra.mxu1 %v3929_v59 }
 0x79b   : > { %8442 = vmatprep.subr.mxu1 %v14153_v42 }
 0x79c   : > { %v3539_v5 = vmul.f32 1.442695, %v3536_v4  ;;  %v3535_v33 = vsub.f32 0.0, %v3527_v16 }
 0x79e   : > { %8549 = vpow2.f32 %v3539_v5  ;;  %v3537_v44 = vmul.f32 1.442695, %v3535_v33 }
 0x7ab   : > { %v8550_v45 = vpop.eup %8549 }
 0x7ac   : > { %v3542_v23 = vadd.f32 1.0, %v8550_v45 }
 0x7ae   : > { %8551 = vrcp.f32 %v3542_v23 }
 0x7af   : > { %8553 = vpow2.f32 %v3537_v44 }
 0x7bb   : > { %v8552_v25 = vpop.eup %8551 }
 0x7bc   : > { %v3638_v46 = vrot.slane %v8552_v25, %v9945_v21  ;;  %v3649_v29 = vrot.slane %v8552_v25, %v10708_v0  ;;  %v3660_v61 = vrot.slane %v8552_v25, %v10712_v55  ;;  %v8554_v53 = vpop.eup %8553  ;;  %v3671_v7 = vrot.slane %v8552_v25, %v10716_v31 }
 0x7bd   : > { %v3541_v18 = vadd.f32 1.0, %v8554_v53  ;;  %v3682_v48 = vrot.slane %v8552_v25, %v10720_v2  ;;  %v3693_v30 = vrot.slane %v8552_v25, %v10724_v39  ;;  %v3704_v49 = vrot.slane %v8552_v25, %v10728_v41 }
 0x7be   : > { %3644 = vbcast.lane.b32.xlu1 %v3638_v46, 264  ;;  %3640 = vbcast.lane.b32.xlu0 %v3638_v46, 256  ;;  %v3715_v52 = vrot.slane %v8552_v25, %v10732_v28 }
 0x7bf   : > { %8555 = vrcp.f32 %v3541_v18 }
 0x7c2   : > { %3655 = vbcast.lane.b32.xlu1 %v3649_v29, 264  ;;  %3651 = vbcast.lane.b32.xlu0 %v3649_v29, 256 }
 0x7c6   : > { %3662 = vbcast.lane.b32.xlu1 %v3660_v61, 256  ;;  %3666 = vbcast.lane.b32.xlu0 %v3660_v61, 264 }
 0x7ca   : > { %3673 = vbcast.lane.b32.xlu1 %v3671_v7, 256  ;;  %3677 = vbcast.lane.b32.xlu0 %v3671_v7, 264 }
 0x7cc   : > { %v8556_v50 = vpop.eup %8555 }
 0x7cd   : > { %v3550_v62 = vrot.slane %v8556_v50, %v9945_v21  ;;  %v3561_v54 = vrot.slane %v8556_v50, %v10708_v0  ;;  %v3572_v10 = vrot.slane %v8556_v50, %v10712_v55  ;;  %v3583_v17 = vrot.slane %v8556_v50, %v10716_v31 }
 0x7ce   : > { %3684 = vbcast.lane.b32.xlu1 %v3682_v48, 256  ;;  %3688 = vbcast.lane.b32.xlu0 %v3682_v48, 264  ;;  %v3594_v56 = vrot.slane %v8556_v50, %v10720_v2  ;;  %v3605_v26 = vrot.slane %v8556_v50, %v10724_v39  ;;  %v3616_v24 = vrot.slane %v8556_v50, %v10728_v41 }
 0x7cf   : > { %v3627_v1 = vrot.slane %v8556_v50, %v10732_v28 }
 0x7d2   : > { %3695 = vbcast.lane.b32.xlu1 %v3693_v30, 256  ;;  %3699 = vbcast.lane.b32.xlu0 %v3693_v30, 264 }
 0x7d6   : > { %3706 = vbcast.lane.b32.xlu1 %v3704_v49, 256  ;;  %3710 = vbcast.lane.b32.xlu0 %v3704_v49, 264 }
 0x7da   : > { %3717 = vbcast.lane.b32.xlu1 %v3715_v52, 256  ;;  %3721 = vbcast.lane.b32.xlu0 %v3715_v52, 264 }
 0x7de   : > { %3556 = vbcast.lane.b32.xlu1 %v3550_v62, 264  ;;  %3552 = vbcast.lane.b32.xlu0 %v3550_v62, 256 }
 0x7e2   : > { %3567 = vbcast.lane.b32.xlu1 %v3561_v54, 264  ;;  %3563 = vbcast.lane.b32.xlu0 %v3561_v54, 256 }
 0x7e6   : > { %3578 = vbcast.lane.b32.xlu1 %v3572_v10, 264  ;;  %3574 = vbcast.lane.b32.xlu0 %v3572_v10, 256 }
 0x7ea   : > { %3589 = vbcast.lane.b32.xlu1 %v3583_v17, 264  ;;  %3585 = vbcast.lane.b32.xlu0 %v3583_v17, 256 }
 0x7ee   : > { %3600 = vbcast.lane.b32.xlu1 %v3594_v56, 264  ;;  %3596 = vbcast.lane.b32.xlu0 %v3594_v56, 256 }
 0x7f2   : > { %3611 = vbcast.lane.b32.xlu1 %v3605_v26, 264  ;;  %3607 = vbcast.lane.b32.xlu0 %v3605_v26, 256 }
 0x7f6   : > { %3622 = vbcast.lane.b32.xlu1 %v3616_v24, 264  ;;  %3618 = vbcast.lane.b32.xlu0 %v3616_v24, 256 }
 0x7fa   : > { %3633 = vbcast.lane.b32.xlu1 %v3627_v1, 264  ;;  %3629 = vbcast.lane.b32.xlu0 %v3627_v1, 256 }
 0x830   : > { %v3645_v4 = vpop.permute.xlu1 %3644  ;;  %v3641_v5 = vpop.permute.xlu0 %3640 }
 0x831   : > { %v3740_v43 = vmul.f32 %v3645_v4, %v9988_v51  ;;  %v3739_v35 = vmul.f32 %v3641_v5, %v9964_v36 }
 0x833   : > { %3828 = vst.msk [vmem:[#allocation4 + $0xe1] sm:$0xff] %vm2176_vm13, %v3740_v43  ;;  %3827 = vst.msk [vmem:[#allocation4 + $0xd9] sm:$0xff] %vm2176_vm13, %v3739_v35 }
 0x834   : > { %v3656_v14 = vpop.permute.xlu1 %3655  ;;  %v3652_v13 = vpop.permute.xlu0 %3651 }
 0x835   : > { %v3742_v45 = vmul.f32 %v3656_v14, %v9996_v19  ;;  %v3741_v23 = vmul.f32 %v3652_v13, %v9976_v27 }
 0x837   : > { %3830 = vst.msk [vmem:[#allocation4 + $0xf9] sm:$0xff] %vm2176_vm13, %v3742_v45  ;;  %3829 = vst.msk [vmem:[#allocation4 + $0xf1] sm:$0xff] %vm2176_vm13, %v3741_v23 }
 0x838   : > { %v3663_v16 = vpop.permute.xlu1 %3662  ;;  %v3667_v20 = vpop.permute.xlu0 %3666 }
 0x839   : > { %v3743_v51 = vmul.f32 %v3663_v16, %v10000_v57  ;;  %v3744_v36 = vmul.f32 %v3667_v20, %v10020_v47 }
 0x83a   : > { %v3870_v33 = vld [vmem:[#allocation4 + $0xd8] sm:$0xff]  ;;  %v3871_v6 = vld [vmem:[#allocation4 + $0xe0] sm:$0xff]  ;;  %v3872_v44 = vld [vmem:[#allocation4 + $0xe8] sm:$0x3] }
 0x83b   : > { %3831 = vst.msk [vmem:[#allocation4 + $0x109] sm:$0xff] %vm2176_vm13, %v3743_v51  ;;  %3832 = vst.msk [vmem:[#allocation4 + $0x111] sm:$0xff] %vm2176_vm13, %v3744_v36  ;;  %v4268_v19 = vrot.slane %v3870_v33, 2  ;;  %4466 = vrot.lane.b32.xlu1 %v3870_v33, %s8601_s30  ;;  %4796 = vrot.lane.b32.xlu0 %v3870_v33, %s8600_s20  ;;  %v4269_v27 = vrot.slane %v3871_v6, 2  ;;  %v4271_v25 = vrot.slane %v3872_v44, 2  ;;  %v4059_v57 = vrot.slane %v3870_v33, 1 }
 0x83c   : > { %3952 = vst.msk [vmem:[#allocation3 + $0x1b0] sm:$0xff] %vm2176_vm13, %v3870_v33  ;;  %3953 = vst.msk [vmem:[#allocation3 + $0x1c8] sm:$0xff] %vm2176_vm13, %v3871_v6  ;;  %v3674_v47 = vpop.permute.xlu1 %3673  ;;  %v3678_v46 = vpop.permute.xlu0 %3677  ;;  %v4060_v29 = vrot.slane %v3871_v6, 1  ;;  %v4062_v61 = vrot.slane %v3872_v44, 1 }
 0x83d   : > { %v3745_v53 = vmul.f32 %v3674_v47, %v10024_v8  ;;  %v3746_v18 = vmul.f32 %v3678_v46, %v10044_v63  ;;  %v10775_v7 = vsel %vm14166_vm14, %v4268_v19, %v4269_v27  ;;  %v10778_v48 = vsel %vm14167_vm8, %v4269_v27, %v4271_v25  ;;  %vm14171_vm14 = vmmov %vm14167_vm8 }
 0x83e   : > { %5081 = vst.msk [vmem:[#allocation3 + $0x160] sm:$0xff] %vm2176_vm13, %v10775_v7  ;;  %5082 = vst.msk [vmem:[#allocation3 + $0x178] sm:$0xff] %vm2176_vm13, %v10778_v48  ;;  %v3873_v30 = vld [vmem:[#allocation4 + $0xf0] sm:$0xff]  ;;  %v3874_v49 = vld [vmem:[#allocation4 + $0xf8] sm:$0xff]  ;;  %v10785_v50 = vsel %vm14168_vm9, %v4059_v57, %v4060_v29  ;;  %v10788_v8 = vsel %vm14169_vm10, %v4060_v29, %v4062_v61 }
 0x83f   : > { %v3875_v52 = vld [vmem:[#allocation4 + $0x100] sm:$0x3]  ;;  %3833 = vst.msk [vmem:[#allocation4 + $0x121] sm:$0xff] %vm2176_vm13, %v3745_v53  ;;  %3834 = vst.msk [vmem:[#allocation4 + $0x129] sm:$0xff] %vm2176_vm13, %v3746_v18  ;;  %4468 = vrot.lane.b32.xlu1 %v3871_v6, %s8601_s30  ;;  %4798 = vrot.lane.b32.xlu0 %v3871_v6, %s8600_s20  ;;  %v4273_v63 = vrot.slane %v3873_v30, 2  ;;  %v4274_v62 = vrot.slane %v3874_v49, 2 }
 0x840   : > { %3954 = vst.msk [vmem:[#allocation3 + $0x1e0] sm:$0xff] %vm2176_vm13, %v3873_v30  ;;  %v4276_v54 = vrot.slane %v3875_v52, 2  ;;  %3955 = vst.msk [vmem:[#allocation3 + $0x1f8] sm:$0xff] %vm2176_vm13, %v3874_v49  ;;  %v4064_v10 = vrot.slane %v3873_v30, 1  ;;  %v3685_v17 = vpop.permute.xlu1 %3684  ;;  %v3689_v3 = vpop.permute.xlu0 %3688  ;;  %v4065_v56 = vrot.slane %v3874_v49, 1  ;;  %v4067_v37 = vrot.slane %v3875_v52, 1 }
 0x841   : > { %4617 = vst.msk [vmem:[#allocation3 + $0x188] sm:$0xff] %vm2176_vm13, %v10785_v50  ;;  %4618 = vst.msk [vmem:[#allocation3 + $0x1a0] sm:$0xff] %vm2176_vm13, %v10788_v8  ;;  %v3747_v26 = vmul.f32 %v3685_v17, %v10048_v15  ;;  %v3748_v32 = vmul.f32 %v3689_v3, %v10068_v9 }
 0x842   : > { %vm14170_vm10 = vmmov %vm14167_vm8  ;;  %v10806_v24 = vsel %vm14171_vm14, %v4274_v62, %v4276_v54  ;;  %v3876_v1 = vld [vmem:[#allocation4 + $0x108] sm:$0xff]  ;;  %v10812_v4 = vld [vmem:[#allocation4 + $0x110] sm:$0xff] }
 0x843   : > { %v10803_v59 = vsel %vm14170_vm10, %v4273_v63, %v4274_v62  ;;  %5084 = vst.msk [vmem:[#allocation3 + $0x1a8] sm:$0xff] %vm2176_vm13, %v10806_v24  ;;  %v3878_v5 = vld [vmem:[#allocation4 + $0x118] sm:$0x3]  ;;  %vm14172_vm8 = vmmov %vm14168_vm9  ;;  %4470 = vrot.lane.b32.xlu1 %v3873_v30, %s8601_s30  ;;  %4800 = vrot.lane.b32.xlu0 %v3873_v30, %s8600_s20  ;;  %v4278_v43 = vrot.slane %v3876_v1, 2  ;;  %v4279_v35 = vrot.slane %v10812_v4, 2  ;;  %v4069_v13 = vrot.slane %v3876_v1, 1 }
 0x844   : > { %5083 = vst.msk [vmem:[#allocation3 + $0x190] sm:$0xff] %vm2176_vm13, %v10803_v59  ;;  %v10815_v15 = vsel %vm14172_vm8, %v4064_v10, %v4065_v56  ;;  %vm14173_vm9 = vmmov %vm14172_vm8  ;;  %v4281_v14 = vrot.slane %v3878_v5, 2  ;;  %v3696_v45 = vpop.permute.xlu1 %3695  ;;  %v3700_v23 = vpop.permute.xlu0 %3699  ;;  %v4070_v16 = vrot.slane %v10812_v4, 1  ;;  %v4072_v20 = vrot.slane %v3878_v5, 1 }
 0x845   : > { %v10818_v9 = vsel %vm14173_vm9, %v4065_v56, %v4067_v37  ;;  %3835 = vst.msk [vmem:[#allocation4 + $0x139] sm:$0xff] %vm2176_vm13, %v3747_v26  ;;  %3836 = vst.msk [vmem:[#allocation4 + $0x141] sm:$0xff] %vm2176_vm13, %v3748_v32  ;;  %v3749_v51 = vmul.f32 %v3696_v45, %v10072_v38  ;;  %v3750_v36 = vmul.f32 %v3700_v23, %v10088_v60 }
 0x846   : > { %3956 = vst.msk [vmem:[#allocation3 + $0x210] sm:$0xff] %vm2176_vm13, %v3876_v1  ;;  %3957 = vst.msk [vmem:[#allocation3 + $0x228] sm:$0xff] %vm2176_vm13, %v10812_v4  ;;  %v10836_v33 = vsel %vm14170_vm10, %v4278_v43, %v4279_v35  ;;  %v10845_v44 = vld [vmem:[#allocation4 + $0x120] sm:$0xff]  ;;  %v10847_v19 = vld [vmem:[#allocation4 + $0x128] sm:$0xff]  ;;  %v10850_v38 = vsel %vm14172_vm8, %v4069_v13, %v4070_v16 }
 0x847   : > { %4619 = vst.msk [vmem:[#allocation3 + $0x1b8] sm:$0xff] %vm2176_vm13, %v10815_v15  ;;  %4620 = vst.msk [vmem:[#allocation3 + $0x1d0] sm:$0xff] %vm2176_vm13, %v10818_v9  ;;  %v3881_v27 = vld [vmem:[#allocation4 + $0x130] sm:$0x3]  ;;  %4472 = vrot.lane.b32.xlu1 %v3874_v49, %s8601_s30  ;;  %4802 = vrot.lane.b32.xlu0 %v3874_v49, %s8600_s20  ;;  %v4283_v25 = vrot.slane %v10845_v44, 2  ;;  %v4284_v57 = vrot.slane %v10847_v19, 2 }
 0x848   : > { %vm14174_vm14 = vmmov %vm14170_vm10  ;;  %5085 = vst.msk [vmem:[#allocation3 + $0x1c0] sm:$0xff] %vm2176_vm13, %v10836_v33  ;;  %v4286_v47 = vrot.slane %v3881_v27, 2  ;;  %v4074_v46 = vrot.slane %v10845_v44, 1  ;;  %v3707_v29 = vpop.permute.xlu1 %3706  ;;  %v3711_v61 = vpop.permute.xlu0 %3710  ;;  %v4075_v53 = vrot.slane %v10847_v19, 1  ;;  %v4077_v18 = vrot.slane %v3881_v27, 1 }
 0x849   : > { %v10839_v6 = vsel %vm14174_vm14, %v4279_v35, %v4281_v14  ;;  %vm14175_vm9 = vmmov %vm14172_vm8  ;;  %3837 = vst.msk [vmem:[#allocation4 + $0x151] sm:$0xff] %vm2176_vm13, %v3749_v51  ;;  %v3751_v30 = vmul.f32 %v3707_v29, %v10104_v40  ;;  %v3752_v49 = vmul.f32 %v3711_v61, %v10124_v22  ;;  %v10874_v52 = vsel %vm14170_vm10, %v4283_v25, %v4284_v57  ;;  %v14183_v61 = vld [vmem:[#allocation8_spill] sm:$0xff] }
 0x84a   : > { %5086 = vst.msk [vmem:[#allocation3 + $0x1d8] sm:$0xff] %vm2176_vm13, %v10839_v6  ;;  %v10853_v60 = vsel %vm14175_vm9, %v4070_v16, %v4072_v20  ;;  %3838 = vst.msk [vmem:[#allocation4 + $0x159] sm:$0xff] %vm2176_vm13, %v3750_v36  ;;  %v10888_v40 = vsel %vm14172_vm8, %v4074_v46, %v4075_v53  ;;  %v14182_v46 = vld [vmem:[#allocation9_spill] sm:$0xff] }
 0x84b   : > { %3958 = vst.msk [vmem:[#allocation3 + $0x240] sm:$0xff] %vm2176_vm13, %v10845_v44  ;;  %3959 = vst.msk [vmem:[#allocation3 + $0x258] sm:$0xff] %vm2176_vm13, %v10847_v19  ;;  %4474 = vrot.lane.b32.xlu1 %v3876_v1, %s8601_s30  ;;  %4804 = vrot.lane.b32.xlu0 %v3876_v1, %s8600_s20 }
 0x84c   : > { %4621 = vst.msk [vmem:[#allocation3 + $0x1e8] sm:$0xff] %vm2176_vm13, %v10850_v38  ;;  %4622 = vst.msk [vmem:[#allocation3 + $0x200] sm:$0xff] %vm2176_vm13, %v10853_v60  ;;  %v10883_v62 = vld [vmem:[#allocation4 + $0x138] sm:$0xff]  ;;  %v10885_v54 = vld [vmem:[#allocation4 + $0x140] sm:$0xff]  ;;  %v3718_v26 = vpop.permute.xlu1 %3717  ;;  %v3722_v32 = vpop.permute.xlu0 %3721 }
 0x84d   : > { %vm14176_vm14 = vmmov %vm14170_vm10  ;;  %5087 = vst.msk [vmem:[#allocation3 + $0x1f0] sm:$0xff] %vm2176_vm13, %v10874_v52  ;;  %v3884_v10 = vld [vmem:[#allocation4 + $0x148] sm:$0x3]  ;;  %v4288_v17 = vrot.slane %v10883_v62, 2  ;;  %v4289_v3 = vrot.slane %v10885_v54, 2  ;;  %v4079_v37 = vrot.slane %v10883_v62, 1  ;;  %v3753_v43 = vmul.f32 %v3718_v26, %v10132_v58 }
 0x84e   : > { %v10877_v63 = vsel %vm14176_vm14, %v4284_v57, %v4286_v47  ;;  %vm14177_vm9 = vmmov %vm14172_vm8  ;;  %3839 = vst.msk [vmem:[#allocation4 + $0x169] sm:$0xff] %vm2176_vm13, %v3751_v30  ;;  %v4291_v56 = vrot.slane %v3884_v10, 2  ;;  %v4080_v1 = vrot.slane %v10885_v54, 1  ;;  %v4082_v5 = vrot.slane %v3884_v10, 1 }
 0x84f   : > { %5088 = vst.msk [vmem:[#allocation3 + $0x208] sm:$0xff] %vm2176_vm13, %v10877_v63  ;;  %v10891_v22 = vsel %vm14177_vm9, %v4075_v53, %v4077_v18  ;;  %3840 = vst.msk [vmem:[#allocation4 + $0x171] sm:$0xff] %vm2176_vm13, %v3752_v49  ;;  %v3754_v35 = vmul.f32 %v3722_v32, %v10148_v12  ;;  %v10912_v14 = vsel %vm14170_vm10, %v4288_v17, %v4289_v3  ;;  %4476 = vrot.lane.b32.xlu1 %v10812_v4, %s8601_s30 }
 0x850   : > { %3960 = vst.msk [vmem:[#allocation3 + $0x270] sm:$0xff] %vm2176_vm13, %v10883_v62  ;;  %3961 = vst.msk [vmem:[#allocation3 + $0x288] sm:$0xff] %vm2176_vm13, %v10885_v54  ;;  %v10921_v45 = vld [vmem:[#allocation4 + $0x150] sm:$0xff]  ;;  %v10926_v58 = vsel %vm14172_vm8, %v4079_v37, %v4080_v1  ;;  %4806 = vrot.lane.b32.xlu0 %v10812_v4, %s8600_s20  ;;  %v3557_v4 = vpop.permute.xlu1 %3556  ;;  %v3553_v25 = vpop.permute.xlu0 %3552 }
 0x851   : > { %4623 = vst.msk [vmem:[#allocation3 + $0x218] sm:$0xff] %vm2176_vm13, %v10888_v40  ;;  %4624 = vst.msk [vmem:[#allocation3 + $0x230] sm:$0xff] %vm2176_vm13, %v10891_v22  ;;  %v10923_v23 = vld [vmem:[#allocation4 + $0x158] sm:$0xff]  ;;  %v3887_v16 = vld [vmem:[#allocation4 + $0x160] sm:$0x3]  ;;  %v4293_v20 = vrot.slane %v10921_v45, 2  ;;  %v3724_v29 = vmul.f32 %v3557_v4, %v14182_v46  ;;  %v3723_v53 = vmul.f32 %v3553_v25, %v14183_v61 }
 0x852   : > { %vm14178_vm14 = vmmov %vm14170_vm10  ;;  %5089 = vst.msk [vmem:[#allocation3 + $0x220] sm:$0xff] %vm2176_vm13, %v10912_v14  ;;  %v4294_v51 = vrot.slane %v10923_v23, 2  ;;  %v4296_v36 = vrot.slane %v3887_v16, 2  ;;  %v4084_v27 = vrot.slane %v10921_v45, 1  ;;  %v4085_v57 = vrot.slane %v10923_v23, 1 }
 0x853   : > { %v10915_v13 = vsel %vm14178_vm14, %v4289_v3, %v4291_v56  ;;  %14179 = vst [vmem:[#allocation33_spill] sm:$0xff] %v10921_v45  ;;  %14180 = vst [vmem:[#allocation34_spill] sm:$0xff] %v10923_v23  ;;  %v4087_v47 = vrot.slane %v3887_v16, 1  ;;  %4478 = vrot.lane.b32.xlu1 %v10845_v44, %s8601_s30 }
 0x854   : > { %5090 = vst.msk [vmem:[#allocation3 + $0x238] sm:$0xff] %vm2176_vm13, %v10915_v13  ;;  %vm14181_vm9 = vmmov %vm14172_vm8  ;;  %v10952_v18 = vsel %vm14170_vm10, %v4293_v20, %v4294_v51  ;;  %v10966_v3 = vsel %vm14172_vm8, %v4084_v27, %v4085_v57  ;;  %4808 = vrot.lane.b32.xlu0 %v10845_v44, %s8600_s20  ;;  %v14189_v20 = vld [vmem:[#allocation11_spill] sm:$0xff] }
 0x855   : > { %v10929_v12 = vsel %vm14181_vm9, %v4080_v1, %v4082_v5  ;;  %3841 = vst.msk [vmem:[#allocation4 + $0x181] sm:$0xff] %vm2176_vm13, %v3753_v43  ;;  %3842 = vst.msk [vmem:[#allocation4 + $0x189] sm:$0xff] %vm2176_vm13, %v3754_v35  ;;  %v10957_v49 = vld [vmem:[#allocation4 + $0x168] sm:$0xff]  ;;  %v3568_v1 = vpop.permute.xlu1 %3567  ;;  %v3564_v5 = vpop.permute.xlu0 %3563 }
 0x856   : > { %3962 = vst.msk [vmem:[#allocation3 + $0x2a0] sm:$0xff] %vm2176_vm13, %v10921_v45  ;;  %3963 = vst.msk [vmem:[#allocation3 + $0x2b8] sm:$0xff] %vm2176_vm13, %v10923_v23  ;;  %v10959_v10 = vld [vmem:[#allocation4 + $0x170] sm:$0xff]  ;;  %v3890_v17 = vld [vmem:[#allocation4 + $0x178] sm:$0x3]  ;;  %v4298_v37 = vrot.slane %v10957_v49, 2  ;;  %v3726_v44 = vmul.f32 %v3568_v1, %v14189_v20 }
 0x857   : > { %4625 = vst.msk [vmem:[#allocation3 + $0x248] sm:$0xff] %vm2176_vm13, %v10926_v58  ;;  %4626 = vst.msk [vmem:[#allocation3 + $0x260] sm:$0xff] %vm2176_vm13, %v10929_v12  ;;  %v4299_v26 = vrot.slane %v10959_v10, 2  ;;  %v4301_v32 = vrot.slane %v3890_v17, 2  ;;  %v4089_v43 = vrot.slane %v10957_v49, 1  ;;  %v4090_v35 = vrot.slane %v10959_v10, 1  ;;  %4480 = vrot.lane.b32.xlu1 %v10847_v19, %s8601_s30 }
 0x858   : > { %vm14184_vm14 = vmmov %vm14170_vm10  ;;  %14186 = vst [vmem:[#allocation8_spill] sm:$0xff] %v10957_v49  ;;  %v4092_v16 = vrot.slane %v3890_v17, 1  ;;  %4810 = vrot.lane.b32.xlu0 %v10847_v19, %s8600_s20 }
 0x859   : > { %v10955_v30 = vsel %vm14184_vm14, %v4294_v51, %v4296_v36  ;;  %14187 = vst [vmem:[#allocation35_spill] sm:$0xff] %v10959_v10  ;;  %5091 = vst.msk [vmem:[#allocation3 + $0x250] sm:$0xff] %vm2176_vm13, %v10952_v18  ;;  %v14190_v51 = vld [vmem:[#allocation10_spill] sm:$0xff]  ;;  %v10992_v27 = vsel %vm14170_vm10, %v4298_v37, %v4299_v26  ;;  %v11002_v46 = vsel %vm14172_vm8, %v4089_v43, %v4090_v35  ;;  %v14197_v43 = vld [vmem:[#allocation13_spill] sm:$0xff] }
 0x85a   : > { %14185 = vst [vmem:[#allocation9_spill] sm:$0xff] %v10955_v30  ;;  %5092 = vst.msk [vmem:[#allocation3 + $0x268] sm:$0xff] %vm2176_vm13, %v10955_v30  ;;  %v3725_v36 = vmul.f32 %v3564_v5, %v14190_v51 }
 0x85b   : > { %vm14188_vm9 = vmmov %vm14172_vm8  ;;  %3964 = vst.msk [vmem:[#allocation3 + $0x2d0] sm:$0xff] %vm2176_vm13, %v10957_v49  ;;  %4482 = vrot.lane.b32.xlu1 %v10883_v62, %s8601_s30 }
 0x85c   : > { %v10969_v56 = vsel %vm14188_vm9, %v4085_v57, %v4087_v47  ;;  %3965 = vst.msk [vmem:[#allocation3 + $0x2e8] sm:$0xff] %vm2176_vm13, %v10959_v10  ;;  %3812 = vst.msk [vmem:[#allocation4 + $0x21] sm:$0xff] %vm2176_vm13, %v3724_v29  ;;  %v3891_v25 = vld [vmem:[#allocation4 + $0x180] sm:$0xff]  ;;  %v3892_v57 = vld [vmem:[#allocation4 + $0x188] sm:$0xff]  ;;  %4812 = vrot.lane.b32.xlu0 %v10883_v62, %s8600_s20 }
 0x85d   : > { %3811 = vst.msk [vmem:[#allocation4 + $0x19] sm:$0xff] %vm2176_vm13, %v3723_v53  ;;  %4627 = vst.msk [vmem:[#allocation3 + $0x278] sm:$0xff] %vm2176_vm13, %v10966_v3  ;;  %v3893_v47 = vld [vmem:[#allocation4 + $0x190] sm:$0x3]  ;;  %v4633_v61 = vrot.slane %v3891_v25, 2  ;;  %v4634_v53 = vrot.slane %v3892_v57, 2 }
 0x85e   : > { %4628 = vst.msk [vmem:[#allocation3 + $0x290] sm:$0xff] %vm2176_vm13, %v10969_v56  ;;  %14191 = vst [vmem:[#allocation11_spill] sm:$0xff] %v10992_v27  ;;  %v4636_v17 = vrot.slane %v3893_v47, 2  ;;  %v4564_v37 = vrot.slane %v3891_v25, 1  ;;  %v4565_v1 = vrot.slane %v3892_v57, 1  ;;  %v4567_v5 = vrot.slane %v3893_v47, 1 }
 0x85f   : > { %vm14192_vm14 = vmmov %vm14170_vm10  ;;  %5093 = vst.msk [vmem:[#allocation3 + $0x280] sm:$0xff] %vm2176_vm13, %v10992_v27  ;;  %v11020_v19 = vsel %vm14170_vm10, %v4633_v61, %v4634_v53  ;;  %4484 = vrot.lane.b32.xlu1 %v10885_v54, %s8601_s30 }
 0x860   : > { %v10995_v4 = vsel %vm14192_vm14, %v4299_v26, %v4301_v32  ;;  %14194 = vst [vmem:[#allocation36_spill] sm:$0xff] %v11002_v46  ;;  %vm14195_vm9 = vmmov %vm14172_vm8  ;;  %v3579_v26 = vpop.permute.xlu1 %3578  ;;  %v3575_v32 = vpop.permute.xlu0 %3574  ;;  %v11034_v57 = vsel %vm14172_vm8, %v4564_v37, %v4565_v1  ;;  %4814 = vrot.lane.b32.xlu0 %v10885_v54, %s8600_s20 }
 0x861   : > { %14193 = vst [vmem:[#allocation10_spill] sm:$0xff] %v10995_v4  ;;  %5094 = vst.msk [vmem:[#allocation3 + $0x298] sm:$0xff] %vm2176_vm13, %v10995_v4  ;;  %v11005_v29 = vsel %vm14195_vm9, %v4090_v35, %v4092_v16  ;;  %v3728_v35 = vmul.f32 %v3579_v26, %v14197_v43  ;;  %v14198_v16 = vld [vmem:[#allocation12_spill] sm:$0xff] }
 0x862   : > { %14196 = vst [vmem:[#allocation37_spill] sm:$0xff] %v11005_v29  ;;  %3814 = vst.msk [vmem:[#allocation4 + $0x39] sm:$0xff] %vm2176_vm13, %v3726_v44  ;;  %v3727_v20 = vmul.f32 %v3575_v32, %v14198_v16 }
 0x863   : > { %3813 = vst.msk [vmem:[#allocation4 + $0x31] sm:$0xff] %vm2176_vm13, %v3725_v36  ;;  %4629 = vst.msk [vmem:[#allocation3 + $0x2a8] sm:$0xff] %vm2176_vm13, %v11002_v46  ;;  %v3848_v25 = vld [vmem:[#allocation4 + $0x28] sm:$0x3] }
 0x864   : > { %4630 = vst.msk [vmem:[#allocation3 + $0x2c0] sm:$0xff] %vm2176_vm13, %v11005_v29  ;;  %14199 = vst [vmem:[#allocation13_spill] sm:$0xff] %v11020_v19  ;;  %v11025_v51 = vld [vmem:[#allocation4 + $0x18] sm:$0xff]  ;;  %v11027_v36 = vld [vmem:[#allocation4 + $0x20] sm:$0xff]  ;;  %v3590_v62 = vpop.permute.xlu1 %3589  ;;  %v3586_v26 = vpop.permute.xlu0 %3585  ;;  %v4022_v32 = vrot.slane %v3848_v25, 1  ;;  %4816 = vrot.lane.b32.xlu0 %v10921_v45, %s8600_s20 }
 0x865   : > { %vm14200_vm14 = vmmov %vm14170_vm10  ;;  %5095 = vst.msk [vmem:[#allocation3 + $0x2b0] sm:$0xff] %vm2176_vm13, %v11020_v19  ;;  %v4019_v61 = vrot.slane %v11025_v51, 1  ;;  %v4229_v37 = vrot.slane %v11027_v36, 2  ;;  %4434 = vrot.lane.b32.xlu1 %v11025_v51, %s8601_s30 }
 0x866   : > { %v11023_v44 = vsel %vm14200_vm14, %v4634_v53, %v4636_v17  ;;  %14202 = vst [vmem:[#allocation38_spill] sm:$0xff] %v11034_v57  ;;  %vm14203_vm9 = vmmov %vm14172_vm8  ;;  %v4228_v53 = vrot.slane %v11025_v51, 2  ;;  %v4020_v17 = vrot.slane %v11027_v36, 1 }
 0x867   : > { %14201 = vst [vmem:[#allocation12_spill] sm:$0xff] %v11023_v44  ;;  %5096 = vst.msk [vmem:[#allocation3 + $0x2c8] sm:$0xff] %vm2176_vm13, %v11023_v44  ;;  %v11037_v47 = vsel %vm14203_vm9, %v4565_v1, %v4567_v5  ;;  %v4231_v1 = vrot.slane %v3848_v25, 2  ;;  %v14205_v5 = vld [vmem:[#allocation15_spill] sm:$0xff] }
 0x868   : > { %14204 = vst [vmem:[#allocation39_spill] sm:$0xff] %v11037_v47  ;;  %3816 = vst.msk [vmem:[#allocation4 + $0x51] sm:$0xff] %vm2176_vm13, %v3728_v35  ;;  %v3730_v43 = vmul.f32 %v3590_v62, %v14205_v5  ;;  %v14206_v35 = vld [vmem:[#allocation14_spill] sm:$0xff]  ;;  %v11063_v28 = vsel %vm14200_vm14, %v4228_v53, %v4229_v37  ;;  %v11072_v25 = vsel %vm14172_vm8, %v4020_v17, %v4022_v32  ;;  %v3597_v32 = vpop.permute.xlu0 %3596  ;;  %4818 = vrot.lane.b32.xlu0 %v10923_v23, %s8600_s20 }
 0x869   : > { %3815 = vst.msk [vmem:[#allocation4 + $0x49] sm:$0xff] %vm2176_vm13, %v3727_v20  ;;  %3936 = vst.msk [vmem:[#allocation3 + $0x30] sm:$0xff] %vm2176_vm13, %v11025_v51  ;;  %v3729_v16 = vmul.f32 %v3586_v26, %v14206_v35  ;;  %v3851_v41 = vld [vmem:[#allocation4 + $0x40] sm:$0x3]  ;;  %4436 = vrot.lane.b32.xlu1 %v11027_v36, %s8601_s30 }
 0x86a   : > { %3937 = vst.msk [vmem:[#allocation3 + $0x48] sm:$0xff] %vm2176_vm13, %v11027_v36  ;;  %4631 = vst.msk [vmem:[#allocation3 + $0x2d8] sm:$0xff] %vm2176_vm13, %v11034_v57  ;;  %v11065_v39 = vld [vmem:[#allocation4 + $0x30] sm:$0xff]  ;;  %v11067_v2 = vld [vmem:[#allocation4 + $0x38] sm:$0xff]  ;;  %v4236_v26 = vrot.slane %v3851_v41, 2  ;;  %v4027_v5 = vrot.slane %v3851_v41, 1 }
 0x86b   : > { %4632 = vst.msk [vmem:[#allocation3 + $0x2f0] sm:$0xff] %vm2176_vm13, %v11037_v47  ;;  %vm14207_vm10 = vmmov %vm14172_vm8  ;;  %v4234_v53 = vrot.slane %v11067_v2, 2 }
 0x86c   : > { %v11060_v20 = vsel %vm14207_vm10, %v4019_v61, %v4020_v17  ;;  %vm14208_vm9 = vmmov %vm14200_vm14  ;;  %3938 = vst.msk [vmem:[#allocation3 + $0x60] sm:$0xff] %vm2176_vm13, %v11065_v39  ;;  %v4233_v61 = vrot.slane %v11065_v39, 2  ;;  %v4024_v17 = vrot.slane %v11065_v39, 1  ;;  %4768 = vrot.lane.b32.xlu0 %v11065_v39, %s8600_s20 }
 0x86d   : > { %4601 = vst.msk [vmem:[#allocation3 + $0x8] sm:$0xff] %vm2176_vm13, %v11060_v20  ;;  %v11075_v62 = vsel %vm14208_vm9, %v4229_v37, %v4231_v1  ;;  %3939 = vst.msk [vmem:[#allocation3 + $0x78] sm:$0xff] %vm2176_vm13, %v11067_v2  ;;  %v3601_v37 = vpop.permute.xlu1 %3600  ;;  %v4025_v1 = vrot.slane %v11067_v2, 1  ;;  %4438 = vrot.lane.b32.xlu1 %v11065_v39, %s8601_s30 }
 0x86e   : > { %3818 = vst.msk [vmem:[#allocation4 + $0x69] sm:$0xff] %vm2176_vm13, %v3730_v43  ;;  %3817 = vst.msk [vmem:[#allocation4 + $0x61] sm:$0xff] %vm2176_vm13, %v3729_v16  ;;  %v14209_v43 = vld [vmem:[#allocation17_spill] sm:$0xff]  ;;  %v14210_v16 = vld [vmem:[#allocation16_spill] sm:$0xff] }
 0x86f   : > { %4602 = vst.msk [vmem:[#allocation3 + $0x20] sm:$0xff] %vm2176_vm13, %v11072_v25  ;;  %v3732_v35 = vmul.f32 %v3601_v37, %v14209_v43  ;;  %v3731_v31 = vmul.f32 %v3597_v32, %v14210_v16  ;;  %vm14211_vm10 = vmmov %vm14208_vm9  ;;  %v3854_v0 = vld [vmem:[#allocation4 + $0x58] sm:$0x3]  ;;  %v11110_v41 = vsel %vm14172_vm8, %v4024_v17, %v4025_v1  ;;  %v3608_v32 = vpop.permute.xlu0 %3607  ;;  %v14214_v43 = vld [vmem:[#allocation19_spill] sm:$0xff] }
 0x870   : > { %v11096_v54 = vsel %vm14211_vm10, %v4233_v61, %v4234_v53  ;;  %vm14212_vm14 = vmmov %vm14208_vm9  ;;  %v11101_v11 = vld [vmem:[#allocation4 + $0x48] sm:$0xff]  ;;  %v11103_v34 = vld [vmem:[#allocation4 + $0x50] sm:$0xff]  ;;  %v4241_v17 = vrot.slane %v3854_v0, 2  ;;  %4603 = vst.msk [vmem:[#allocation3 + $0x38] sm:$0xff] %vm2176_vm13, %v11110_v41  ;;  %4770 = vrot.lane.b32.xlu0 %v11067_v2, %s8600_s20 }
 0x871   : > { %v11099_v55 = vsel %vm14212_vm14, %v4234_v53, %v4236_v26  ;;  %5067 = vst.msk [vmem:[#allocation3 + $0x10] sm:$0xff] %vm2176_vm13, %v11096_v54  ;;  %vm14213_vm9 = vmmov %vm14172_vm8  ;;  %v4238_v26 = vrot.slane %v11101_v11, 2  ;;  %v4239_v53 = vrot.slane %v11103_v34, 2  ;;  %v4029_v37 = vrot.slane %v11101_v11, 1  ;;  %4440 = vrot.lane.b32.xlu1 %v11067_v2, %s8601_s30 }
 0x872   : > { %5068 = vst.msk [vmem:[#allocation3 + $0x28] sm:$0xff] %vm2176_vm13, %v11099_v55  ;;  %v11113_v61 = vsel %vm14213_vm9, %v4025_v1, %v4027_v5  ;;  %3940 = vst.msk [vmem:[#allocation3 + $0x90] sm:$0xff] %vm2176_vm13, %v11101_v11  ;;  %v4030_v1 = vrot.slane %v11103_v34, 1  ;;  %v4032_v5 = vrot.slane %v3854_v0, 1 }
 0x873   : > { %3941 = vst.msk [vmem:[#allocation3 + $0xa8] sm:$0xff] %vm2176_vm13, %v11103_v34  ;;  %3820 = vst.msk [vmem:[#allocation4 + $0x81] sm:$0xff] %vm2176_vm13, %v3732_v35  ;;  %v14215_v35 = vld [vmem:[#allocation18_spill] sm:$0xff]  ;;  %v11136_v21 = vsel %vm14211_vm10, %v4238_v26, %v4239_v53 }
 0x874   : > { %3819 = vst.msk [vmem:[#allocation4 + $0x79] sm:$0xff] %vm2176_vm13, %v3731_v31  ;;  %4604 = vst.msk [vmem:[#allocation3 + $0x50] sm:$0xff] %vm2176_vm13, %v11113_v61  ;;  %v3612_v31 = vpop.permute.xlu1 %3611  ;;  %v3733_v16 = vmul.f32 %v3608_v32, %v14215_v35  ;;  %v11150_v0 = vsel %vm14172_vm8, %v4029_v37, %v4030_v1  ;;  %v14219_v35 = vld [vmem:[#allocation20_spill] sm:$0xff]  ;;  %4772 = vrot.lane.b32.xlu0 %v11101_v11, %s8600_s20 }
 0x875   : > { %v3734_v51 = vmul.f32 %v3612_v31, %v14214_v43  ;;  %vm14216_vm14 = vmmov %vm14211_vm10  ;;  %v3857_v19 = vld [vmem:[#allocation4 + $0x70] sm:$0x3]  ;;  %v11141_v47 = vld [vmem:[#allocation4 + $0x60] sm:$0xff]  ;;  %5069 = vst.msk [vmem:[#allocation3 + $0x40] sm:$0xff] %vm2176_vm13, %v11136_v21  ;;  %4442 = vrot.lane.b32.xlu1 %v11101_v11, %s8601_s30 }
 0x876   : > { %v11139_v44 = vsel %vm14216_vm14, %v4239_v53, %v4241_v17  ;;  %v11143_v4 = vld [vmem:[#allocation4 + $0x68] sm:$0xff]  ;;  %vm14217_vm9 = vmmov %vm14172_vm8  ;;  %3942 = vst.msk [vmem:[#allocation3 + $0xc0] sm:$0xff] %vm2176_vm13, %v11141_v47  ;;  %v4243_v53 = vrot.slane %v11141_v47, 2  ;;  %v4246_v37 = vrot.slane %v3857_v19, 2  ;;  %v4034_v31 = vrot.slane %v11141_v47, 1 }
 0x877   : > { %5070 = vst.msk [vmem:[#allocation3 + $0x58] sm:$0xff] %vm2176_vm13, %v11139_v44  ;;  %v11153_v26 = vsel %vm14217_vm9, %v4030_v1, %v4032_v5  ;;  %3943 = vst.msk [vmem:[#allocation3 + $0xd8] sm:$0xff] %vm2176_vm13, %v11143_v4  ;;  %v4244_v17 = vrot.slane %v11143_v4, 2  ;;  %v3619_v1 = vpop.permute.xlu0 %3618  ;;  %v4035_v5 = vrot.slane %v11143_v4, 1  ;;  %v4037_v43 = vrot.slane %v3857_v19, 1 }
 0x878   : > { %3822 = vst.msk [vmem:[#allocation4 + $0x99] sm:$0xff] %vm2176_vm13, %v3734_v51  ;;  %3821 = vst.msk [vmem:[#allocation4 + $0x91] sm:$0xff] %vm2176_vm13, %v3733_v16  ;;  %v3623_v32 = vpop.permute.xlu1 %3622  ;;  %v14218_v51 = vld [vmem:[#allocation21_spill] sm:$0xff]  ;;  %v3735_v16 = vmul.f32 %v3619_v1, %v14219_v35  ;;  %v5101_v57 = vld [vmem:[#allocation3 + $0x10] sm:$0xff]  ;;  %4774 = vrot.lane.b32.xlu0 %v11103_v34, %s8600_s20 }
 0x879   : > { %4605 = vst.msk [vmem:[#allocation3 + $0x68] sm:$0xff] %vm2176_vm13, %v11150_v0  ;;  %4606 = vst.msk [vmem:[#allocation3 + $0x80] sm:$0xff] %vm2176_vm13, %v11153_v26  ;;  %v3736_v36 = vmul.f32 %v3623_v32, %v14218_v51  ;;  %v5104_v27 = vld [vmem:[#allocation3 + $0x28] sm:$0xff]  ;;  %v11176_v29 = vsel %vm14211_vm10, %v4243_v53, %v4244_v17  ;;  %8394 = vmatprep.mubr.msk.f32.mxu1 %vm2176_vm13, %v5101_v57  ;;  %v11191_v19 = vsel %vm14172_vm8, %v4034_v31, %v4035_v5 }
 0x87a   : > { %14220 = vst [vmem:[#allocation15_spill] sm:$0xff] %v11176_v29  ;;  %vm14221_vm14 = vmmov %vm14211_vm10  ;;  %v3860_v30 = vld [vmem:[#allocation4 + $0x88] sm:$0x3]  ;;  %8395 = vmatmul.mubr.msk.f32.vlgmr.msra.gmra.mxu1 %vm2176_vm13, %v5104_v27  ;;  %4444 = vrot.lane.b32.xlu1 %v11103_v34, %s8601_s30 }
 0x87b   : > { %v11179_v10 = vsel %vm14221_vm14, %v4244_v17, %v4246_v37  ;;  %v11181_v46 = vld [vmem:[#allocation4 + $0x78] sm:$0xff]  ;;  %v11183_v49 = vld [vmem:[#allocation4 + $0x80] sm:$0xff]  ;;  %5071 = vst.msk [vmem:[#allocation3 + $0x70] sm:$0xff] %vm2176_vm13, %v11176_v29  ;;  %vm14223_vm9 = vmmov %vm14172_vm8  ;;  %v4251_v37 = vrot.slane %v3860_v30, 2  ;;  %v3630_v1 = vpop.permute.xlu0 %3629  ;;  %v4042_v39 = vrot.slane %v3860_v30, 1 }
 0x87c   : > { %14222 = vst [vmem:[#allocation14_spill] sm:$0xff] %v11179_v10  ;;  %5072 = vst.msk [vmem:[#allocation3 + $0x88] sm:$0xff] %vm2176_vm13, %v11179_v10  ;;  %v11194_v53 = vsel %vm14223_vm9, %v4035_v5, %v4037_v43  ;;  %v4248_v57 = vrot.slane %v11181_v46, 2  ;;  %v4249_v17 = vrot.slane %v11183_v49, 2  ;;  %v4039_v31 = vrot.slane %v11181_v46, 1  ;;  %v3634_v32 = vpop.permute.xlu1 %3633  ;;  %v14225_v43 = vld [vmem:[#allocation23_spill] sm:$0xff]  ;;  %4776 = vrot.lane.b32.xlu0 %v11141_v47, %s8600_s20 }
 0x87d   : > { %14224 = vst [vmem:[#allocation17_spill] sm:$0xff] %v11194_v53  ;;  %3944 = vst.msk [vmem:[#allocation3 + $0xf0] sm:$0xff] %vm2176_vm13, %v11181_v46  ;;  %v4040_v5 = vrot.slane %v11183_v49, 1  ;;  %v3738_v51 = vmul.f32 %v3634_v32, %v14225_v43 }
 0x87e   : > { %3945 = vst.msk [vmem:[#allocation3 + $0x108] sm:$0xff] %vm2176_vm13, %v11183_v49  ;;  %3824 = vst.msk [vmem:[#allocation4 + $0xb1] sm:$0xff] %vm2176_vm13, %v3736_v36  ;;  %v14226_v36 = vld [vmem:[#allocation22_spill] sm:$0xff]  ;;  %v5110_v23 = vld [vmem:[#allocation3 + $0x58] sm:$0xff]  ;;  %v11218_v45 = vsel %vm14211_vm10, %v4248_v57, %v4249_v17  ;;  %4446 = vrot.lane.b32.xlu1 %v11141_v47, %s8601_s30 }
 0x87f   : > { %3823 = vst.msk [vmem:[#allocation4 + $0xa9] sm:$0xff] %vm2176_vm13, %v3735_v16  ;;  %4607 = vst.msk [vmem:[#allocation3 + $0x98] sm:$0xff] %vm2176_vm13, %v11191_v19  ;;  %v3737_v35 = vmul.f32 %v3630_v1, %v14226_v36  ;;  %v5107_v16 = vld [vmem:[#allocation3 + $0x40] sm:$0xff]  ;;  %v11223_v29 = vld [vmem:[#allocation4 + $0x90] sm:$0xff]  ;;  %v11233_v30 = vsel %vm14172_vm8, %v4039_v31, %v4040_v5 }
 0x880   : > { %4608 = vst.msk [vmem:[#allocation3 + $0xb0] sm:$0xff] %vm2176_vm13, %v11194_v53  ;;  %vm14227_vm14 = vmmov %vm14211_vm10  ;;  %v3863_v53 = vld [vmem:[#allocation4 + $0xa0] sm:$0x3]  ;;  %v11225_v27 = vld [vmem:[#allocation4 + $0x98] sm:$0xff]  ;;  %8397 = vmatprep.mubr.msk.f32.mxu1 %vm2176_vm13, %v5107_v16  ;;  %v4044_v32 = vrot.slane %v11223_v29, 1  ;;  %4778 = vrot.lane.b32.xlu0 %v11143_v4, %s8600_s20 }
 0x881   : > { %v11221_v10 = vsel %vm14227_vm14, %v4249_v17, %v4251_v37  ;;  %5073 = vst.msk [vmem:[#allocation3 + $0xa0] sm:$0xff] %vm2176_vm13, %v11218_v45  ;;  %vm14229_vm9 = vmmov %vm14172_vm8  ;;  %v4253_v17 = vrot.slane %v11223_v29, 2  ;;  %v4254_v37 = vrot.slane %v11225_v27, 2  ;;  %v4256_v31 = vrot.slane %v3863_v53, 2  ;;  %8398 = vmatmul.mubr.msk.f32.gmra.mxu1 %vm2176_vm13, %v5110_v23 }
 0x882   : > { %14228 = vst [vmem:[#allocation16_spill] sm:$0xff] %v11221_v10  ;;  %5074 = vst.msk [vmem:[#allocation3 + $0xb8] sm:$0xff] %vm2176_vm13, %v11221_v10  ;;  %v11236_v57 = vsel %vm14229_vm9, %v4040_v5, %v4042_v39  ;;  %v4045_v1 = vrot.slane %v11225_v27, 1  ;;  %v4047_v5 = vrot.slane %v3863_v53, 1  ;;  %v5113_v39 = vld [vmem:[#allocation3 + $0x70] sm:$0xff]  ;;  %4448 = vrot.lane.b32.xlu1 %v11143_v4, %s8601_s30  ;;  %v5146_v4 = vld [vmem:[#allocation3 + $0x178] sm:$0xff] }
 0x883   : > { %14230 = vst [vmem:[#allocation19_spill] sm:$0xff] %v11236_v57  ;;  %3946 = vst.msk [vmem:[#allocation3 + $0x120] sm:$0xff] %vm2176_vm13, %v11223_v29  ;;  %v5116_v2 = vld [vmem:[#allocation3 + $0x88] sm:$0xff]  ;;  %v11258_v43 = vsel %vm14211_vm10, %v4253_v17, %v4254_v37  ;;  %8400 = vmatprep.mubr.msk.f32.mxu1 %vm2176_vm13, %v5113_v39 }
 0x884   : > { %3947 = vst.msk [vmem:[#allocation3 + $0x138] sm:$0xff] %vm2176_vm13, %v11225_v27  ;;  %3826 = vst.msk [vmem:[#allocation4 + $0xc9] sm:$0xff] %vm2176_vm13, %v3738_v51  ;;  %v11273_v23 = vsel %vm14172_vm8, %v4044_v32, %v4045_v1  ;;  %4780 = vrot.lane.b32.xlu0 %v11181_v46, %s8600_s20 }
 0x885   : > { %3825 = vst.msk [vmem:[#allocation4 + $0xc1] sm:$0xff] %vm2176_vm13, %v3737_v35  ;;  %4609 = vst.msk [vmem:[#allocation3 + $0xc8] sm:$0xff] %vm2176_vm13, %v11233_v30  ;;  %v3866_v36 = vld [vmem:[#allocation4 + $0xb8] sm:$0x3]  ;;  %8401 = vmatmul.mubr.msk.f32.gmra.mxu1 %vm2176_vm13, %v5116_v2 }
 0x886   : > { %4610 = vst.msk [vmem:[#allocation3 + $0xe0] sm:$0xff] %vm2176_vm13, %v11236_v57  ;;  %14231 = vst [vmem:[#allocation18_spill] sm:$0xff] %v11258_v43  ;;  %v11263_v35 = vld [vmem:[#allocation4 + $0xa8] sm:$0xff]  ;;  %v11265_v16 = vld [vmem:[#allocation4 + $0xb0] sm:$0xff]  ;;  %4450 = vrot.lane.b32.xlu1 %v11181_v46, %s8601_s30 }
 0x887   : > { %vm14232_vm14 = vmmov %vm14211_vm10  ;;  %5075 = vst.msk [vmem:[#allocation3 + $0xd0] sm:$0xff] %vm2176_vm13, %v11258_v43  ;;  %v4258_v17 = vrot.slane %v11263_v35, 2  ;;  %v4049_v32 = vrot.slane %v11263_v35, 1  ;;  %v5152_v46 = vld [vmem:[#allocation3 + $0x1a8] sm:$0xff] }
 0x888   : > { %v11261_v51 = vsel %vm14232_vm14, %v4254_v37, %v4256_v31  ;;  %14234 = vst [vmem:[#allocation20_spill] sm:$0xff] %v11273_v23  ;;  %vm14235_vm9 = vmmov %vm14172_vm8  ;;  %v4259_v37 = vrot.slane %v11265_v16, 2  ;;  %v4261_v31 = vrot.slane %v3866_v36, 2  ;;  %v5119_v39 = vld [vmem:[#allocation3 + $0xa0] sm:$0xff]  ;;  %4782 = vrot.lane.b32.xlu0 %v11183_v49, %s8600_s20 }
 0x889   : > { %14233 = vst [vmem:[#allocation21_spill] sm:$0xff] %v11261_v51  ;;  %5076 = vst.msk [vmem:[#allocation3 + $0xe8] sm:$0xff] %vm2176_vm13, %v11261_v51  ;;  %v11276_v53 = vsel %vm14235_vm9, %v4045_v1, %v4047_v5  ;;  %v4050_v1 = vrot.slane %v11265_v16, 1  ;;  %v4052_v5 = vrot.slane %v3866_v36, 1  ;;  %v5122_v11 = vld [vmem:[#allocation3 + $0xb8] sm:$0xff]  ;;  %8403 = vmatprep.mubr.msk.f32.mxu1 %vm2176_vm13, %v5119_v39 }
 0x88a   : > { %3948 = vst.msk [vmem:[#allocation3 + $0x150] sm:$0xff] %vm2176_vm13, %v11263_v35  ;;  %3949 = vst.msk [vmem:[#allocation3 + $0x168] sm:$0xff] %vm2176_vm13, %v11265_v16  ;;  %v11296_v51 = vsel %vm14211_vm10, %v4258_v17, %v4259_v37  ;;  %8404 = vmatmul.mubr.msk.f32.gmra.mxu1 %vm2176_vm13, %v5122_v11  ;;  %4452 = vrot.lane.b32.xlu1 %v11183_v49, %s8601_s30  ;;  %v5158_v49 = vld [vmem:[#allocation3 + $0x1d8] sm:$0xff] }
 0x88b   : > { %4611 = vst.msk [vmem:[#allocation3 + $0xf8] sm:$0xff] %vm2176_vm13, %v11273_v23  ;;  %4612 = vst.msk [vmem:[#allocation3 + $0x110] sm:$0xff] %vm2176_vm13, %v11276_v53  ;;  %v3869_v10 = vld [vmem:[#allocation4 + $0xd0] sm:$0x3]  ;;  %v11311_v2 = vsel %vm14172_vm8, %v4049_v32, %v4050_v1 }
 0x88c   : > { %14236 = vst [vmem:[#allocation23_spill] sm:$0xff] %v11296_v51  ;;  %vm14237_vm14 = vmmov %vm14211_vm10  ;;  %v11301_v23 = vld [vmem:[#allocation4 + $0xc0] sm:$0xff]  ;;  %v11303_v57 = vld [vmem:[#allocation4 + $0xc8] sm:$0xff]  ;;  %4784 = vrot.lane.b32.xlu0 %v11223_v29, %s8600_s20 }
 0x88d   : > { %v11299_v43 = vsel %vm14237_vm14, %v4259_v37, %v4261_v31  ;;  %5077 = vst.msk [vmem:[#allocation3 + $0x100] sm:$0xff] %vm2176_vm13, %v11296_v51  ;;  %vm14239_vm9 = vmmov %vm14172_vm8  ;;  %v4263_v17 = vrot.slane %v11301_v23, 2  ;;  %v4264_v37 = vrot.slane %v11303_v57, 2  ;;  %v4266_v31 = vrot.slane %v3869_v10, 2 }
 0x88e   : > { %14238 = vst [vmem:[#allocation22_spill] sm:$0xff] %v11299_v43  ;;  %5078 = vst.msk [vmem:[#allocation3 + $0x118] sm:$0xff] %vm2176_vm13, %v11299_v43  ;;  %v11314_v36 = vsel %vm14239_vm9, %v4050_v1, %v4052_v5  ;;  %v4054_v32 = vrot.slane %v11301_v23, 1  ;;  %v4055_v1 = vrot.slane %v11303_v57, 1  ;;  %v4057_v5 = vrot.slane %v3869_v10, 1  ;;  %v5125_v39 = vld [vmem:[#allocation3 + $0xd0] sm:$0xff]  ;;  %4454 = vrot.lane.b32.xlu1 %v11223_v29, %s8601_s30 }
 0x88f   : > { %3950 = vst.msk [vmem:[#allocation3 + $0x180] sm:$0xff] %vm2176_vm13, %v11301_v23  ;;  %3951 = vst.msk [vmem:[#allocation3 + $0x198] sm:$0xff] %vm2176_vm13, %v11303_v57  ;;  %v11334_v43 = vsel %vm14211_vm10, %v4263_v17, %v4264_v37  ;;  %8406 = vmatprep.mubr.msk.f32.mxu1 %vm2176_vm13, %v5125_v39  ;;  %v5161_v39 = vld [vmem:[#allocation3 + $0x1f0] sm:$0xff]  ;;  %v5164_v29 = vld [vmem:[#allocation3 + $0x208] sm:$0xff] }
 0x890   : > { %4613 = vst.msk [vmem:[#allocation3 + $0x128] sm:$0xff] %vm2176_vm13, %v11311_v2  ;;  %4614 = vst.msk [vmem:[#allocation3 + $0x140] sm:$0xff] %vm2176_vm13, %v11314_v36  ;;  %v5128_v34 = vld [vmem:[#allocation3 + $0xe8] sm:$0xff]  ;;  %v11345_v11 = vsel %vm14172_vm8, %v4054_v32, %v4055_v1  ;;  %v5143_v32 = vld [vmem:[#allocation3 + $0x160] sm:$0xff]  ;;  %4786 = vrot.lane.b32.xlu0 %v11225_v27, %s8600_s20 }
 0x891   : > { %vm14240_vm14 = vmmov %vm14211_vm10  ;;  %5079 = vst.msk [vmem:[#allocation3 + $0x130] sm:$0xff] %vm2176_vm13, %v11334_v43  ;;  %8407 = vmatmul.mubr.msk.f32.gmra.mxu1 %vm2176_vm13, %v5128_v34  ;;  %v5167_v34 = vld [vmem:[#allocation3 + $0x220] sm:$0xff]  ;;  %vm4530_vm10 = vcmask 1048320  }
 0x892   : > { %v11337_v51 = vsel %vm14240_vm14, %v4264_v37, %v4266_v31  ;;  %vm14241_vm9 = vmmov %vm14172_vm8  ;;  %4615 = vst.msk [vmem:[#allocation3 + $0x158] sm:$0xff] %vm2176_vm13, %v11345_v11  ;;  %4456 = vrot.lane.b32.xlu1 %v11225_v27, %s8601_s30  ;;  %v5170_v27 = vld [vmem:[#allocation3 + $0x238] sm:$0xff] }
 0x893   : > { %5080 = vst.msk [vmem:[#allocation3 + $0x148] sm:$0xff] %vm2176_vm13, %v11337_v51  ;;  %v11348_v10 = vsel %vm14241_vm9, %v4055_v1, %v4057_v5  ;;  %v5149_v1 = vld [vmem:[#allocation3 + $0x190] sm:$0xff]  ;;  %v5155_v5 = vld [vmem:[#allocation3 + $0x1c0] sm:$0xff]  ;;  %vm14261_vm8 = vmmov %vm14240_vm14 }
 0x894   : > { %4616 = vst.msk [vmem:[#allocation3 + $0x170] sm:$0xff] %vm2176_vm13, %v11348_v10  ;;  %v5131_v17 = vld [vmem:[#allocation3 + $0x100] sm:$0xff]  ;;  %4788 = vrot.lane.b32.xlu0 %v11263_v35, %s8600_s20 }
 0x895   : > { %v5134_v37 = vld [vmem:[#allocation3 + $0x118] sm:$0xff]  ;;  %8409 = vmatprep.mubr.msk.f32.mxu1 %vm2176_vm13, %v5131_v17  ;;  %v5173_v17 = vld [vmem:[#allocation3 + $0x250] sm:$0xff] }
 0x896   : > { %8410 = vmatmul.mubr.msk.f32.gmra.mxu1 %vm2176_vm13, %v5134_v37  ;;  %4458 = vrot.lane.b32.xlu1 %v11263_v35, %s8601_s30  ;;  %v5176_v35 = vld [vmem:[#allocation3 + $0x268] sm:$0xff]  ;;  %v5179_v37 = vld [vmem:[#allocation3 + $0x280] sm:$0xff] }
 0x898   : > { %v5137_v47 = vld [vmem:[#allocation3 + $0x130] sm:$0xff]  ;;  %4790 = vrot.lane.b32.xlu0 %v11265_v16, %s8600_s20 }
 0x899   : > { %8412 = vmatprep.mubr.msk.f32.mxu1 %vm2176_vm13, %v5137_v47  ;;  %v5185_v47 = vld [vmem:[#allocation3 + $0x2b0] sm:$0xff] }
 0x89a   : > { %v5140_v31 = vld [vmem:[#allocation3 + $0x148] sm:$0xff]  ;;  %4460 = vrot.lane.b32.xlu1 %v11265_v16, %s8601_s30  ;;  %v5182_v16 = vld [vmem:[#allocation3 + $0x298] sm:$0xff] }
 0x89b   : > { %8413 = vmatmul.mubr.msk.f32.gmra.mxu1 %vm2176_vm13, %v5140_v31 }
 0x89c   : > { %8415 = vmatprep.mubr.msk.f32.mxu1 %vm2176_vm13, %v5143_v32  ;;  %4792 = vrot.lane.b32.xlu0 %v11301_v23, %s8600_s20 }
 0x89e   : > { %4462 = vrot.lane.b32.xlu1 %v11301_v23, %s8601_s30  ;;  %v5188_v23 = vld [vmem:[#allocation3 + $0x2c8] sm:$0xff] }
 0x89f   : > { %8416 = vmatmul.mubr.msk.f32.gmra.mxu1 %vm2176_vm13, %v5146_v4 }
 0x8a0   : > { %8418 = vmatprep.mubr.msk.f32.mxu1 %vm2176_vm13, %v5149_v1  ;;  %4794 = vrot.lane.b32.xlu0 %v11303_v57, %s8600_s20 }
 0x8a2   : > { %4464 = vrot.lane.b32.xlu1 %v11303_v57, %s8601_s30 }
 0x8a3   : > { %8419 = vmatmul.mubr.msk.f32.gmra.mxu1 %vm2176_vm13, %v5152_v46  ;;  %v3912_v46 = vld [vmem:[%s13991_s6 + $0x78] sm:$0xff] }
 0x8a4   : > { %8421 = vmatprep.mubr.msk.f32.mxu1 %vm2176_vm13, %v5155_v5  ;;  %4930 = vrot.lane.b32.xlu0 %v10785_v50, %s8601_s30 }
 0x8a5   : > { %5298 = vmatpush1.msra.mxu0 %v3912_v46 }
 0x8a6   : > { %4130 = vrot.lane.b32.xlu1 %v10785_v50, %s14155_s29  ;;  %5299 = vmatprep.subr.mxu0 %v14153_v42 }
 0x8a7   : > { %8422 = vmatmul.mubr.msk.f32.gmra.mxu1 %vm2176_vm13, %v5158_v49  ;;  %v3910_v49 = vld [vmem:[%s13991_s6 + $0x68] sm:$0xff] }
 0x8a8   : > { %8424 = vmatprep.mubr.msk.f32.mxu1 %vm2176_vm13, %v5161_v39  ;;  %4932 = vrot.lane.b32.xlu0 %v10788_v8, %s8601_s30 }
 0x8aa   : > { %4339 = vrot.lane.b32.xlu1 %v10775_v7, %s8600_s20 }
 0x8ab   : > { %8425 = vmatmul.mubr.msk.f32.gmra.mxu1 %vm2176_vm13, %v5164_v29 }
 0x8ac   : > { %8427 = vmatprep.mubr.msk.f32.mxu1 %vm2176_vm13, %v5167_v34  ;;  %4670 = vrot.lane.b32.xlu0 %v10775_v7, %s14155_s29 }
 0x8ad   : > { %v11427_v57 = vpop.permute.xlu1 %4466  ;;  %v11429_v31 = vpop.permute.xlu0 %4796 }
 0x8ae   : > { %4132 = vrot.lane.b32.xlu1 %v10788_v8, %s14155_s29  ;;  %14242 = vst [vmem:[#allocation40_spill] sm:$0xff] %v11427_v57  ;;  %14243 = vst [vmem:[#allocation41_spill] sm:$0xff] %v11429_v31  ;;  %v3923_v31 = vld [vmem:[%s13991_s6 + $0xd0] sm:$0xff]  ;;  %v3921_v57 = vld [vmem:[%s13991_s6 + $0xc0] sm:$0xff] }
 0x8af   : > { %8428 = vmatmul.mubr.msk.f32.gmra.mxu1 %vm2176_vm13, %v5170_v27  ;;  %v3908_v27 = vld [vmem:[%s13991_s6 + $0x58] sm:$0xff] }
 0x8b0   : > { %8430 = vmatprep.mubr.msk.f32.mxu1 %vm2176_vm13, %v5173_v17  ;;  %4934 = vrot.lane.b32.xlu0 %v10815_v15, %s8601_s30  ;;  %v3907_v17 = vld [vmem:[%s13991_s6 + $0x50] sm:$0xff] }
 0x8b1   : > { %v11435_v50 = vpop.permute.xlu1 %4468  ;;  %v11437_v32 = vpop.permute.xlu0 %4798 }
 0x8b2   : > { %4341 = vrot.lane.b32.xlu1 %v10778_v48, %s8600_s20  ;;  %14244 = vst [vmem:[#allocation42_spill] sm:$0xff] %v11435_v50  ;;  %14245 = vst [vmem:[#allocation43_spill] sm:$0xff] %v11437_v32 }
 0x8b3   : > { %8431 = vmatmul.mubr.msk.f32.gmra.mxu1 %vm2176_vm13, %v5176_v35 }
 0x8b4   : > { %8433 = vmatprep.mubr.msk.f32.mxu1 %vm2176_vm13, %v5179_v37  ;;  %4672 = vrot.lane.b32.xlu0 %v10778_v48, %s14155_s29 }
 0x8b5   : > { %v11443_v7 = vpop.permute.xlu1 %4470  ;;  %v11445_v8 = vpop.permute.xlu0 %4800 }
 0x8b6   : > { %4134 = vrot.lane.b32.xlu1 %v10815_v15, %s14155_s29 }
 0x8b7   : > { %8434 = vmatmul.mubr.msk.f32.gmra.mxu1 %vm2176_vm13, %v5182_v16  ;;  %v3906_v16 = vld [vmem:[%s13991_s6 + $0x48] sm:$0xff] }
 0x8b8   : > { %8436 = vmatprep.mubr.msk.f32.mxu1 %vm2176_vm13, %v5185_v47  ;;  %4936 = vrot.lane.b32.xlu0 %v10818_v9, %s8601_s30  ;;  %v3905_v47 = vld [vmem:[%s13991_s6 + $0x40] sm:$0xff] }
 0x8b9   : > { %v11451_v4 = vpop.permute.xlu1 %4472  ;;  %v11453_v1 = vpop.permute.xlu0 %4802 }
 0x8ba   : > { %4343 = vrot.lane.b32.xlu1 %v10803_v59, %s8600_s20 }
 0x8bb   : > { %8437 = vmatmul.mubr.msk.f32.gmra.mxu1 %vm2176_vm13, %v5188_v23  ;;  %v3904_v23 = vld [vmem:[%s13991_s6 + $0x38] sm:$0xff] }
 0x8bc   : > { %4674 = vrot.lane.b32.xlu0 %v10803_v59, %s14155_s29  ;;  %v3911_v59 = vld [vmem:[%s13991_s6 + $0x70] sm:$0xff] }
 0x8bd   : > { %v11459_v48 = vpop.permute.xlu1 %4474  ;;  %v11461_v15 = vpop.permute.xlu0 %4804  ;;  %5300 = vmatpush1.msra.mxu0 %v3911_v59 }
 0x8be   : > { %4136 = vrot.lane.b32.xlu1 %v10818_v9, %s14155_s29  ;;  %5301 = vmatprep.subr.mxu0 %v14153_v42 }
 0x8bf   : > { %5302 = vmatpush1.msra.mxu0 %v3910_v49 }
 0x8c0   : > { %4938 = vrot.lane.b32.xlu0 %v10850_v38, %s8601_s30  ;;  %5303 = vmatprep.subr.mxu0 %v14153_v42 }
 0x8c1   : > { %v11470_v5 = vpop.permute.xlu1 %4476 }
 0x8c2   : > { %4345 = vrot.lane.b32.xlu1 %v10806_v24, %s8600_s20  ;;  %v11472_v9 = vpop.permute.xlu0 %4806 }
 0x8c4   : > { %4676 = vrot.lane.b32.xlu0 %v10806_v24, %s14155_s29  ;;  %v3909_v24 = vld [vmem:[%s13991_s6 + $0x60] sm:$0xff] }
 0x8c5   : > { %v11485_v39 = vpop.permute.xlu1 %4478  ;;  %5304 = vmatpush1.msra.mxu0 %v3909_v24  ;;  %v3902_v24 = vld [vmem:[%s13991_s6 + $0x28] sm:$0xff] }
 0x8c6   : > { %4138 = vrot.lane.b32.xlu1 %v10850_v38, %s14155_s29  ;;  %v11487_v29 = vpop.permute.xlu0 %4808  ;;  %5305 = vmatprep.subr.mxu0 %v14153_v42 }
 0x8c7   : > { %5306 = vmatpush1.msra.mxu0 %v3908_v27  ;;  %v3901_v27 = vld [vmem:[%s13991_s6 + $0x20] sm:$0xff] }
 0x8c8   : > { %4940 = vrot.lane.b32.xlu0 %v10853_v60, %s8601_s30  ;;  %5307 = vmatprep.subr.mxu0 %v14153_v42 }
 0x8c9   : > { %v11498_v38 = vpop.permute.xlu1 %4480  ;;  %5308 = vmatpush1.msra.mxu0 %v3907_v17 }
 0x8ca   : > { %4347 = vrot.lane.b32.xlu1 %v10836_v33, %s8600_s20  ;;  %v11500_v34 = vpop.permute.xlu0 %4810  ;;  %5309 = vmatprep.subr.mxu0 %v14153_v42 }
 0x8cb   : > { %5310 = vmatpush1.msra.mxu0 %v3906_v16 }
 0x8cc   : > { %4678 = vrot.lane.b32.xlu0 %v10836_v33, %s14155_s29  ;;  %5311 = vmatprep.subr.mxu0 %v14153_v42 }
 0x8cd   : > { %v11513_v35 = vpop.permute.xlu1 %4482  ;;  %5312 = vmatpush1.msra.mxu0 %v3905_v47  ;;  %v3900_v47 = vld [vmem:[%s13991_s6 + $0x18] sm:$0xff] }
 0x8ce   : > { %4140 = vrot.lane.b32.xlu1 %v10853_v60, %s14155_s29  ;;  %v11515_v37 = vpop.permute.xlu0 %4812  ;;  %5313 = vmatprep.subr.mxu0 %v14153_v42 }
 0x8cf   : > { %5314 = vmatpush1.msra.mxu0 %v3904_v23  ;;  %v3899_v23 = vld [vmem:[%s13991_s6 + $0x10] sm:$0xff] }
 0x8d0   : > { %4942 = vrot.lane.b32.xlu0 %v10888_v40, %s8601_s30  ;;  %5315 = vmatprep.subr.mxu0 %v14153_v42 }
 0x8d1   : > { %v11526_v33 = vpop.permute.xlu1 %4484 }
 0x8d2   : > { %4349 = vrot.lane.b32.xlu1 %v10839_v6, %s8600_s20  ;;  %v11528_v60 = vpop.permute.xlu0 %4814 }
 0x8d4   : > { %4680 = vrot.lane.b32.xlu0 %v10839_v6, %s14155_s29 }
 0x8d6   : > { %4142 = vrot.lane.b32.xlu1 %v10888_v40, %s14155_s29  ;;  %v11541_v59 = vpop.permute.xlu0 %4816  ;;  %v3903_v40 = vld [vmem:[%s13991_s6 + $0x30] sm:$0xff] }
 0x8d7   : > { %v4435_v46 = vpop.permute.xlu1 %4434  ;;  %5316 = vmatpush1.msra.mxu0 %v3903_v40 }
 0x8d8   : > { %4531 = vst.msk [vmem:[#allocation3] sm:$0xff] %vm4530_vm10, %v4435_v46  ;;  %4944 = vrot.lane.b32.xlu0 %v10891_v22, %s8601_s30  ;;  %5317 = vmatprep.subr.mxu0 %v14153_v42  ;;  %v3898_v46 = vld [vmem:[%s13991_s6 + $0x8] sm:$0xff] }
 0x8d9   : > { %5318 = vmatpush1.msra.mxu0 %v3902_v24  ;;  %v3897_v24 = vld [vmem:[%s13991_s6] sm:$0xff] }
 0x8da   : > { %4351 = vrot.lane.b32.xlu1 %v10874_v52, %s8600_s20  ;;  %v11553_v49 = vpop.permute.xlu0 %4818  ;;  %5319 = vmatprep.subr.mxu0 %v14153_v42 }
 0x8db   : > { %v4437_v6 = vpop.permute.xlu1 %4436  ;;  %5320 = vmatpush1.msra.mxu0 %v3901_v27  ;;  %v3928_v27 = vld [vmem:[%s13991_s6 + $0xf8] sm:$0xff] }
 0x8dc   : > { %4532 = vst.msk [vmem:[#allocation3 + $0x18] sm:$0xff] %vm4530_vm10, %v4437_v6  ;;  %4682 = vrot.lane.b32.xlu0 %v10874_v52, %s14155_s29  ;;  %5321 = vmatprep.subr.mxu0 %v14153_v42 }
 0x8dd   : > { %5322 = vmatpush1.msra.mxu0 %v3900_v47 }
 0x8de   : > { %4144 = vrot.lane.b32.xlu1 %v10891_v22, %s14155_s29  ;;  %v11569_v16 = vpop.permute.xlu0 %4768  ;;  %5323 = vmatprep.subr.mxu0 %v14153_v42 }
 0x8df   : > { %v11567_v17 = vpop.permute.xlu1 %4438  ;;  %5324 = vmatpush1.msra.mxu0 %v3899_v23 }
 0x8e0   : > { %4946 = vrot.lane.b32.xlu0 %v10926_v58, %s8601_s30  ;;  %5325 = vmatprep.subr.mxu0 %v14153_v42 }
 0x8e1   : > { %5326 = vmatpush1.msra.mxu0 %v3898_v46  ;;  %v3926_v46 = vld [vmem:[%s13991_s6 + $0xe8] sm:$0xff] }
 0x8e2   : > { %4353 = vrot.lane.b32.xlu1 %v10877_v63, %s8600_s20  ;;  %v11582_v22 = vpop.permute.xlu0 %4770  ;;  %5327 = vmatprep.subr.mxu0 %v14153_v42 }
 0x8e3   : > { %v11580_v52 = vpop.permute.xlu1 %4440  ;;  %5328 = vmatpush1.msra.mxu0 %v3897_v24 }
 0x8e4   : > { %4684 = vrot.lane.b32.xlu0 %v10877_v63, %s14155_s29  ;;  %5329 = vmatprep.subr.mxu0 %v14153_v42 }
 0x8e5   : > { %5330 = vmatpush2.msra.mxu0 %v3928_v27 }
 0x8e6   : > { %4146 = vrot.lane.b32.xlu1 %v10926_v58, %s14155_s29  ;;  %v11597_v6 = vpop.permute.xlu0 %4772  ;;  %5331 = vmatprep.subr.mxu0 %v14153_v42 }
 0x8e7   : > { %v11595_v40 = vpop.permute.xlu1 %4442 }
 0x8e8   : > { %4948 = vrot.lane.b32.xlu0 %v10929_v12, %s8601_s30 }
 0x8ea   : > { %4098 = vrot.lane.b32.xlu1 %v11060_v20, %s14155_s29  ;;  %v11610_v58 = vpop.permute.xlu0 %4774  ;;  %v3927_v20 = vld [vmem:[%s13991_s6 + $0xf0] sm:$0xff] }
 0x8eb   : > { %5332 = vmatpush2.msra.mxu0 %v3927_v20  ;;  %v3925_v20 = vld [vmem:[%s13991_s6 + $0xe0] sm:$0xff] }
 0x8ec   : > { %v11608_v63 = vpop.permute.xlu1 %4444  ;;  %4686 = vrot.lane.b32.xlu0 %v10912_v14, %s14155_s29  ;;  %5333 = vmatprep.subr.mxu0 %v14153_v42 }
 0x8ed   : > { %5334 = vmatpush2.msra.mxu0 %v3926_v46 }
 0x8ee   : > { %4307 = vrot.lane.b32.xlu1 %v11063_v28, %s8600_s20  ;;  %v11625_v23 = vpop.permute.xlu0 %4776  ;;  %5335 = vmatprep.subr.mxu0 %v14153_v42 }
 0x8ef   : > { %5336 = vmatpush2.msra.mxu0 %v3925_v20 }
 0x8f0   : > { %v11623_v47 = vpop.permute.xlu1 %4446  ;;  %4950 = vrot.lane.b32.xlu0 %v10966_v3, %s8601_s30  ;;  %5337 = vmatprep.subr.mxu0 %v14153_v42 }
 0x8f2   : > { %4100 = vrot.lane.b32.xlu1 %v11072_v25, %s14155_s29  ;;  %v11638_v27 = vpop.permute.xlu0 %4778  ;;  %v3924_v25 = vld [vmem:[%s13991_s6 + $0xd8] sm:$0xff] }
 0x8f3   : > { %5338 = vmatpush2.msra.mxu0 %v3924_v25  ;;  %v3922_v25 = vld [vmem:[%s13991_s6 + $0xc8] sm:$0xff] }
 0x8f4   : > { %v11636_v24 = vpop.permute.xlu1 %4448  ;;  %4688 = vrot.lane.b32.xlu0 %v10915_v13, %s14155_s29  ;;  %5339 = vmatprep.subr.mxu0 %v14153_v42 }
 0x8f5   : > { %5340 = vmatpush2.msra.mxu0 %v3923_v31 }
 0x8f6   : > { %4309 = vrot.lane.b32.xlu1 %v11075_v62, %s8600_s20  ;;  %v11653_v46 = vpop.permute.xlu0 %4780  ;;  %5341 = vmatprep.subr.mxu0 %v14153_v42 }
 0x8f7   : > { %14246 = vst [vmem:[#allocation44_spill] sm:$0xff] %v11653_v46  ;;  %5342 = vmatpush2.msra.mxu0 %v3922_v25 }
 0x8f8   : > { %v11651_v32 = vpop.permute.xlu1 %4450  ;;  %4952 = vrot.lane.b32.xlu0 %v10969_v56, %s8601_s30  ;;  %5343 = vmatprep.subr.mxu0 %v14153_v42 }
 0x8f9   : > { %5344 = vmatpush2.msra.mxu0 %v3921_v57  ;;  %v3919_v57 = vld [vmem:[%s13991_s6 + $0xb0] sm:$0xff] }
 0x8fa   : > { %4102 = vrot.lane.b32.xlu1 %v11110_v41, %s14155_s29  ;;  %v11666_v50 = vpop.permute.xlu0 %4782  ;;  %5345 = vmatprep.subr.mxu0 %v14153_v42 }
 0x8fb   : > { %14247 = vst [vmem:[#allocation45_spill] sm:$0xff] %v11666_v50  ;;  %v3920_v50 = vld [vmem:[%s13991_s6 + $0xb8] sm:$0xff] }
 0x8fc   : > { %v11664_v20 = vpop.permute.xlu1 %4452  ;;  %4690 = vrot.lane.b32.xlu0 %v10952_v18, %s14155_s29  ;;  %5346 = vmatpush2.msra.mxu0 %v3920_v50 }
 0x8fd   : > { %5347 = vmatprep.subr.mxu0 %v14153_v42 }
 0x8fe   : > { %4311 = vrot.lane.b32.xlu1 %v11096_v54, %s8600_s20  ;;  %v11681_v31 = vpop.permute.xlu0 %4784  ;;  %5348 = vmatpush2.msra.mxu0 %v3919_v57 }
 0x8ff   : > { %14249 = vst [vmem:[#allocation47_spill] sm:$0xff] %v11681_v31  ;;  %5349 = vmatprep.subr.mxu0 %v14153_v42 }
 0x900   : > { %v11679_v46 = vpop.permute.xlu1 %4454  ;;  %4638 = vrot.lane.b32.xlu0 %v11063_v28, %s14155_s29  ;;  %v3918_v28 = vld [vmem:[%s13991_s6 + $0xa8] sm:$0xff] }
 0x901   : > { %14248 = vst [vmem:[#allocation46_spill] sm:$0xff] %v11679_v46  ;;  %5350 = vmatpush2.msra.mxu0 %v3918_v28  ;;  %v3916_v28 = vld [vmem:[%s13991_s6 + $0x98] sm:$0xff] }
 0x902   : > { %4104 = vrot.lane.b32.xlu1 %v11113_v61, %s14155_s29  ;;  %v11694_v46 = vpop.permute.xlu0 %4786  ;;  %5351 = vmatprep.subr.mxu0 %v14153_v42 }
 0x903   : > { %14250 = vst [vmem:[#allocation48_spill] sm:$0xff] %v11694_v46  ;;  %v3917_v46 = vld [vmem:[%s13991_s6 + $0xa0] sm:$0xff] }
 0x904   : > { %v11692_v25 = vpop.permute.xlu1 %4456  ;;  %4902 = vrot.lane.b32.xlu0 %v11110_v41, %s8601_s30  ;;  %5352 = vmatpush2.msra.mxu0 %v3917_v46 }
 0x905   : > { %5353 = vmatprep.subr.mxu0 %v14153_v42 }
 0x906   : > { %4313 = vrot.lane.b32.xlu1 %v11099_v55, %s8600_s20  ;;  %v11709_v50 = vpop.permute.xlu0 %4788  ;;  %5354 = vmatpush2.msra.mxu0 %v3916_v28 }
 0x907   : > { %14251 = vst [vmem:[#allocation49_spill] sm:$0xff] %v11709_v50  ;;  %5355 = vmatprep.subr.mxu0 %v14153_v42 }
 0x908   : > { %v11707_v31 = vpop.permute.xlu1 %4458  ;;  %4640 = vrot.lane.b32.xlu0 %v11075_v62, %s14155_s29  ;;  %v3915_v62 = vld [vmem:[%s13991_s6 + $0x90] sm:$0xff] }
 0x909   : > { %5356 = vmatpush2.msra.mxu0 %v3915_v62  ;;  %v3913_v62 = vld [vmem:[%s13991_s6 + $0x80] sm:$0xff] }
 0x90a   : > { %4106 = vrot.lane.b32.xlu1 %v11150_v0, %s14155_s29  ;;  %v11722_v57 = vpop.permute.xlu0 %4790  ;;  %5357 = vmatprep.subr.mxu0 %v14153_v42 }
 0x90b   : > { %14252 = vst [vmem:[#allocation50_spill] sm:$0xff] %v11722_v57  ;;  %v3914_v57 = vld [vmem:[%s13991_s6 + $0x88] sm:$0xff] }
 0x90c   : > { %v11720_v41 = vpop.permute.xlu1 %4460  ;;  %4904 = vrot.lane.b32.xlu0 %v11113_v61, %s8601_s30  ;;  %5358 = vmatpush2.msra.mxu0 %v3914_v57 }
 0x90d   : > { %5359 = vmatprep.subr.mxu0 %v14153_v42 }
 0x90e   : > { %4315 = vrot.lane.b32.xlu1 %v11136_v21, %s8600_s20  ;;  %v11737_v46 = vpop.permute.xlu0 %4792  ;;  %5360 = vmatpush2.msra.mxu0 %v3913_v62 }
 0x90f   : > { %14253 = vst [vmem:[#allocation51_spill] sm:$0xff] %v11737_v46 }
 0x910   : > { %v11735_v50 = vpop.permute.xlu1 %4462  ;;  %4642 = vrot.lane.b32.xlu0 %v11096_v54, %s14155_s29 }
 0x912   : > { %4108 = vrot.lane.b32.xlu1 %v11153_v26, %s14155_s29  ;;  %v11750_v28 = vpop.permute.xlu0 %4794 }
 0x913   : > { %14254 = vst [vmem:[#allocation52_spill] sm:$0xff] %v11750_v28 }
 0x914   : > { %v11748_v61 = vpop.permute.xlu1 %4464  ;;  %4906 = vrot.lane.b32.xlu0 %v11150_v0, %s8601_s30  ;;  %v14255_v0 = vld [vmem:[#allocation15_spill] sm:$0xff] }
 0x916   : > { %4317 = vrot.lane.b32.xlu1 %v11139_v44, %s8600_s20  ;;  %v11760_v46 = vpop.permute.xlu0 %4930 }
 0x918   : > { %v4131_v54 = vpop.permute.xlu1 %4130  ;;  %4644 = vrot.lane.b32.xlu0 %v11099_v55, %s14155_s29  ;;  %v14256_v55 = vld [vmem:[#allocation17_spill] sm:$0xff] }
 0x919   : > { %4209 = vst.msk [vmem:[#allocation3 + $0x1b0] sm:$0xff] %vm4190_vm1, %v4131_v54 }
 0x91a   : > { %4110 = vrot.lane.b32.xlu1 %v11191_v19, %s14155_s29  ;;  %v11767_v28 = vpop.permute.xlu0 %4932 }
 0x91c   : > { %v4340_v57 = vpop.permute.xlu1 %4339  ;;  %4908 = vrot.lane.b32.xlu0 %v11153_v26, %s8601_s30  ;;  %v14257_v26 = vld [vmem:[#allocation14_spill] sm:$0xff] }
 0x91d   : > { %4418 = vst.msk [vmem:[#allocation3 + $0x1b0] sm:$0xff] %vm4399_vm2, %v4340_v57 }
 0x91e   : > { %4549 = vst.msk [vmem:[#allocation3 + $0x1b0] sm:$0xff] %vm4530_vm10, %v11443_v7  ;;  %4319 = vrot.lane.b32.xlu1 %v14255_v0, %s8600_s20  ;;  %v4671_v54 = vpop.permute.xlu0 %4670 }
 0x91f   : > { %4750 = vst.msk [vmem:[#allocation3 + $0x188] sm:$0xff] %vm4190_vm1, %v4671_v54 }
 0x920   : > { %v4133_v62 = vpop.permute.xlu1 %4132  ;;  %4880 = vst.msk [vmem:[#allocation3 + $0x188] sm:$0xff] %vm4399_vm2, %v11445_v8  ;;  %4646 = vrot.lane.b32.xlu0 %v11136_v21, %s14155_s29  ;;  %v11800_v21 = vld [vmem:[#allocation4 + $0x198] sm:$0xff] }
 0x921   : > { %4210 = vst.msk [vmem:[#allocation3 + $0x1c8] sm:$0xff] %vm4190_vm1, %v4133_v62 }
 0x922   : > { %4112 = vrot.lane.b32.xlu1 %v14256_v55, %s14155_s29  ;;  %v4935_v57 = vpop.permute.xlu0 %4934 }
 0x923   : > { %5014 = vst.msk [vmem:[#allocation3 + $0x188] sm:$0xff] %vm4530_vm10, %v4935_v57 }
 0x924   : > { %v4342_v7 = vpop.permute.xlu1 %4341  ;;  %4910 = vrot.lane.b32.xlu0 %v11191_v19, %s8601_s30  ;;  %v5030_v19 = vrot.slane %v11800_v21, 2 }
 0x925   : > { %4419 = vst.msk [vmem:[#allocation3 + $0x1c8] sm:$0xff] %vm4399_vm2, %v4342_v7 }
 0x926   : > { %4550 = vst.msk [vmem:[#allocation3 + $0x1c8] sm:$0xff] %vm4530_vm10, %v11451_v4  ;;  %4321 = vrot.lane.b32.xlu1 %v14257_v26, %s8600_s20  ;;  %v4673_v62 = vpop.permute.xlu0 %4672  ;;  %v11802_v4 = vld [vmem:[#allocation4 + $0x1a0] sm:$0xff] }
 0x927   : > { %4751 = vst.msk [vmem:[#allocation3 + $0x1a0] sm:$0xff] %vm4190_vm1, %v4673_v62  ;;  %v5031_v54 = vrot.slane %v11802_v4, 2  ;;  %v14258_v62 = vld [vmem:[#allocation19_spill] sm:$0xff] }
 0x928   : > { %v4135_v8 = vpop.permute.xlu1 %4134  ;;  %4881 = vst.msk [vmem:[#allocation3 + $0x1a0] sm:$0xff] %vm4399_vm2, %v11453_v1  ;;  %4648 = vrot.lane.b32.xlu0 %v11139_v44, %s14155_s29 }
 0x929   : > { %4211 = vst.msk [vmem:[#allocation3 + $0x1e0] sm:$0xff] %vm4190_vm1, %v4135_v8  ;;  %v5032_v1 = vsel %vm14240_vm14, %v5030_v19, %v5031_v54  ;;  %vm14282_vm14 = vmmov 0  }
 0x92a   : > { %4114 = vrot.lane.b32.xlu1 %v11233_v30, %s14155_s29  ;;  %v4937_v57 = vpop.permute.xlu0 %4936  ;;  %5097 = vst.msk [vmem:[#allocation3 + $0x2e0] sm:$0xff] %vm2176_vm13, %v5032_v1 }
 0x92b   : > { %5015 = vst.msk [vmem:[#allocation3 + $0x1a0] sm:$0xff] %vm4530_vm10, %v4937_v57 }
 0x92c   : > { %v4344_v7 = vpop.permute.xlu1 %4343  ;;  %4912 = vrot.lane.b32.xlu0 %v14256_v55, %s8601_s30  ;;  %v14259_v55 = vld [vmem:[#allocation16_spill] sm:$0xff] }
 0x92d   : > { %4420 = vst.msk [vmem:[#allocation3 + $0x1e0] sm:$0xff] %vm4399_vm2, %v4344_v7 }
 0x92e   : > { %4551 = vst.msk [vmem:[#allocation3 + $0x1e0] sm:$0xff] %vm4530_vm10, %v11459_v48  ;;  %4323 = vrot.lane.b32.xlu1 %v11218_v45, %s8600_s20  ;;  %v4675_v8 = vpop.permute.xlu0 %4674 }
 0x92f   : > { %4752 = vst.msk [vmem:[#allocation3 + $0x1b8] sm:$0xff] %vm4190_vm1, %v4675_v8 }
 0x930   : > { %v4137_v44 = vpop.permute.xlu1 %4136  ;;  %4882 = vst.msk [vmem:[#allocation3 + $0x1b8] sm:$0xff] %vm4399_vm2, %v11461_v15  ;;  %4650 = vrot.lane.b32.xlu0 %v14255_v0, %s14155_s29  ;;  %v14260_v0 = vld [vmem:[#allocation20_spill] sm:$0xff] }
 0x931   : > { %4212 = vst.msk [vmem:[#allocation3 + $0x1f8] sm:$0xff] %vm4190_vm1, %v4137_v44 }
 0x932   : > { %4116 = vrot.lane.b32.xlu1 %v14258_v62, %s14155_s29  ;;  %v4939_v19 = vpop.permute.xlu0 %4938 }
 0x933   : > { %5016 = vst.msk [vmem:[#allocation3 + $0x1b8] sm:$0xff] %vm4530_vm10, %v4939_v19  ;;  %v14264_v19 = vld [vmem:[#allocation23_spill] sm:$0xff] }
 0x934   : > { %v4346_v48 = vpop.permute.xlu1 %4345  ;;  %4914 = vrot.lane.b32.xlu0 %v11233_v30, %s8601_s30 }
 0x935   : > { %4421 = vst.msk [vmem:[#allocation3 + $0x1f8] sm:$0xff] %vm4399_vm2, %v4346_v48 }
 0x936   : > { %4552 = vst.msk [vmem:[#allocation3 + $0x1f8] sm:$0xff] %vm4530_vm10, %v11470_v5  ;;  %4325 = vrot.lane.b32.xlu1 %v14259_v55, %s8600_s20  ;;  %v4677_v7 = vpop.permute.xlu0 %4676  ;;  %v11840_v5 = vld [vmem:[#allocation4 + $0x1a8] sm:$0x3] }
 0x937   : > { %4753 = vst.msk [vmem:[#allocation3 + $0x1d0] sm:$0xff] %vm4190_vm1, %v4677_v7  ;;  %v5033_v57 = vrot.slane %v11840_v5, 2 }
 0x938   : > { %v4139_v15 = vpop.permute.xlu1 %4138  ;;  %4883 = vst.msk [vmem:[#allocation3 + $0x1d0] sm:$0xff] %vm4399_vm2, %v11472_v9  ;;  %4652 = vrot.lane.b32.xlu0 %v14257_v26, %s14155_s29  ;;  %v14262_v9 = vld [vmem:[#allocation18_spill] sm:$0xff] }
 0x939   : > { %4213 = vst.msk [vmem:[#allocation3 + $0x210] sm:$0xff] %vm4190_vm1, %v4139_v15  ;;  %v5034_v44 = vsel %vm14261_vm8, %v5031_v54, %v5033_v57  ;;  %vm5997_vm8 = vcmask 7168  }
 0x93a   : > { %4118 = vrot.lane.b32.xlu1 %v14260_v0, %s14155_s29  ;;  %v4941_v1 = vpop.permute.xlu0 %4940  ;;  %5098 = vst.msk [vmem:[#allocation3 + $0x2f8] sm:$0xff] %vm2176_vm13, %v5034_v44 }
 0x93b   : > { %5017 = vst.msk [vmem:[#allocation3 + $0x1d0] sm:$0xff] %vm4530_vm10, %v4941_v1 }
 0x93c   : > { %v4348_v30 = vpop.permute.xlu1 %4347  ;;  %4916 = vrot.lane.b32.xlu0 %v14258_v62, %s8601_s30  ;;  %v14263_v62 = vld [vmem:[#allocation21_spill] sm:$0xff] }
 0x93d   : > { %4422 = vst.msk [vmem:[#allocation3 + $0x210] sm:$0xff] %vm4399_vm2, %v4348_v30 }
 0x93e   : > { %4553 = vst.msk [vmem:[#allocation3 + $0x210] sm:$0xff] %vm4530_vm10, %v11485_v39  ;;  %4327 = vrot.lane.b32.xlu1 %v14262_v9, %s8600_s20  ;;  %v4679_v8 = vpop.permute.xlu0 %4678 }
 0x93f   : > { %4754 = vst.msk [vmem:[#allocation3 + $0x1e8] sm:$0xff] %vm4190_vm1, %v4679_v8 }
 0x940   : > { %v4141_v26 = vpop.permute.xlu1 %4140  ;;  %4884 = vst.msk [vmem:[#allocation3 + $0x1e8] sm:$0xff] %vm4399_vm2, %v11487_v29  ;;  %4654 = vrot.lane.b32.xlu0 %v11218_v45, %s14155_s29 }
 0x941   : > { %4214 = vst.msk [vmem:[#allocation3 + $0x228] sm:$0xff] %vm4190_vm1, %v4141_v26 }
 0x942   : > { %4120 = vrot.lane.b32.xlu1 %v11276_v53, %s14155_s29  ;;  %v4943_v54 = vpop.permute.xlu0 %4942 }
 0x943   : > { %5018 = vst.msk [vmem:[#allocation3 + $0x1e8] sm:$0xff] %vm4530_vm10, %v4943_v54 }
 0x944   : > { %v4350_v39 = vpop.permute.xlu1 %4349  ;;  %4918 = vrot.lane.b32.xlu0 %v14260_v0, %s8601_s30 }
 0x945   : > { %4423 = vst.msk [vmem:[#allocation3 + $0x228] sm:$0xff] %vm4399_vm2, %v4350_v39 }
 0x946   : > { %4554 = vst.msk [vmem:[#allocation3 + $0x228] sm:$0xff] %vm4530_vm10, %v11498_v38  ;;  %4329 = vrot.lane.b32.xlu1 %v14263_v62, %s8600_s20  ;;  %v4681_v48 = vpop.permute.xlu0 %4680 }
 0x947   : > { %4755 = vst.msk [vmem:[#allocation3 + $0x200] sm:$0xff] %vm4190_vm1, %v4681_v48 }
 0x948   : > { %v4143_v29 = vpop.permute.xlu1 %4142  ;;  %4885 = vst.msk [vmem:[#allocation3 + $0x200] sm:$0xff] %vm4399_vm2, %v11500_v34  ;;  %4656 = vrot.lane.b32.xlu0 %v14259_v55, %s14155_s29 }
 0x949   : > { %4215 = vst.msk [vmem:[#allocation3 + $0x240] sm:$0xff] %vm4190_vm1, %v4143_v29  ;;  %v5102_v29 = vld [vmem:[#allocation3 + $0x18] sm:$0xff] }
 0x94a   : > { %4122 = vrot.lane.b32.xlu1 %v11311_v2, %s14155_s29  ;;  %v4945_v38 = vpop.permute.xlu0 %4944 }
 0x94b   : > { %5019 = vst.msk [vmem:[#allocation3 + $0x200] sm:$0xff] %vm4530_vm10, %v4945_v38 }
 0x94c   : > { %v4352_v45 = vpop.permute.xlu1 %4351  ;;  %4920 = vrot.lane.b32.xlu0 %v11276_v53, %s8601_s30  ;;  %v14265_v53 = vld [vmem:[#allocation33_spill] sm:$0xff] }
 0x94d   : > { %4424 = vst.msk [vmem:[#allocation3 + $0x240] sm:$0xff] %vm4399_vm2, %v4352_v45 }
 0x94e   : > { %4555 = vst.msk [vmem:[#allocation3 + $0x240] sm:$0xff] %vm4530_vm10, %v11513_v35  ;;  %4331 = vrot.lane.b32.xlu1 %v14264_v19, %s8600_s20  ;;  %v4683_v15 = vpop.permute.xlu0 %4682 }
 0x94f   : > { %4756 = vst.msk [vmem:[#allocation3 + $0x218] sm:$0xff] %vm4190_vm1, %v4683_v15 }
 0x950   : > { %v4145_v34 = vpop.permute.xlu1 %4144  ;;  %4886 = vst.msk [vmem:[#allocation3 + $0x218] sm:$0xff] %vm4399_vm2, %v11515_v37  ;;  %4658 = vrot.lane.b32.xlu0 %v14262_v9, %s14155_s29 }
 0x951   : > { %4216 = vst.msk [vmem:[#allocation3 + $0x258] sm:$0xff] %vm4190_vm1, %v4145_v34 }
 0x952   : > { %4355 = vrot.lane.b32.xlu1 %v10912_v14, %s8600_s20  ;;  %v4947_v55 = vpop.permute.xlu0 %4946 }
 0x953   : > { %5020 = vst.msk [vmem:[#allocation3 + $0x218] sm:$0xff] %vm4530_vm10, %v4947_v55 }
 0x954   : > { %v4354_v35 = vpop.permute.xlu1 %4353  ;;  %4922 = vrot.lane.b32.xlu0 %v11311_v2, %s8601_s30  ;;  %v14266_v2 = vld [vmem:[#allocation22_spill] sm:$0xff] }
 0x955   : > { %4425 = vst.msk [vmem:[#allocation3 + $0x258] sm:$0xff] %vm4399_vm2, %v4354_v35 }
 0x956   : > { %4556 = vst.msk [vmem:[#allocation3 + $0x258] sm:$0xff] %vm4530_vm10, %v11526_v33  ;;  %4486 = vrot.lane.b32.xlu1 %v14265_v53, %s8601_s30  ;;  %v4685_v14 = vpop.permute.xlu0 %4684 }
 0x957   : > { %4757 = vst.msk [vmem:[#allocation3 + $0x230] sm:$0xff] %vm4190_vm1, %v4685_v14 }
 0x958   : > { %v4147_v37 = vpop.permute.xlu1 %4146  ;;  %4887 = vst.msk [vmem:[#allocation3 + $0x230] sm:$0xff] %vm4399_vm2, %v11528_v60  ;;  %4660 = vrot.lane.b32.xlu0 %v14263_v62, %s14155_s29 }
 0x959   : > { %4217 = vst.msk [vmem:[#allocation3 + $0x270] sm:$0xff] %vm4190_vm1, %v4147_v37 }
 0x95a   : > { %4124 = vrot.lane.b32.xlu1 %v11314_v36, %s14155_s29  ;;  %v4949_v7 = vpop.permute.xlu0 %4948 }
 0x95b   : > { %5021 = vst.msk [vmem:[#allocation3 + $0x230] sm:$0xff] %vm4530_vm10, %v4949_v7 }
 0x95c   : > { %v4099_v33 = vpop.permute.xlu1 %4098  ;;  %4924 = vrot.lane.b32.xlu0 %v11314_v36, %s8601_s30 }
 0x95d   : > { %4193 = vst.msk [vmem:[#allocation3 + $0x30] sm:$0xff] %vm4190_vm1, %v4099_v33 }
 0x95e   : > { %4333 = vrot.lane.b32.xlu1 %v14266_v2, %s8600_s20  ;;  %v4687_v60 = vpop.permute.xlu0 %4686 }
 0x95f   : > { %4758 = vst.msk [vmem:[#allocation3 + $0x248] sm:$0xff] %vm4190_vm1, %v4687_v60 }
 0x960   : > { %v4308_v0 = vpop.permute.xlu1 %4307  ;;  %4888 = vst.msk [vmem:[#allocation3 + $0x248] sm:$0xff] %vm4399_vm2, %v11541_v59  ;;  %4662 = vrot.lane.b32.xlu0 %v14264_v19, %s14155_s29 }
 0x961   : > { %4402 = vst.msk [vmem:[#allocation3 + $0x30] sm:$0xff] %vm4399_vm2, %v4308_v0 }
 0x962   : > { %4533 = vst.msk [vmem:[#allocation3 + $0x30] sm:$0xff] %vm4530_vm10, %v11567_v17  ;;  %4126 = vrot.lane.b32.xlu1 %v11345_v11, %s14155_s29  ;;  %v4951_v36 = vpop.permute.xlu0 %4950 }
 0x963   : > { %5022 = vst.msk [vmem:[#allocation3 + $0x248] sm:$0xff] %vm4530_vm10, %v4951_v36 }
 0x964   : > { %v4101_v57 = vpop.permute.xlu1 %4100  ;;  %4926 = vrot.lane.b32.xlu0 %v11345_v11, %s8601_s30 }
 0x965   : > { %4194 = vst.msk [vmem:[#allocation3 + $0x48] sm:$0xff] %vm4190_vm1, %v4101_v57  ;;  %v14276_v57 = vld [vmem:[#allocation46_spill] sm:$0xff] }
 0x966   : > { %4335 = vrot.lane.b32.xlu1 %v11334_v43, %s8600_s20  ;;  %v4689_v59 = vpop.permute.xlu0 %4688 }
 0x967   : > { %4759 = vst.msk [vmem:[#allocation3 + $0x260] sm:$0xff] %vm4190_vm1, %v4689_v59 }
 0x968   : > { %v4310_v17 = vpop.permute.xlu1 %4309  ;;  %4889 = vst.msk [vmem:[#allocation3 + $0x260] sm:$0xff] %vm4399_vm2, %v11553_v49  ;;  %4664 = vrot.lane.b32.xlu0 %v14266_v2, %s14155_s29 }
 0x969   : > { %4403 = vst.msk [vmem:[#allocation3 + $0x48] sm:$0xff] %vm4399_vm2, %v4310_v17  ;;  %v5105_v34 = vld [vmem:[#allocation3 + $0x30] sm:$0xff] }
 0x96a   : > { %4534 = vst.msk [vmem:[#allocation3 + $0x48] sm:$0xff] %vm4530_vm10, %v11580_v52  ;;  %4128 = vrot.lane.b32.xlu1 %v11348_v10, %s14155_s29  ;;  %v4953_v11 = vpop.permute.xlu0 %4952 }
 0x96b   : > { %5023 = vst.msk [vmem:[#allocation3 + $0x260] sm:$0xff] %vm4530_vm10, %v4953_v11  ;;  %v14279_v11 = vld [vmem:[#allocation13_spill] sm:$0xff] }
 0x96c   : > { %v4103_v30 = vpop.permute.xlu1 %4102  ;;  %4928 = vrot.lane.b32.xlu0 %v11348_v10, %s8601_s30 }
 0x96d   : > { %4195 = vst.msk [vmem:[#allocation3 + $0x60] sm:$0xff] %vm4190_vm1, %v4103_v30  ;;  %v14278_v30 = vld [vmem:[#allocation44_spill] sm:$0xff] }
 0x96e   : > { %4337 = vrot.lane.b32.xlu1 %v11337_v51, %s8600_s20  ;;  %v4691_v49 = vpop.permute.xlu0 %4690 }
 0x96f   : > { %4760 = vst.msk [vmem:[#allocation3 + $0x278] sm:$0xff] %vm4190_vm1, %v4691_v49  ;;  %v4898_v49 = vrot.slane %v11802_v4, 1 }
 0x970   : > { %v4312_v52 = vpop.permute.xlu1 %4311  ;;  %4666 = vrot.lane.b32.xlu0 %v11334_v43, %s14155_s29  ;;  %v14267_v43 = vld [vmem:[#allocation34_spill] sm:$0xff] }
 0x971   : > { %4404 = vst.msk [vmem:[#allocation3 + $0x60] sm:$0xff] %vm4399_vm2, %v4312_v52  ;;  %v5108_v14 = vld [vmem:[#allocation3 + $0x48] sm:$0xff]  ;;  %v4897_v52 = vrot.slane %v11800_v21, 1 }
 0x972   : > { %4535 = vst.msk [vmem:[#allocation3 + $0x60] sm:$0xff] %vm4530_vm10, %v11595_v40  ;;  %4148 = vrot.lane.b32.xlu1 %v10929_v12, %s14155_s29  ;;  %v4639_v44 = vpop.permute.xlu0 %4638 }
 0x973   : > { %4734 = vst.msk [vmem:[#allocation3 + $0x8] sm:$0xff] %vm4190_vm1, %v4639_v44 }
 0x974   : > { %v4105_v1 = vpop.permute.xlu1 %4104  ;;  %4864 = vst.msk [vmem:[#allocation3 + $0x8] sm:$0xff] %vm4399_vm2, %v11569_v16  ;;  %4668 = vrot.lane.b32.xlu0 %v11337_v51, %s14155_s29  ;;  %v14268_v16 = vld [vmem:[#allocation8_spill] sm:$0xff] }
 0x975   : > { %4196 = vst.msk [vmem:[#allocation3 + $0x78] sm:$0xff] %vm4190_vm1, %v4105_v1  ;;  %v14269_v51 = vld [vmem:[#allocation36_spill] sm:$0xff] }
 0x976   : > { %4357 = vrot.lane.b32.xlu1 %v10915_v13, %s8600_s20  ;;  %v4903_v12 = vpop.permute.xlu0 %4902 }
 0x977   : > { %4998 = vst.msk [vmem:[#allocation3 + $0x8] sm:$0xff] %vm4530_vm10, %v4903_v12 }
 0x978   : > { %v4314_v10 = vpop.permute.xlu1 %4313  ;;  %4820 = vrot.lane.b32.xlu0 %v14268_v16, %s8600_s20 }
 0x979   : > { %4405 = vst.msk [vmem:[#allocation3 + $0x78] sm:$0xff] %vm4399_vm2, %v4314_v10  ;;  %v5111_v36 = vld [vmem:[#allocation3 + $0x60] sm:$0xff] }
 0x97a   : > { %4536 = vst.msk [vmem:[#allocation3 + $0x78] sm:$0xff] %vm4530_vm10, %v11608_v63  ;;  %4488 = vrot.lane.b32.xlu1 %v14267_v43, %s8601_s30  ;;  %v4641_v13 = vpop.permute.xlu0 %4640  ;;  %v4899_v43 = vsel %vm14241_vm9, %v4897_v52, %v4898_v49 }
 0x97b   : > { %4735 = vst.msk [vmem:[#allocation3 + $0x20] sm:$0xff] %vm4190_vm1, %v4641_v13  ;;  %v5191_v13 = vld [vmem:[#allocation3 + $0x2e0] sm:$0xff] }
 0x97c   : > { %v4107_v40 = vpop.permute.xlu1 %4106  ;;  %4865 = vst.msk [vmem:[#allocation3 + $0x20] sm:$0xff] %vm4399_vm2, %v11582_v22  ;;  %4954 = vrot.lane.b32.xlu0 %v14269_v51, %s8601_s30  ;;  %v14270_v22 = vld [vmem:[#allocation9_spill] sm:$0xff]  ;;  %8439 = vmatprep.mubr.msk.f32.mxu1 %vm2176_vm13, %v5191_v13  ;;  %v14293_v13 = vld [vmem:[#allocation43_spill] sm:$0xff] }
 0x97d   : > { %4197 = vst.msk [vmem:[#allocation3 + $0x90] sm:$0xff] %vm4190_vm1, %v4107_v40 }
 0x97e   : > { %4150 = vrot.lane.b32.xlu1 %v10966_v3, %s14155_s29  ;;  %v4905_v9 = vpop.permute.xlu0 %4904  ;;  %v5100_v26 = vld [vmem:[#allocation3 + $0x8] sm:$0xff]  ;;  %v5099_v3 = vld [vmem:[#allocation3] sm:$0xff] }
 0x97f   : > { %4999 = vst.msk [vmem:[#allocation3 + $0x20] sm:$0xff] %vm4530_vm10, %v4905_v9  ;;  %5361 = vmatprep.mubr.f32.mxu0 %v5100_v26  ;;  %v5194_v9 = vld [vmem:[#allocation3 + $0x2f8] sm:$0xff] }
 0x980   : > { %v4316_v63 = vpop.permute.xlu1 %4315  ;;  %4692 = vrot.lane.b32.xlu0 %v14270_v22, %s14155_s29  ;;  %5362 = vmatmul.mubr.f32.vlgmr.msra.gmra.mxu0 %v5099_v3  ;;  %v4900_v3 = vrot.slane %v11840_v5, 1 }
 0x981   : > { %4406 = vst.msk [vmem:[#allocation3 + $0x90] sm:$0xff] %vm4399_vm2, %v4316_v63  ;;  %v5114_v12 = vld [vmem:[#allocation3 + $0x78] sm:$0xff]  ;;  %8440 = vmatmul.mubr.msk.f32.gmra.mxu1 %vm2176_vm13, %v5194_v9  ;;  %vm14284_vm13 = vmmov %vm14241_vm9  ;;  %vm14315_vm9 = vcmask 154712  }
 0x982   : > { %4537 = vst.msk [vmem:[#allocation3 + $0x90] sm:$0xff] %vm4530_vm10, %v11623_v47  ;;  %4359 = vrot.lane.b32.xlu1 %v10952_v18, %s8600_s20  ;;  %v4643_v39 = vpop.permute.xlu0 %4642  ;;  %v14271_v47 = vld [vmem:[#allocation35_spill] sm:$0xff]  ;;  %8446 = vmatprep.mubr.msk.f32.mxu1 %vm14282_vm14, %v14153_v42 }
 0x983   : > { %4736 = vst.msk [vmem:[#allocation3 + $0x38] sm:$0xff] %vm4190_vm1, %v4643_v39 }
 0x984   : > { %v4109_v8 = vpop.permute.xlu1 %4108  ;;  %4866 = vst.msk [vmem:[#allocation3 + $0x38] sm:$0xff] %vm4399_vm2, %v11597_v6  ;;  %4822 = vrot.lane.b32.xlu0 %v14271_v47, %s8600_s20  ;;  %v14272_v6 = vld [vmem:[#allocation37_spill] sm:$0xff] }
 0x985   : > { %4198 = vst.msk [vmem:[#allocation3 + $0xa8] sm:$0xff] %vm4190_vm1, %v4109_v8 }
 0x986   : > { %4490 = vrot.lane.b32.xlu1 %v14268_v16, %s8601_s30  ;;  %v4907_v54 = vpop.permute.xlu0 %4906  ;;  %v5103_v62 = vld [vmem:[#allocation3 + $0x20] sm:$0xff] }
 0x987   : > { %5000 = vst.msk [vmem:[#allocation3 + $0x38] sm:$0xff] %vm4530_vm10, %v4907_v54  ;;  %5366 = vmatprep.mubr.f32.mxu0 %v5103_v62 }
 0x988   : > { %v4318_v18 = vpop.permute.xlu1 %4317  ;;  %4956 = vrot.lane.b32.xlu0 %v14272_v6, %s8601_s30  ;;  %5367 = vmatmul.mubr.f32.gmra.mxu0 %v5102_v29 }
 0x989   : > { %4407 = vst.msk [vmem:[#allocation3 + $0xa8] sm:$0xff] %vm4399_vm2, %v4318_v18  ;;  %v5117_v26 = vld [vmem:[#allocation3 + $0x90] sm:$0xff] }
 0x98a   : > { %4538 = vst.msk [vmem:[#allocation3 + $0xa8] sm:$0xff] %vm4530_vm10, %v11636_v24  ;;  %4152 = vrot.lane.b32.xlu1 %v10969_v56, %s14155_s29  ;;  %v4645_v45 = vpop.permute.xlu0 %4644  ;;  %v14273_v24 = vld [vmem:[#allocation11_spill] sm:$0xff] }
 0x98b   : > { %4737 = vst.msk [vmem:[#allocation3 + $0x50] sm:$0xff] %vm4190_vm1, %v4645_v45 }
 0x98c   : > { %v4111_v48 = vpop.permute.xlu1 %4110  ;;  %4867 = vst.msk [vmem:[#allocation3 + $0x50] sm:$0xff] %vm4399_vm2, %v11610_v58  ;;  %4694 = vrot.lane.b32.xlu0 %v14273_v24, %s14155_s29  ;;  %v8569_v58 = vld [vmem:[#allocation4 + $0x180] sm:$0xff] }
 0x98d   : > { %4199 = vst.msk [vmem:[#allocation3 + $0xc0] sm:$0xff] %vm4190_vm1, %v4111_v48 }
 0x98e   : > { %4361 = vrot.lane.b32.xlu1 %v14270_v22, %s8600_s20  ;;  %v4909_v38 = vpop.permute.xlu0 %4908  ;;  %v5106_v19 = vld [vmem:[#allocation3 + $0x38] sm:$0xff] }
 0x98f   : > { %5001 = vst.msk [vmem:[#allocation3 + $0x50] sm:$0xff] %vm4530_vm10, %v4909_v38  ;;  %5371 = vmatprep.mubr.f32.mxu0 %v5106_v19  ;;  %v14281_v22 = vld [vmem:[#allocation12_spill] sm:$0xff]  ;;  %v14286_v19 = vld [vmem:[#allocation49_spill] sm:$0xff] }
 0x990   : > { %v4320_v56 = vpop.permute.xlu1 %4319  ;;  %4824 = vrot.lane.b32.xlu0 %v8569_v58, %s8600_s20  ;;  %5372 = vmatmul.mubr.f32.gmra.mxu0 %v5105_v34 }
 0x991   : > { %4408 = vst.msk [vmem:[#allocation3 + $0xc0] sm:$0xff] %vm4399_vm2, %v4320_v56  ;;  %v5120_v62 = vld [vmem:[#allocation3 + $0xa8] sm:$0xff] }
 0x992   : > { %4539 = vst.msk [vmem:[#allocation3 + $0xc0] sm:$0xff] %vm4530_vm10, %v11651_v32  ;;  %4492 = vrot.lane.b32.xlu1 %v14271_v47, %s8601_s30  ;;  %v4647_v35 = vpop.permute.xlu0 %4646  ;;  %v14274_v32 = vld [vmem:[#allocation38_spill] sm:$0xff]  ;;  %v14283_v47 = vld [vmem:[#allocation47_spill] sm:$0xff] }
 0x993   : > { %4738 = vst.msk [vmem:[#allocation3 + $0x68] sm:$0xff] %vm4190_vm1, %v4647_v35 }
 0x994   : > { %v4113_v15 = vpop.permute.xlu1 %4112  ;;  %4868 = vst.msk [vmem:[#allocation3 + $0x68] sm:$0xff] %vm4399_vm2, %v11625_v23  ;;  %4958 = vrot.lane.b32.xlu0 %v14274_v32, %s8601_s30  ;;  %v14275_v23 = vld [vmem:[#allocation10_spill] sm:$0xff] }
 0x995   : > { %4200 = vst.msk [vmem:[#allocation3 + $0xd8] sm:$0xff] %vm4190_vm1, %v4113_v15 }
 0x996   : > { %4154 = vrot.lane.b32.xlu1 %v14269_v51, %s14155_s29  ;;  %v4911_v53 = vpop.permute.xlu0 %4910  ;;  %v5109_v37 = vld [vmem:[#allocation3 + $0x50] sm:$0xff]  ;;  %v14280_v51 = vld [vmem:[#allocation45_spill] sm:$0xff] }
 0x997   : > { %5002 = vst.msk [vmem:[#allocation3 + $0x68] sm:$0xff] %vm4530_vm10, %v4911_v53  ;;  %5376 = vmatprep.mubr.f32.mxu0 %v5109_v37 }
 0x998   : > { %v4322_v55 = vpop.permute.xlu1 %4321  ;;  %4696 = vrot.lane.b32.xlu0 %v14275_v23, %s14155_s29  ;;  %5377 = vmatmul.mubr.f32.gmra.mxu0 %v5108_v14 }
 0x999   : > { %4409 = vst.msk [vmem:[#allocation3 + $0xd8] sm:$0xff] %vm4399_vm2, %v4322_v55  ;;  %v14287_v55 = vld [vmem:[#allocation50_spill] sm:$0xff] }
 0x99a   : > { %4540 = vst.msk [vmem:[#allocation3 + $0xd8] sm:$0xff] %vm4530_vm10, %v11664_v20  ;;  %4363 = vrot.lane.b32.xlu1 %v14273_v24, %s8600_s20  ;;  %v4649_v7 = vpop.permute.xlu0 %4648  ;;  %v8570_v20 = vld [vmem:[#allocation4 + $0x188] sm:$0xff] }
 0x99b   : > { %4739 = vst.msk [vmem:[#allocation3 + $0x80] sm:$0xff] %vm4190_vm1, %v4649_v7 }
 0x99c   : > { %v4115_v33 = vpop.permute.xlu1 %4114  ;;  %4869 = vst.msk [vmem:[#allocation3 + $0x80] sm:$0xff] %vm4399_vm2, %v11638_v27  ;;  %4826 = vrot.lane.b32.xlu0 %v8570_v20, %s8600_s20  ;;  %v14277_v27 = vld [vmem:[#allocation39_spill] sm:$0xff] }
 0x99d   : > { %4201 = vst.msk [vmem:[#allocation3 + $0xf0] sm:$0xff] %vm4190_vm1, %v4115_v33 }
 0x99e   : > { %4494 = vrot.lane.b32.xlu1 %v8569_v58, %s8601_s30  ;;  %v4913_v0 = vpop.permute.xlu0 %4912  ;;  %v5112_v60 = vld [vmem:[#allocation3 + $0x68] sm:$0xff] }
 0x99f   : > { %5003 = vst.msk [vmem:[#allocation3 + $0x80] sm:$0xff] %vm4530_vm10, %v4913_v0  ;;  %5381 = vmatprep.mubr.f32.mxu0 %v5112_v60 }
 0x9a0   : > { %v4324_v2 = vpop.permute.xlu1 %4323  ;;  %4960 = vrot.lane.b32.xlu0 %v14277_v27, %s8601_s30  ;;  %5382 = vmatmul.mubr.f32.gmra.mxu0 %v5111_v36 }
 0x9a1   : > { %4410 = vst.msk [vmem:[#allocation3 + $0xf0] sm:$0xff] %vm4399_vm2, %v4324_v2  ;;  %v5126_v35 = vld [vmem:[#allocation3 + $0xd8] sm:$0xff] }
 0x9a2   : > { %4541 = vst.msk [vmem:[#allocation3 + $0xf0] sm:$0xff] %vm4530_vm10, %v14276_v57  ;;  %4156 = vrot.lane.b32.xlu1 %v14272_v6, %s14155_s29  ;;  %v4651_v59 = vpop.permute.xlu0 %4650 }
 0x9a3   : > { %4740 = vst.msk [vmem:[#allocation3 + $0x98] sm:$0xff] %vm4190_vm1, %v4651_v59 }
 0x9a4   : > { %v4117_v17 = vpop.permute.xlu1 %4116  ;;  %4870 = vst.msk [vmem:[#allocation3 + $0x98] sm:$0xff] %vm4399_vm2, %v14278_v30  ;;  %4698 = vrot.lane.b32.xlu0 %v14279_v11, %s14155_s29 }
 0x9a5   : > { %4202 = vst.msk [vmem:[#allocation3 + $0x108] sm:$0xff] %vm4190_vm1, %v4117_v17  ;;  %v14290_v17 = vld [vmem:[#allocation52_spill] sm:$0xff] }
 0x9a6   : > { %4365 = vrot.lane.b32.xlu1 %v14275_v23, %s8600_s20  ;;  %v4915_v44 = vpop.permute.xlu0 %4914  ;;  %v5115_v10 = vld [vmem:[#allocation3 + $0x80] sm:$0xff] }
 0x9a7   : > { %5004 = vst.msk [vmem:[#allocation3 + $0x98] sm:$0xff] %vm4530_vm10, %v4915_v44  ;;  %5386 = vmatprep.mubr.f32.mxu0 %v5115_v10  ;;  %v14292_v10 = vld [vmem:[#allocation41_spill] sm:$0xff] }
 0x9a8   : > { %v4326_v1 = vpop.permute.xlu1 %4325  ;;  %4828 = vrot.lane.b32.xlu0 %v11800_v21, %s8600_s20  ;;  %5387 = vmatmul.mubr.f32.gmra.mxu0 %v5114_v12 }
 0x9a9   : > { %4411 = vst.msk [vmem:[#allocation3 + $0x108] sm:$0xff] %vm4399_vm2, %v4326_v1  ;;  %v5129_v14 = vld [vmem:[#allocation3 + $0xf0] sm:$0xff] }
 0x9aa   : > { %4542 = vst.msk [vmem:[#allocation3 + $0x108] sm:$0xff] %vm4530_vm10, %v11692_v25  ;;  %4496 = vrot.lane.b32.xlu1 %v8570_v20, %s8601_s30  ;;  %v4653_v40 = vpop.permute.xlu0 %4652  ;;  %v14288_v20 = vld [vmem:[#allocation51_spill] sm:$0xff] }
 0x9ab   : > { %4741 = vst.msk [vmem:[#allocation3 + $0xb0] sm:$0xff] %vm4190_vm1, %v4653_v40 }
 0x9ac   : > { %v4119_v16 = vpop.permute.xlu1 %4118  ;;  %4871 = vst.msk [vmem:[#allocation3 + $0xb0] sm:$0xff] %vm4399_vm2, %v14280_v51  ;;  %4962 = vrot.lane.b32.xlu0 %v4899_v43, %s8601_s30 }
 0x9ad   : > { %4203 = vst.msk [vmem:[#allocation3 + $0x120] sm:$0xff] %vm4190_vm1, %v4119_v16 }
 0x9ae   : > { %v4917_v21 = vpop.permute.xlu0 %4916  ;;  %v5118_v63 = vld [vmem:[#allocation3 + $0x98] sm:$0xff] }
 0x9af   : > { %5005 = vst.msk [vmem:[#allocation3 + $0xb0] sm:$0xff] %vm4530_vm10, %v4917_v21  ;;  %5391 = vmatprep.mubr.f32.mxu0 %v5118_v63 }
 0x9b0   : > { %v4328_v25 = vpop.permute.xlu1 %4327  ;;  %4700 = vrot.lane.b32.xlu0 %v14281_v22, %s14155_s29  ;;  %5392 = vmatmul.mubr.f32.gmra.mxu0 %v5117_v26  ;;  %s14373_s29 = smov 92  }
 0x9b1   : > { %4412 = vst.msk [vmem:[#allocation3 + $0x120] sm:$0xff] %vm4399_vm2, %v4328_v25  ;;  %v5132_v57 = vld [vmem:[#allocation3 + $0x108] sm:$0xff] }
 0x9b2   : > { %4543 = vst.msk [vmem:[#allocation3 + $0x120] sm:$0xff] %vm4530_vm10, %v11707_v31  ;;  %v4655_v39 = vpop.permute.xlu0 %4654  ;;  %v4901_v31 = vsel %vm14284_vm13, %v4898_v49, %v4900_v3  ;;  %v14291_v49 = vld [vmem:[#allocation42_spill] sm:$0xff]  ;;  %vm14317_vm13 = vmmov %vm14315_vm9 }
 0x9b3   : > { %4742 = vst.msk [vmem:[#allocation3 + $0xc8] sm:$0xff] %vm4190_vm1, %v4655_v39 }
 0x9b4   : > { %v4121_v8 = vpop.permute.xlu1 %4120  ;;  %4872 = vst.msk [vmem:[#allocation3 + $0xc8] sm:$0xff] %vm4399_vm2, %v14283_v47  ;;  %4830 = vrot.lane.b32.xlu0 %v11802_v4, %s8600_s20  ;;  %v14285_v4 = vld [vmem:[#allocation48_spill] sm:$0xff] }
 0x9b5   : > { %4204 = vst.msk [vmem:[#allocation3 + $0x138] sm:$0xff] %vm4190_vm1, %v4121_v8  ;;  %v5148_v8 = vld [vmem:[#allocation3 + $0x188] sm:$0xff] }
 0x9b6   : > { %v4919_v54 = vpop.permute.xlu0 %4918  ;;  %v5121_v5 = vld [vmem:[#allocation3 + $0xb0] sm:$0xff] }
 0x9b7   : > { %5006 = vst.msk [vmem:[#allocation3 + $0xc8] sm:$0xff] %vm4530_vm10, %v4919_v54  ;;  %5396 = vmatprep.mubr.f32.mxu0 %v5121_v5 }
 0x9b8   : > { %v4330_v18 = vpop.permute.xlu1 %4329  ;;  %4964 = vrot.lane.b32.xlu0 %v4901_v31, %s8601_s30  ;;  %5397 = vmatmul.mubr.f32.gmra.mxu0 %v5120_v62 }
 0x9b9   : > { %4413 = vst.msk [vmem:[#allocation3 + $0x138] sm:$0xff] %vm4399_vm2, %v4330_v18  ;;  %v5135_v52 = vld [vmem:[#allocation3 + $0x120] sm:$0xff] }
 0x9ba   : > { %4544 = vst.msk [vmem:[#allocation3 + $0x138] sm:$0xff] %vm4530_vm10, %v11720_v41  ;;  %v4657_v29 = vpop.permute.xlu0 %4656  ;;  %v5123_v41 = vld [vmem:[#allocation3 + $0xc0] sm:$0xff] }
 0x9bb   : > { %4743 = vst.msk [vmem:[#allocation3 + $0xe0] sm:$0xff] %vm4190_vm1, %v4657_v29  ;;  %v5151_v18 = vld [vmem:[#allocation3 + $0x1a0] sm:$0xff]  ;;  %v5153_v29 = vld [vmem:[#allocation3 + $0x1b0] sm:$0xff] }
 0x9bc   : > { %v4123_v6 = vpop.permute.xlu1 %4122  ;;  %4873 = vst.msk [vmem:[#allocation3 + $0xe0] sm:$0xff] %vm4399_vm2, %v14285_v4 }
 0x9bd   : > { %4205 = vst.msk [vmem:[#allocation3 + $0x150] sm:$0xff] %vm4190_vm1, %v4123_v6  ;;  %v5154_v6 = vld [vmem:[#allocation3 + $0x1b8] sm:$0xff] }
 0x9be   : > { %v4921_v45 = vpop.permute.xlu0 %4920  ;;  %v5124_v24 = vld [vmem:[#allocation3 + $0xc8] sm:$0xff] }
 0x9bf   : > { %5007 = vst.msk [vmem:[#allocation3 + $0xe0] sm:$0xff] %vm4530_vm10, %v4921_v45  ;;  %5401 = vmatprep.mubr.f32.mxu0 %v5124_v24  ;;  %v5157_v45 = vld [vmem:[#allocation3 + $0x1d0] sm:$0xff]  ;;  %v5156_v24 = vld [vmem:[#allocation3 + $0x1c8] sm:$0xff] }
 0x9c0   : > { %v4332_v48 = vpop.permute.xlu1 %4331  ;;  %5402 = vmatmul.mubr.f32.gmra.mxu0 %v5123_v41 }
 0x9c1   : > { %4414 = vst.msk [vmem:[#allocation3 + $0x150] sm:$0xff] %vm4399_vm2, %v4332_v48  ;;  %v5138_v40 = vld [vmem:[#allocation3 + $0x138] sm:$0xff] }
 0x9c2   : > { %4545 = vst.msk [vmem:[#allocation3 + $0x150] sm:$0xff] %vm4530_vm10, %v11735_v50  ;;  %v4659_v38 = vpop.permute.xlu0 %4658 }
 0x9c3   : > { %4744 = vst.msk [vmem:[#allocation3 + $0xf8] sm:$0xff] %vm4190_vm1, %v4659_v38  ;;  %v5160_v38 = vld [vmem:[#allocation3 + $0x1e8] sm:$0xff] }
 0x9c4   : > { %v4356_v56 = vpop.permute.xlu1 %4355  ;;  %4874 = vst.msk [vmem:[#allocation3 + $0xf8] sm:$0xff] %vm4399_vm2, %v14286_v19  ;;  %v5159_v19 = vld [vmem:[#allocation3 + $0x1e0] sm:$0xff] }
 0x9c5   : > { %4426 = vst.msk [vmem:[#allocation3 + $0x270] sm:$0xff] %vm4399_vm2, %v4356_v56 }
 0x9c6   : > { %v4923_v34 = vpop.permute.xlu0 %4922  ;;  %v5127_v15 = vld [vmem:[#allocation3 + $0xe0] sm:$0xff] }
 0x9c7   : > { %5008 = vst.msk [vmem:[#allocation3 + $0xf8] sm:$0xff] %vm4530_vm10, %v4923_v34  ;;  %5406 = vmatprep.mubr.f32.mxu0 %v5127_v15  ;;  %v5163_v15 = vld [vmem:[#allocation3 + $0x200] sm:$0xff] }
 0x9c8   : > { %v4487_v58 = vpop.permute.xlu1 %4486  ;;  %5407 = vmatmul.mubr.f32.gmra.mxu0 %v5126_v35  ;;  %v5162_v35 = vld [vmem:[#allocation3 + $0x1f8] sm:$0xff] }
 0x9c9   : > { %4557 = vst.msk [vmem:[#allocation3 + $0x270] sm:$0xff] %vm4530_vm10, %v4487_v58  ;;  %v5141_v21 = vld [vmem:[#allocation3 + $0x150] sm:$0xff] }
 0x9ca   : > { %v4661_v32 = vpop.permute.xlu0 %4660 }
 0x9cb   : > { %4745 = vst.msk [vmem:[#allocation3 + $0x110] sm:$0xff] %vm4190_vm1, %v4661_v32 }
 0x9cc   : > { %v4125_v50 = vpop.permute.xlu1 %4124  ;;  %4875 = vst.msk [vmem:[#allocation3 + $0x110] sm:$0xff] %vm4399_vm2, %v14287_v55  ;;  %v5166_v55 = vld [vmem:[#allocation3 + $0x218] sm:$0xff] }
 0x9cd   : > { %4206 = vst.msk [vmem:[#allocation3 + $0x168] sm:$0xff] %vm4190_vm1, %v4125_v50 }
 0x9ce   : > { %v4925_v37 = vpop.permute.xlu0 %4924  ;;  %v5130_v23 = vld [vmem:[#allocation3 + $0xf8] sm:$0xff] }
 0x9cf   : > { %5009 = vst.msk [vmem:[#allocation3 + $0x110] sm:$0xff] %vm4530_vm10, %v4925_v37  ;;  %5411 = vmatprep.mubr.f32.mxu0 %v5130_v23 }
 0x9d0   : > { %v4334_v53 = vpop.permute.xlu1 %4333  ;;  %5412 = vmatmul.mubr.f32.gmra.mxu0 %v5129_v14  ;;  %v5169_v14 = vld [vmem:[#allocation3 + $0x230] sm:$0xff] }
 0x9d1   : > { %4415 = vst.msk [vmem:[#allocation3 + $0x168] sm:$0xff] %vm4399_vm2, %v4334_v53  ;;  %v5165_v53 = vld [vmem:[#allocation3 + $0x210] sm:$0xff] }
 0x9d2   : > { %4546 = vst.msk [vmem:[#allocation3 + $0x168] sm:$0xff] %vm4530_vm10, %v11748_v61  ;;  %v4663_v7 = vpop.permute.xlu0 %4662  ;;  %v14289_v61 = vld [vmem:[#allocation40_spill] sm:$0xff] }
 0x9d3   : > { %4746 = vst.msk [vmem:[#allocation3 + $0x128] sm:$0xff] %vm4190_vm1, %v4663_v7 }
 0x9d4   : > { %v4127_v33 = vpop.permute.xlu1 %4126  ;;  %4876 = vst.msk [vmem:[#allocation3 + $0x128] sm:$0xff] %vm4399_vm2, %v14288_v20 }
 0x9d5   : > { %4207 = vst.msk [vmem:[#allocation3 + $0x180] sm:$0xff] %vm4190_vm1, %v4127_v33  ;;  %v5168_v33 = vld [vmem:[#allocation3 + $0x228] sm:$0xff] }
 0x9d6   : > { %v4927_v0 = vpop.permute.xlu0 %4926  ;;  %v5133_v60 = vld [vmem:[#allocation3 + $0x110] sm:$0xff] }
 0x9d7   : > { %5010 = vst.msk [vmem:[#allocation3 + $0x128] sm:$0xff] %vm4530_vm10, %v4927_v0  ;;  %5416 = vmatprep.mubr.f32.mxu0 %v5133_v60  ;;  %v5171_v0 = vld [vmem:[#allocation3 + $0x240] sm:$0xff] }
 0x9d8   : > { %v4336_v2 = vpop.permute.xlu1 %4335  ;;  %5417 = vmatmul.mubr.f32.gmra.mxu0 %v5132_v57 }
 0x9d9   : > { %4416 = vst.msk [vmem:[#allocation3 + $0x180] sm:$0xff] %vm4399_vm2, %v4336_v2  ;;  %v5144_v22 = vld [vmem:[#allocation3 + $0x168] sm:$0xff] }
 0x9da   : > { %4547 = vst.msk [vmem:[#allocation3 + $0x180] sm:$0xff] %vm4530_vm10, %v14289_v61  ;;  %v4665_v36 = vpop.permute.xlu0 %4664  ;;  %v5172_v2 = vld [vmem:[#allocation3 + $0x248] sm:$0xff]  ;;  %v5175_v61 = vld [vmem:[#allocation3 + $0x260] sm:$0xff] }
 0x9db   : > { %4747 = vst.msk [vmem:[#allocation3 + $0x140] sm:$0xff] %vm4190_vm1, %v4665_v36 }
 0x9dc   : > { %v4129_v27 = vpop.permute.xlu1 %4128  ;;  %4877 = vst.msk [vmem:[#allocation3 + $0x140] sm:$0xff] %vm4399_vm2, %v14290_v17 }
 0x9dd   : > { %4208 = vst.msk [vmem:[#allocation3 + $0x198] sm:$0xff] %vm4190_vm1, %v4129_v27  ;;  %v5174_v27 = vld [vmem:[#allocation3 + $0x258] sm:$0xff] }
 0x9de   : > { %v4929_v30 = vpop.permute.xlu0 %4928  ;;  %v5136_v11 = vld [vmem:[#allocation3 + $0x128] sm:$0xff] }
 0x9df   : > { %5011 = vst.msk [vmem:[#allocation3 + $0x140] sm:$0xff] %vm4530_vm10, %v4929_v30  ;;  %5421 = vmatprep.mubr.f32.mxu0 %v5136_v11  ;;  %v5177_v30 = vld [vmem:[#allocation3 + $0x270] sm:$0xff] }
 0x9e0   : > { %v4338_v59 = vpop.permute.xlu1 %4337  ;;  %5422 = vmatmul.mubr.f32.gmra.mxu0 %v5135_v52 }
 0x9e1   : > { %4417 = vst.msk [vmem:[#allocation3 + $0x198] sm:$0xff] %vm4399_vm2, %v4338_v59  ;;  %v5147_v39 = vld [vmem:[#allocation3 + $0x180] sm:$0xff] }
 0x9e2   : > { %4548 = vst.msk [vmem:[#allocation3 + $0x198] sm:$0xff] %vm4530_vm10, %v14291_v49  ;;  %v4667_v44 = vpop.permute.xlu0 %4666 }
 0x9e3   : > { %4748 = vst.msk [vmem:[#allocation3 + $0x158] sm:$0xff] %vm4190_vm1, %v4667_v44 }
 0x9e4   : > { %v4149_v1 = vpop.permute.xlu1 %4148  ;;  %4878 = vst.msk [vmem:[#allocation3 + $0x158] sm:$0xff] %vm4399_vm2, %v14292_v10 }
 0x9e5   : > { %4218 = vst.msk [vmem:[#allocation3 + $0x288] sm:$0xff] %vm4190_vm1, %v4149_v1 }
 0x9e6   : > { %5012 = vst.msk [vmem:[#allocation3 + $0x158] sm:$0xff] %vm4530_vm10, %v11760_v46  ;;  %v4669_v43 = vpop.permute.xlu0 %4668  ;;  %v5139_v16 = vld [vmem:[#allocation3 + $0x140] sm:$0xff] }
 0x9e7   : > { %4749 = vst.msk [vmem:[#allocation3 + $0x170] sm:$0xff] %vm4190_vm1, %v4669_v43  ;;  %5426 = vmatprep.mubr.f32.mxu0 %v5139_v16 }
 0x9e8   : > { %v4358_v12 = vpop.permute.xlu1 %4357  ;;  %4879 = vst.msk [vmem:[#allocation3 + $0x170] sm:$0xff] %vm4399_vm2, %v14293_v13  ;;  %5427 = vmatmul.mubr.f32.gmra.mxu0 %v5138_v40 }
 0x9e9   : > { %4427 = vst.msk [vmem:[#allocation3 + $0x288] sm:$0xff] %vm4399_vm2, %v4358_v12  ;;  %v5150_v54 = vld [vmem:[#allocation3 + $0x198] sm:$0xff] }
 0x9ea   : > { %5013 = vst.msk [vmem:[#allocation3 + $0x170] sm:$0xff] %vm4530_vm10, %v11767_v28  ;;  %v4821_v25 = vpop.permute.xlu0 %4820 }
 0x9eb   : > { %4890 = vst.msk [vmem:[#allocation3 + $0x278] sm:$0xff] %vm4399_vm2, %v4821_v25 }
 0x9ec   : > { %v4489_v51 = vpop.permute.xlu1 %4488 }
 0x9ed   : > { %4558 = vst.msk [vmem:[#allocation3 + $0x288] sm:$0xff] %vm4530_vm10, %v4489_v51  ;;  %v5142_v46 = vld [vmem:[#allocation3 + $0x158] sm:$0xff] }
 0x9ee   : > { %5431 = vmatprep.mubr.f32.mxu0 %v5142_v46  ;;  %v4955_v9 = vpop.permute.xlu0 %4954 }
 0x9ef   : > { %5432 = vmatmul.mubr.f32.gmra.mxu0 %v5141_v21  ;;  %5024 = vst.msk [vmem:[#allocation3 + $0x278] sm:$0xff] %vm4530_vm10, %v4955_v9 }
 0x9f0   : > { %v4151_v63 = vpop.permute.xlu1 %4150 }
 0x9f1   : > { %4219 = vst.msk [vmem:[#allocation3 + $0x2a0] sm:$0xff] %vm4190_vm1, %v4151_v63  ;;  %v5145_v26 = vld [vmem:[#allocation3 + $0x170] sm:$0xff] }
 0x9f2   : > { %5436 = vmatprep.mubr.f32.mxu0 %v5145_v26  ;;  %v4693_v3 = vpop.permute.xlu0 %4692 }
 0x9f3   : > { %5437 = vmatmul.mubr.f32.gmra.mxu0 %v5144_v22  ;;  %4761 = vst.msk [vmem:[#allocation3 + $0x290] sm:$0xff] %vm4190_vm1, %v4693_v3  ;;  %v5780_v3 = vld [vmem:[%s13993_s8 + $0x8] sm:$0xff] }
 0x9f4   : > { %v4360_v28 = vpop.permute.xlu1 %4359  ;;  %5441 = vmatprep.mubr.f32.mxu0 %v5148_v8  ;;  %v5180_v49 = vld [vmem:[#allocation3 + $0x288] sm:$0xff]  ;;  %8443 = vmatpush3.msra.mxu1 %v5780_v3 }
 0x9f5   : > { %4428 = vst.msk [vmem:[#allocation3 + $0x2a0] sm:$0xff] %vm4399_vm2, %v4360_v28  ;;  %8444 = vmatprep.subr.mxu1 %v14153_v42 }
 0x9f6   : > { %v4823_v31 = vpop.permute.xlu0 %4822  ;;  %v5178_v59 = vld [vmem:[#allocation3 + $0x278] sm:$0xff] }
 0x9f7   : > { %5442 = vmatmul.mubr.f32.gmra.mxu0 %v5147_v39  ;;  %4891 = vst.msk [vmem:[#allocation3 + $0x290] sm:$0xff] %vm4399_vm2, %v4823_v31 }
 0x9f8   : > { %v4491_v47 = vpop.permute.xlu1 %4490  ;;  %5446 = vmatprep.mubr.f32.mxu0 %v5151_v18 }
 0x9f9   : > { %4559 = vst.msk [vmem:[#allocation3 + $0x2a0] sm:$0xff] %vm4530_vm10, %v4491_v47 }
 0x9fa   : > { %v4957_v62 = vpop.permute.xlu0 %4956 }
 0x9fb   : > { %5447 = vmatmul.mubr.f32.gmra.mxu0 %v5150_v54  ;;  %5025 = vst.msk [vmem:[#allocation3 + $0x290] sm:$0xff] %vm4530_vm10, %v4957_v62 }
 0x9fc   : > { %v4153_v5 = vpop.permute.xlu1 %4152  ;;  %5451 = vmatprep.mubr.f32.mxu0 %v5154_v6  ;;  %v8396_v6 = vpop.f32.mrf.mxu1 }
 0x9fd   : > { %4220 = vst.msk [vmem:[#allocation3 + $0x2b8] sm:$0xff] %vm4190_vm1, %v4153_v5 }
 0x9fe   : > { %v4695_v48 = vpop.permute.xlu0 %4694 }
 0x9ff   : > { %5452 = vmatmul.mubr.f32.gmra.mxu0 %v5153_v29  ;;  %4762 = vst.msk [vmem:[#allocation3 + $0x2a8] sm:$0xff] %vm4190_vm1, %v4695_v48  ;;  %v5779_v29 = vld [vmem:[%s13993_s8] sm:$0xff] }
 0xa00   : > { %v4362_v4 = vpop.permute.xlu1 %4361  ;;  %5456 = vmatprep.mubr.f32.mxu0 %v5157_v45  ;;  %v5183_v10 = vld [vmem:[#allocation3 + $0x2a0] sm:$0xff]  ;;  %8445 = vmatpush3.msra.mxu1 %v5779_v29 }
 0xa01   : > { %4429 = vst.msk [vmem:[#allocation3 + $0x2b8] sm:$0xff] %vm4399_vm2, %v4362_v4  ;;  %8449 = vmatprep.subr.mxu1 %v14153_v42  ;;  %v5588_v4 = vpop.f32.mrf.mxu1 }
 0xa02   : > { %v4825_v56 = vpop.permute.xlu0 %4824  ;;  %v5181_v52 = vld [vmem:[#allocation3 + $0x290] sm:$0xff] }
 0xa03   : > { %5457 = vmatmul.mubr.f32.gmra.mxu0 %v5156_v24  ;;  %4892 = vst.msk [vmem:[#allocation3 + $0x2a8] sm:$0xff] %vm4399_vm2, %v4825_v56  ;;  %v8399_v24 = vpop.f32.mrf.mxu1 }
 0xa04   : > { %v4493_v41 = vpop.permute.xlu1 %4492  ;;  %5461 = vmatprep.mubr.f32.mxu0 %v5160_v38 }
 0xa05   : > { %4560 = vst.msk [vmem:[#allocation3 + $0x2b8] sm:$0xff] %vm4530_vm10, %v4493_v41  ;;  %v5598_v41 = vpop.f32.mrf.mxu1 }
 0xa06   : > { %v4959_v34 = vpop.permute.xlu0 %4958 }
 0xa07   : > { %5462 = vmatmul.mubr.f32.gmra.mxu0 %v5159_v19  ;;  %5026 = vst.msk [vmem:[#allocation3 + $0x2a8] sm:$0xff] %vm4530_vm10, %v4959_v34  ;;  %v8402_v19 = vpop.f32.mrf.mxu1 }
 0xa08   : > { %v4155_v58 = vpop.permute.xlu1 %4154  ;;  %5466 = vmatprep.mubr.f32.mxu0 %v5163_v15 }
 0xa09   : > { %4221 = vst.msk [vmem:[#allocation3 + $0x2d0] sm:$0xff] %vm4190_vm1, %v4155_v58  ;;  %v5608_v58 = vpop.f32.mrf.mxu1 }
 0xa0a   : > { %v4697_v32 = vpop.permute.xlu0 %4696 }
 0xa0b   : > { %5467 = vmatmul.mubr.f32.gmra.mxu0 %v5162_v35  ;;  %4763 = vst.msk [vmem:[#allocation3 + $0x2c0] sm:$0xff] %vm4190_vm1, %v4697_v32  ;;  %v8405_v35 = vpop.f32.mrf.mxu1 }
 0xa0c   : > { %v4364_v50 = vpop.permute.xlu1 %4363  ;;  %5471 = vmatprep.mubr.f32.mxu0 %v5166_v55  ;;  %v5186_v16 = vld [vmem:[#allocation3 + $0x2b8] sm:$0xff] }
 0xa0d   : > { %4430 = vst.msk [vmem:[#allocation3 + $0x2d0] sm:$0xff] %vm4399_vm2, %v4364_v50  ;;  %v5618_v50 = vpop.f32.mrf.mxu1 }
 0xa0e   : > { %v4827_v23 = vpop.permute.xlu0 %4826  ;;  %v5184_v44 = vld [vmem:[#allocation3 + $0x2a8] sm:$0xff] }
 0xa0f   : > { %5472 = vmatmul.mubr.f32.gmra.mxu0 %v5165_v53  ;;  %4893 = vst.msk [vmem:[#allocation3 + $0x2c0] sm:$0xff] %vm4399_vm2, %v4827_v23  ;;  %v12186_v53 = vpop.f32.mrf.mxu1 }
 0xa10   : > { %v4495_v37 = vpop.permute.xlu1 %4494  ;;  %5476 = vmatprep.mubr.f32.mxu0 %v5169_v14 }
 0xa11   : > { %4561 = vst.msk [vmem:[#allocation3 + $0x2d0] sm:$0xff] %vm4530_vm10, %v4495_v37  ;;  %v5628_v37 = vpop.f32.mrf.mxu1 }
 0xa12   : > { %v4961_v20 = vpop.permute.xlu0 %4960 }
 0xa13   : > { %5477 = vmatmul.mubr.f32.gmra.mxu0 %v5168_v33  ;;  %5027 = vst.msk [vmem:[#allocation3 + $0x2c0] sm:$0xff] %vm4530_vm10, %v4961_v20  ;;  %v12190_v33 = vpop.f32.mrf.mxu1 }
 0xa14   : > { %v4157_v7 = vpop.permute.xlu1 %4156  ;;  %5481 = vmatprep.mubr.f32.mxu0 %v5172_v2 }
 0xa15   : > { %4222 = vst.msk [vmem:[#allocation3 + $0x2e8] sm:$0xff] %vm4190_vm1, %v4157_v7  ;;  %v12192_v7 = vpop.f32.mrf.mxu1 }
 0xa16   : > { %v4699_v57 = vpop.permute.xlu0 %4698 }
 0xa17   : > { %5482 = vmatmul.mubr.f32.gmra.mxu0 %v5171_v0  ;;  %4764 = vst.msk [vmem:[#allocation3 + $0x2d8] sm:$0xff] %vm4190_vm1, %v4699_v57  ;;  %v12196_v0 = vpop.f32.mrf.mxu1 }
 0xa18   : > { %v4366_v60 = vpop.permute.xlu1 %4365  ;;  %5486 = vmatprep.mubr.f32.mxu0 %v5175_v61  ;;  %v5189_v51 = vld [vmem:[#allocation3 + $0x2d0] sm:$0xff] }
 0xa19   : > { %4431 = vst.msk [vmem:[#allocation3 + $0x2e8] sm:$0xff] %vm4399_vm2, %v4366_v60  ;;  %v12198_v60 = vpop.f32.mrf.mxu1 }
 0xa1a   : > { %v4829_v17 = vpop.permute.xlu0 %4828  ;;  %v5187_v43 = vld [vmem:[#allocation3 + $0x2c0] sm:$0xff] }
 0xa1b   : > { %5487 = vmatmul.mubr.f32.gmra.mxu0 %v5174_v27  ;;  %4894 = vst.msk [vmem:[#allocation3 + $0x2d8] sm:$0xff] %vm4399_vm2, %v4829_v17  ;;  %v12202_v27 = vpop.f32.mrf.mxu1  ;;  %v12209_v17 = vld [vmem:[%s13992_s7] ss:$0 sm:$0xff] }
 0xa1c   : > { %v4497_v36 = vpop.permute.xlu1 %4496  ;;  %5491 = vmatprep.mubr.f32.mxu0 %v5178_v59 }
 0xa1d   : > { %4562 = vst.msk [vmem:[#allocation3 + $0x2e8] sm:$0xff] %vm4530_vm10, %v4497_v36  ;;  %v12211_v59 = vpop.f32.mrf.mxu1 }
 0xa1e   : > { %v4963_v11 = vpop.permute.xlu0 %4962 }
 0xa1f   : > { %5492 = vmatmul.mubr.f32.gmra.mxu0 %v5177_v30  ;;  %5028 = vst.msk [vmem:[#allocation3 + $0x2d8] sm:$0xff] %vm4530_vm10, %v4963_v11 }
 0xa20   : > { %5496 = vmatprep.mubr.f32.mxu0 %v5181_v52 }
 0xa22   : > { %v4701_v1 = vpop.permute.xlu0 %4700 }
 0xa23   : > { %5497 = vmatmul.mubr.f32.gmra.mxu0 %v5180_v49  ;;  %4765 = vst.msk [vmem:[#allocation3 + $0x2f0] sm:$0xff] %vm4190_vm1, %v4701_v1  ;;  %vm5782_vm1 = vcmask 130048  }
 0xa24   : > { %5501 = vmatprep.mubr.f32.mxu0 %v5184_v44  ;;  %v5192_v46 = vld [vmem:[#allocation3 + $0x2e8] sm:$0xff]  ;;  %v12218_v44 = vpop.f32.mrf.mxu1 }
 0xa26   : > { %v4831_v12 = vpop.permute.xlu0 %4830  ;;  %v5190_v13 = vld [vmem:[#allocation3 + $0x2d8] sm:$0xff] }
 0xa27   : > { %5502 = vmatmul.mubr.f32.gmra.mxu0 %v5183_v10  ;;  %4895 = vst.msk [vmem:[#allocation3 + $0x2f0] sm:$0xff] %vm4399_vm2, %v4831_v12  ;;  %vm14294_vm2 = vcmask 1040384  }
 0xa28   : > { %5506 = vmatprep.mubr.f32.mxu0 %v5187_v43 }
 0xa2a   : > { %v4965_v40 = vpop.permute.xlu0 %4964 }
 0xa2b   : > { %5507 = vmatmul.mubr.f32.gmra.mxu0 %v5186_v16  ;;  %5029 = vst.msk [vmem:[#allocation3 + $0x2f0] sm:$0xff] %vm4530_vm10, %v4965_v40  ;;  %vm14295_vm10 = vmmov %vm14294_vm2 }
 0xa2c   : > { %5511 = vmatprep.mubr.f32.mxu0 %v5190_v13 }
 0xa2f   : > { %5512 = vmatmul.mubr.f32.gmra.mxu0 %v5189_v51 }
 0xa32   : > { %v5193_v25 = vld [vmem:[#allocation3 + $0x2f0] sm:$0xff] }
 0xa33   : > { %5516 = vmatprep.mubr.f32.mxu0 %v5193_v25  ;;  %v12224_v25 = vpop.f32.mrf.mxu1 }
 0xa34   : > { %5517 = vmatmul.mubr.f32.gmra.mxu0 %v5192_v46 }
 0xa40   : > { %v5363_v21 = vpop.f32.mrf.mxu0 }
 0xa41   : > { %v5364_v52 = vadd.f32 %v12209_v17, %v5363_v21 }
 0xa42   : > { %v5365_v63 = vpop.f32.mrf.mxu0 }
 0xa43   : > { %v5589_v16 = vadd.f32 %v5588_v4, %v5364_v52 }
 0xa48   : > { %v5368_v9 = vpop.f32.mrf.mxu0 }
 0xa49   : > { %v5369_v11 = vadd.f32 %v12209_v17, %v5368_v9 }
 0xa4a   : > { %v5370_v26 = vpop.f32.mrf.mxu0 }
 0xa4b   : > { %v5594_v12 = vadd.f32 %v8396_v6, %v5369_v11  ;;  %v12229_v26 = vmax.f32 %v5589_v16, 0.0 }
 0xa4d   : > { %v12226_v21 = vmax.f32 %v5594_v12, 0.0  ;;  %v5783_v6 = vsel %vm5782_vm1, %v12229_v26, 0.0 }
 0xa50   : > { %v5373_v22 = vpop.f32.mrf.mxu0 }
 0xa51   : > { %v5374_v1 = vadd.f32 %v12209_v17, %v5373_v22 }
 0xa52   : > { %v5375_v28 = vpop.f32.mrf.mxu0 }
 0xa53   : > { %v5599_v13 = vadd.f32 %v5598_v41, %v5374_v1 }
 0xa55   : > { %v12233_v28 = vmax.f32 %v5599_v13, 0.0 }
 0xa57   : > { %v5786_v4 = vsel %vm5782_vm1, %v12233_v28, 0.0 }
 0xa58   : > { %v5378_v8 = vpop.f32.mrf.mxu0 }
 0xa59   : > { %v5379_v43 = vadd.f32 %v12209_v17, %v5378_v8 }
 0xa5a   : > { %v5380_v39 = vpop.f32.mrf.mxu0 }
 0xa5b   : > { %v5604_v63 = vadd.f32 %v8399_v24, %v5379_v43  ;;  %v12236_v39 = vpop.f32.mrf.mxu1 }
 0xa5d   : > { %v12252_v41 = vpop.f32.mrf.mxu1 }
 0xa5f   : > { %v12268_v11 = vpop.f32.mrf.mxu1 }
 0xa60   : > { %v5383_v47 = vpop.f32.mrf.mxu0 }
 0xa61   : > { %v5384_v51 = vadd.f32 %v12209_v17, %v5383_v47 }
 0xa62   : > { %v5385_v31 = vpop.f32.mrf.mxu0 }
 0xa63   : > { %v5609_v3 = vadd.f32 %v5608_v58, %v5384_v51  ;;  %v5784_v31 = vsel %vm5782_vm1, %v12226_v21, 0.0 }
 0xa68   : > { %v5388_v18 = vpop.f32.mrf.mxu0 }
 0xa69   : > { %v5389_v9 = vadd.f32 %v12209_v17, %v5388_v18 }
 0xa6a   : > { %v5390_v54 = vpop.f32.mrf.mxu0 }
 0xa6b   : > { %v12240_v54 = vmax.f32 %v5604_v63, 0.0 }
 0xa70   : > { %v5393_v5 = vpop.f32.mrf.mxu0 }
 0xa71   : > { %v5394_v8 = vadd.f32 %v12209_v17, %v5393_v5  ;;  %v12249_v5 = vmax.f32 %v5609_v3, 0.0 }
 0xa72   : > { %v5395_v62 = vpop.f32.mrf.mxu0 }
 0xa73   : > { %v5614_v62 = vadd.f32 %v8402_v19, %v5389_v9 }
 0xa75   : > { %v12256_v19 = vmax.f32 %v5614_v62, 0.0 }
 0xa78   : > { %v5398_v48 = vpop.f32.mrf.mxu0 }
 0xa79   : > { %v5399_v18 = vadd.f32 %v12209_v17, %v5398_v48  ;;  %v5788_v48 = vsel %vm5782_vm1, %v12240_v54, 0.0 }
 0xa7a   : > { %v5400_v45 = vpop.f32.mrf.mxu0 }
 0xa7b   : > { %v5619_v45 = vadd.f32 %v5618_v50, %v5394_v8  ;;  %v5790_v50 = vsel %vm5782_vm1, %v12249_v5, 0.0 }
 0xa80   : > { %v5403_v56 = vpop.f32.mrf.mxu0 }
 0xa81   : > { %v5404_v24 = vadd.f32 %v12209_v17, %v5403_v56  ;;  %v12264_v56 = vmax.f32 %v5619_v45, 0.0 }
 0xa82   : > { %v5405_v38 = vpop.f32.mrf.mxu0 }
 0xa83   : > { %v5785_v38 = vadd.f32 %v5784_v31, %v5783_v6 }
 0xa88   : > { %v12182_v34 = vpop.f32.mrf.mxu0 }
 0xa8a   : > { %v5410_v15 = vpop.f32.mrf.mxu0 }
 0xa8b   : > { %v5624_v15 = vadd.f32 %v8405_v35, %v5399_v18  ;;  %v5792_v35 = vsel %vm5782_vm1, %v12256_v19, 0.0 }
 0xa90   : > { %v12184_v32 = vpop.f32.mrf.mxu0 }
 0xa92   : > { %v5415_v55 = vpop.f32.mrf.mxu0 }
 0xa93   : > { %v5409_v55 = vadd.f32 %v12209_v17, %v12182_v34  ;;  %v12272_v34 = vmax.f32 %v5624_v15, 0.0 }
 0xa98   : > { %v12188_v23 = vpop.f32.mrf.mxu0 }
 0xa99   : > { %v5419_v12 = vadd.f32 %v12209_v17, %v12188_v23 }
 0xa9a   : > { %v5420_v14 = vpop.f32.mrf.mxu0 }
 0xa9b   : > { %v5787_v14 = vadd.f32 %v5786_v4, %v5785_v38  ;;  %v5644_v3 = vadd.f32 %v12190_v33, %v5419_v12 }
 0xa9d   : > { %v5789_v52 = vadd.f32 %v5788_v48, %v5787_v14 }
 0xa9f   : > { %v5791_v43 = vadd.f32 %v5790_v50, %v5789_v52 }
 0xaa0   : > { %v12194_v20 = vpop.f32.mrf.mxu0 }
 0xaa1   : > { %v5424_v51 = vadd.f32 %v12209_v17, %v12194_v20  ;;  %v5793_v63 = vadd.f32 %v5792_v35, %v5791_v43 }
 0xaa2   : > { %v5425_v2 = vpop.f32.mrf.mxu0 }
 0xaa3   : > { %v5649_v62 = vadd.f32 %v12198_v60, %v5424_v51 }
 0xaa8   : > { %v12200_v57 = vpop.f32.mrf.mxu0 }
 0xaa9   : > { %v5429_v8 = vadd.f32 %v12209_v17, %v12200_v57  ;;  %v12304_v57 = vmax.f32 %v5644_v3, 0.0 }
 0xaaa   : > { %v5430_v61 = vpop.f32.mrf.mxu0 }
 0xaab   : > { %v5629_v61 = vadd.f32 %v5628_v37, %v5404_v24  ;;  %v5794_v37 = vsel %vm5782_vm1, %v12264_v56, 0.0  ;;  %v5654_v24 = vadd.f32 %v12196_v0, %v5429_v8  ;;  %v5804_v0 = vsel %vm5782_vm1, %v12304_v57, 0.0 }
 0xaaf   : > { %v12204_v36 = vpop.f32.mrf.mxu0 }
 0xab0   : > { %v5434_v18 = vadd.f32 %v12209_v17, %v12204_v36  ;;  %v12311_v36 = vmax.f32 %v5649_v62, 0.0 }
 0xab1   : > { %v5435_v30 = vpop.f32.mrf.mxu0 }
 0xab2   : > { %v5414_v30 = vadd.f32 %v12209_v17, %v12184_v32  ;;  %v12279_v32 = vmax.f32 %v5629_v61, 0.0  ;;  %v5659_v15 = vadd.f32 %v12211_v59, %v5434_v18  ;;  %v5806_v59 = vsel %vm5782_vm1, %v12311_v36, 0.0 }
 0xab3   : > { %v12215_v49 = vpop.f32.mrf.mxu0 }
 0xab4   : > { %v5639_v13 = vadd.f32 %v12192_v7, %v5414_v30  ;;  %v5798_v7 = vsel %vm5782_vm1, %v12279_v32, 0.0  ;;  %v5439_v38 = vadd.f32 %v12209_v17, %v12215_v49  ;;  %v12318_v30 = vmax.f32 %v5654_v24, 0.0 }
 0xab5   : > { %v5440_v10 = vpop.f32.mrf.mxu0 }
 0xab6   : > { %v5634_v10 = vadd.f32 %v12186_v53, %v5409_v55  ;;  %v5796_v53 = vsel %vm5782_vm1, %v12272_v34, 0.0  ;;  %v12295_v20 = vmax.f32 %v5639_v13, 0.0  ;;  %v5664_v49 = vadd.f32 %v12202_v27, %v5439_v38 }
 0xab7   : > { %v12221_v40 = vpop.f32.mrf.mxu0  ;;  %v5808_v27 = vsel %vm5782_vm1, %v12318_v30, 0.0 }
 0xab8   : > { %v12288_v23 = vmax.f32 %v5634_v10, 0.0  ;;  %v5802_v60 = vsel %vm5782_vm1, %v12295_v20, 0.0  ;;  %v5444_v55 = vadd.f32 %v12209_v17, %v12221_v40  ;;  %v12325_v10 = vmax.f32 %v5659_v15, 0.0 }
 0xab9   : > { %v5445_v46 = vpop.f32.mrf.mxu0 }
 0xaba   : > { %v12284_v46 = vpop.f32.mrf.mxu1  ;;  %v5800_v33 = vsel %vm5782_vm1, %v12288_v23, 0.0  ;;  %v5669_v40 = vadd.f32 %v12224_v25, %v5444_v55  ;;  %v5810_v25 = vsel %vm5782_vm1, %v12325_v10, 0.0 }
 0xabb   : > { %v12231_v22 = vpop.f32.mrf.mxu0 }
 0xabc   : > { %v12300_v6 = vpop.f32.mrf.mxu1  ;;  %v5449_v52 = vadd.f32 %v12209_v17, %v12231_v22  ;;  %v12334_v22 = vmax.f32 %v5664_v49, 0.0 }
 0xabd   : > { %v5450_v47 = vpop.f32.mrf.mxu0 }
 0xabe   : > { %v5795_v47 = vadd.f32 %v5794_v37, %v5793_v63  ;;  %v5698_v14 = vpop.f32.mrf.mxu1  ;;  %v5674_v51 = vadd.f32 %v12218_v44, %v5449_v52  ;;  %v5812_v44 = vsel %vm5782_vm1, %v12334_v22, 0.0 }
 0xabf   : > { %v12245_v29 = vpop.f32.mrf.mxu0 }
 0xac0   : > { %v5797_v4 = vadd.f32 %v5796_v53, %v5795_v47  ;;  %v5454_v12 = vadd.f32 %v12209_v17, %v12245_v29  ;;  %v12330_v43 = vpop.f32.mrf.mxu1  ;;  %v12341_v29 = vmax.f32 %v5669_v40, 0.0  ;;  %v12347_v18 = vmax.f32 %v5674_v51, 0.0 }
 0xac1   : > { %v5455_v58 = vpop.f32.mrf.mxu0  ;;  %v5854_v40 = vsel %vm5782_vm1, %v12226_v21, -inf }
 0xac2   : > { %v5799_v58 = vadd.f32 %v5798_v7, %v5797_v4  ;;  %v5679_v3 = vadd.f32 %v12252_v41, %v5454_v12  ;;  %v5708_v47 = vpop.f32.mrf.mxu1  ;;  %v5814_v24 = vsel %vm5782_vm1, %v12341_v29, 0.0  ;;  %v5816_v55 = vsel %vm5782_vm1, %v12347_v18, 0.0 }
 0xac3   : > { %v12260_v2 = vpop.f32.mrf.mxu0 }
 0xac4   : > { %v5801_v50 = vadd.f32 %v5800_v33, %v5799_v58  ;;  %v5459_v63 = vadd.f32 %v12209_v17, %v12260_v2  ;;  %v12353_v41 = vmax.f32 %v5679_v3, 0.0  ;;  %v8435_v58 = vpop.f32.mrf.mxu1 }
 0xac5   : > { %v5460_v1 = vpop.f32.mrf.mxu0 }
 0xac6   : > { %v5803_v1 = vadd.f32 %v5802_v60, %v5801_v50  ;;  %v5684_v2 = vadd.f32 %v12236_v39, %v5459_v63  ;;  %v5855_v63 = vsel %vm5782_vm1, %v12233_v28, -inf }
 0xac7   : > { %v5463_v16 = vpop.f32.mrf.mxu0 }
 0xac8   : > { %v5805_v37 = vadd.f32 %v5804_v0, %v5803_v1  ;;  %v5464_v8 = vadd.f32 %v12209_v17, %v5463_v16  ;;  %v12359_v39 = vmax.f32 %v5684_v2, 0.0 }
 0xac9   : > { %v5465_v9 = vpop.f32.mrf.mxu0 }
 0xaca   : > { %v5807_v9 = vadd.f32 %v5806_v59, %v5805_v37  ;;  %v5689_v16 = vadd.f32 %v12284_v46, %v5464_v8  ;;  %v5818_v46 = vsel %vm5782_vm1, %v12353_v41, 0.0  ;;  %v5718_v59 = vpop.f32.mrf.mxu1 }
 0xacb   : > { %v5468_v31 = vpop.f32.mrf.mxu0 }
 0xacc   : > { %v5809_v7 = vadd.f32 %v5808_v27, %v5807_v9  ;;  %v5469_v4 = vadd.f32 %v12209_v17, %v5468_v31  ;;  %v5856_v9 = vsel %vm5782_vm1, %v12240_v54, -inf }
 0xacd   : > { %v5470_v45 = vpop.f32.mrf.mxu0 }
 0xace   : > { %v5811_v45 = vadd.f32 %v5810_v25, %v5809_v7  ;;  %v5694_v31 = vadd.f32 %v12268_v11, %v5469_v4  ;;  %v5857_v11 = vsel %vm5782_vm1, %v12249_v5, -inf }
 0xacf   : > { %v5473_v48 = vpop.f32.mrf.mxu0 }
 0xad0   : > { %v5474_v38 = vadd.f32 %v12209_v17, %v5473_v48  ;;  %v5813_v60 = vadd.f32 %v5812_v44, %v5811_v45  ;;  %v12367_v48 = vmax.f32 %v5689_v16, 0.0  ;;  %v12378_v27 = vmax.f32 %v5694_v31, 0.0  ;;  %v8438_v44 = vpop.f32.mrf.mxu1 }
 0xad1   : > { %v5475_v61 = vpop.f32.mrf.mxu0  ;;  %v5863_v45 = vsel %vm5782_vm1, %v12272_v34, -inf  ;;  %v5867_v31 = vsel %vm5782_vm1, %v12288_v23, -inf }
 0xad2   : > { %v5853_v61 = vsel %vm5782_vm1, %v12229_v26, -inf  ;;  %v5815_v0 = vadd.f32 %v5814_v24, %v5813_v60  ;;  %v5699_v52 = vadd.f32 %v5698_v14, %v5474_v38  ;;  %v5822_v8 = vsel %vm5782_vm1, %v12367_v48, 0.0 }
 0xad3   : > { %v5478_v35 = vpop.f32.mrf.mxu0  ;;  %v5858_v2 = vmax.f32 %v5853_v61, %v5857_v11  ;;  %v5824_v16 = vsel %vm5782_vm1, %v12378_v27, 0.0  ;;  %v5871_v11 = vsel %vm5782_vm1, %v12304_v57, -inf }
 0xad4   : > { %v5479_v50 = vadd.f32 %v12209_v17, %v5478_v35  ;;  %v5859_v35 = vsel %vm5782_vm1, %v12256_v19, -inf  ;;  %v5817_v12 = vadd.f32 %v5816_v55, %v5815_v0  ;;  %v12390_v7 = vmax.f32 %v5699_v52, 0.0 }
 0xad5   : > { %v5480_v13 = vpop.f32.mrf.mxu0  ;;  %v5860_v4 = vmax.f32 %v5854_v40, %v5859_v35  ;;  %v5865_v55 = vsel %vm5782_vm1, %v12279_v32, -inf  ;;  %v5869_v40 = vsel %vm5782_vm1, %v12295_v20, -inf }
 0xad6   : > { %v5820_v13 = vsel %vm5782_vm1, %v12359_v39, 0.0  ;;  %v5704_v14 = vadd.f32 %v12300_v6, %v5479_v50  ;;  %v5819_v25 = vadd.f32 %v5818_v46, %v5817_v12  ;;  %v5826_v0 = vsel %vm5782_vm1, %v12390_v7, 0.0 }
 0xad7   : > { %v5483_v53 = vpop.f32.mrf.mxu0 }
 0xad8   : > { %v5484_v1 = vadd.f32 %v12209_v17, %v5483_v53  ;;  %v5861_v53 = vsel %vm5782_vm1, %v12264_v56, -inf  ;;  %v12397_v38 = vmax.f32 %v5704_v14, 0.0 }
 0xad9   : > { %v5485_v62 = vpop.f32.mrf.mxu0 }
 0xada   : > { %v5709_v62 = vadd.f32 %v5708_v47, %v5484_v1  ;;  %v5862_v47 = vmax.f32 %v5855_v63, %v5861_v53  ;;  %v5864_v1 = vmax.f32 %v5856_v9, %v5863_v45  ;;  %v5868_v63 = vmax.f32 %v5860_v4, %v5867_v31 }
 0xadb   : > { %v5488_v33 = vpop.f32.mrf.mxu0  ;;  %v5875_v9 = vsel %vm5782_vm1, %v12318_v30, -inf  ;;  %v5877_v4 = vsel %vm5782_vm1, %v12325_v10, -inf }
 0xadc   : > { %v5489_v51 = vadd.f32 %v12209_v17, %v5488_v33  ;;  %v5821_v33 = vadd.f32 %v5820_v13, %v5819_v25  ;;  %v5828_v13 = vsel %vm5782_vm1, %v12397_v38, 0.0  ;;  %v5876_v31 = vmax.f32 %v5868_v63, %v5875_v9 }
 0xadd   : > { %v5490_v15 = vpop.f32.mrf.mxu0 }
 0xade   : > { %v5714_v60 = vadd.f32 %v12330_v43, %v5489_v51  ;;  %v5823_v50 = vadd.f32 %v5822_v8, %v5821_v33  ;;  %v5728_v43 = vpop.f32.mrf.mxu1  ;;  %v5866_v51 = vmax.f32 %v5858_v2, %v5865_v55  ;;  %v5870_v33 = vmax.f32 %v5862_v47, %v5869_v40 }
 0xadf   : > { %v5493_v49 = vpop.f32.mrf.mxu0  ;;  %v5881_v47 = vsel %vm5782_vm1, %v12341_v29, -inf }
 0xae0   : > { %v5494_v6 = vadd.f32 %v12209_v17, %v5493_v49  ;;  %v12407_v49 = vmax.f32 %v5709_v62, 0.0  ;;  %v5825_v35 = vadd.f32 %v5824_v16, %v5823_v50  ;;  %v12418_v14 = vmax.f32 %v5714_v60, 0.0 }
 0xae1   : > { %v5495_v37 = vpop.f32.mrf.mxu0  ;;  %v5879_v50 = vsel %vm5782_vm1, %v12334_v22, -inf  ;;  %v5878_v40 = vmax.f32 %v5870_v33, %v5877_v4 }
 0xae2   : > { %v5719_v46 = vadd.f32 %v5718_v59, %v5494_v6  ;;  %v5873_v37 = vsel %vm5782_vm1, %v12311_v36, -inf  ;;  %v5827_v53 = vadd.f32 %v5826_v0, %v5825_v35  ;;  %v5830_v8 = vsel %vm5782_vm1, %v12407_v49, 0.0 }
 0xae3   : > { %v5498_v3 = vpop.f32.mrf.mxu0  ;;  %v5874_v16 = vmax.f32 %v5866_v51, %v5873_v37  ;;  %v5832_v60 = vsel %vm5782_vm1, %v12418_v14, 0.0  ;;  %v5887_v35 = vsel %vm5782_vm1, %v12359_v39, -inf }
 0xae4   : > { %v5499_v15 = vadd.f32 %v12209_v17, %v5498_v3  ;;  %v8441_v3 = vpop.f32.mrf.mxu1  ;;  %v12424_v62 = vmax.f32 %v5719_v46, 0.0 }
 0xae5   : > { %v5500_v24 = vpop.f32.mrf.mxu0 }
 0xae6   : > { %v5724_v59 = vadd.f32 %v8435_v58, %v5499_v15  ;;  %v5872_v24 = vmax.f32 %v5864_v1, %v5871_v11  ;;  %v5829_v58 = vadd.f32 %v5828_v13, %v5827_v53  ;;  %v5738_v46 = vpop.f32.mrf.mxu1  ;;  %v5885_v11 = vsel %vm5782_vm1, %v12353_v41, -inf }
 0xae7   : > { %v5503_v61 = vpop.f32.mrf.mxu0  ;;  %v5889_v13 = vsel %vm5782_vm1, %v12367_v48, -inf  ;;  %v5882_v53 = vmax.f32 %v5874_v16, %v5881_v47  ;;  %v5899_v16 = vsel %vm5782_vm1, %v12418_v14, -inf }
 0xae8   : > { %v5504_v52 = vadd.f32 %v12209_v17, %v5503_v61  ;;  %v12431_v15 = vmax.f32 %v5724_v59, 0.0  ;;  %v5831_v61 = vadd.f32 %v5830_v8, %v5829_v58  ;;  %v5880_v9 = vmax.f32 %v5872_v24, %v5879_v50 }
 0xae9   : > { %v5505_v12 = vpop.f32.mrf.mxu0  ;;  %v5890_v4 = vmax.f32 %v5882_v53, %v5889_v13  ;;  %v5895_v24 = vsel %vm5782_vm1, %v12397_v38, -inf }
 0xaea   : > { %v5729_v6 = vadd.f32 %v5728_v43, %v5504_v52  ;;  %v5883_v52 = vsel %vm5782_vm1, %v12347_v18, -inf  ;;  %v5834_v43 = vsel %vm5782_vm1, %v12424_v62, 0.0  ;;  %v5833_v12 = vadd.f32 %v5832_v60, %v5831_v61 }
 0xaeb   : > { %v5508_v25 = vpop.f32.mrf.mxu0  ;;  %v5836_v59 = vsel %vm5782_vm1, %v12431_v15, 0.0  ;;  %v5893_v60 = vsel %vm5782_vm1, %v12390_v7, -inf }
 0xaec   : > { %v5509_v45 = vadd.f32 %v12209_v17, %v5508_v25  ;;  %v12441_v1 = vmax.f32 %v5729_v6, 0.0  ;;  %v5884_v25 = vmax.f32 %v5876_v31, %v5883_v52  ;;  %v5835_v8 = vadd.f32 %v5834_v43, %v5833_v12 }
 0xaed   : > { %v5510_v2 = vpop.f32.mrf.mxu0  ;;  %v5886_v6 = vmax.f32 %v5878_v40, %v5885_v11 }
 0xaee   : > { %v5734_v55 = vadd.f32 %v8438_v44, %v5509_v45  ;;  %v5891_v45 = vsel %vm5782_vm1, %v12378_v27, -inf  ;;  %v5838_v33 = vsel %vm5782_vm1, %v12441_v1, 0.0  ;;  %v5888_v2 = vmax.f32 %v5880_v9, %v5887_v35 }
 0xaef   : > { %v5513_v0 = vpop.f32.mrf.mxu0  ;;  %v5892_v47 = vmax.f32 %v5884_v25, %v5891_v45 }
 0xaf0   : > { %v5514_v44 = vadd.f32 %v12209_v17, %v5513_v0  ;;  %v12452_v51 = vmax.f32 %v5734_v55, 0.0  ;;  %v5837_v55 = vadd.f32 %v5836_v59, %v5835_v8  ;;  %v5897_v0 = vsel %vm5782_vm1, %v12407_v49, -inf }
 0xaf1   : > { %v5515_v37 = vpop.f32.mrf.mxu0  ;;  %v5896_v12 = vmax.f32 %v5888_v2, %v5895_v24  ;;  %v5898_v59 = vmax.f32 %v5890_v4, %v5897_v0 }
 0xaf2   : > { %v5739_v63 = vadd.f32 %v5738_v46, %v5514_v44  ;;  %v5840_v31 = vsel %vm5782_vm1, %v12452_v51, 0.0  ;;  %v5901_v46 = vsel %vm5782_vm1, %v12424_v62, -inf  ;;  %v5839_v52 = vadd.f32 %v5838_v33, %v5837_v55 }
 0xaf3   : > { %v5903_v44 = vsel %vm5782_vm1, %v12431_v15, -inf  ;;  %v5907_v40 = vsel %vm5782_vm1, %v12452_v51, -inf  ;;  %v5900_v37 = vmax.f32 %v5892_v47, %v5899_v16 }
 0xaf4   : > { %v12458_v58 = vmax.f32 %v5739_v63, 0.0  ;;  %v5518_v61 = vpop.f32.mrf.mxu0  ;;  %v5841_v13 = vadd.f32 %v5840_v31, %v5839_v52  ;;  %v5905_v63 = vsel %vm5782_vm1, %v12441_v1, -inf  ;;  %v5904_v25 = vmax.f32 %v5896_v12, %v5903_v44 }
 0xaf5   : > { %v5519_v50 = vadd.f32 %v12209_v17, %v5518_v61  ;;  %v5894_v17 = vmax.f32 %v5886_v6, %v5893_v60  ;;  %v5908_v8 = vmax.f32 %v5900_v37, %v5907_v40  ;;  %v5906_v2 = vmax.f32 %v5898_v59, %v5905_v63  ;;  %v5781_v37 = vld [vmem:[%s13994_s9] sm:$0x1] }
 0xaf6   : > { %v5520_v43 = vpop.f32.mrf.mxu0  ;;  %v5842_v11 = vsel %vm5782_vm1, %v12458_v58, 0.0  ;;  %v5909_v9 = vsel %vm5782_vm1, %v12458_v58, -inf }
 0xaf7   : > { %v5744_v35 = vadd.f32 %v8441_v3, %v5519_v50  ;;  %v5843_v45 = vadd.f32 %v5842_v11, %v5841_v13  ;;  %v5902_v33 = vmax.f32 %v5894_v17, %v5901_v46  ;;  %v5913_v61 = vmax.f32 %v5906_v2, %v5908_v8 }
 0xaf9   : > { %v12483_v53 = vmax.f32 %v5744_v35, 0.0  ;;  %v5910_v4 = vmax.f32 %v5902_v33, %v5909_v9 }
 0xafb   : > { %v5844_v3 = vsel %vm5782_vm1, %v12483_v53, 0.0  ;;  %v5911_v6 = vsel %vm5782_vm1, %v12483_v53, -inf }
 0xafc   : > { %v5845_v60 = vadd.f32 %v5844_v3, %v5843_v45  ;;  %v5912_v55 = vmax.f32 %v5904_v25, %v5911_v6 }
 0xafe   : > { %v5846_v24 = vrot.slane %v5845_v60, 4  ;;  %v5914_v16 = vmax.f32 %v5910_v4, %v5912_v55  ;;  %v14296_v55 = vld [vmem:[#allocation7_spill] sm:$0xff] }
 0xb00   : > { %v5847_v31 = vadd.f32 %v5846_v24, %v5845_v60  ;;  %v5915_v50 = vmax.f32 %v5913_v61, %v5914_v16 }
 0xb02   : > { %v5848_v47 = vrot.slane %v5847_v31, 2  ;;  %v5916_v0 = vrot.slane %v5915_v50, 4 }
 0xb04   : > { %v5849_v52 = vadd.f32 %v5848_v47, %v5847_v31  ;;  %v5917_v43 = vmax.f32 %v5915_v50, %v5916_v0 }
 0xb06   : > { %v5850_v46 = vrot.slane %v5849_v52, 1  ;;  %v5918_v44 = vrot.slane %v5917_v43, 2 }
 0xb08   : > { %v5851_v40 = vadd.f32 %v5850_v46, %v5849_v52  ;;  %v5919_v11 = vmax.f32 %v5917_v43, %v5918_v44 }
 0xb0a   : > { %v5920_v35 = vrot.slane %v5919_v11, 1  ;;  %v5852_v17 = vmul.f32 0.00390625, %v5851_v40 }
 0xb0c   : > { %v5921_v12 = vmax.f32 %v5919_v11, %v5920_v35 }
 0xb0e   : > { %v5922_v13 = vsel %vm14294_vm2, %v5852_v17, %v5921_v12  ;;  %vm14319_vm2 = vmmov %vm14315_vm9 }
 0xb0f   : > { %8447 = vmatmul.mubr.msk.f32.vlgmr.msra.gmra.mxu1 %vm5782_vm1, %v5922_v13 }
 0xb10   : > { %8450 = vmatpush3.msk.msra.mxu1 %vm14295_vm10, %v5781_v37  ;;  %8451 = vmatprep.mubr.msk.f32.mxu1 %vm14282_vm14, %v14153_v42  ;;  %vm14316_vm14 = vmmov %vm14315_vm9 }
 0xb11   : > { %vm14320_vm10 = vmmov %vm14319_vm2 }
 0xbcf   : > { %v5992_v59 = vpop.f32.mrf.mxu1 }
 0xbd0   : > { %v5996_v63 = vmax.f32 %v5992_v59, 0.0 }
 0xbd1   : > { %v8448_v9 = vpop.f32.mrf.mxu1 }
 0xbd2   : > { %8452 = vmatmul.mubr.msk.f32.vlgmr.msra.gmra.mxu1 %vm5997_vm8, %v5996_v63 }
 0xc92   : > { %v6070_v25 = vpop.f32.mrf.mxu1 }
 0xc93   : > { %v6075_v8 = vrot.slane %v6070_v25, 1 }
 0xc94   : > { %v8453_v45 = vpop.f32.mrf.mxu1 }
 0xc95   : > { %v6077_v33 = vadd.f32 %v6075_v8, %v6070_v25 }
 0xc97   : > { %v6078_v3 = vsub.f32 0.0, %v6077_v33 }
 0xc99   : > { %v6079_v6 = vmul.f32 1.442695, %v6078_v3 }
 0xc9b   : > { %8557 = vpow2.f32 %v6079_v6 }
 0xca8   : > { %v8558_v2 = vpop.eup %8557 }
 0xca9   : > { %v6081_v4 = vadd.f32 1.0, %v8558_v2 }
 0xcab   : > { %8559 = vrcp.f32 %v6081_v4 }
 0xcb8   : > { %v8560_v60 = vpop.eup %8559 }
 0xcb9   : > { %v12498_v61 = vrot.slane %v8560_v60, %v14296_v55 }
 0xcbb   : > { %v12502_v42 = vmul.f32 %v12498_v61, %v12226_v21  ;;  %v12506_v24 = vmul.f32 %v12498_v61, %v12229_v26  ;;  %v12514_v50 = vmul.f32 %v12498_v61, %v12341_v29  ;;  %v12518_v47 = vmul.f32 %v12498_v61, %v12233_v28 }
 0xcbc   : > { %v12526_v0 = vmul.f32 %v12498_v61, %v12353_v41  ;;  %v12530_v29 = vmul.f32 %v12498_v61, %v12240_v54  ;;  %v12538_v43 = vmul.f32 %v12498_v61, %v12249_v5  ;;  %v12542_v41 = vmul.f32 %v12498_v61, %v12347_v18 }
 0xcbd   : > { %v6168_v16 = vsel %vm5782_vm1, %v12502_v42, 0.0  ;;  %v6165_v31 = vsel %vm5782_vm1, %v12506_v24, 0.0  ;;  %v6213_v21 = vsel %vm5782_vm1, %v12514_v50, 0.0  ;;  %v6171_v26 = vsel %vm5782_vm1, %v12518_v47, 0.0 }
 0xcbe   : > { %6169 = vadd.xlane.f32.xlu1 %v6168_v16  ;;  %6166 = vadd.xlane.f32.xlu0 %v6165_v31  ;;  %v6219_v28 = vsel %vm5782_vm1, %v12526_v0, 0.0  ;;  %v6174_v52 = vsel %vm5782_vm1, %v12530_v29, 0.0  ;;  %v6177_v54 = vsel %vm5782_vm1, %v12538_v43, 0.0  ;;  %v6216_v46 = vsel %vm5782_vm1, %v12542_v41, 0.0 }
 0xcbf   : > { %v12550_v44 = vmul.f32 %v12498_v61, %v12367_v48  ;;  %v12554_v5 = vmul.f32 %v12498_v61, %v12359_v39  ;;  %v12562_v11 = vmul.f32 %v12498_v61, %v12264_v56  ;;  %v12566_v48 = vmul.f32 %v12498_v61, %v12256_v19 }
 0xcc0   : > { %v12574_v17 = vmul.f32 %v12498_v61, %v12390_v7  ;;  %v12578_v56 = vmul.f32 %v12498_v61, %v12378_v27  ;;  %v12586_v37 = vmul.f32 %v12498_v61, %v12279_v32  ;;  %v12590_v7 = vmul.f32 %v12498_v61, %v12272_v34 }
 0xcc1   : > { %v6225_v18 = vsel %vm5782_vm1, %v12550_v44, 0.0  ;;  %v6222_v40 = vsel %vm5782_vm1, %v12554_v5, 0.0  ;;  %v6183_v39 = vsel %vm5782_vm1, %v12562_v11, 0.0  ;;  %v6180_v35 = vsel %vm5782_vm1, %v12566_v48, 0.0 }
 0xcc2   : > { %6214 = vadd.xlane.f32.xlu1 %v6213_v21  ;;  %6172 = vadd.xlane.f32.xlu0 %v6171_v26  ;;  %v6231_v19 = vsel %vm5782_vm1, %v12574_v17, 0.0  ;;  %v6228_v12 = vsel %vm5782_vm1, %v12578_v56, 0.0  ;;  %14297 = vst [vmem:[#allocation15_spill] sm:$0xff] %v12586_v37  ;;  %v6189_v27 = vsel %vm5782_vm1, %v12586_v37, 0.0  ;;  %v6186_v13 = vsel %vm5782_vm1, %v12590_v7, 0.0 }
 0xcc3   : > { %v12598_v59 = vmul.f32 %v12498_v61, %v12407_v49  ;;  %v12602_v32 = vmul.f32 %v12498_v61, %v12397_v38  ;;  %v12610_v9 = vmul.f32 %v12498_v61, %v12295_v20  ;;  %v12614_v49 = vmul.f32 %v12498_v61, %v12288_v23 }
 0xcc4   : > { %v12622_v8 = vmul.f32 %v12498_v61, %v12424_v62  ;;  %v12626_v20 = vmul.f32 %v12498_v61, %v12418_v14  ;;  %v12634_v33 = vmul.f32 %v12498_v61, %v12304_v57  ;;  %v6488_v62 = vsel %vm5782_vm1, %v12506_v24, -inf }
 0xcc5   : > { %14298 = vst [vmem:[#allocation17_spill] sm:$0xff] %v12598_v59  ;;  %v6237_v34 = vsel %vm5782_vm1, %v12598_v59, 0.0  ;;  %v6234_v63 = vsel %vm5782_vm1, %v12602_v32, 0.0  ;;  %14299 = vst [vmem:[#allocation14_spill] sm:$0xff] %v12610_v9  ;;  %v6195_v38 = vsel %vm5782_vm1, %v12610_v9, 0.0  ;;  %v6192_v25 = vsel %vm5782_vm1, %v12614_v49, 0.0 }
 0xcc6   : > { %6220 = vadd.xlane.f32.xlu1 %v6219_v28  ;;  %6175 = vadd.xlane.f32.xlu0 %v6174_v52  ;;  %14300 = vst [vmem:[#allocation19_spill] sm:$0xff] %v12614_v49  ;;  %14301 = vst [vmem:[#allocation16_spill] sm:$0xff] %v12622_v8  ;;  %v6243_v23 = vsel %vm5782_vm1, %v12622_v8, 0.0  ;;  %v6240_v45 = vsel %vm5782_vm1, %v12626_v20, 0.0  ;;  %v6198_v14 = vsel %vm5782_vm1, %v12634_v33, 0.0  ;;  %v12642_v3 = vmul.f32 %v12498_v61, %v12431_v15 }
 0xcc7   : > { %14302 = vst [vmem:[#allocation20_spill] sm:$0xff] %v12626_v20  ;;  %14303 = vst [vmem:[#allocation18_spill] sm:$0xff] %v12634_v33  ;;  %v6494_v6 = vsel %vm5782_vm1, %v12518_v47, -inf  ;;  %v12650_v2 = vmul.f32 %v12498_v61, %v12311_v36  ;;  %v6491_v15 = vsel %vm5782_vm1, %v12502_v42, -inf  ;;  %v12658_v60 = vmul.f32 %v12498_v61, %v12441_v1 }
 0xcc8   : > { %14304 = vst [vmem:[#allocation21_spill] sm:$0xff] %v12642_v3  ;;  %v6246_v57 = vsel %vm5782_vm1, %v12642_v3, 0.0  ;;  %v6497_v36 = vsel %vm5782_vm1, %v12530_v29, -inf  ;;  %v12666_v31 = vmul.f32 %v12498_v61, %v12318_v30  ;;  %v6500_v21 = vsel %vm5782_vm1, %v12538_v43, -inf }
 0xcc9   : > { %14305 = vst [vmem:[#allocation23_spill] sm:$0xff] %v12650_v2  ;;  %v6201_v4 = vsel %vm5782_vm1, %v12650_v2, 0.0  ;;  %14306 = vst [vmem:[#allocation33_spill] sm:$0xff] %v12658_v60  ;;  %v6249_v16 = vsel %vm5782_vm1, %v12658_v60, 0.0  ;;  %v12674_v26 = vmul.f32 %v12498_v61, %v12325_v10  ;;  %v12678_v28 = vmul.f32 %v12498_v61, %v12452_v51 }
 0xcca   : > { %6178 = vadd.xlane.f32.xlu1 %v6177_v54  ;;  %6217 = vadd.xlane.f32.xlu0 %v6216_v46  ;;  %14307 = vst [vmem:[#allocation22_spill] sm:$0xff] %v12666_v31  ;;  %v6204_v1 = vsel %vm5782_vm1, %v12666_v31, 0.0  ;;  %v12682_v30 = vmul.f32 %v12498_v61, %v12458_v58  ;;  %v6503_v51 = vsel %vm5782_vm1, %v12566_v48, -inf  ;;  %v12694_v46 = vmul.f32 %v12498_v61, %v12334_v22 }
 0xccb   : > { %14308 = vst [vmem:[#allocation34_spill] sm:$0xff] %v12674_v26  ;;  %14309 = vst [vmem:[#allocation8_spill] sm:$0xff] %v12678_v28  ;;  %v6207_v52 = vsel %vm5782_vm1, %v12674_v26, 0.0  ;;  %v6252_v54 = vsel %vm5782_vm1, %v12678_v28, 0.0  ;;  %v6506_v58 = vsel %vm5782_vm1, %v12562_v11, -inf }
 0xccc   : > { %14310 = vst [vmem:[#allocation36_spill] sm:$0xff] %v12682_v30  ;;  %v6255_v10 = vsel %vm5782_vm1, %v12682_v30, 0.0  ;;  %14311 = vst [vmem:[#allocation9_spill] sm:$0xff] %v12694_v46 }
 0xcce   : > { %6226 = vadd.xlane.f32.xlu1 %v6225_v18  ;;  %6223 = vadd.xlane.f32.xlu0 %v6222_v40  ;;  %v6210_v18 = vsel %vm5782_vm1, %v12694_v46, 0.0  ;;  %v12702_v40 = vmul.f32 %v12498_v61, %v12483_v53  ;;  %v6536_v53 = vsel %vm5782_vm1, %v12514_v50, -inf  ;;  %v6515_v61 = vsel %vm5782_vm1, %v12614_v49, -inf }
 0xcd0   : > { %14312 = vst [vmem:[#allocation35_spill] sm:$0xff] %v12702_v40  ;;  %v6258_v22 = vsel %vm5782_vm1, %v12702_v40, 0.0 }
 0xcd2   : > { %6184 = vadd.xlane.f32.xlu1 %v6183_v39  ;;  %6181 = vadd.xlane.f32.xlu0 %v6180_v35  ;;  %v6512_v39 = vsel %vm5782_vm1, %v12586_v37, -inf  ;;  %v6518_v35 = vsel %vm5782_vm1, %v12610_v9, -inf  ;;  %v14314_v9 = vld [vmem:[#allocation24_spill] sm:$0xff] }
 0xcd6   : > { %6232 = vadd.xlane.f32.xlu1 %v6231_v19  ;;  %6229 = vadd.xlane.f32.xlu0 %v6228_v12  ;;  %v6509_v19 = vsel %vm5782_vm1, %v12590_v7, -inf  ;;  %v6542_v12 = vsel %vm5782_vm1, %v12526_v0, -inf }
 0xcda   : > { %6190 = vadd.xlane.f32.xlu1 %v6189_v27  ;;  %6187 = vadd.xlane.f32.xlu0 %v6186_v13  ;;  %v6521_v27 = vsel %vm5782_vm1, %v12634_v33, -inf  ;;  %v6524_v13 = vsel %vm5782_vm1, %v12650_v2, -inf  ;;  %v14313_v2 = vld [vmem:[#allocation25_spill] sm:$0xff] }
 0xcde   : > { %6238 = vadd.xlane.f32.xlu1 %v6237_v34  ;;  %6235 = vadd.xlane.f32.xlu0 %v6234_v63  ;;  %v6539_v34 = vsel %vm5782_vm1, %v12542_v41, -inf  ;;  %v6548_v63 = vsel %vm5782_vm1, %v12550_v44, -inf }
 0xce2   : > { %6196 = vadd.xlane.f32.xlu1 %v6195_v38  ;;  %6193 = vadd.xlane.f32.xlu0 %v6192_v25  ;;  %v6545_v38 = vsel %vm5782_vm1, %v12554_v5, -inf  ;;  %v6530_v25 = vsel %vm5782_vm1, %v12674_v26, -inf }
 0xce6   : > { %6244 = vadd.xlane.f32.xlu1 %v6243_v23  ;;  %6241 = vadd.xlane.f32.xlu0 %v6240_v45  ;;  %v6527_v23 = vsel %vm5782_vm1, %v12666_v31, -inf  ;;  %v6554_v45 = vsel %vm5782_vm1, %v12574_v17, -inf }
 0xcea   : > { %6489 = vmax.xlane.f32.xlu1 %v6488_v62  ;;  %6199 = vadd.xlane.f32.xlu0 %v6198_v14  ;;  %v6551_v62 = vsel %vm5782_vm1, %v12578_v56, -inf  ;;  %v6560_v14 = vsel %vm5782_vm1, %v12598_v59, -inf }
 0xcee   : > { %6495 = vmax.xlane.f32.xlu1 %v6494_v6  ;;  %6247 = vadd.xlane.f32.xlu0 %v6246_v57  ;;  %v6533_v6 = vsel %vm5782_vm1, %v12694_v46, -inf  ;;  %v6566_v57 = vsel %vm5782_vm1, %v12622_v8, -inf }
 0xcf2   : > { %6202 = vadd.xlane.f32.xlu1 %v6201_v4  ;;  %6492 = vmax.xlane.f32.xlu0 %v6491_v15  ;;  %v6557_v4 = vsel %vm5782_vm1, %v12602_v32, -inf  ;;  %v6572_v15 = vsel %vm5782_vm1, %v12658_v60, -inf }
 0xcf6   : > { %6250 = vadd.xlane.f32.xlu1 %v6249_v16  ;;  %6498 = vmax.xlane.f32.xlu0 %v6497_v36  ;;  %v6563_v16 = vsel %vm5782_vm1, %v12626_v20, -inf  ;;  %v6578_v36 = vsel %vm5782_vm1, %v12682_v30, -inf }
 0xcfa   : > { %6501 = vmax.xlane.f32.xlu1 %v6500_v21  ;;  %6205 = vadd.xlane.f32.xlu0 %v6204_v1  ;;  %v6569_v21 = vsel %vm5782_vm1, %v12642_v3, -inf  ;;  %v6575_v1 = vsel %vm5782_vm1, %v12678_v28, -inf }
 0xcfe   : > { %6208 = vadd.xlane.f32.xlu1 %v6207_v52  ;;  %6253 = vadd.xlane.f32.xlu0 %v6252_v54  ;;  %v6581_v52 = vsel %vm5782_vm1, %v12702_v40, -inf  ;;  %vm14318_vm1 = vcmask 1041409  }
 0xcff   : > { %vm14321_vm8 = vmmov %vm14318_vm1 }
 0xd02   : > { %6256 = vadd.xlane.f32.xlu1 %v6255_v10  ;;  %6504 = vmax.xlane.f32.xlu0 %v6503_v51 }
 0xd06   : > { %6507 = vmax.xlane.f32.xlu1 %v6506_v58  ;;  %6211 = vadd.xlane.f32.xlu0 %v6210_v18 }
 0xd0a   : > { %6513 = vmax.xlane.f32.xlu1 %v6512_v39  ;;  %6259 = vadd.xlane.f32.xlu0 %v6258_v22 }
 0xd0e   : > { %6519 = vmax.xlane.f32.xlu1 %v6518_v35  ;;  %6510 = vmax.xlane.f32.xlu0 %v6509_v19 }
 0xd12   : > { %6537 = vmax.xlane.f32.xlu1 %v6536_v53  ;;  %6516 = vmax.xlane.f32.xlu0 %v6515_v61 }
 0xd16   : > { %6543 = vmax.xlane.f32.xlu1 %v6542_v12  ;;  %6522 = vmax.xlane.f32.xlu0 %v6521_v27 }
 0xd1a   : > { %6525 = vmax.xlane.f32.xlu1 %v6524_v13  ;;  %6540 = vmax.xlane.f32.xlu0 %v6539_v34 }
 0xd1e   : > { %6549 = vmax.xlane.f32.xlu1 %v6548_v63  ;;  %6546 = vmax.xlane.f32.xlu0 %v6545_v38 }
 0xd22   : > { %6531 = vmax.xlane.f32.xlu1 %v6530_v25  ;;  %6528 = vmax.xlane.f32.xlu0 %v6527_v23 }
 0xd26   : > { %6555 = vmax.xlane.f32.xlu1 %v6554_v45  ;;  %6552 = vmax.xlane.f32.xlu0 %v6551_v62 }
 0xd2a   : > { %6561 = vmax.xlane.f32.xlu1 %v6560_v14  ;;  %6534 = vmax.xlane.f32.xlu0 %v6533_v6 }
 0xd2e   : > { %6567 = vmax.xlane.f32.xlu1 %v6566_v57  ;;  %6558 = vmax.xlane.f32.xlu0 %v6557_v4 }
 0xd32   : > { %6573 = vmax.xlane.f32.xlu1 %v6572_v15  ;;  %6564 = vmax.xlane.f32.xlu0 %v6563_v16 }
 0xd36   : > { %6579 = vmax.xlane.f32.xlu1 %v6578_v36  ;;  %6570 = vmax.xlane.f32.xlu0 %v6569_v21 }
 0xd3a   : > { %6576 = vmax.xlane.f32.xlu0 %v6575_v1 }
 0xd3e   : > { %6582 = vmax.xlane.f32.xlu0 %v6581_v52 }
 0xd47   : > { %v6170_v54 = vpop.xlane.xlu1 %6169  ;;  %v6167_v10 = vpop.xlane.xlu0 %6166 }
 0xd48   : > { %v6263_v1 = vmul.f32 0.0625, %v6170_v54  ;;  %v6262_v52 = vmul.f32 0.0625, %v6167_v10 }
 0xd4a   : > { %v6333_v3 = vrot.slane %v6263_v1, %v14313_v2  ;;  %v6329_v8 = vrot.slane %v6262_v52, %v14314_v9 }
 0xd4b   : > { %v6215_v51 = vpop.xlane.xlu1 %6214  ;;  %v6173_v58 = vpop.xlane.xlu0 %6172 }
 0xd4c   : > { %v6264_v46 = vmul.f32 0.0625, %v6173_v58  ;;  %v6278_v20 = vmul.f32 0.0625, %v6215_v51 }
 0xd4e   : > { %v6338_v54 = vrot.slane %v6264_v46, %v14314_v9 }
 0xd4f   : > { %v6221_v18 = vpop.xlane.xlu1 %6220  ;;  %v6176_v39 = vpop.xlane.xlu0 %6175 }
 0xd50   : > { %v6265_v21 = vmul.f32 0.0625, %v6176_v39  ;;  %v6280_v26 = vmul.f32 0.0625, %v6221_v18 }
 0xd52   : > { %v6342_v60 = vrot.slane %v6265_v21, %v14313_v2  ;;  %v6410_v58 = vrot.slane %v6280_v26, %v14314_v9 }
 0xd53   : > { %v6179_v22 = vpop.xlane.xlu1 %6178  ;;  %v6218_v35 = vpop.xlane.xlu0 %6217 }
 0xd54   : > { %v6279_v33 = vmul.f32 0.0625, %v6218_v35  ;;  %v6266_v49 = vmul.f32 0.0625, %v6179_v22  ;;  %v6334_v22 = vsel %vm14316_vm14, %v6333_v3, %v6329_v8  ;;  %vm14323_vm14 = vmmov %vm14319_vm2 }
 0xd56   : > { %v6405_v35 = vrot.slane %v6279_v33, %v14313_v2  ;;  %v6347_v51 = vrot.slane %v6266_v49, %v14314_v9 }
 0xd57   : > { %v6227_v19 = vpop.xlane.xlu1 %6226  ;;  %v6224_v53 = vpop.xlane.xlu0 %6223 }
 0xd58   : > { %v6281_v40 = vmul.f32 0.0625, %v6224_v53  ;;  %v6282_v21 = vmul.f32 0.0625, %v6227_v19 }
 0xd5a   : > { %v6414_v10 = vrot.slane %v6281_v40, %v14313_v2  ;;  %v6401_v40 = vrot.slane %v6278_v20, %v14314_v9  ;;  %v6419_v8 = vrot.slane %v6282_v21, %v14314_v9 }
 0xd5b   : > { %v6185_v61 = vpop.xlane.xlu1 %6184  ;;  %v6182_v12 = vpop.xlane.xlu0 %6181 }
 0xd5c   : > { %v6267_v30 = vmul.f32 0.0625, %v6182_v12  ;;  %v6343_v12 = vsel %vm14315_vm9, %v6342_v60, %v6338_v54  ;;  %v6415_v26 = vsel %vm14317_vm13, %v6414_v10, %v6410_v58  ;;  %v6268_v52 = vmul.f32 0.0625, %v6185_v61  ;;  %vm14324_vm13 = vmmov %vm14319_vm2 }
 0xd5d   : > { %v6470_v37 = vsel %vm14318_vm1, %v6343_v12, %v6334_v22  ;;  %vm14322_vm9 = vcmask 1042434   ;;  %vm14325_vm1 = vmmov %vm14319_vm2 }
 0xd5e   : > { %v6351_v18 = vrot.slane %v6267_v30, %v14313_v2  ;;  %v6356_v10 = vrot.slane %v6268_v52, %v14314_v9  ;;  %vm14337_vm11 = vmmov %vm14325_vm1 }
 0xd5f   : > { %v6233_v27 = vpop.xlane.xlu1 %6232  ;;  %v6230_v13 = vpop.xlane.xlu0 %6229 }
 0xd60   : > { %v6283_v46 = vmul.f32 0.0625, %v6230_v13  ;;  %v6352_v59 = vsel %vm14319_vm2, %v6351_v18, %v6347_v51  ;;  %v6284_v60 = vmul.f32 0.0625, %v6233_v27  ;;  %vm14326_vm2 = vcmask 1043459  }
 0xd61   : > { %v6471_v27 = vsel %vm14322_vm9, %v6352_v59, %v6470_v37  ;;  %vm14329_vm9 = vcmask 1044484  }
 0xd62   : > { %v6423_v61 = vrot.slane %v6283_v46, %v14313_v2  ;;  %v6428_v18 = vrot.slane %v6284_v60, %v14314_v9 }
 0xd63   : > { %v6191_v34 = vpop.xlane.xlu1 %6190  ;;  %v6188_v63 = vpop.xlane.xlu0 %6187 }
 0xd64   : > { %v6269_v1 = vmul.f32 0.0625, %v6188_v63  ;;  %v6270_v54 = vmul.f32 0.0625, %v6191_v34  ;;  %v6406_v63 = vsel %vm14320_vm10, %v6405_v35, %v6401_v40  ;;  %v6424_v37 = vsel %vm14324_vm13, %v6423_v61, %v6419_v8  ;;  %vm14327_vm10 = vmmov %vm14325_vm1 }
 0xd65   : > { %v6477_v20 = vsel %vm14321_vm8, %v6415_v26, %v6406_v63  ;;  %vm14328_vm8 = vmmov %vm14325_vm1  ;;  %vm14331_vm13 = vcmask 1042434  }
 0xd66   : > { %v6360_v49 = vrot.slane %v6269_v1, %v14313_v2  ;;  %v6365_v12 = vrot.slane %v6270_v54, %v14314_v9 }
 0xd67   : > { %v12756_v38 = vpop.xlane.xlu1 %6238  ;;  %v6236_v25 = vpop.xlane.xlu0 %6235 }
 0xd68   : > { %v6285_v13 = vmul.f32 0.0625, %v6236_v25  ;;  %v6361_v22 = vsel %vm14323_vm14, %v6360_v49, %v6356_v10  ;;  %v6286_v25 = vmul.f32 0.0625, %v12756_v38  ;;  %vm14330_vm14 = vmmov %vm14325_vm1 }
 0xd69   : > { %v6472_v52 = vsel %vm14326_vm2, %v6361_v22, %v6471_v27  ;;  %v6478_v27 = vsel %vm14331_vm13, %v6424_v37, %v6477_v20  ;;  %vm14332_vm2 = vcmask 1045509   ;;  %vm14338_vm13 = vcmask 1047559  }
 0xd6a   : > { %v6432_v59 = vrot.slane %v6285_v13, %v14313_v2 }
 0xd6b   : > { %v6197_v23 = vpop.xlane.xlu1 %6196  ;;  %v6194_v45 = vpop.xlane.xlu0 %6193 }
 0xd6c   : > { %v6271_v30 = vmul.f32 0.0625, %v6194_v45  ;;  %v6272_v34 = vmul.f32 0.0625, %v6197_v23 }
 0xd6e   : > { %v6369_v58 = vrot.slane %v6271_v30, %v14313_v2 }
 0xd6f   : > { %v12758_v62 = vpop.xlane.xlu1 %6244  ;;  %v6242_v14 = vpop.xlane.xlu0 %6241 }
 0xd70   : > { %v6287_v35 = vmul.f32 0.0625, %v6242_v14  ;;  %v6374_v14 = vrot.slane %v6272_v34, %v14314_v9  ;;  %v6288_v40 = vmul.f32 0.0625, %v12758_v62  ;;  %v6433_v62 = vsel %vm14328_vm8, %v6432_v59, %v6428_v18 }
 0xd71   : > { %vm14334_vm8 = vcmask 1046534  }
 0xd72   : > { %v6441_v38 = vrot.slane %v6287_v35, %v14313_v2 }
 0xd73   : > { %v12760_v6 = vpop.xlane.xlu1 %6489  ;;  %v6200_v57 = vpop.xlane.xlu0 %6199 }
 0xd74   : > { %v6273_v3 = vmul.f32 0.0625, %v6200_v57 }
 0xd77   : > { %v12762_v4 = vpop.xlane.xlu1 %6495  ;;  %v6248_v15 = vpop.xlane.xlu0 %6247 }
 0xd78   : > { %v6289_v51 = vmul.f32 0.0625, %v6248_v15 }
 0xd7a   : > { %v6450_v8 = vrot.slane %v6289_v51, %v14313_v2 }
 0xd7b   : > { %v6203_v16 = vpop.xlane.xlu1 %6202  ;;  %v12764_v36 = vpop.xlane.xlu0 %6492 }
 0xd7c   : > { %v6274_v21 = vmul.f32 0.0625, %v6203_v16  ;;  %v6370_v16 = vsel %vm14325_vm1, %v6369_v58, %v6365_v12 }
 0xd7e   : > { %v6383_v15 = vrot.slane %v6274_v21, %v14314_v9 }
 0xd7f   : > { %v12766_v31 = vpop.xlane.xlu1 %6250  ;;  %v12768_v28 = vpop.xlane.xlu0 %6498 }
 0xd80   : > { %v6290_v30 = vmul.f32 0.0625, %v12766_v31  ;;  %v6446_v31 = vrot.slane %v6288_v40, %v14314_v9 }
 0xd82   : > { %v6455_v18 = vrot.slane %v6290_v30, %v14314_v9 }
 0xd83   : > { %v12777_v39 = vpop.xlane.xlu1 %6501  ;;  %v6206_v53 = vpop.xlane.xlu0 %6205 }
 0xd84   : > { %v6275_v45 = vmul.f32 0.0625, %v6206_v53  ;;  %v6378_v53 = vrot.slane %v6273_v3, %v14313_v2 }
 0xd86   : > { %v6387_v23 = vrot.slane %v6275_v45, %v14313_v2  ;;  %v6379_v63 = vsel %vm14327_vm10, %v6378_v53, %v6374_v14  ;;  %vm14333_vm10 = vmmov %vm14325_vm1 }
 0xd87   : > { %v6209_v33 = vpop.xlane.xlu1 %6208  ;;  %v6254_v19 = vpop.xlane.xlu0 %6253  ;;  %v6451_v21 = vsel %vm14333_vm10, %v6450_v8, %v6446_v31  ;;  %vm14341_vm10 = vcmask 1045509  }
 0xd88   : > { %v6291_v46 = vmul.f32 0.0625, %v6254_v19  ;;  %v6276_v26 = vmul.f32 0.0625, %v6209_v33  ;;  %v6437_v19 = vrot.slane %v6286_v25, %v14314_v9  ;;  %v6473_v33 = vsel %vm14329_vm9, %v6370_v16, %v6472_v52  ;;  %vm14335_vm9 = vmmov %vm14325_vm1 }
 0xd89   : > { %v6388_v3 = vsel %vm14330_vm14, %v6387_v23, %v6383_v15  ;;  %v6474_v58 = vsel %vm14332_vm2, %v6379_v63, %v6473_v33  ;;  %vm14336_vm14 = vcmask 1043459   ;;  %vm14340_vm2 = vcmask 154648  }
 0xd8a   : > { %v6459_v61 = vrot.slane %v6291_v46, %v14313_v2  ;;  %v6392_v13 = vrot.slane %v6276_v26, %v14314_v9  ;;  %v6442_v34 = vsel %vm14325_vm1, %v6441_v38, %v6437_v19  ;;  %v6475_v22 = vsel %vm14334_vm8, %v6388_v3, %v6474_v58 }
 0xd8b   : > { %v6257_v57 = vpop.xlane.xlu1 %6256  ;;  %v12797_v1 = vpop.xlane.xlu0 %6504  ;;  %vm14339_vm1 = vcmask 1044484   ;;  %v6632_v3 = vrot.slane %v12768_v28, %v14313_v2  ;;  %v6619_v28 = vrot.slane %v12760_v6, %v14314_v9 }
 0xd8c   : > { %v6292_v45 = vmul.f32 0.0625, %v6257_v57  ;;  %v6479_v57 = vsel %vm14336_vm14, %v6433_v62, %v6478_v27  ;;  %v6460_v51 = vsel %vm14337_vm11, %v6459_v61, %v6455_v18  ;;  %vm14342_vm14 = vmmov %vm14338_vm13  ;;  %v6641_v61 = vrot.slane %v12797_v1, %v14313_v2 }
 0xd8d   : > { %v6480_v37 = vsel %vm14339_vm1, %v6442_v34, %v6479_v57  ;;  %vm14343_vm11 = vmmov %vm14340_vm2  ;;  %v6637_v34 = vrot.slane %v12777_v39, %v14314_v9 }
 0xd8e   : > { %v6464_v59 = vrot.slane %v6292_v45, %v14314_v9  ;;  %v6481_v46 = vsel %vm14341_vm10, %v6451_v21, %v6480_v37  ;;  %v6628_v45 = vrot.slane %v12762_v4, %v14314_v9 }
 0xd8f   : > { %v12812_v60 = vpop.xlane.xlu1 %6507  ;;  %v6212_v54 = vpop.xlane.xlu0 %6211  ;;  %v6482_v40 = vsel %vm14334_vm8, %v6460_v51, %v6481_v46 }
 0xd90   : > { %v6277_v49 = vmul.f32 0.0625, %v6212_v54  ;;  %v6646_v18 = vrot.slane %v12812_v60, %v14314_v9 }
 0xd92   : > { %v6396_v10 = vrot.slane %v6277_v49, %v14313_v2 }
 0xd93   : > { %v6514_v12 = vpop.xlane.xlu1 %6513  ;;  %v6260_v35 = vpop.xlane.xlu0 %6259 }
 0xd94   : > { %v6397_v25 = vsel %vm14335_vm9, %v6396_v10, %v6392_v13  ;;  %v6293_v53 = vmul.f32 0.0625, %v6260_v35  ;;  %v6623_v10 = vrot.slane %v12764_v36, %v14313_v2  ;;  %v6655_v36 = vrot.slane %v6514_v12, %v14314_v9 }
 0xd95   : > { %v6476_v20 = vsel %vm14338_vm13, %v6397_v25, %v6475_v22  ;;  %vm14344_vm13 = vcmask 179200  }
 0xd96   : > { %6486 = vst.msk [vmem:[#allocation5 + $0x3] sm:$0xff] %vm14340_vm2, %v6476_v20  ;;  %v6468_v23 = vrot.slane %v6293_v53, %v14313_v2  ;;  %vm14345_vm1 = vmmov %vm14344_vm13 }
 0xd97   : > { %v6520_v14 = vpop.xlane.xlu1 %6519  ;;  %v6511_v16 = vpop.xlane.xlu0 %6510  ;;  %vm14346_vm2 = vmmov %vm14335_vm9 }
 0xd98   : > { %v6469_v26 = vsel %vm14335_vm9, %v6468_v23, %v6464_v59  ;;  %v6650_v27 = vrot.slane %v6511_v16, %v14313_v2  ;;  %v6633_v1 = vsel %vm14346_vm2, %v6632_v3, %v6628_v45  ;;  %vm14347_vm10 = vmmov %vm14346_vm2  ;;  %v6664_v53 = vrot.slane %v6520_v14, %v14314_v9 }
 0xd99   : > { %v6483_v52 = vsel %vm14342_vm14, %v6469_v26, %v6482_v40  ;;  %v6642_v35 = vsel %vm14347_vm10, %v6641_v61, %v6637_v34  ;;  %vm14348_vm8 = vmmov %vm14346_vm2  ;;  %vm14350_vm14 = vcmask 1041409  }
 0xd9a   : > { %6487 = vst.msk [vmem:[#allocation5 + $0xb] sm:$0xff] %vm14343_vm11, %v6483_v52  ;;  %v6624_v25 = vsel %vm14348_vm8, %v6623_v10, %v6619_v28  ;;  %vm14349_vm9 = vmmov %vm14346_vm2  ;;  %vm14356_vm8 = vcmask 1044484  }
 0xd9b   : > { %v12843_v38 = vpop.xlane.xlu1 %6537  ;;  %v6517_v15 = vpop.xlane.xlu0 %6516  ;;  %v6651_v6 = vsel %vm14349_vm9, %v6650_v27, %v6646_v18  ;;  %v6760_v57 = vsel %vm14350_vm14, %v6633_v1, %v6624_v25  ;;  %vm14351_vm11 = vmmov %vm14346_vm2  ;;  %vm14357_vm9 = vcmask 1045509   ;;  %vm14358_vm14 = vcmask 1046534  }
 0xd9c   : > { %v6659_v58 = vrot.slane %v6517_v15, %v14313_v2  ;;  %v6691_v1 = vrot.slane %v12843_v38, %v14314_v9 }
 0xd9d   : > { %v6778_v30 = vld [vmem:[#allocation5] sm:$0xff] }
 0xd9e   : > { %6780 = vst.msk [vmem:[#allocation6] sm:$0xff] %vm14344_vm13, %v6778_v30  ;;  %v6660_v60 = vsel %vm14351_vm11, %v6659_v58, %v6655_v36  ;;  %vm14352_vm13 = vcmask 1042434  }
 0xd9f   : > { %v12845_v54 = vpop.xlane.xlu1 %6543  ;;  %v6523_v19 = vpop.xlane.xlu0 %6522  ;;  %v6761_v20 = vsel %vm14352_vm13, %v6642_v35, %v6760_v57  ;;  %vm14360_vm13 = vcmask 1047559  }
 0xda0   : > { %v6668_v4 = vrot.slane %v6523_v19, %v14313_v2  ;;  %v6700_v27 = vrot.slane %v12845_v54, %v14314_v9 }
 0xda1   : > { %v6779_v49 = vld [vmem:[#allocation5 + $0x8] sm:$0xff] }
 0xda2   : > { %6781 = vst.msk [vmem:[#allocation6 + $0x18] sm:$0xff] %vm14345_vm1, %v6779_v49  ;;  %vm14353_vm1 = vmmov %vm14346_vm2  ;;  %vm14354_vm2 = vcmask 1043459  }
 0xda3   : > { %v6526_v63 = vpop.xlane.xlu1 %6525  ;;  %v12848_v8 = vpop.xlane.xlu0 %6540  ;;  %v6669_v12 = vsel %vm14353_vm1, %v6668_v4, %v6664_v53  ;;  %v6762_v37 = vsel %vm14354_vm2, %v6651_v6, %v6761_v20  ;;  %vm14355_vm10 = vmmov %vm14353_vm1 }
 0xda4   : > { %v6673_v51 = vrot.slane %v6526_v63, %v14314_v9  ;;  %v6763_v14 = vsel %vm14356_vm8, %v6660_v60, %v6762_v37  ;;  %vm14359_vm11 = vmmov %vm14353_vm1  ;;  %vm14361_vm1 = vcmask 154648   ;;  %v6695_v34 = vrot.slane %v12848_v8, %v14313_v2 }
 0xda5   : > { %v6764_v26 = vsel %vm14357_vm9, %v6669_v12, %v6763_v14  ;;  %vm14362_vm2 = vmmov %vm14355_vm10 }
 0xda6   : > { %vm14364_vm8 = vmmov %vm14362_vm2 }
 0xda7   : > { %v6550_v62 = vpop.xlane.xlu1 %6549  ;;  %v6547_v33 = vpop.xlane.xlu0 %6546  ;;  %vm14365_vm9 = vmmov %vm14362_vm2 }
 0xda8   : > { %v6704_v3 = vrot.slane %v6547_v33, %v14313_v2  ;;  %v6709_v33 = vrot.slane %v6550_v62, %v14314_v9 }
 0xdaa   : > { %v6705_v18 = vsel %vm14362_vm2, %v6704_v3, %v6700_v27  ;;  %v6133_v3 = vld [vmem:[%s13995_s10 + $0x68] sm:$0xff]  ;;  %v6132_v27 = vld [vmem:[%s13995_s10 + $0x60] sm:$0xff] }
 0xdab   : > { %v6532_v31 = vpop.xlane.xlu1 %6531  ;;  %v6529_v13 = vpop.xlane.xlu0 %6528 }
 0xdac   : > { %v6677_v21 = vrot.slane %v6529_v13, %v14313_v2  ;;  %v6682_v16 = vrot.slane %v6532_v31, %v14314_v9 }
 0xdae   : > { %v6678_v59 = vsel %vm14355_vm10, %v6677_v21, %v6673_v51  ;;  %vm14363_vm10 = vmmov %vm14362_vm2 }
 0xdaf   : > { %v6556_v22 = vpop.xlane.xlu1 %6555  ;;  %v6553_v39 = vpop.xlane.xlu0 %6552  ;;  %v6765_v52 = vsel %vm14358_vm14, %v6678_v59, %v6764_v26  ;;  %vm14366_vm14 = vcmask 1041409  }
 0xdb0   : > { %v6713_v61 = vrot.slane %v6553_v39, %v14313_v2  ;;  %v6718_v54 = vrot.slane %v6556_v22, %v14314_v9  ;;  %v6696_v39 = vsel %vm14364_vm8, %v6695_v34, %v6691_v1  ;;  %vm14372_vm8 = vcmask 1044484   ;;  %v6147_v34 = vld [vmem:[%s13995_s10 + $0xd8] sm:$0xff]  ;;  %v6146_v1 = vld [vmem:[%s13995_s10 + $0xd0] sm:$0xff] }
 0xdb1   : > { %v6767_v22 = vsel %vm14366_vm14, %v6705_v18, %v6696_v39  ;;  %vm14375_vm14 = vcmask 1046534   ;;  %v6130_v18 = vld [vmem:[%s13995_s10 + $0x50] sm:$0xff]  ;;  %v6795_v39 = vld [vmem:[#allocation5 + $0xa] sm:$0xff] }
 0xdb2   : > { %v6714_v8 = vsel %vm14363_vm10, %v6713_v61, %v6709_v33  ;;  %v6148_v61 = vld [vmem:[%s13995_s10 + $0xe0] sm:$0xff] }
 0xdb3   : > { %v6562_v23 = vpop.xlane.xlu1 %6561  ;;  %v6535_v46 = vpop.xlane.xlu0 %6534  ;;  %v6845_v33 = vld [vmem:[#allocation5 + $0xe] sm:$0xff] }
 0xdb4   : > { %v6686_v40 = vrot.slane %v6535_v46, %v14313_v2  ;;  %v6727_v35 = vrot.slane %v6562_v23, %v14314_v9 }
 0xdb6   : > { %v6687_v15 = vsel %vm14359_vm11, %v6686_v40, %v6682_v16  ;;  %vm14367_vm11 = vmmov %vm14362_vm2 }
 0xdb7   : > { %v6766_v30 = vsel %vm14360_vm13, %v6687_v15, %v6765_v52  ;;  %v6559_v19 = vpop.xlane.xlu0 %6558  ;;  %v6568_v63 = vpop.xlane.xlu1 %6567  ;;  %vm14368_vm13 = vcmask 1042434   ;;  %v6151_v15 = vld [vmem:[%s13995_s10 + $0xf8] sm:$0xff] }
 0xdb8   : > { %6776 = vst.msk [vmem:[#allocation5 + $0x1b] sm:$0xff] %vm14361_vm1, %v6766_v30  ;;  %v6722_v58 = vrot.slane %v6559_v19, %v14313_v2  ;;  %v6736_v62 = vrot.slane %v6568_v63, %v14314_v9  ;;  %v6768_v60 = vsel %vm14368_vm13, %v6714_v8, %v6767_v22  ;;  %vm14369_vm1 = vmmov %vm14362_vm2  ;;  %vm14370_vm2 = vcmask 1043459   ;;  %8248 = vmatprep.subr.mxu1 %v6151_v15  ;;  %v6134_v30 = vld [vmem:[%s13995_s10 + $0x70] sm:$0xff]  ;;  %v6149_v19 = vld [vmem:[%s13995_s10 + $0xe8] sm:$0xff] }
 0xdb9   : > { %vm14371_vm10 = vmmov %vm14369_vm1  ;;  %vm14377_vm13 = vcmask 1047559   ;;  %v6830_v8 = vld [vmem:[#allocation5 + $0x5] sm:$0xff]  ;;  %v6831_v15 = vld [vmem:[#allocation5 + $0xd] sm:$0xff] }
 0xdba   : > { %v6723_v25 = vsel %vm14365_vm9, %v6722_v58, %v6718_v54  ;;  %vm14374_vm9 = vcmask 1045509   ;;  %v6131_v58 = vld [vmem:[%s13995_s10 + $0x58] sm:$0xff]  ;;  %v6145_v54 = vld [vmem:[%s13995_s10 + $0xc8] sm:$0xff]  ;;  %v6142_v22 = vld [vmem:[%s13995_s10 + $0xb0] sm:$0xff] }
 0xdbb   : > { %v6565_v49 = vpop.xlane.xlu0 %6564  ;;  %v6574_v31 = vpop.xlane.xlu1 %6573  ;;  %v6769_v20 = vsel %vm14370_vm2, %v6723_v25, %v6768_v60  ;;  %v6143_v25 = vld [vmem:[%s13995_s10 + $0xb8] sm:$0xff]  ;;  %v6141_v60 = vld [vmem:[%s13995_s10 + $0xa8] sm:$0xff]  ;;  %vm14386_vm2 = vcmask 359600  }
 0xdbc   : > { %v6731_v28 = vrot.slane %v6565_v49, %v14313_v2  ;;  %v6745_v53 = vrot.slane %v6574_v31, %v14314_v9  ;;  %v6844_v31 = vld [vmem:[#allocation5 + $0x6] sm:$0xff] }
 0xdbe   : > { %v6732_v6 = vsel %vm14367_vm11, %v6731_v28, %v6727_v35  ;;  %vm14376_vm11 = vmmov %vm14369_vm1  ;;  %v6129_v35 = vld [vmem:[%s13995_s10 + $0x48] sm:$0xff] }
 0xdbf   : > { %v6571_v13 = vpop.xlane.xlu0 %6570  ;;  %v6868_v45 = vld [vmem:[#allocation5 + $0x19] sm:$0xff]  ;;  %v6580_v57 = vpop.xlane.xlu1 %6579  ;;  %v6770_v23 = vsel %vm14372_vm8, %v6732_v6, %v6769_v20  ;;  %v6794_v6 = vld [vmem:[#allocation5 + $0x2] sm:$0xff]  ;;  %v6819_v20 = vld [vmem:[#allocation5 + $0xc] sm:$0xff]  ;;  %vm14388_vm8 = vcmask 540000  }
 0xdc0   : > { %v6856_v10 = vld [vmem:[#allocation5 + $0x18] sm:$0xff]  ;;  %6872 = vrot.lane.b32.xlu0 %v6868_v45, %s8589_s18  ;;  %v6740_v4 = vrot.slane %v6571_v13, %v14313_v2  ;;  %v6754_v46 = vrot.slane %v6580_v57, %v14314_v9  ;;  %v6135_v9 = vld [vmem:[%s13995_s10 + $0x78] sm:$0xff]  ;;  %v6126_v57 = vld [vmem:[%s13995_s10 + $0x30] sm:$0xff] }
 0xdc1   : > { %6860 = vrot.lane.b32.xlu1 %v6856_v10, %s8590_s26  ;;  %v6880_v21 = vld [vmem:[#allocation5 + $0x1a] sm:$0xff]  ;;  %8249 = vmatpush3.msra.mxu1 %v6135_v9 }
 0xdc2   : > { %v6741_v51 = vsel %vm14369_vm1, %v6740_v4, %v6736_v62  ;;  %v6892_v59 = vld [vmem:[#allocation5 + $0x1b] sm:$0xff]  ;;  %vm14378_vm1 = vcmask 154648   ;;  %v6783_v4 = vld [vmem:[#allocation5 + $0x9] sm:$0xff] }
 0xdc3   : > { %v6577_v36 = vpop.xlane.xlu0 %6576  ;;  %v6771_v16 = vsel %vm14374_vm9, %v6741_v51, %v6770_v23  ;;  %v6782_v62 = vld [vmem:[#allocation5 + $0x1] sm:$0xff]  ;;  %v6125_v51 = vld [vmem:[%s13995_s10 + $0x28] sm:$0xff]  ;;  %vm14389_vm9 = vcmask 933600  }
 0xdc4   : > { %v6749_v38 = vrot.slane %v6577_v36, %v14313_v2  ;;  %6884 = vrot.lane.b32.xlu0 %v6880_v21, %s8591_s27  ;;  %v6144_v36 = vld [vmem:[%s13995_s10 + $0xc0] sm:$0xff]  ;;  %v6139_v23 = vld [vmem:[%s13995_s10 + $0x98] sm:$0xff]  ;;  %v6121_v9 = vld [vmem:[%s13995_s10 + $0x8] sm:$0xff] }
 0xdc5   : > { %v6128_v21 = vld [vmem:[%s13995_s10 + $0x40] sm:$0xff] }
 0xdc6   : > { %v6750_v12 = vsel %vm14371_vm10, %v6749_v38, %v6745_v53  ;;  %v6127_v38 = vld [vmem:[%s13995_s10 + $0x38] sm:$0xff]  ;;  %vm14387_vm10 = vmmov %vm14386_vm2 }
 0xdc7   : > { %v6583_v37 = vpop.xlane.xlu0 %6582  ;;  %v6772_v40 = vsel %vm14375_vm14, %v6750_v12, %v6771_v16  ;;  %v6807_v53 = vld [vmem:[#allocation5 + $0xb] sm:$0xff]  ;;  %v6806_v12 = vld [vmem:[#allocation5 + $0x3] sm:$0xff]  ;;  %vm14390_vm14 = vcmask 1048464  }
 0xdc8   : > { %v6758_v14 = vrot.slane %v6583_v37, %v14313_v2  ;;  %6896 = vrot.lane.b32.xlu0 %v6892_v59, %s14373_s29  ;;  %v6150_v2 = vld [vmem:[%s13995_s10 + $0xf0] sm:$0xff]  ;;  %v6140_v37 = vld [vmem:[%s13995_s10 + $0xa0] sm:$0xff]  ;;  %v6123_v16 = vld [vmem:[%s13995_s10 + $0x18] sm:$0xff] }
 0xdc9   : > { %8250 = vmatprep.subr.mxu1 %v6150_v2  ;;  %v6124_v59 = vld [vmem:[%s13995_s10 + $0x20] sm:$0xff] }
 0xdca   : > { %v6759_v26 = vsel %vm14376_vm11, %v6758_v14, %v6754_v46  ;;  %8251 = vmatpush3.msra.mxu1 %v6134_v30  ;;  %v6818_v14 = vld [vmem:[#allocation5 + $0x4] sm:$0xff]  ;;  %v6136_v2 = vld [vmem:[%s13995_s10 + $0x80] sm:$0xff]  ;;  %vm14391_vm11 = vmmov %vm14388_vm8 }
 0xdcb   : > { %v6773_v52 = vsel %vm14377_vm13, %v6759_v26, %v6772_v40  ;;  %8252 = vmatprep.subr.mxu1 %v6149_v19  ;;  %v6138_v40 = vld [vmem:[%s13995_s10 + $0x90] sm:$0xff]  ;;  %v6120_v30 = vld [vmem:[%s13995_s10] sm:$0xff]  ;;  %vm14392_vm13 = vcmask 720400  }
 0xdcc   : > { %6777 = vst.msk [vmem:[#allocation5 + $0x23] sm:$0xff] %vm14378_vm1, %v6773_v52  ;;  %8253 = vmatpush3.msra.mxu1 %v6133_v3  ;;  %v6122_v26 = vld [vmem:[%s13995_s10 + $0x10] sm:$0xff]  ;;  %v6137_v52 = vld [vmem:[%s13995_s10 + $0x88] sm:$0xff]  ;;  %vm14393_vm1 = vmmov %vm14392_vm13 }
 0xdcd   : > { %8254 = vmatprep.subr.mxu1 %v6148_v61  ;;  %v13047_v19 = vld [vmem:[%s13995_s10 + $0x130] sm:$0xf] }
 0xdce   : > { %8255 = vmatpush3.msra.mxu1 %v6132_v27 }
 0xdcf   : > { %8256 = vmatprep.subr.mxu1 %v6147_v34 }
 0xdd0   : > { %8257 = vmatpush3.msra.mxu1 %v6131_v58 }
 0xdd1   : > { %8258 = vmatprep.subr.mxu1 %v6146_v1 }
 0xdd2   : > { %8259 = vmatpush3.msra.mxu1 %v6130_v18 }
 0xdd3   : > { %v6904_v63 = vld [vmem:[#allocation5 + $0x1c] sm:$0xff]  ;;  %8260 = vmatprep.subr.mxu1 %v6145_v54  ;;  %v6931_v3 = vld [vmem:[#allocation5 + $0x26] sm:$0xff] }
 0xdd4   : > { %v6857_v49 = vld [vmem:[#allocation5 + $0x20] sm:$0xff]  ;;  %6908 = vrot.lane.b32.xlu0 %v6904_v63, %s8593_s15  ;;  %8261 = vmatpush3.msra.mxu1 %v6129_v35 }
 0xdd5   : > { %6862 = vrot.lane.b32.xlu1 %v6857_v49, %s8590_s26  ;;  %v6869_v13 = vld [vmem:[#allocation5 + $0x21] sm:$0xff]  ;;  %8262 = vmatprep.subr.mxu1 %v6144_v36 }
 0xdd6   : > { %v6918_v45 = vld [vmem:[#allocation5 + $0x1d] sm:$0xff]  ;;  %8263 = vmatpush3.msra.mxu1 %v6128_v21  ;;  %v6919_v49 = vld [vmem:[#allocation5 + $0x25] sm:$0xff] }
 0xdd7   : > { %v6881_v10 = vld [vmem:[#allocation5 + $0x22] sm:$0xff]  ;;  %8264 = vmatprep.subr.mxu1 %v6143_v25 }
 0xdd8   : > { %6848 = vrot.lane.b32.xlu0 %v6844_v31, %s14379_s13  ;;  %v6893_v28 = vld [vmem:[#allocation5 + $0x23] sm:$0xff]  ;;  %8265 = vmatpush3.msra.mxu1 %v6127_v38 }
 0xdd9   : > { %6874 = vrot.lane.b32.xlu1 %v6869_v13, %s8589_s18  ;;  %8266 = vmatprep.subr.mxu1 %v6142_v22  ;;  %v6930_v46 = vld [vmem:[#allocation5 + $0x1e] sm:$0xff] }
 0xdda   : > { %8267 = vmatpush3.msra.mxu1 %v6126_v57  ;;  %v6905_v63 = vld [vmem:[#allocation5 + $0x24] sm:$0xff] }
 0xddb   : > { %8268 = vmatprep.subr.mxu1 %v6141_v60  ;;  %v6157_v60 = vld [vmem:[%s13995_s10 + $0x128] sm:$0xff] }
 0xddc   : > { %6922 = vrot.lane.b32.xlu0 %v6918_v45, %s8580_s28  ;;  %8269 = vmatpush3.msra.mxu1 %v6125_v51  ;;  %v6156_v51 = vld [vmem:[%s13995_s10 + $0x120] sm:$0xff] }
 0xddd   : > { %6886 = vrot.lane.b32.xlu1 %v6881_v10, %s8591_s27  ;;  %s14382_s27 = smov 44   ;;  %8270 = vmatprep.subr.mxu1 %v6140_v37  ;;  %v6154_v37 = vld [vmem:[%s13995_s10 + $0x110] sm:$0xff] }
 0xdde   : > { %8271 = vmatpush3.msra.mxu1 %v6124_v59 }
 0xddf   : > { %8272 = vmatprep.subr.mxu1 %v6139_v23  ;;  %v6153_v23 = vld [vmem:[%s13995_s10 + $0x108] sm:$0xff] }
 0xde0   : > { %6850 = vrot.lane.b32.xlu0 %v6845_v33, %s14379_s13  ;;  %s14380_s13 = smov 22   ;;  %8273 = vmatpush3.msra.mxu1 %v6123_v16  ;;  %v6152_v16 = vld [vmem:[%s13995_s10 + $0x100] sm:$0xff] }
 0xde1   : > { %6898 = vrot.lane.b32.xlu1 %v6893_v28, %s14373_s29  ;;  %s14381_s29 = smov 110   ;;  %8274 = vmatprep.subr.mxu1 %v6138_v40 }
 0xde2   : > { %8275 = vmatpush3.msra.mxu1 %v6122_v26 }
 0xde3   : > { %8276 = vmatprep.subr.mxu1 %v6137_v52 }
 0xde4   : > { %6788 = vrot.lane.b32.xlu0 %v6783_v4, %s14380_s13  ;;  %8277 = vmatpush3.msra.mxu1 %v6121_v9 }
 0xde5   : > { %6834 = vrot.lane.b32.xlu1 %v6830_v8, %s14381_s29  ;;  %8278 = vmatprep.subr.mxu1 %v6136_v2 }
 0xde6   : > { %8279 = vmatpush3.msra.mxu1 %v6120_v30 }
 0xde7   : > { %8454 = vmatprep.subr.msk.mxu1 %vm1910_vm3, %v13047_v19 }
 0xde8   : > { %6800 = vrot.lane.b32.xlu0 %v6795_v39, %s14382_s27 }
 0xde9   : > { %6786 = vrot.lane.b32.xlu1 %v6782_v62, %s14380_s13 }
 0xdec   : > { %6812 = vrot.lane.b32.xlu0 %v6807_v53, %s14383_s16 }
 0xded   : > { %6798 = vrot.lane.b32.xlu1 %v6794_v6, %s14382_s27 }
 0xdf0   : > { %6824 = vrot.lane.b32.xlu0 %v6819_v20, %s14384_s24 }
 0xdf1   : > { %6810 = vrot.lane.b32.xlu1 %v6806_v12, %s14383_s16  ;;  %v6155_v12 = vld [vmem:[%s13995_s10 + $0x118] sm:$0xff] }
 0xdf4   : > { %6934 = vrot.lane.b32.xlu0 %v6930_v46, %s14385_s19 }
 0xdf5   : > { %6822 = vrot.lane.b32.xlu1 %v6818_v14, %s14384_s24 }
 0xdf9   : > { %6836 = vrot.lane.b32.xlu1 %v6831_v15, %s14381_s29 }
 0xdfd   : > { %6910 = vrot.lane.b32.xlu1 %v6905_v63, %s8593_s15 }
 0xe01   : > { %6924 = vrot.lane.b32.xlu1 %v6919_v49, %s8580_s28 }
 0xe05   : > { %6936 = vrot.lane.b32.xlu1 %v6931_v3, %s14385_s19 }
 0xe32   : > { %v6873_v61 = vpop.permute.xlu0 %6872 }
 0xe33   : > { %v6861_v13 = vpop.permute.xlu1 %6860 }
 0xe36   : > { %v6885_v31 = vpop.permute.xlu0 %6884 }
 0xe3a   : > { %v6897_v45 = vpop.permute.xlu0 %6896 }
 0xe46   : > { %v6909_v27 = vpop.permute.xlu0 %6908 }
 0xe47   : > { %v6863_v10 = vpop.permute.xlu1 %6862  ;;  %6915 = vst.msk [vmem:[#allocation6 + $0x10] sm:$0xff] %vm3339_vm7, %v6909_v27 }
 0xe4a   : > { %v6849_v58 = vpop.permute.xlu0 %6848 }
 0xe4b   : > { %v6875_v34 = vpop.permute.xlu1 %6874 }
 0xe4e   : > { %v6923_v28 = vpop.permute.xlu0 %6922 }
 0xe4f   : > { %v6887_v33 = vpop.permute.xlu1 %6886  ;;  %6928 = vst.msk [vmem:[#allocation6 + $0x10] sm:$0xff] %vm3353_vm6, %v6923_v28  ;;  %v7512_v28 = vld [vmem:[%s13996_s11 + $0x3c8] sm:$0xff] }
 0xe50   : > { %7647 = vmatprep.subr.mxu0 %v7512_v28  ;;  %v7407_v28 = vld [vmem:[%s13996_s11 + $0x80] sm:$0xff] }
 0xe52   : > { %v6851_v18 = vpop.permute.xlu0 %6850 }
 0xe53   : > { %v6899_v1 = vpop.permute.xlu1 %6898 }
 0xe56   : > { %v6789_v4 = vpop.permute.xlu0 %6788 }
 0xe57   : > { %v6835_v54 = vpop.permute.xlu1 %6834  ;;  %6793 = vst.msk [vmem:[#allocation6 + $0x18] sm:$0xff] %vm14386_vm2, %v6789_v4  ;;  %vm14394_vm2 = vcmask 900800  }
 0xe58   : > { %6841 = vst.msk [vmem:[#allocation6 + $0x8] sm:$0xff] %vm474_vm0, %v6835_v54 }
 0xe59   : > { %6854 = vst.msk [vmem:[#allocation6 + $0x8] sm:$0xff] %vm3272_vm15, %v6849_v58 }
 0xe5a   : > { %6866 = vst.msk [vmem:[#allocation6 + $0x8] sm:$0xff] %vm3285_vm5, %v6861_v13  ;;  %v6801_v35 = vpop.permute.xlu0 %6800 }
 0xe5b   : > { %6878 = vst.msk [vmem:[#allocation6 + $0x8] sm:$0xff] %vm3298_vm4, %v6873_v61  ;;  %v6787_v8 = vpop.permute.xlu1 %6786 }
 0xe5c   : > { %6890 = vst.msk [vmem:[#allocation6 + $0x8] sm:$0xff] %vm3311_vm12, %v6885_v31 }
 0xe5d   : > { %6792 = vst.msk [vmem:[#allocation6] sm:$0xff] %vm14387_vm10, %v6787_v8  ;;  %vm14395_vm10 = vmmov %vm14394_vm2 }
 0xe5e   : > { %6805 = vst.msk [vmem:[#allocation6 + $0x18] sm:$0xff] %vm14388_vm8, %v6801_v35  ;;  %v6813_v21 = vpop.permute.xlu0 %6812  ;;  %vm14396_vm8 = vcmask 425200   ;;  %v7503_v35 = vld [vmem:[%s13996_s11 + $0x380] sm:$0xff] }
 0xe5f   : > { %6902 = vst.msk [vmem:[#allocation6 + $0x8] sm:$0xff] %vm14389_vm9, %v6897_v45  ;;  %v6799_v36 = vpop.permute.xlu1 %6798  ;;  %vm14397_vm9 = vcmask 1048432  }
 0xe60   : > { %6914 = vst.msk [vmem:[#allocation6 + $0x8] sm:$0xff] %vm14390_vm14, %v6909_v27  ;;  %vm14398_vm14 = vmmov %vm14397_vm9 }
 0xe61   : > { %6804 = vst.msk [vmem:[#allocation6] sm:$0xff] %vm14391_vm11, %v6799_v36  ;;  %vm14399_vm11 = vcmask 933600   ;;  %v7496_v36 = vld [vmem:[%s13996_s11 + $0x348] sm:$0xff] }
 0xe62   : > { %6817 = vst.msk [vmem:[#allocation6 + $0x18] sm:$0xff] %vm14392_vm13, %v6813_v21  ;;  %v6825_v62 = vpop.permute.xlu0 %6824 }
 0xe63   : > { %v6811_v39 = vpop.permute.xlu1 %6810  ;;  %6829 = vst.msk [vmem:[#allocation6 + $0x18] sm:$0xff] %vm14394_vm2, %v6825_v62  ;;  %v7488_v62 = vld [vmem:[%s13996_s11 + $0x308] sm:$0xff] }
 0xe64   : > { %6816 = vst.msk [vmem:[#allocation6] sm:$0xff] %vm14393_vm1, %v6811_v39  ;;  %v7495_v39 = vld [vmem:[%s13996_s11 + $0x340] sm:$0xff] }
 0xe66   : > { %v6935_v22 = vpop.permute.xlu0 %6934 }
 0xe67   : > { %v6943_v25 = vld [vmem:[#allocation6 + $0x8] sm:$0xff]  ;;  %v6823_v38 = vpop.permute.xlu1 %6822  ;;  %6940 = vst.msk [vmem:[#allocation6 + $0x10] sm:$0xff] %vm14396_vm8, %v6935_v22 }
 0xe68   : > { %7021 = vmatprep.mubr.f32.mxu1 %v6943_v25  ;;  %6828 = vst.msk [vmem:[#allocation6] sm:$0xff] %vm14395_vm10, %v6823_v38  ;;  %v14404_v25 = vld [vmem:[#allocation26_spill] sm:$0xff] }
 0xe69   : > { %6840 = vst.msk [vmem:[#allocation6] sm:$0xff] %vm14397_vm9, %v6835_v54  ;;  %v7480_v22 = vld [vmem:[%s13996_s11 + $0x2c8] sm:$0xff] }
 0xe6b   : > { %v6837_v53 = vpop.permute.xlu1 %6836 }
 0xe6c   : > { %6842 = vst.msk [vmem:[#allocation6 + $0x18] sm:$0xff] %vm14398_vm14, %v6837_v53 }
 0xe6d   : > { %6843 = vst.msk [vmem:[#allocation6 + $0x20] sm:$0xff] %vm474_vm0, %v6837_v53  ;;  %vm14400_vm0 = vcmask 1048464  }
 0xe6e   : > { %6855 = vst.msk [vmem:[#allocation6 + $0x20] sm:$0xff] %vm3272_vm15, %v6851_v18  ;;  %v6944_v40 = vld [vmem:[#allocation6 + $0x10] sm:$0xff]  ;;  %vm14402_vm15 = vcmask 424960   ;;  %v7504_v18 = vld [vmem:[%s13996_s11 + $0x388] sm:$0xff] }
 0xe6f   : > { %6867 = vst.msk [vmem:[#allocation6 + $0x20] sm:$0xff] %vm3285_vm5, %v6863_v10  ;;  %v6911_v6 = vpop.permute.xlu1 %6910 }
 0xe70   : > { %6879 = vst.msk [vmem:[#allocation6 + $0x20] sm:$0xff] %vm3298_vm4, %v6875_v34  ;;  %v6942_v57 = vld [vmem:[#allocation6] sm:$0xff] }
 0xe71   : > { %6891 = vst.msk [vmem:[#allocation6 + $0x20] sm:$0xff] %vm3311_vm12, %v6887_v33  ;;  %7022 = vmatmul.mubr.f32.vlgmr.msra.gmra.mxu1 %v6942_v57  ;;  %v7472_v57 = vld [vmem:[%s13996_s11 + $0x288] sm:$0xff] }
 0xe72   : > { %6917 = vst.msk [vmem:[#allocation6 + $0x28] sm:$0xff] %vm3339_vm7, %v6911_v6  ;;  %8455 = vmatpush3.msk.msra.mxu1 %vm1910_vm3, %v13047_v19  ;;  %vm14401_vm3 = vmmov %vm14396_vm8 }
 0xe73   : > { %6903 = vst.msk [vmem:[#allocation6 + $0x20] sm:$0xff] %vm14399_vm11, %v6899_v1  ;;  %v6925_v20 = vpop.permute.xlu1 %6924  ;;  %8456 = vmatprep.subr.mxu1 %v6157_v60  ;;  %v6945_v14 = vld [vmem:[#allocation6 + $0x18] sm:$0xff]  ;;  %v7511_v1 = vld [vmem:[%s13996_s11 + $0x3c0] sm:$0xff] }
 0xe74   : > { %6916 = vst.msk [vmem:[#allocation6 + $0x20] sm:$0xff] %vm14400_vm0, %v6911_v6  ;;  %8457 = vmatpush3.msra.mxu1 %v6157_v60  ;;  %7648 = vmatpush1.msra.mxu0 %v7511_v1  ;;  %v7479_v6 = vld [vmem:[%s13996_s11 + $0x2c0] sm:$0xff]  ;;  %v14405_v60 = vld [vmem:[#allocation27_spill] sm:$0xff]  ;;  %v7400_v1 = vld [vmem:[%s13996_s11 + $0x48] sm:$0xff] }
 0xe75   : > { %6929 = vst.msk [vmem:[#allocation6 + $0x28] sm:$0xff] %vm3353_vm6, %v6925_v20  ;;  %8458 = vmatprep.subr.mxu1 %v6156_v51  ;;  %vm14403_vm6 = vmmov %vm14402_vm15  ;;  %7649 = vmatprep.subr.mxu0 %v7504_v18  ;;  %v7471_v20 = vld [vmem:[%s13996_s11 + $0x280] sm:$0xff] }
 0xe76   : > { %8459 = vmatpush3.msra.mxu1 %v6156_v51  ;;  %7650 = vmatpush1.msra.mxu0 %v7503_v35  ;;  %v7392_v35 = vld [vmem:[%s13996_s11 + $0x8] sm:$0xff] }
 0xe77   : > { %v6937_v59 = vpop.permute.xlu1 %6936  ;;  %8460 = vmatprep.subr.mxu1 %v6155_v12  ;;  %7651 = vmatprep.subr.mxu0 %v7496_v36  ;;  %v7391_v36 = vld [vmem:[%s13996_s11] sm:$0xff] }
 0xe78   : > { %6941 = vst.msk [vmem:[#allocation6 + $0x28] sm:$0xff] %vm14401_vm3, %v6937_v59  ;;  %8461 = vmatpush3.msra.mxu1 %v6155_v12  ;;  %7652 = vmatpush1.msra.mxu0 %v7495_v39  ;;  %v7464_v12 = vld [vmem:[%s13996_s11 + $0x248] sm:$0xff]  ;;  %v7463_v59 = vld [vmem:[%s13996_s11 + $0x240] sm:$0xff]  ;;  %v7514_v39 = vld [vmem:[%s13996_s11 + $0x3d8] sm:$0xff] }
 0xe79   : > { %8462 = vmatprep.subr.mxu1 %v6154_v37  ;;  %7653 = vmatprep.subr.mxu0 %v7488_v62  ;;  %v7639_v62 = vld [vmem:[%s13996_s11 + $0x7c0] sm:$0xff] }
 0xe7a   : > { %8463 = vmatpush3.msra.mxu1 %v6154_v37 }
 0xe7b   : > { %v6946_v46 = vld [vmem:[#allocation6 + $0x20] sm:$0xff]  ;;  %8464 = vmatprep.subr.mxu1 %v6153_v23 }
 0xe7c   : > { %7026 = vmatprep.mubr.f32.mxu1 %v6946_v46  ;;  %8465 = vmatpush3.msra.mxu1 %v6153_v23  ;;  %v7456_v23 = vld [vmem:[%s13996_s11 + $0x208] sm:$0xff]  ;;  %v14406_v46 = vld [vmem:[#allocation28_spill] sm:$0xff] }
 0xe7d   : > { %7027 = vmatmul.mubr.f32.gmra.mxu1 %v6945_v14  ;;  %8466 = vmatprep.subr.mxu1 %v6152_v16 }
 0xe7e   : > { %8468 = vmatprep.mubr.msk.f32.mxu1 %vm14402_vm15, %v6944_v40  ;;  %8467 = vmatpush3.msra.mxu1 %v6152_v16  ;;  %v7455_v16 = vld [vmem:[%s13996_s11 + $0x200] sm:$0xff]  ;;  %v7448_v40 = vld [vmem:[%s13996_s11 + $0x1c8] sm:$0xff] }
 0xe7f   : > { %v6947_v26 = vld [vmem:[#allocation6 + $0x28] sm:$0xff]  ;;  %7724 = vmatprep.subr.mxu1 %v7514_v39  ;;  %v7418_v39 = vld [vmem:[%s13996_s11 + $0xd8] sm:$0xff] }
 0xe81   : > { %8469 = vmatmul.mubr.msk.f32.vlgmr.msra.gmra.mxu1 %vm14403_vm6, %v6947_v26 }
 0xf31   : > { %v8280_v52 = vpop.f32.mrf.mxu1 }
 0xf33   : > { %v8281_v15 = vpop.f32.mrf.mxu1 }
 0xf34   : > { %v8282_v63 = vadd.f32 %v8281_v15, %v8280_v52  ;;  %v7447_v52 = vld [vmem:[%s13996_s11 + $0x1c0] sm:$0xff]  ;;  %v7440_v15 = vld [vmem:[%s13996_s11 + $0x188] sm:$0xff] }
 0xf3d   : > { %v8283_v9 = vpop.f32.mrf.mxu1 }
 0xf3f   : > { %v8284_v2 = vpop.f32.mrf.mxu1 }
 0xf40   : > { %v8285_v30 = vadd.f32 %v8284_v2, %v8283_v9  ;;  %v14407_v9 = vld [vmem:[#allocation29_spill] sm:$0xff] }
 0xf41   : > { %v8470_v19 = vpop.f32.mrf.mxu1 }
 0xf42   : > { %v7104_v49 = vadd.f32 %v8470_v19, %v8285_v30  ;;  %v7439_v30 = vld [vmem:[%s13996_s11 + $0x180] sm:$0xff]  ;;  %v7432_v19 = vld [vmem:[%s13996_s11 + $0x148] sm:$0xff] }
 0xf43   : > { %v7098_v3 = vpop.f32.mrf.mxu1 }
 0xf44   : > { %v7108_v61 = vsub.f32 0.0, %v7104_v49  ;;  %v7099_v31 = vadd.f32 %v8282_v63, %v7098_v3  ;;  %v7431_v49 = vld [vmem:[%s13996_s11 + $0x140] sm:$0xff]  ;;  %v7424_v3 = vld [vmem:[%s13996_s11 + $0x108] sm:$0xff] }
 0xf46   : > { %v7111_v13 = vmul.f32 1.442695, %v7108_v61  ;;  %v7107_v45 = vsub.f32 0.0, %v7099_v31  ;;  %v14408_v61 = vld [vmem:[#allocation30_spill] sm:$0xff] }
 0xf48   : > { %8561 = vpow2.f32 %v7111_v13  ;;  %v7109_v10 = vmul.f32 1.442695, %v7107_v45  ;;  %v7423_v13 = vld [vmem:[%s13996_s11 + $0x100] sm:$0xff]  ;;  %v7416_v45 = vld [vmem:[%s13996_s11 + $0xc8] sm:$0xff] }
 0xf4a   : > { %8563 = vpow2.f32 %v7109_v10 }
 0xf55   : > { %v8562_v27 = vpop.eup %8561 }
 0xf56   : > { %v7114_v34 = vadd.f32 1.0, %v8562_v27  ;;  %v7415_v27 = vld [vmem:[%s13996_s11 + $0xc0] sm:$0xff] }
 0xf57   : > { %v8564_v58 = vpop.eup %8563 }
 0xf58   : > { %8565 = vrcp.f32 %v7114_v34  ;;  %v7113_v33 = vadd.f32 1.0, %v8564_v58  ;;  %v7408_v34 = vld [vmem:[%s13996_s11 + $0x88] sm:$0xff]  ;;  %v14409_v58 = vld [vmem:[#allocation31_spill] sm:$0xff] }
 0xf5a   : > { %8567 = vrcp.f32 %v7113_v33 }
 0xf65   : > { %v13115_v54 = vpop.eup %8565 }
 0xf66   : > { %v7210_v4 = vrot.slane %v13115_v54, %v14296_v55  ;;  %v7221_v38 = vrot.slane %v13115_v54, %v14404_v25  ;;  %v7232_v51 = vrot.slane %v13115_v54, %v14405_v60  ;;  %v7243_v14 = vrot.slane %v13115_v54, %v14406_v46 }
 0xf67   : > { %v13119_v8 = vpop.eup %8567  ;;  %v7254_v2 = vrot.slane %v13115_v54, %v14407_v9  ;;  %v7265_v31 = vrot.slane %v13115_v54, %v14408_v61  ;;  %v7276_v33 = vrot.slane %v13115_v54, %v14409_v58 }
 0xf68   : > { %7212 = vbcast.lane.b32.xlu0 %v7210_v4, 256  ;;  %v7122_v21 = vrot.slane %v13119_v8, %v14296_v55  ;;  %v7487_v55 = vld [vmem:[%s13996_s11 + $0x300] sm:$0xff]  ;;  %v7133_v53 = vrot.slane %v13119_v8, %v14404_v25  ;;  %v7144_v37 = vrot.slane %v13119_v8, %v14405_v60  ;;  %v7155_v26 = vrot.slane %v13119_v8, %v14406_v46  ;;  %v14410_v25 = vld [vmem:[#allocation32_spill] sm:$0xff]  ;;  %v7481_v46 = vld [vmem:[%s13996_s11 + $0x2d0] sm:$0xff] }
 0xf69   : > { %7654 = vmatpush1.msra.mxu0 %v7487_v55  ;;  %v7166_v63 = vrot.slane %v13119_v8, %v14407_v9  ;;  %v7177_v10 = vrot.slane %v13119_v8, %v14408_v61  ;;  %v7188_v18 = vrot.slane %v13119_v8, %v14409_v58  ;;  %v7513_v55 = vld [vmem:[%s13996_s11 + $0x3d0] sm:$0xff]  ;;  %v7498_v60 = vld [vmem:[%s13996_s11 + $0x358] sm:$0xff]  ;;  %v7600_v9 = vld [vmem:[%s13996_s11 + $0x688] sm:$0xff] }
 0xf6a   : > { %7124 = vbcast.lane.b32.xlu1 %v7122_v21, 256  ;;  %7655 = vmatprep.subr.mxu0 %v7480_v22  ;;  %v7506_v22 = vld [vmem:[%s13996_s11 + $0x398] sm:$0xff]  ;;  %v7575_v58 = vld [vmem:[%s13996_s11 + $0x5c0] sm:$0xff] }
 0xf6b   : > { %7656 = vmatpush1.msra.mxu0 %v7479_v6  ;;  %v7199_v6 = vrot.slane %v13119_v8, %v14410_v25  ;;  %7725 = vmatpush1.msra.mxu1 %v7513_v55  ;;  %v7497_v8 = vld [vmem:[%s13996_s11 + $0x350] sm:$0xff]  ;;  %v7450_v61 = vld [vmem:[%s13996_s11 + $0x1d8] sm:$0xff] }
 0xf6c   : > { %7216 = vbcast.lane.b32.xlu0 %v7210_v4, 264  ;;  %7657 = vmatprep.subr.mxu0 %v7472_v57  ;;  %v7399_v4 = vld [vmem:[%s13996_s11 + $0x40] sm:$0xff]  ;;  %v7410_v55 = vld [vmem:[%s13996_s11 + $0x98] sm:$0xff] }
 0xf6d   : > { %7658 = vmatpush1.msra.mxu0 %v7471_v20  ;;  %v7631_v57 = vld [vmem:[%s13996_s11 + $0x780] sm:$0xff]  ;;  %7726 = vmatprep.subr.mxu1 %v7506_v22  ;;  %v7490_v20 = vld [vmem:[%s13996_s11 + $0x318] sm:$0xff]  ;;  %v7544_v22 = vld [vmem:[%s13996_s11 + $0x4c8] sm:$0xff] }
 0xf6e   : > { %7128 = vbcast.lane.b32.xlu1 %v7122_v21, 264  ;;  %7659 = vmatprep.subr.mxu0 %v7464_v12  ;;  %v7640_v21 = vld [vmem:[%s13996_s11 + $0x7c8] sm:$0xff]  ;;  %v7489_v12 = vld [vmem:[%s13996_s11 + $0x310] sm:$0xff] }
 0xf6f   : > { %7660 = vmatpush1.msra.mxu0 %v7463_v59  ;;  %v7482_v59 = vld [vmem:[%s13996_s11 + $0x2d8] sm:$0xff] }
 0xf70   : > { %7223 = vbcast.lane.b32.xlu0 %v7221_v38, 256  ;;  %7661 = vmatprep.subr.mxu0 %v7456_v23  ;;  %v7616_v23 = vld [vmem:[%s13996_s11 + $0x708] sm:$0xff] }
 0xf71   : > { %7662 = vmatpush1.msra.mxu0 %v7455_v16  ;;  %v7474_v16 = vld [vmem:[%s13996_s11 + $0x298] sm:$0xff] }
 0xf72   : > { %7135 = vbcast.lane.b32.xlu1 %v7133_v53, 256  ;;  %7663 = vmatprep.subr.mxu0 %v7448_v40  ;;  %v7608_v40 = vld [vmem:[%s13996_s11 + $0x6c8] sm:$0xff] }
 0xf73   : > { %7664 = vmatpush1.msra.mxu0 %v7447_v52  ;;  %v7607_v52 = vld [vmem:[%s13996_s11 + $0x6c0] sm:$0xff] }
 0xf74   : > { %7227 = vbcast.lane.b32.xlu0 %v7221_v38, 264  ;;  %7665 = vmatprep.subr.mxu0 %v7440_v15  ;;  %v7287_v38 = vrot.slane %v13115_v54, %v14410_v25  ;;  %v7505_v54 = vld [vmem:[%s13996_s11 + $0x390] sm:$0xff]  ;;  %v7466_v15 = vld [vmem:[%s13996_s11 + $0x258] sm:$0xff] }
 0xf75   : > { %7666 = vmatpush1.msra.mxu0 %v7439_v30  ;;  %7727 = vmatpush1.msra.mxu1 %v7505_v54  ;;  %v7599_v30 = vld [vmem:[%s13996_s11 + $0x680] sm:$0xff]  ;;  %v7417_v25 = vld [vmem:[%s13996_s11 + $0xd0] sm:$0xff]  ;;  %v7402_v54 = vld [vmem:[%s13996_s11 + $0x58] sm:$0xff] }
 0xf76   : > { %7139 = vbcast.lane.b32.xlu1 %v7133_v53, 264  ;;  %7667 = vmatprep.subr.mxu0 %v7432_v19  ;;  %v7632_v53 = vld [vmem:[%s13996_s11 + $0x788] sm:$0xff]  ;;  %v7458_v19 = vld [vmem:[%s13996_s11 + $0x218] sm:$0xff] }
 0xf77   : > { %7668 = vmatpush1.msra.mxu0 %v7431_v49  ;;  %7728 = vmatprep.subr.mxu1 %v7498_v60  ;;  %v7457_v49 = vld [vmem:[%s13996_s11 + $0x210] sm:$0xff] }
 0xf78   : > { %7234 = vbcast.lane.b32.xlu0 %v7232_v51, 256  ;;  %7669 = vmatprep.subr.mxu0 %v7424_v3  ;;  %v7591_v3 = vld [vmem:[%s13996_s11 + $0x640] sm:$0xff]  ;;  %v7401_v60 = vld [vmem:[%s13996_s11 + $0x50] sm:$0xff] }
 0xf79   : > { %7670 = vmatpush1.msra.mxu0 %v7423_v13  ;;  %7729 = vmatpush1.msra.mxu1 %v7497_v8  ;;  %v7449_v13 = vld [vmem:[%s13996_s11 + $0x1d0] sm:$0xff]  ;;  %v7535_v8 = vld [vmem:[%s13996_s11 + $0x480] sm:$0xff] }
 0xf7a   : > { %7146 = vbcast.lane.b32.xlu1 %v7144_v37, 256  ;;  %7671 = vmatprep.subr.mxu0 %v7416_v45  ;;  %v7583_v45 = vld [vmem:[%s13996_s11 + $0x600] sm:$0xff] }
 0xf7b   : > { %7672 = vmatpush1.msra.mxu0 %v7415_v27  ;;  %7730 = vmatprep.subr.mxu1 %v7490_v20  ;;  %v7576_v27 = vld [vmem:[%s13996_s11 + $0x5c8] sm:$0xff] }
 0xf7c   : > { %7238 = vbcast.lane.b32.xlu0 %v7232_v51, 264  ;;  %7673 = vmatprep.subr.mxu0 %v7408_v34  ;;  %v7624_v51 = vld [vmem:[%s13996_s11 + $0x748] sm:$0xff]  ;;  %v7441_v34 = vld [vmem:[%s13996_s11 + $0x190] sm:$0xff] }
 0xf7d   : > { %7674 = vmatpush1.msra.mxu0 %v7407_v28  ;;  %7731 = vmatpush1.msra.mxu1 %v7489_v12  ;;  %v7568_v28 = vld [vmem:[%s13996_s11 + $0x588] sm:$0xff]  ;;  %v7393_v12 = vld [vmem:[%s13996_s11 + $0x10] sm:$0xff] }
 0xf7e   : > { %7150 = vbcast.lane.b32.xlu1 %v7144_v37, 264  ;;  %7675 = vmatprep.subr.mxu0 %v7400_v1  ;;  %v7623_v37 = vld [vmem:[%s13996_s11 + $0x740] sm:$0xff]  ;;  %v7433_v1 = vld [vmem:[%s13996_s11 + $0x150] sm:$0xff]  ;;  %v7528_v20 = vld [vmem:[%s13996_s11 + $0x448] sm:$0xff] }
 0xf7f   : > { %7676 = vmatpush1.msra.mxu0 %v7399_v4  ;;  %7732 = vmatprep.subr.mxu1 %v7482_v59  ;;  %v7426_v4 = vld [vmem:[%s13996_s11 + $0x118] sm:$0xff] }
 0xf80   : > { %7245 = vbcast.lane.b32.xlu0 %v7243_v14, 256  ;;  %7677 = vmatprep.subr.mxu0 %v7392_v35  ;;  %v7560_v35 = vld [vmem:[%s13996_s11 + $0x548] sm:$0xff]  ;;  %v7642_v59 = vld [vmem:[%s13996_s11 + $0x7d8] sm:$0xff] }
 0xf81   : > { %7678 = vmatpush1.msra.mxu0 %v7391_v36  ;;  %7733 = vmatpush1.msra.mxu1 %v7481_v46  ;;  %v7425_v36 = vld [vmem:[%s13996_s11 + $0x110] sm:$0xff] }
 0xf82   : > { %7157 = vbcast.lane.b32.xlu1 %v7155_v26, 256  ;;  %7679 = vmatprep.subr.mxu0 %v7640_v21  ;;  %v7559_v21 = vld [vmem:[%s13996_s11 + $0x540] sm:$0xff]  ;;  %v7641_v46 = vld [vmem:[%s13996_s11 + $0x7d0] sm:$0xff] }
 0xf83   : > { %7680 = vmatpush2.msra.mxu0 %v7639_v62  ;;  %7734 = vmatprep.subr.mxu1 %v7474_v16  ;;  %v7552_v62 = vld [vmem:[%s13996_s11 + $0x508] sm:$0xff]  ;;  %v7634_v16 = vld [vmem:[%s13996_s11 + $0x798] sm:$0xff] }
 0xf84   : > { %7249 = vbcast.lane.b32.xlu0 %v7243_v14, 264  ;;  %7681 = vmatprep.subr.mxu0 %v7632_v53  ;;  %v7615_v14 = vld [vmem:[%s13996_s11 + $0x700] sm:$0xff]  ;;  %v7409_v53 = vld [vmem:[%s13996_s11 + $0x90] sm:$0xff] }
 0xf85   : > { %7682 = vmatpush2.msra.mxu0 %v7631_v57  ;;  %v7536_v57 = vld [vmem:[%s13996_s11 + $0x488] sm:$0xff] }
 0xf86   : > { %7161 = vbcast.lane.b32.xlu1 %v7155_v26, 264  ;;  %7683 = vmatprep.subr.mxu0 %v7624_v51  ;;  %v7473_v26 = vld [vmem:[%s13996_s11 + $0x290] sm:$0xff]  ;;  %v7394_v51 = vld [vmem:[%s13996_s11 + $0x18] sm:$0xff] }
 0xf87   : > { %7684 = vmatpush2.msra.mxu0 %v7623_v37  ;;  %7735 = vmatpush1.msra.mxu1 %v7473_v26  ;;  %v7527_v37 = vld [vmem:[%s13996_s11 + $0x440] sm:$0xff]  ;;  %v7626_v26 = vld [vmem:[%s13996_s11 + $0x758] sm:$0xff] }
 0xf88   : > { %7256 = vbcast.lane.b32.xlu0 %v7254_v2, 256  ;;  %7685 = vmatprep.subr.mxu0 %v7616_v23  ;;  %v7520_v23 = vld [vmem:[%s13996_s11 + $0x408] sm:$0xff] }
 0xf89   : > { %7686 = vmatpush2.msra.mxu0 %v7615_v14  ;;  %7736 = vmatprep.subr.mxu1 %v7466_v15  ;;  %v7519_v14 = vld [vmem:[%s13996_s11 + $0x400] sm:$0xff]  ;;  %v7618_v15 = vld [vmem:[%s13996_s11 + $0x718] sm:$0xff] }
 0xf8a   : > { %7168 = vbcast.lane.b32.xlu1 %v7166_v63, 256  ;;  %7687 = vmatprep.subr.mxu0 %v7608_v40  ;;  %v7633_v40 = vld [vmem:[%s13996_s11 + $0x790] sm:$0xff] }
 0xf8b   : > { %7688 = vmatpush2.msra.mxu0 %v7607_v52  ;;  %v7625_v52 = vld [vmem:[%s13996_s11 + $0x750] sm:$0xff] }
 0xf8c   : > { %7260 = vbcast.lane.b32.xlu0 %v7254_v2, 264  ;;  %v7465_v2 = vld [vmem:[%s13996_s11 + $0x250] sm:$0xff]  ;;  %7689 = vmatprep.subr.mxu0 %v7600_v9 }
 0xf8d   : > { %7737 = vmatpush1.msra.mxu1 %v7465_v2  ;;  %7690 = vmatpush2.msra.mxu0 %v7599_v30  ;;  %v7617_v9 = vld [vmem:[%s13996_s11 + $0x710] sm:$0xff]  ;;  %v7610_v2 = vld [vmem:[%s13996_s11 + $0x6d8] sm:$0xff] }
 0xf8e   : > { %7172 = vbcast.lane.b32.xlu1 %v7166_v63, 264  ;;  %v7592_v63 = vld [vmem:[%s13996_s11 + $0x648] sm:$0xff]  ;;  %7738 = vmatprep.subr.mxu1 %v7458_v19  ;;  %v7609_v30 = vld [vmem:[%s13996_s11 + $0x6d0] sm:$0xff]  ;;  %v7602_v19 = vld [vmem:[%s13996_s11 + $0x698] sm:$0xff] }
 0xf8f   : > { %7691 = vmatprep.subr.mxu0 %v7592_v63  ;;  %7739 = vmatpush1.msra.mxu1 %v7457_v49  ;;  %v7601_v63 = vld [vmem:[%s13996_s11 + $0x690] sm:$0xff]  ;;  %v7594_v49 = vld [vmem:[%s13996_s11 + $0x658] sm:$0xff] }
 0xf90   : > { %7267 = vbcast.lane.b32.xlu0 %v7265_v31, 256  ;;  %7692 = vmatpush2.msra.mxu0 %v7591_v3  ;;  %v7593_v3 = vld [vmem:[%s13996_s11 + $0x650] sm:$0xff] }
 0xf91   : > { %7740 = vmatprep.subr.mxu1 %v7450_v61  ;;  %v7586_v61 = vld [vmem:[%s13996_s11 + $0x618] sm:$0xff] }
 0xf92   : > { %7179 = vbcast.lane.b32.xlu1 %v7177_v10, 256  ;;  %7741 = vmatpush1.msra.mxu1 %v7449_v13  ;;  %v7578_v13 = vld [vmem:[%s13996_s11 + $0x5d8] sm:$0xff] }
 0xf94   : > { %7271 = vbcast.lane.b32.xlu0 %v7265_v31, 264  ;;  %v7584_v31 = vld [vmem:[%s13996_s11 + $0x608] sm:$0xff] }
 0xf95   : > { %7693 = vmatprep.subr.mxu0 %v7584_v31  ;;  %v7585_v31 = vld [vmem:[%s13996_s11 + $0x610] sm:$0xff] }
 0xf96   : > { %7183 = vbcast.lane.b32.xlu1 %v7177_v10, 264  ;;  %v7442_v10 = vld [vmem:[%s13996_s11 + $0x198] sm:$0xff]  ;;  %7694 = vmatpush2.msra.mxu0 %v7583_v45  ;;  %v7577_v45 = vld [vmem:[%s13996_s11 + $0x5d0] sm:$0xff] }
 0xf97   : > { %7742 = vmatprep.subr.mxu1 %v7442_v10  ;;  %7695 = vmatprep.subr.mxu0 %v7576_v27  ;;  %v7570_v10 = vld [vmem:[%s13996_s11 + $0x598] sm:$0xff]  ;;  %v7569_v27 = vld [vmem:[%s13996_s11 + $0x590] sm:$0xff] }
 0xf98   : > { %7278 = vbcast.lane.b32.xlu0 %v7276_v33, 256  ;;  %7743 = vmatpush1.msra.mxu1 %v7441_v34  ;;  %v7562_v34 = vld [vmem:[%s13996_s11 + $0x558] sm:$0xff] }
 0xf99   : > { %7696 = vmatpush2.msra.mxu0 %v7575_v58  ;;  %v7561_v58 = vld [vmem:[%s13996_s11 + $0x550] sm:$0xff] }
 0xf9a   : > { %7190 = vbcast.lane.b32.xlu1 %v7188_v18, 256  ;;  %7697 = vmatprep.subr.mxu0 %v7568_v28  ;;  %v7553_v28 = vld [vmem:[%s13996_s11 + $0x510] sm:$0xff] }
 0xf9c   : > { %7282 = vbcast.lane.b32.xlu0 %v7276_v33, 264  ;;  %v7434_v33 = vld [vmem:[%s13996_s11 + $0x158] sm:$0xff] }
 0xf9d   : > { %7744 = vmatprep.subr.mxu1 %v7434_v33  ;;  %v7554_v33 = vld [vmem:[%s13996_s11 + $0x518] sm:$0xff] }
 0xf9e   : > { %7194 = vbcast.lane.b32.xlu1 %v7188_v18, 264  ;;  %v7567_v18 = vld [vmem:[%s13996_s11 + $0x580] sm:$0xff]  ;;  %7745 = vmatpush1.msra.mxu1 %v7433_v1  ;;  %v7546_v1 = vld [vmem:[%s13996_s11 + $0x4d8] sm:$0xff] }
 0xf9f   : > { %7698 = vmatpush2.msra.mxu0 %v7567_v18  ;;  %7746 = vmatprep.subr.mxu1 %v7426_v4  ;;  %v7545_v18 = vld [vmem:[%s13996_s11 + $0x4d0] sm:$0xff]  ;;  %v7538_v4 = vld [vmem:[%s13996_s11 + $0x498] sm:$0xff] }
 0xfa0   : > { %7289 = vbcast.lane.b32.xlu0 %v7287_v38, 256  ;;  %7699 = vmatprep.subr.mxu0 %v7560_v35  ;;  %v7537_v35 = vld [vmem:[%s13996_s11 + $0x490] sm:$0xff] }
 0xfa1   : > { %7747 = vmatpush1.msra.mxu1 %v7425_v36  ;;  %7700 = vmatpush2.msra.mxu0 %v7559_v21  ;;  %v7530_v36 = vld [vmem:[%s13996_s11 + $0x458] sm:$0xff] }
 0xfa2   : > { %7201 = vbcast.lane.b32.xlu1 %v7199_v6, 256  ;;  %7748 = vmatprep.subr.mxu1 %v7418_v39  ;;  %v7529_v39 = vld [vmem:[%s13996_s11 + $0x450] sm:$0xff] }
 0xfa3   : > { %7701 = vmatprep.subr.mxu0 %v7552_v62  ;;  %7749 = vmatpush1.msra.mxu1 %v7417_v25 }
 0xfa4   : > { %7293 = vbcast.lane.b32.xlu0 %v7287_v38, 264  ;;  %v7551_v38 = vld [vmem:[%s13996_s11 + $0x500] sm:$0xff]  ;;  %7750 = vmatprep.subr.mxu1 %v7410_v55 }
 0xfa5   : > { %7702 = vmatpush2.msra.mxu0 %v7551_v38  ;;  %7751 = vmatpush1.msra.mxu1 %v7409_v53  ;;  %v7521_v53 = vld [vmem:[%s13996_s11 + $0x410] sm:$0xff] }
 0xfa6   : > { %7205 = vbcast.lane.b32.xlu1 %v7199_v6, 264  ;;  %v7543_v6 = vld [vmem:[%s13996_s11 + $0x4c0] sm:$0xff]  ;;  %7703 = vmatprep.subr.mxu0 %v7544_v22  ;;  %v7522_v22 = vld [vmem:[%s13996_s11 + $0x418] sm:$0xff] }
 0xfa7   : > { %7704 = vmatpush2.msra.mxu0 %v7543_v6  ;;  %7752 = vmatprep.subr.mxu1 %v7402_v54 }
 0xfa8   : > { %7705 = vmatprep.subr.mxu0 %v7536_v57  ;;  %7753 = vmatpush1.msra.mxu1 %v7401_v60 }
 0xfa9   : > { %7706 = vmatpush2.msra.mxu0 %v7535_v8  ;;  %7754 = vmatprep.subr.mxu1 %v7394_v51 }
 0xfaa   : > { %7707 = vmatprep.subr.mxu0 %v7528_v20  ;;  %7755 = vmatpush1.msra.mxu1 %v7393_v12 }
 0xfab   : > { %7708 = vmatpush2.msra.mxu0 %v7527_v37  ;;  %7756 = vmatprep.subr.mxu1 %v7642_v59 }
 0xfac   : > { %7709 = vmatprep.subr.mxu0 %v7520_v23  ;;  %7757 = vmatpush2.msra.mxu1 %v7641_v46 }
 0xfad   : > { %7710 = vmatpush2.msra.mxu0 %v7519_v14  ;;  %7758 = vmatprep.subr.mxu1 %v7634_v16 }
 0xfae   : > { %7759 = vmatpush2.msra.mxu1 %v7633_v40 }
 0xfaf   : > { %7760 = vmatprep.subr.mxu1 %v7626_v26 }
 0xfb0   : > { %7761 = vmatpush2.msra.mxu1 %v7625_v52 }
 0xfb1   : > { %7762 = vmatprep.subr.mxu1 %v7618_v15 }
 0xfb2   : > { %7763 = vmatpush2.msra.mxu1 %v7617_v9 }
 0xfb3   : > { %7764 = vmatprep.subr.mxu1 %v7610_v2 }
 0xfb4   : > { %7765 = vmatpush2.msra.mxu1 %v7609_v30 }
 0xfb5   : > { %7766 = vmatprep.subr.mxu1 %v7602_v19 }
 0xfb6   : > { %7767 = vmatpush2.msra.mxu1 %v7601_v63 }
 0xfb7   : > { %7768 = vmatprep.subr.mxu1 %v7594_v49 }
 0xfb8   : > { %7769 = vmatpush2.msra.mxu1 %v7593_v3 }
 0xfb9   : > { %7770 = vmatprep.subr.mxu1 %v7586_v61 }
 0xfba   : > { %7771 = vmatpush2.msra.mxu1 %v7585_v31 }
 0xfbb   : > { %7772 = vmatprep.subr.mxu1 %v7578_v13  ;;  %v14411_v13 = vld [vmem:[#allocation17_spill] sm:$0xff] }
 0xfbc   : > { %7773 = vmatpush2.msra.mxu1 %v7577_v45 }
 0xfbd   : > { %7774 = vmatprep.subr.mxu1 %v7570_v10  ;;  %v14412_v10 = vld [vmem:[#allocation15_spill] sm:$0xff] }
 0xfbe   : > { %7775 = vmatpush2.msra.mxu1 %v7569_v27 }
 0xfbf   : > { %7776 = vmatprep.subr.mxu1 %v7562_v34 }
 0xfc0   : > { %7777 = vmatpush2.msra.mxu1 %v7561_v58  ;;  %v14413_v58 = vld [vmem:[#allocation20_spill] sm:$0xff] }
 0xfc1   : > { %7778 = vmatprep.subr.mxu1 %v7554_v33 }
 0xfc2   : > { %7779 = vmatpush2.msra.mxu1 %v7553_v28  ;;  %v14414_v28 = vld [vmem:[#allocation19_spill] sm:$0xff] }
 0xfc3   : > { %7780 = vmatprep.subr.mxu1 %v7546_v1 }
 0xfc4   : > { %7781 = vmatpush2.msra.mxu1 %v7545_v18 }
 0xfc5   : > { %7782 = vmatprep.subr.mxu1 %v7538_v4  ;;  %v14415_v4 = vld [vmem:[#allocation16_spill] sm:$0xff] }
 0xfc6   : > { %7783 = vmatpush2.msra.mxu1 %v7537_v35 }
 0xfc7   : > { %7784 = vmatprep.subr.mxu1 %v7530_v36  ;;  %v14416_v36 = vld [vmem:[#allocation14_spill] sm:$0xff] }
 0xfc8   : > { %7785 = vmatpush2.msra.mxu1 %v7529_v39 }
 0xfc9   : > { %7786 = vmatprep.subr.mxu1 %v7522_v22  ;;  %v14418_v22 = vld [vmem:[#allocation18_spill] sm:$0xff] }
 0xfca   : > { %7787 = vmatpush2.msra.mxu1 %v7521_v53 }
 0xfda   : > { %v7213_v21 = vpop.permute.xlu0 %7212 }
 0xfdb   : > { %v7311_v25 = vmul.f32 %v7213_v21, %v12514_v50  ;;  %v7516_v50 = vld [vmem:[%s13996_s11 + $0x3e8] sm:$0xff] }
 0xfdc   : > { %v7125_v62 = vpop.permute.xlu1 %7124  ;;  %7801 = vmatprep.subr.mxu0 %v7516_v50 }
 0xfdd   : > { %v7295_v38 = vmul.f32 %v7125_v62, %v12506_v24  ;;  %v7518_v24 = vld [vmem:[%s13996_s11 + $0x3f8] sm:$0xff] }
 0xfde   : > { %v7217_v55 = vpop.permute.xlu0 %7216  ;;  %7878 = vmatprep.subr.mxu1 %v7518_v24  ;;  %v14419_v24 = vld [vmem:[#allocation33_spill] sm:$0xff] }
 0xfdf   : > { %v8503_v6 = vpack.i.bf16 %v7295_v38, %v7311_v25  ;;  %v7312_v57 = vmul.f32 %v7217_v55, %v12542_v41  ;;  %v14417_v38 = vld [vmem:[#allocation21_spill] sm:$0xff] }
 0xfe0   : > { %v7129_v54 = vpop.permute.xlu1 %7128 }
 0xfe1   : > { %v7296_v60 = vmul.f32 %v7129_v54, %v12502_v42  ;;  %8504 = vxpose.xlu0.b32.start [1/16] (narrow) %v8503_v6, 16 }
 0xfe2   : > { %v7224_v8 = vpop.permute.xlu0 %7223 }
 0xfe3   : > { %v8505_v51 = vpack.i.bf16 %v7296_v60, %v7312_v57  ;;  %v7313_v12 = vmul.f32 %v7224_v8, %v12526_v0  ;;  %v14420_v60 = vld [vmem:[#allocation23_spill] sm:$0xff] }
 0xfe4   : > { %v7136_v20 = vpop.permute.xlu1 %7135 }
 0xfe5   : > { %v7297_v37 = vmul.f32 %v7136_v20, %v12518_v47  ;;  %8506 = vxpose.xlu0.b32.cont [2/16] (narrow) %v8505_v51, 16 }
 0xfe6   : > { %v7228_v59 = vpop.permute.xlu0 %7227 }
 0xfe7   : > { %v8507_v23 = vpack.i.bf16 %v7297_v37, %v7313_v12  ;;  %v7314_v14 = vmul.f32 %v7228_v59, %v12554_v5  ;;  %v14421_v37 = vld [vmem:[#allocation8_spill] sm:$0xff] }
 0xfe8   : > { %v7140_v46 = vpop.permute.xlu1 %7139 }
 0xfe9   : > { %v7298_v41 = vmul.f32 %v7140_v46, %v12530_v29  ;;  %8508 = vxpose.xlu0.b32.cont [3/16] (narrow) %v8507_v23, 16  ;;  %v14422_v23 = vld [vmem:[#allocation22_spill] sm:$0xff] }
 0xfea   : > { %v7235_v42 = vpop.permute.xlu0 %7234 }
 0xfeb   : > { %v8509_v16 = vpack.i.bf16 %v7298_v41, %v7314_v14  ;;  %v7315_v26 = vmul.f32 %v7235_v42, %v12550_v44 }
 0xfec   : > { %v7147_v40 = vpop.permute.xlu1 %7146 }
 0xfed   : > { %v7299_v52 = vmul.f32 %v7147_v40, %v12538_v43  ;;  %8510 = vxpose.xlu0.b32.cont [4/16] (narrow) %v8509_v16, 16  ;;  %v14423_v16 = vld [vmem:[#allocation36_spill] sm:$0xff] }
 0xfee   : > { %v7239_v0 = vpop.permute.xlu0 %7238 }
 0xfef   : > { %v8511_v15 = vpack.i.bf16 %v7299_v52, %v7315_v26  ;;  %v7316_v9 = vmul.f32 %v7239_v0, %v12578_v56  ;;  %v14424_v26 = vld [vmem:[#allocation34_spill] sm:$0xff] }
 0xff0   : > { %v7151_v47 = vpop.permute.xlu1 %7150 }
 0xff1   : > { %v7300_v2 = vmul.f32 %v7151_v47, %v12566_v48  ;;  %8512 = vxpose.xlu0.b32.cont [5/16] (narrow) %v8511_v15, 16 }
 0xff2   : > { %v7246_v5 = vpop.permute.xlu0 %7245 }
 0xff3   : > { %v8513_v30 = vpack.i.bf16 %v7300_v2, %v7316_v9  ;;  %v7317_v19 = vmul.f32 %v7246_v5, %v12574_v17  ;;  %v14425_v9 = vld [vmem:[#allocation35_spill] sm:$0xff]  ;;  %v14426_v5 = vld [vmem:[#allocation9_spill] sm:$0xff] }
 0xff4   : > { %v7158_v29 = vpop.permute.xlu1 %7157 }
 0xff5   : > { %v7301_v63 = vmul.f32 %v7158_v29, %v12562_v11  ;;  %8514 = vxpose.xlu0.b32.cont [6/16] (narrow) %v8513_v30, 16 }
 0xff6   : > { %v7250_v44 = vpop.permute.xlu0 %7249 }
 0xff7   : > { %v8515_v49 = vpack.i.bf16 %v7301_v63, %v7317_v19  ;;  %v7318_v3 = vmul.f32 %v7250_v44, %v12602_v32 }
 0xff8   : > { %v7162_v43 = vpop.permute.xlu1 %7161 }
 0xff9   : > { %v7302_v61 = vmul.f32 %v7162_v43, %v12590_v7  ;;  %8516 = vxpose.xlu0.b32.cont [7/16] (narrow) %v8515_v49, 16  ;;  %v7515_v49 = vld [vmem:[%s13996_s11 + $0x3e0] sm:$0xff]  ;;  %v7517_v43 = vld [vmem:[%s13996_s11 + $0x3f0] sm:$0xff] }
 0xffa   : > { %v7257_v56 = vpop.permute.xlu0 %7256 }
 0xffb   : > { %v8517_v31 = vpack.i.bf16 %v7302_v61, %v7318_v3  ;;  %v7319_v45 = vmul.f32 %v7257_v56, %v14411_v13  ;;  %v7508_v3 = vld [vmem:[%s13996_s11 + $0x3a8] sm:$0xff]  ;;  %v7510_v61 = vld [vmem:[%s13996_s11 + $0x3b8] sm:$0xff] }
 0xffc   : > { %v7169_v48 = vpop.permute.xlu1 %7168 }
 0xffd   : > { %v7303_v27 = vmul.f32 %v7169_v48, %v14412_v10  ;;  %8518 = vxpose.xlu0.b32.cont [8/16] (narrow) %v8517_v31, 16  ;;  %v7507_v31 = vld [vmem:[%s13996_s11 + $0x3a0] sm:$0xff]  ;;  %v7509_v48 = vld [vmem:[%s13996_s11 + $0x3b0] sm:$0xff]  ;;  %v7500_v10 = vld [vmem:[%s13996_s11 + $0x368] sm:$0xff] }
 0xffe   : > { %v7261_v17 = vpop.permute.xlu0 %7260 }
 0xfff   : > { %v8519_v34 = vpack.i.bf16 %v7303_v27, %v7319_v45  ;;  %v7320_v33 = vmul.f32 %v7261_v17, %v14413_v58  ;;  %v7502_v27 = vld [vmem:[%s13996_s11 + $0x378] sm:$0xff]  ;;  %v7499_v17 = vld [vmem:[%s13996_s11 + $0x360] sm:$0xff] }
0x1000   : > { %v7173_v11 = vpop.permute.xlu1 %7172  ;;  %v7494_v58 = vld [vmem:[%s13996_s11 + $0x338] sm:$0xff] }
0x1001   : > { %v7304_v1 = vmul.f32 %v7173_v11, %v14414_v28  ;;  %8520 = vxpose.xlu0.b32.cont [9/16] (narrow) %v8519_v34, 16  ;;  %v7501_v34 = vld [vmem:[%s13996_s11 + $0x370] sm:$0xff]  ;;  %v7492_v11 = vld [vmem:[%s13996_s11 + $0x328] sm:$0xff] }
0x1002   : > { %v7268_v32 = vpop.permute.xlu0 %7267  ;;  %v7493_v28 = vld [vmem:[%s13996_s11 + $0x330] sm:$0xff] }
0x1003   : > { %v8521_v18 = vpack.i.bf16 %v7304_v1, %v7320_v33  ;;  %v7321_v35 = vmul.f32 %v7268_v32, %v14415_v4  ;;  %v7491_v33 = vld [vmem:[%s13996_s11 + $0x320] sm:$0xff]  ;;  %v7484_v1 = vld [vmem:[%s13996_s11 + $0x2e8] sm:$0xff]  ;;  %v7486_v32 = vld [vmem:[%s13996_s11 + $0x2f8] sm:$0xff] }
0x1004   : > { %v7180_v7 = vpop.permute.xlu1 %7179  ;;  %v7476_v4 = vld [vmem:[%s13996_s11 + $0x2a8] sm:$0xff] }
0x1005   : > { %v7305_v21 = vmul.f32 %v7180_v7, %v14416_v36  ;;  %8522 = vxpose.xlu0.b32.cont [10/16] (narrow) %v8521_v18, 16  ;;  %v7483_v18 = vld [vmem:[%s13996_s11 + $0x2e0] sm:$0xff]  ;;  %v7485_v7 = vld [vmem:[%s13996_s11 + $0x2f0] sm:$0xff] }
0x1006   : > { %v7272_v39 = vpop.permute.xlu0 %7271  ;;  %v7475_v36 = vld [vmem:[%s13996_s11 + $0x2a0] sm:$0xff] }
0x1007   : > { %v8523_v62 = vpack.i.bf16 %v7305_v21, %v7321_v35  ;;  %v7322_v55 = vmul.f32 %v7272_v39, %v14417_v38  ;;  %v7478_v35 = vld [vmem:[%s13996_s11 + $0x2b8] sm:$0xff]  ;;  %v7477_v21 = vld [vmem:[%s13996_s11 + $0x2b0] sm:$0xff]  ;;  %v7468_v39 = vld [vmem:[%s13996_s11 + $0x268] sm:$0xff] }
0x1008   : > { %v7184_v25 = vpop.permute.xlu1 %7183  ;;  %v7469_v38 = vld [vmem:[%s13996_s11 + $0x270] sm:$0xff] }
0x1009   : > { %v7306_v53 = vmul.f32 %v7184_v25, %v14418_v22  ;;  %8524 = vxpose.xlu0.b32.cont [11/16] (narrow) %v8523_v62, 16  ;;  %v7470_v62 = vld [vmem:[%s13996_s11 + $0x278] sm:$0xff]  ;;  %v7467_v25 = vld [vmem:[%s13996_s11 + $0x260] sm:$0xff] }
0x100a   : > { %v7279_v6 = vpop.permute.xlu0 %7278  ;;  %v7462_v22 = vld [vmem:[%s13996_s11 + $0x238] sm:$0xff] }
0x100b   : > { %v8525_v54 = vpack.i.bf16 %v7306_v53, %v7322_v55  ;;  %v7323_v57 = vmul.f32 %v7279_v6, %v14419_v24  ;;  %v7460_v55 = vld [vmem:[%s13996_s11 + $0x228] sm:$0xff]  ;;  %v7459_v53 = vld [vmem:[%s13996_s11 + $0x220] sm:$0xff]  ;;  %v7461_v6 = vld [vmem:[%s13996_s11 + $0x230] sm:$0xff] }
0x100c   : > { %v7191_v50 = vpop.permute.xlu1 %7190  ;;  %v7451_v24 = vld [vmem:[%s13996_s11 + $0x1e0] sm:$0xff] }
0x100d   : > { %v7307_v8 = vmul.f32 %v7191_v50, %v14420_v60  ;;  %8526 = vxpose.xlu0.b32.cont [12/16] (narrow) %v8525_v54, 16  ;;  %v7452_v54 = vld [vmem:[%s13996_s11 + $0x1e8] sm:$0xff]  ;;  %v7454_v50 = vld [vmem:[%s13996_s11 + $0x1f8] sm:$0xff] }
0x100e   : > { %v7283_v51 = vpop.permute.xlu0 %7282  ;;  %v7444_v60 = vld [vmem:[%s13996_s11 + $0x1a8] sm:$0xff] }
0x100f   : > { %v8527_v20 = vpack.i.bf16 %v7307_v8, %v7323_v57  ;;  %v7324_v59 = vmul.f32 %v7283_v51, %v14421_v37  ;;  %v7453_v57 = vld [vmem:[%s13996_s11 + $0x1f0] sm:$0xff]  ;;  %v7446_v8 = vld [vmem:[%s13996_s11 + $0x1b8] sm:$0xff]  ;;  %v7443_v51 = vld [vmem:[%s13996_s11 + $0x1a0] sm:$0xff] }
0x1010   : > { %v7195_v12 = vpop.permute.xlu1 %7194  ;;  %v7438_v37 = vld [vmem:[%s13996_s11 + $0x178] sm:$0xff] }
0x1011   : > { %v7308_v46 = vmul.f32 %v7195_v12, %v14422_v23  ;;  %8528 = vxpose.xlu0.b32.cont [13/16] (narrow) %v8527_v20, 16  ;;  %v7445_v20 = vld [vmem:[%s13996_s11 + $0x1b0] sm:$0xff]  ;;  %v7436_v12 = vld [vmem:[%s13996_s11 + $0x168] sm:$0xff] }
0x1012   : > { %v7290_v14 = vpop.permute.xlu0 %7289  ;;  %v7437_v23 = vld [vmem:[%s13996_s11 + $0x170] sm:$0xff] }
0x1013   : > { %v8529_v41 = vpack.i.bf16 %v7308_v46, %v7324_v59  ;;  %v7325_v40 = vmul.f32 %v7290_v14, %v14423_v16  ;;  %v7435_v59 = vld [vmem:[%s13996_s11 + $0x160] sm:$0xff]  ;;  %v7428_v46 = vld [vmem:[%s13996_s11 + $0x128] sm:$0xff]  ;;  %v7430_v14 = vld [vmem:[%s13996_s11 + $0x138] sm:$0xff] }
0x1014   : > { %v7202_v42 = vpop.permute.xlu1 %7201  ;;  %v7420_v16 = vld [vmem:[%s13996_s11 + $0xe8] sm:$0xff] }
0x1015   : > { %v7309_v52 = vmul.f32 %v7202_v42, %v14424_v26  ;;  %8530 = vxpose.xlu0.b32.cont [14/16] (narrow) %v8529_v41, 16  ;;  %v7427_v41 = vld [vmem:[%s13996_s11 + $0x120] sm:$0xff]  ;;  %v7429_v42 = vld [vmem:[%s13996_s11 + $0x130] sm:$0xff] }
0x1016   : > { %v7294_v0 = vpop.permute.xlu0 %7293  ;;  %v7419_v26 = vld [vmem:[%s13996_s11 + $0xe0] sm:$0xff] }
0x1017   : > { %v8531_v15 = vpack.i.bf16 %v7309_v52, %v7325_v40  ;;  %v7326_v2 = vmul.f32 %v7294_v0, %v14425_v9  ;;  %v7422_v40 = vld [vmem:[%s13996_s11 + $0xf8] sm:$0xff]  ;;  %v7421_v52 = vld [vmem:[%s13996_s11 + $0xf0] sm:$0xff]  ;;  %v7412_v0 = vld [vmem:[%s13996_s11 + $0xa8] sm:$0xff] }
0x1018   : > { %v7206_v47 = vpop.permute.xlu1 %7205  ;;  %v7413_v9 = vld [vmem:[%s13996_s11 + $0xb0] sm:$0xff] }
0x1019   : > { %v7310_v30 = vmul.f32 %v7206_v47, %v14426_v5  ;;  %8532 = vxpose.xlu0.b32.cont [15/16] (narrow) %v8531_v15, 16  ;;  %v7414_v15 = vld [vmem:[%s13996_s11 + $0xb8] sm:$0xff]  ;;  %v7411_v47 = vld [vmem:[%s13996_s11 + $0xa0] sm:$0xff] }
0x101a   : > { %v7406_v5 = vld [vmem:[%s13996_s11 + $0x78] sm:$0xff] }
0x101b   : > { %v8533_v29 = vpack.i.bf16 %v7310_v30, %v7326_v2  ;;  %v7404_v2 = vld [vmem:[%s13996_s11 + $0x68] sm:$0xff]  ;;  %v7403_v30 = vld [vmem:[%s13996_s11 + $0x60] sm:$0xff] }
0x101d   : > { %8534 = vxpose.xlu0.b32.end [16/16] (narrow) %v8533_v29, 16  ;;  %v7405_v29 = vld [vmem:[%s13996_s11 + $0x70] sm:$0xff] }
0x105d   : > { %v8535_v19 = vpop.trf.xlu0 }
0x105e   : > { %v13564_v63 = vunpack.i.h.bf16 %v8535_v19  ;;  %v8536_v44 = vunpack.i.l.bf16 %v8535_v19  ;;  %v7396_v19 = vld [vmem:[%s13996_s11 + $0x28] sm:$0xff] }
0x1060   : > { %7711 = vmatprep.mubr.f32.mxu0 %v8536_v44  ;;  %7788 = vmatprep.mubr.f32.mxu1 %v8536_v44 }
0x1061   : > { %v8540_v56 = vpop.trf.xlu0  ;;  %7712 = vmatmul.mubr.f32.vlgmr.msra.gmra.mxu0 %v13564_v63  ;;  %7789 = vmatmul.mubr.f32.vlgmr.msra.gmra.mxu1 %v13564_v63 }
0x1062   : > { %v13586_v13 = vunpack.i.l.bf16 %v8540_v56  ;;  %7802 = vmatpush1.msra.mxu0 %v7515_v49  ;;  %7879 = vmatpush1.msra.mxu1 %v7517_v43  ;;  %v13588_v45 = vunpack.i.h.bf16 %v8540_v56  ;;  %v7395_v49 = vld [vmem:[%s13996_s11 + $0x20] sm:$0xff]  ;;  %v7397_v43 = vld [vmem:[%s13996_s11 + $0x30] sm:$0xff] }
0x1063   : > { %7803 = vmatprep.subr.mxu0 %v7508_v3  ;;  %7880 = vmatprep.subr.mxu1 %v7510_v61  ;;  %v7644_v3 = vld [vmem:[%s13996_s11 + $0x7e8] sm:$0xff]  ;;  %v7646_v61 = vld [vmem:[%s13996_s11 + $0x7f8] sm:$0xff]  ;;  %v7643_v56 = vld [vmem:[%s13996_s11 + $0x7e0] sm:$0xff] }
0x1064   : > { %7804 = vmatpush1.msra.mxu0 %v7507_v31  ;;  %7881 = vmatpush1.msra.mxu1 %v7509_v48  ;;  %v7645_v31 = vld [vmem:[%s13996_s11 + $0x7f0] sm:$0xff]  ;;  %v7636_v48 = vld [vmem:[%s13996_s11 + $0x7a8] sm:$0xff] }
0x1065   : > { %7717 = vmatprep.mubr.f32.mxu0 %v13586_v13  ;;  %7794 = vmatprep.mubr.f32.mxu1 %v13586_v13 }
0x1066   : > { %7805 = vmatprep.subr.mxu0 %v7500_v10  ;;  %7882 = vmatprep.subr.mxu1 %v7502_v27  ;;  %v7638_v10 = vld [vmem:[%s13996_s11 + $0x7b8] sm:$0xff]  ;;  %v7635_v27 = vld [vmem:[%s13996_s11 + $0x7a0] sm:$0xff] }
0x1067   : > { %7718 = vmatmul.mubr.f32.gmra.mxu0 %v13588_v45  ;;  %7795 = vmatmul.mubr.f32.gmra.mxu1 %v13588_v45 }
0x1068   : > { %7806 = vmatpush1.msra.mxu0 %v7499_v17  ;;  %7883 = vmatpush1.msra.mxu1 %v7501_v34  ;;  %v7637_v17 = vld [vmem:[%s13996_s11 + $0x7b0] sm:$0xff]  ;;  %v7628_v34 = vld [vmem:[%s13996_s11 + $0x768] sm:$0xff] }
0x1069   : > { %7807 = vmatprep.subr.mxu0 %v7492_v11  ;;  %7865 = vmatprep.mubr.f32.mxu0 %v8536_v44  ;;  %v7630_v11 = vld [vmem:[%s13996_s11 + $0x778] sm:$0xff] }
0x106a   : > { %7884 = vmatprep.subr.mxu1 %v7494_v58  ;;  %7942 = vmatprep.mubr.f32.mxu1 %v8536_v44  ;;  %v7398_v44 = vld [vmem:[%s13996_s11 + $0x38] sm:$0xff]  ;;  %v7627_v58 = vld [vmem:[%s13996_s11 + $0x760] sm:$0xff] }
0x106b   : > { %7808 = vmatpush1.msra.mxu0 %v7491_v33  ;;  %7885 = vmatpush1.msra.mxu1 %v7493_v28  ;;  %v7629_v33 = vld [vmem:[%s13996_s11 + $0x770] sm:$0xff]  ;;  %v7620_v28 = vld [vmem:[%s13996_s11 + $0x728] sm:$0xff] }
0x106c   : > { %7809 = vmatprep.subr.mxu0 %v7484_v1  ;;  %7886 = vmatprep.subr.mxu1 %v7486_v32  ;;  %v7622_v1 = vld [vmem:[%s13996_s11 + $0x738] sm:$0xff]  ;;  %v7619_v32 = vld [vmem:[%s13996_s11 + $0x720] sm:$0xff] }
0x106d   : > { %7810 = vmatpush1.msra.mxu0 %v7483_v18  ;;  %7887 = vmatpush1.msra.mxu1 %v7485_v7  ;;  %v7621_v18 = vld [vmem:[%s13996_s11 + $0x730] sm:$0xff]  ;;  %v7612_v7 = vld [vmem:[%s13996_s11 + $0x6e8] sm:$0xff] }
0x106e   : > { %7811 = vmatprep.subr.mxu0 %v7476_v4  ;;  %7888 = vmatprep.subr.mxu1 %v7478_v35  ;;  %v7614_v4 = vld [vmem:[%s13996_s11 + $0x6f8] sm:$0xff]  ;;  %v7611_v35 = vld [vmem:[%s13996_s11 + $0x6e0] sm:$0xff] }
0x106f   : > { %7812 = vmatpush1.msra.mxu0 %v7475_v36  ;;  %7889 = vmatpush1.msra.mxu1 %v7477_v21  ;;  %v7613_v36 = vld [vmem:[%s13996_s11 + $0x6f0] sm:$0xff]  ;;  %v7604_v21 = vld [vmem:[%s13996_s11 + $0x6a8] sm:$0xff] }
0x1070   : > { %7813 = vmatprep.subr.mxu0 %v7468_v39  ;;  %7890 = vmatprep.subr.mxu1 %v7470_v62  ;;  %v7606_v39 = vld [vmem:[%s13996_s11 + $0x6b8] sm:$0xff]  ;;  %v7603_v62 = vld [vmem:[%s13996_s11 + $0x6a0] sm:$0xff] }
0x1071   : > { %7814 = vmatpush1.msra.mxu0 %v7467_v25  ;;  %7891 = vmatpush1.msra.mxu1 %v7469_v38  ;;  %v7605_v25 = vld [vmem:[%s13996_s11 + $0x6b0] sm:$0xff]  ;;  %v7596_v38 = vld [vmem:[%s13996_s11 + $0x668] sm:$0xff] }
0x1072   : > { %7815 = vmatprep.subr.mxu0 %v7460_v55  ;;  %7892 = vmatprep.subr.mxu1 %v7462_v22  ;;  %v7598_v55 = vld [vmem:[%s13996_s11 + $0x678] sm:$0xff]  ;;  %v7595_v22 = vld [vmem:[%s13996_s11 + $0x660] sm:$0xff] }
0x1073   : > { %7816 = vmatpush1.msra.mxu0 %v7459_v53  ;;  %7893 = vmatpush1.msra.mxu1 %v7461_v6  ;;  %v7597_v53 = vld [vmem:[%s13996_s11 + $0x670] sm:$0xff]  ;;  %v7588_v6 = vld [vmem:[%s13996_s11 + $0x628] sm:$0xff] }
0x1074   : > { %7817 = vmatprep.subr.mxu0 %v7452_v54  ;;  %7894 = vmatprep.subr.mxu1 %v7454_v50  ;;  %v7590_v54 = vld [vmem:[%s13996_s11 + $0x638] sm:$0xff]  ;;  %v7587_v50 = vld [vmem:[%s13996_s11 + $0x620] sm:$0xff] }
0x1075   : > { %7818 = vmatpush1.msra.mxu0 %v7451_v24  ;;  %7895 = vmatpush1.msra.mxu1 %v7453_v57  ;;  %v7589_v24 = vld [vmem:[%s13996_s11 + $0x630] sm:$0xff]  ;;  %v7580_v57 = vld [vmem:[%s13996_s11 + $0x5e8] sm:$0xff] }
0x1076   : > { %7819 = vmatprep.subr.mxu0 %v7444_v60  ;;  %7896 = vmatprep.subr.mxu1 %v7446_v8  ;;  %v7582_v60 = vld [vmem:[%s13996_s11 + $0x5f8] sm:$0xff]  ;;  %v7579_v8 = vld [vmem:[%s13996_s11 + $0x5e0] sm:$0xff] }
0x1077   : > { %7820 = vmatpush1.msra.mxu0 %v7443_v51  ;;  %7897 = vmatpush1.msra.mxu1 %v7445_v20  ;;  %v7581_v51 = vld [vmem:[%s13996_s11 + $0x5f0] sm:$0xff]  ;;  %v7572_v20 = vld [vmem:[%s13996_s11 + $0x5a8] sm:$0xff] }
0x1078   : > { %7821 = vmatprep.subr.mxu0 %v7436_v12  ;;  %7898 = vmatprep.subr.mxu1 %v7438_v37  ;;  %v7574_v12 = vld [vmem:[%s13996_s11 + $0x5b8] sm:$0xff]  ;;  %v7571_v37 = vld [vmem:[%s13996_s11 + $0x5a0] sm:$0xff] }
0x1079   : > { %7822 = vmatpush1.msra.mxu0 %v7435_v59  ;;  %7899 = vmatpush1.msra.mxu1 %v7437_v23  ;;  %v7573_v59 = vld [vmem:[%s13996_s11 + $0x5b0] sm:$0xff]  ;;  %v7564_v23 = vld [vmem:[%s13996_s11 + $0x568] sm:$0xff] }
0x107a   : > { %7823 = vmatprep.subr.mxu0 %v7428_v46  ;;  %7900 = vmatprep.subr.mxu1 %v7430_v14  ;;  %v7566_v46 = vld [vmem:[%s13996_s11 + $0x578] sm:$0xff]  ;;  %v7563_v14 = vld [vmem:[%s13996_s11 + $0x560] sm:$0xff] }
0x107b   : > { %7824 = vmatpush1.msra.mxu0 %v7427_v41  ;;  %7901 = vmatpush1.msra.mxu1 %v7429_v42  ;;  %v7565_v41 = vld [vmem:[%s13996_s11 + $0x570] sm:$0xff]  ;;  %v7556_v42 = vld [vmem:[%s13996_s11 + $0x528] sm:$0xff] }
0x107c   : > { %7825 = vmatprep.subr.mxu0 %v7420_v16  ;;  %7902 = vmatprep.subr.mxu1 %v7422_v40  ;;  %v7558_v16 = vld [vmem:[%s13996_s11 + $0x538] sm:$0xff]  ;;  %v7555_v40 = vld [vmem:[%s13996_s11 + $0x520] sm:$0xff] }
0x107d   : > { %7826 = vmatpush1.msra.mxu0 %v7419_v26  ;;  %7903 = vmatpush1.msra.mxu1 %v7421_v52  ;;  %v7557_v26 = vld [vmem:[%s13996_s11 + $0x530] sm:$0xff]  ;;  %v7548_v52 = vld [vmem:[%s13996_s11 + $0x4e8] sm:$0xff] }
0x107e   : > { %7827 = vmatprep.subr.mxu0 %v7412_v0  ;;  %7904 = vmatprep.subr.mxu1 %v7414_v15  ;;  %v7550_v0 = vld [vmem:[%s13996_s11 + $0x4f8] sm:$0xff]  ;;  %v7547_v15 = vld [vmem:[%s13996_s11 + $0x4e0] sm:$0xff] }
0x107f   : > { %7828 = vmatpush1.msra.mxu0 %v7411_v47  ;;  %7905 = vmatpush1.msra.mxu1 %v7413_v9  ;;  %v7549_v47 = vld [vmem:[%s13996_s11 + $0x4f0] sm:$0xff]  ;;  %v7540_v9 = vld [vmem:[%s13996_s11 + $0x4a8] sm:$0xff] }
0x1080   : > { %7829 = vmatprep.subr.mxu0 %v7404_v2  ;;  %7906 = vmatprep.subr.mxu1 %v7406_v5  ;;  %v7542_v2 = vld [vmem:[%s13996_s11 + $0x4b8] sm:$0xff]  ;;  %v7539_v5 = vld [vmem:[%s13996_s11 + $0x4a0] sm:$0xff] }
0x1081   : > { %7830 = vmatpush1.msra.mxu0 %v7403_v30  ;;  %7907 = vmatpush1.msra.mxu1 %v7405_v29  ;;  %v7541_v30 = vld [vmem:[%s13996_s11 + $0x4b0] sm:$0xff]  ;;  %v7532_v29 = vld [vmem:[%s13996_s11 + $0x468] sm:$0xff] }
0x1082   : > { %7831 = vmatprep.subr.mxu0 %v7396_v19  ;;  %7908 = vmatprep.subr.mxu1 %v7398_v44  ;;  %v7534_v19 = vld [vmem:[%s13996_s11 + $0x478] sm:$0xff]  ;;  %v7531_v44 = vld [vmem:[%s13996_s11 + $0x460] sm:$0xff] }
0x1083   : > { %7832 = vmatpush1.msra.mxu0 %v7395_v49  ;;  %7909 = vmatpush1.msra.mxu1 %v7397_v43  ;;  %v7533_v49 = vld [vmem:[%s13996_s11 + $0x470] sm:$0xff]  ;;  %v7524_v43 = vld [vmem:[%s13996_s11 + $0x428] sm:$0xff] }
0x1084   : > { %7833 = vmatprep.subr.mxu0 %v7644_v3  ;;  %7910 = vmatprep.subr.mxu1 %v7646_v61  ;;  %v7526_v3 = vld [vmem:[%s13996_s11 + $0x438] sm:$0xff]  ;;  %v7523_v61 = vld [vmem:[%s13996_s11 + $0x420] sm:$0xff] }
0x1085   : > { %7834 = vmatpush2.msra.mxu0 %v7643_v56  ;;  %7911 = vmatpush2.msra.mxu1 %v7645_v31  ;;  %v7525_v56 = vld [vmem:[%s13996_s11 + $0x430] sm:$0xff] }
0x1086   : > { %7835 = vmatprep.subr.mxu0 %v7636_v48  ;;  %7912 = vmatprep.subr.mxu1 %v7638_v10 }
0x1087   : > { %7836 = vmatpush2.msra.mxu0 %v7635_v27  ;;  %7913 = vmatpush2.msra.mxu1 %v7637_v17 }
0x1088   : > { %7837 = vmatprep.subr.mxu0 %v7628_v34  ;;  %7914 = vmatprep.subr.mxu1 %v7630_v11 }
0x1089   : > { %7838 = vmatpush2.msra.mxu0 %v7627_v58  ;;  %7915 = vmatpush2.msra.mxu1 %v7629_v33 }
0x108a   : > { %7839 = vmatprep.subr.mxu0 %v7620_v28  ;;  %7916 = vmatprep.subr.mxu1 %v7622_v1 }
0x108b   : > { %7840 = vmatpush2.msra.mxu0 %v7619_v32  ;;  %7917 = vmatpush2.msra.mxu1 %v7621_v18 }
0x108c   : > { %7841 = vmatprep.subr.mxu0 %v7612_v7  ;;  %7918 = vmatprep.subr.mxu1 %v7614_v4 }
0x108d   : > { %7842 = vmatpush2.msra.mxu0 %v7611_v35  ;;  %7919 = vmatpush2.msra.mxu1 %v7613_v36 }
0x108e   : > { %7843 = vmatprep.subr.mxu0 %v7604_v21  ;;  %7920 = vmatprep.subr.mxu1 %v7606_v39 }
0x108f   : > { %7844 = vmatpush2.msra.mxu0 %v7603_v62  ;;  %7921 = vmatpush2.msra.mxu1 %v7605_v25 }
0x1090   : > { %7845 = vmatprep.subr.mxu0 %v7596_v38  ;;  %7922 = vmatprep.subr.mxu1 %v7598_v55 }
0x1091   : > { %7846 = vmatpush2.msra.mxu0 %v7595_v22  ;;  %7923 = vmatpush2.msra.mxu1 %v7597_v53 }
0x1092   : > { %7847 = vmatprep.subr.mxu0 %v7588_v6  ;;  %7924 = vmatprep.subr.mxu1 %v7590_v54 }
0x1093   : > { %7848 = vmatpush2.msra.mxu0 %v7587_v50  ;;  %7925 = vmatpush2.msra.mxu1 %v7589_v24 }
0x1094   : > { %7849 = vmatprep.subr.mxu0 %v7580_v57  ;;  %7926 = vmatprep.subr.mxu1 %v7582_v60 }
0x1095   : > { %7850 = vmatpush2.msra.mxu0 %v7579_v8  ;;  %7927 = vmatpush2.msra.mxu1 %v7581_v51 }
0x1096   : > { %7851 = vmatprep.subr.mxu0 %v7572_v20  ;;  %7928 = vmatprep.subr.mxu1 %v7574_v12 }
0x1097   : > { %7852 = vmatpush2.msra.mxu0 %v7571_v37  ;;  %7929 = vmatpush2.msra.mxu1 %v7573_v59 }
0x1098   : > { %7853 = vmatprep.subr.mxu0 %v7564_v23  ;;  %7930 = vmatprep.subr.mxu1 %v7566_v46 }
0x1099   : > { %7854 = vmatpush2.msra.mxu0 %v7563_v14  ;;  %7931 = vmatpush2.msra.mxu1 %v7565_v41 }
0x109a   : > { %7855 = vmatprep.subr.mxu0 %v7556_v42  ;;  %7932 = vmatprep.subr.mxu1 %v7558_v16 }
0x109b   : > { %7856 = vmatpush2.msra.mxu0 %v7555_v40  ;;  %7933 = vmatpush2.msra.mxu1 %v7557_v26 }
0x109c   : > { %7857 = vmatprep.subr.mxu0 %v7548_v52  ;;  %7934 = vmatprep.subr.mxu1 %v7550_v0 }
0x109d   : > { %7858 = vmatpush2.msra.mxu0 %v7547_v15  ;;  %7935 = vmatpush2.msra.mxu1 %v7549_v47 }
0x109e   : > { %7859 = vmatprep.subr.mxu0 %v7540_v9  ;;  %7936 = vmatprep.subr.mxu1 %v7542_v2 }
0x109f   : > { %7860 = vmatpush2.msra.mxu0 %v7539_v5  ;;  %7937 = vmatpush2.msra.mxu1 %v7541_v30 }
0x10a0   : > { %7861 = vmatprep.subr.mxu0 %v7532_v29  ;;  %7938 = vmatprep.subr.mxu1 %v7534_v19 }
0x10a1   : > { %7862 = vmatpush2.msra.mxu0 %v7531_v44  ;;  %7939 = vmatpush2.msra.mxu1 %v7533_v49 }
0x10a2   : > { %7863 = vmatprep.subr.mxu0 %v7524_v43  ;;  %7940 = vmatprep.subr.mxu1 %v7526_v3 }
0x10a3   : > { %7864 = vmatpush2.msra.mxu0 %v7523_v61  ;;  %7941 = vmatpush2.msra.mxu1 %v7525_v56 }
0x10a4   : > { %7866 = vmatmul.mubr.f32.vlgmr.msra.gmra.mxu0 %v13564_v63  ;;  %7943 = vmatmul.mubr.f32.vlgmr.msra.gmra.mxu1 %v13564_v63 }
0x10a5   : > { %7871 = vmatprep.mubr.f32.mxu0 %v13586_v13  ;;  %7948 = vmatprep.mubr.f32.mxu1 %v13586_v13 }
0x10a8   : > { %7872 = vmatmul.mubr.f32.gmra.mxu0 %v13588_v45  ;;  %7949 = vmatmul.mubr.f32.gmra.mxu1 %v13588_v45 }
0x1121   : > { %v7713_v63 = vpop.f32.mrf.mxu0  ;;  %v7790_v13 = vpop.f32.mrf.mxu1 }
0x1122   : > { %7955 = vst [vmem:[%s13964_s23] sm:$0xff] %v7713_v63  ;;  %7957 = vst [vmem:[%s13964_s23 + $0x10] sm:$0xff] %v7790_v13 }
0x1123   : > { %v7715_v45 = vpop.f32.mrf.mxu0  ;;  %v7792_v31 = vpop.f32.mrf.mxu1 }
0x1124   : > { %7956 = vst [vmem:[%s13964_s23 + $0x8] sm:$0xff] %v7715_v45  ;;  %7958 = vst [vmem:[%s13964_s23 + $0x18] sm:$0xff] %v7792_v31 }
0x1127   : > { %v7719_v48 = vpop.f32.mrf.mxu0  ;;  %v7796_v10 = vpop.f32.mrf.mxu1 }
0x1128   : > { %7963 = vst [vmem:[%s13964_s23 + $0x40] sm:$0xff] %v7719_v48  ;;  %7965 = vst [vmem:[%s13964_s23 + $0x50] sm:$0xff] %v7796_v10 }
0x1129   : > { %v7721_v27 = vpop.f32.mrf.mxu0  ;;  %v7798_v17 = vpop.f32.mrf.mxu1 }
0x112a   : > { %7964 = vst [vmem:[%s13964_s23 + $0x48] sm:$0xff] %v7721_v27  ;;  %7966 = vst [vmem:[%s13964_s23 + $0x58] sm:$0xff] %v7798_v17 }
0x1164   : > { %v7867_v34 = vpop.f32.mrf.mxu0  ;;  %v7944_v11 = vpop.f32.mrf.mxu1 }
0x1165   : > { %7959 = vst [vmem:[%s13964_s23 + $0x20] sm:$0xff] %v7867_v34  ;;  %7961 = vst [vmem:[%s13964_s23 + $0x30] sm:$0xff] %v7944_v11 }
0x1166   : > { %v7869_v58 = vpop.f32.mrf.mxu0  ;;  %v7946_v33 = vpop.f32.mrf.mxu1 }
0x1167   : > { %7960 = vst [vmem:[%s13964_s23 + $0x28] sm:$0xff] %v7869_v58  ;;  %7962 = vst [vmem:[%s13964_s23 + $0x38] sm:$0xff] %v7946_v33 }
0x1168   : > { %v7873_v28 = vpop.f32.mrf.mxu0  ;;  %v7950_v1 = vpop.f32.mrf.mxu1 }
0x1169   : > { %7967 = vst [vmem:[%s13964_s23 + $0x60] sm:$0xff] %v7873_v28  ;;  %7969 = vst [vmem:[%s13964_s23 + $0x70] sm:$0xff] %v7950_v1 }
0x116a   : > { %v7875_v32 = vpop.f32.mrf.mxu0  ;;  %v7952_v18 = vpop.f32.mrf.mxu1 }
0x116b   : > { %7968 = vst [vmem:[%s13964_s23 + $0x68] sm:$0xff] %v7875_v32  ;;  %7970 = vst [vmem:[%s13964_s23 + $0x78] sm:$0xff] %v7952_v18 }
0x116c PF: > { %s22_s21 = sadd.s32 1, %s8577_s21  }
0x116d   : > { %p19_p4 = scmp.ge.s32.totalorder %s22_s21, 4  }
0x116f   :  { %21 = sbr.rel (!%p19_p4) target bundleno = 1 (0x1), region = 100 }

</bundles_post_ra>
